<compile_context>
chip_gen: v6e
topology: v6e:2x2x1
jax: 0.10.0
libtpu: 0.0.40
codegen_flags: <defaults>
</compile_context>

<pallas_src>
import math
import numpy as np
import jax
import jax.numpy as jnp
from jax.experimental import pallas as pl
from jax.experimental.pallas import tpu as pltpu

TIME_PRECISION = jax.lax.Precision.HIGHEST   # prod knob: HIGH (constants are bf16-exact)
CHAN_PRECISION = jax.lax.Precision.HIGHEST   # prod knob: HIGH at large T, re-validate
REF_PRECISION = jax.lax.Precision.HIGHEST    # pure-JAX reference


# ----------------------------------------------------------------------------
# Skeleton-structure helpers (pure python; mirror Encoder.__init__ bookkeeping)
# ----------------------------------------------------------------------------
def find_neighbor(edges, dist):
    """neighbor_list[i] = edges within skeleton-distance `dist` of edge i."""
    n = len(edges)
    INF = 10 ** 6
    d = [[0 if i == j else INF for j in range(n)] for i in range(n)]
    for i in range(n):
        for j in range(n):
            if i != j and len(set(edges[i]) & set(edges[j])) > 0:
                d[i][j] = 1
    for k in range(n):
        for i in range(n):
            for j in range(n):
                if d[i][k] + d[k][j] < d[i][j]:
                    d[i][j] = d[i][k] + d[k][j]
    return [[j for j in range(n) if d[i][j] <= dist] for i in range(n)]


def skeleton_pool(edges, last_pool):
    """Chain-merging pooling (mean mode).  Returns (pooling_list, new_edges)."""
    joints = set()
    for a, b in edges:
        joints.add(a); joints.add(b)
    degree = {j: 0 for j in joints}
    for a, b in edges:
        degree[a] += 1
        degree[b] += 1
    children = {}
    for idx, (a, b) in enumerate(edges):
        children.setdefault(a, []).append((idx, b))

    seq_list = []

    def find_seq(j, seq):
        if degree[j] > 2 and j != 0 and seq:
            seq_list.append(seq)
            seq = []
        if degree[j] == 1 and seq:
            seq_list.append(seq)
            return
        for idx, child in children.get(j, []):
            find_seq(child, seq + [idx])

    find_seq(0, [])

    pooling_list, new_edges = [], []
    for seq in seq_list:
        if last_pool:
            pooling_list.append(list(seq))
            new_edges.append((edges[seq[0]][0], edges[seq[-1]][1]))
            continue
        s = list(seq)
        if len(s) % 2 == 1:
            pooling_list.append([s[0]])
            new_edges.append(tuple(edges[s[0]]))
            s = s[1:]
        for i in range(0, len(s), 2):
            pooling_list.append([s[i], s[i + 1]])
            new_edges.append((edges[s[i]][0], edges[s[i + 1]][1]))
    return pooling_list, new_edges


class EncoderStructure:
    """Replicates the bookkeeping of Encoder.__init__ that Decoder depends on."""

    def __init__(self, args, topology):
        self.topologies = [topology]
        self.channel_base = [3] if args['trajectory_input_joint_pos'] else [6]
        self.channel_list = []
        self.edge_num = [len(topology)]
        self.pooling_list = []
        for _ in range(args['num_layers']):
            self.channel_base.append(self.channel_base[-1] * 2)
        for i in range(args['num_layers']):
            in_channels = self.channel_base[i] * self.edge_num[i]
            out_channels = self.channel_base[i + 1] * self.edge_num[i]
            if i == 0:
                self.channel_list.append(in_channels)
            self.channel_list.append(out_channels)
            last_pool = (i == args['num_layers'] - 1)
            pooling_list, new_edges = skeleton_pool(self.topologies[i], last_pool)
            self.topologies.append(new_edges)
            self.pooling_list.append(pooling_list)
            self.edge_num.append(len(new_edges))


# ----------------------------------------------------------------------------
# Constant-matrix construction (host-side, done ONCE at build time)
# ----------------------------------------------------------------------------
def round_up(x, m):
    return ((x + m - 1) // m) * m


def upsample_matrix(T):
    """(T, 2T) linear upsample, scale=2, align_corners=False (PyTorch semantics)."""
    Tu = 2 * T
    U = np.zeros((T, Tu), np.float32)
    for o in range(Tu):
        src = max((o + 0.5) / 2.0 - 0.5, 0.0)
        i0 = int(np.floor(src))
        lam = src - i0
        i1 = min(i0 + 1, T - 1)
        i0 = min(i0, T - 1)
        U[i0, o] += (1.0 - lam)
        U[i1, o] += lam
    return U


def _reflect(s, T):
    if s < 0:
        return -s
    if s >= T:
        return 2 * T - 2 - s
    return s


def tap_select_matrices(T_up, K, pad, stride, reflection):
    """mats[k] is (T_up, T_out): column t selects padded sample t*stride+k-pad."""
    assert pad <= T_up - 1, "reflect padding requires pad <= T_up - 1"   # review guard
    T_out = (T_up + 2 * pad - K) // stride + 1
    mats = np.zeros((K, T_up, T_out), np.float32)
    for k in range(K):
        for t in range(T_out):
            s = t * stride + k - pad
            if reflection:
                mats[k, _reflect(s, T_up), t] += 1.0
            elif 0 <= s < T_up:
                mats[k, s, t] = 1.0
    return mats, T_out


def per_tap_time_matrices(T_in, K, pad, stride, reflection):
    """M_k = Uup @ Tsel_k folded: (K, T_in, T_out).  Entries in {0,.25,.5,.75,1}."""
    Uup = upsample_matrix(T_in)                                   # (T_in, 2*T_in)
    Tsel, T_out = tap_select_matrices(2 * T_in, K, pad, stride, reflection)
    M = np.einsum('tu,kus->kts', Uup, Tsel).astype(np.float32)    # exact
    return M, T_out


def batch_blockdiag(M, NB):
    """kron(I_NB, M_k): (K, NB*T_in, NB*T_out).  NB*T ~ 128 so these stay tiny."""
    eye = np.eye(NB, dtype=np.float32)
    return np.stack([np.kron(eye, M[k]) for k in range(M.shape[0])], 0)


def unpool_matrix(pooling_list, cpe):
    """SkeletonUnpool weight: (out_edges*cpe, in_edges*cpe) 0/1 channel copy."""
    in_edges = len(pooling_list)
    out_edges = sum(len(g) for g in pooling_list)
    U = np.zeros((out_edges * cpe, in_edges * cpe), np.float32)
    for i, group in enumerate(pooling_list):
        for j in group:
            for c in range(cpe):
                U[j * cpe + c, i * cpe + c] = 1.0
    return U


def skeleton_conv_params(key, neighbor_list, in_ch, out_ch, joint_num, K, use_bias):
    """Deterministic masked-Conv1d parameters (synthetic init)."""
    icpj = in_ch // joint_num
    ocpj = out_ch // joint_num
    kw, kb = jax.random.split(key)
    W = jax.random.normal(kw, (out_ch, in_ch, K), jnp.float32) * 0.1
    mask = np.zeros((out_ch, in_ch, K), np.float32)
    for j, nbrs in enumerate(neighbor_list):
        for n in nbrs:
            mask[j * ocpj:(j + 1) * ocpj, n * icpj:(n + 1) * icpj, :] = 1.0
    Wm = W * jnp.asarray(mask)
    if use_bias:
        b = jax.random.normal(kb, (out_ch,), jnp.float32) * 0.1
    else:
        b = jnp.zeros((out_ch,), jnp.float32)
    return Wm, b


# ----------------------------------------------------------------------------
# Pallas kernel: the ENTIRE decoder fused into one invocation, batch-chunk grid.
#   activations: (C_pad, NB*T) slabs, channels on sublanes, batch*time on lanes.
#   per layer:  xcat = [h@M_0 ; ... ; h@M_{K-1}]  ->  z = Wcat @ xcat + b ; LeakyReLU.
# ----------------------------------------------------------------------------
def make_decoder_kernel(metas):
    def kernel(x_ref, *refs):
        out_ref = refs[-1]
        h = x_ref[...]                                             # (C0_pad, NB*T0) f32
        for li, meta in enumerate(metas):
            m_ref, w_ref, b_ref = refs[3 * li: 3 * li + 3]
            # K tap-folded time transforms (upsample + reflect-pad + stride inside M_k).
            xms = [jnp.dot(h, m_ref[k], precision=TIME_PRECISION,
                           preferred_element_type=jnp.float32)
                   for k in range(meta['K'])]                      # K x (C_in_pad, NB*T_out)
            # 8-aligned sublane stack -> ONE deep channel contraction (K*C_in_pad).
            xcat = jnp.concatenate(xms, axis=0)                    # (K*C_in_pad, NB*T_out)
            z = jnp.dot(w_ref[...], xcat, precision=CHAN_PRECISION,
                        preferred_element_type=jnp.float32)        # (C_out_pad, NB*T_out)
            z = z + b_ref[...]                                     # bias (C_out_pad, 1)
            if meta['apply_act']:
                z = jnp.where(z >= 0, z, 0.2 * z)                  # LeakyReLU(0.2)
            h = z                                                  # stays resident in VMEM
        out_ref[...] = h                                           # lane-dense store
    return kernel


# ----------------------------------------------------------------------------
# Decoder (parameter build + cached jitted forward)
# ----------------------------------------------------------------------------
class DecoderPallas:
    def __init__(self, args, enc: EncoderStructure, key):
        L = args['num_layers']
        K = args['kernel_size']
        pad = (K - 1) // 2
        reflection = args['padding_mode'] in ('reflection', 'reflect')
        assert args['upsampling'] == 'linear'   # TODO(synk): other upsampling modes
        assert args['extra_conv'] == 0          # TODO(synk): extra_conv blocks not instantiated
        self.layers = []
        for i in range(L):
            in_channels = enc.channel_list[L - i]
            out_channels = in_channels // 2
            neighbor_list = find_neighbor(enc.topologies[L - i - 1], args['skeleton_dist'])
            joint_num = enc.edge_num[L - i - 1]
            use_bias = not (i != 0 and i != L - 1)
            cpe = in_channels // len(neighbor_list)
            U = unpool_matrix(enc.pooling_list[L - i - 1], cpe)     # (in_ch, C_pool)
            key, sub = jax.random.split(key)
            Wm, b = skeleton_conv_params(sub, neighbor_list, in_channels,
                                         out_channels, joint_num, K, use_bias)
            C_pool = U.shape[1]
            # Fold the (exact 0/1 gather) unpool into the masked conv weight: (K, C_out, C_pool)
            Wf = np.einsum('oik,ip->kop', np.asarray(Wm, np.float64), U.astype(np.float64))
            # Pad channel dims to multiples of 8 and concat the K taps along the
            # contraction axis -> one (C_out_pad, K*C_in_pad) weight; zeros are free.
            C_in_pad = round_up(C_pool, 8)
            C_out_pad = round_up(out_channels, 8)
            Wcat = np.zeros((C_out_pad, K * C_in_pad), np.float32)
            for k in range(K):
                Wcat[:out_channels, k * C_in_pad: k * C_in_pad + C_pool] = \
                    Wf[k].astype(np.float32)
            b2 = np.zeros((C_out_pad, 1), np.float32)
            b2[:out_channels, 0] = np.asarray(b, np.float32)
            self.layers.append(dict(
                Wm=Wm, U=jnp.asarray(U), bvec=b,                     # kept for the reference
                Wcat=jnp.asarray(Wcat), b2=jnp.asarray(b2),
                stride=(1 if i % 2 == 0 else 2), pad=pad, K=K,
                reflection=reflection, apply_act=(i != L - 1),
                C_pool=C_pool, C_out=out_channels,
                C_in_pad=C_in_pad, C_out_pad=C_out_pad))
        self._fwd_cache = {}

    # ------------------------------------------------------------------ build
    def _build_forward(self, N, C0, T0):
        lyr0 = self.layers[0]
        assert C0 == lyr0['C_pool']
        C0_pad = lyr0['C_in_pad']

        # Lane packing: NB batch elements per grid step so every lane extent is >=128 and
        # a multiple of 128 (unmasked stores, full MXU columns).  NB is independent of N.
        NB = max(1, 128 // math.gcd(128, T0))
        NG = -(-N // NB)                       # ceil(N / NB) grid steps (batch chunks)
        Npad = NG * NB

        metas, consts, in_specs = [], [], []
        in_specs.append(pl.BlockSpec((C0_pad, NB * T0), lambda g: (0, g)))   # activation in

        T = T0
        work_bytes = 0
        for lyr in self.layers:
            K = lyr['K']
            M, T_out = per_tap_time_matrices(T, K, lyr['pad'], lyr['stride'],
                                             lyr['reflection'])
            Mblk = batch_blockdiag(M, NB)                 # (K, NB*T, NB*T_out) ~ O(K*128^2)
            consts += [jnp.asarray(Mblk), lyr['Wcat'], lyr['b2']]
            in_specs += [pl.BlockSpec(Mblk.shape, lambda g: (0, 0, 0)),
                         pl.BlockSpec(tuple(lyr['Wcat'].shape), lambda g: (0, 0)),
                         pl.BlockSpec(tuple(lyr['b2'].shape), lambda g: (0, 0))]
            metas.append(dict(K=K, apply_act=lyr['apply_act']))
            work_bytes = max(
                work_bytes,
                4 * ((2 * K * lyr['C_in_pad'] + lyr['C_out_pad']) * NB * T_out
                     + lyr['C_in_pad'] * NB * T))
            T = T_out

        C_last = self.layers[-1]['C_out']
        C_last_pad = self.layers[-1]['C_out_pad']
        T_last = T

        # Explicit VMEM budget (review: v5e 16 MiB scoped default / v7x 64 MiB physical).
        blk_bytes = 4 * (C0_pad * NB * T0 + C_last_pad * NB * T_last)       # streamed blocks
        const_bytes = sum(int(np.prod(c.shape)) * 4 for c in consts)        # resident consts
        vmem_est = 2 * blk_bytes + 2 * const_bytes + work_bytes             # x2 double-buffer
        VMEM_LIMIT = 32 * 1024 * 1024
        assert vmem_est < int(0.75 * VMEM_LIMIT), (
            f"decoder needs ~{vmem_est / 2**20:.1f} MiB VMEM; reduce NB or tile time")

        fused = pl.pallas_call(
            make_decoder_kernel(metas),
            out_shape=jax.ShapeDtypeStruct((C_last_pad, Npad * T_last), jnp.float32),
            grid=(NG,),                                   # batch chunks; constants resident
            in_specs=in_specs,
            out_specs=pl.BlockSpec((C_last_pad, NB * T_last), lambda g: (0, g)),
            compiler_params=pltpu.CompilerParams(
                dimension_semantics=("parallel",),        # v7x: chunks split across 2 TCs
                vmem_limit_bytes=VMEM_LIMIT),
        )

        def forward(x):
            # (N, C, T) -> lane-dense (C_pad, Npad*T) slab and back (tiny XLA relayouts;
            # TODO(synk): hand the slab directly to the consumer at production shapes).
            xp = jnp.pad(x, ((0, Npad - N), (0, C0_pad - C0), (0, 0)))
            xs = jnp.transpose(xp, (1, 0, 2)).reshape(C0_pad, Npad * T0)
            ys = fused(xs, *consts)
            y = jnp.transpose(ys.reshape(C_last_pad, Npad, T_last), (1, 0, 2))
            return y[:N, :C_last]

        return jax.jit(forward)

    # ---------------------------------------------------------------- forward
    def __call__(self, x):
        N, C0, T0 = x.shape
        sig = (N, C0, T0)
        if sig not in self._fwd_cache:
            self._fwd_cache[sig] = self._build_forward(N, C0, T0)
        return self._fwd_cache[sig](x)


# ----------------------------------------------------------------------------
# Pure-JAX reference (independent formulation) for validation
# ----------------------------------------------------------------------------
def upsample_linear_ref(x):
    xp = jnp.concatenate([x[..., :1], x[..., :-1]], axis=-1)
    xn = jnp.concatenate([x[..., 1:], x[..., -1:]], axis=-1)
    even = 0.25 * xp + 0.75 * x
    odd = 0.75 * x + 0.25 * xn
    return jnp.stack([even, odd], axis=-1).reshape(x.shape[0], x.shape[1], -1)


def conv1d_ref(x, W, b, stride, pad, reflection):
    N, Cin, T = x.shape
    Cout, _, K = W.shape
    mode = 'reflect' if reflection else 'constant'
    xp = jnp.pad(x, ((0, 0), (0, 0), (pad, pad)), mode=mode)
    Tout = (T + 2 * pad - K) // stride + 1
    out = jnp.zeros((N, Cout, Tout), jnp.float32)
    for k in range(K):
        sl = xp[:, :, k: k + stride * (Tout - 1) + 1: stride]
        out = out + jnp.einsum('oi,nit->not', W[:, :, k], sl, precision=REF_PRECISION)
    return out + b[None, :, None]


def reference_forward(x, dec):
    for lyr in dec.layers:
        x = upsample_linear_ref(x)
        x = jnp.einsum('ij,njt->nit', lyr['U'], x, precision=REF_PRECISION)
        x = conv1d_ref(x, lyr['Wm'], lyr['bvec'], lyr['stride'], lyr['pad'],
                       lyr['reflection'])
        if lyr['apply_act']:
            x = jnp.where(x >= 0, x, 0.2 * x)
    return x


# ----------------------------------------------------------------------------
if __name__ == "__main__":
    args = dict(trajectory_input_joint_pos=True, kernel_size=3, num_layers=2,
                skeleton_dist=2, skeleton_pool='mean', extra_conv=0,
                padding_mode='reflection', upsampling='linear')
    # Small synthetic skeleton: 9 joints, 8 edges (root=0, three chains).
    topology = [(0, 1), (1, 2), (2, 3), (3, 4), (0, 5), (5, 6), (0, 7), (7, 8)]

    enc = EncoderStructure(args, topology)
    key = jax.random.PRNGKey(0)
    k_in, k_params = jax.random.split(key)
    dec = DecoderPallas(args, enc, k_params)

    # Decoder input = encoder latent: (N, channel_base[L]*edge_num[L], T)
    N, T = 2, 16
    C_in = enc.channel_base[args['num_layers']] * enc.edge_num[args['num_layers']]
    x = jax.random.normal(k_in, (N, C_in, T), jnp.float32)   # (2, 36, 16)

    out = jax.block_until_ready(dec(x))

    ref = jax.block_until_ready(reference_forward(x, dec))
    assert out.shape == ref.shape == (N, enc.channel_list[1] // 2, 2 * T)
    max_err = float(jnp.max(jnp.abs(out - ref)))
    assert max_err < 1e-4, f"mismatch vs reference: {max_err}"

    print("KERNEL_OK")
</pallas_src>

<mosaic_0001>
module attributes {stable_mosaic.version = 11 : i64} {
  func.func @kernel(%arg0: i32, %arg1: memref<40x128xf32, #tpu.memory_space<vmem>>, %arg2: memref<3x128x256xf32, #tpu.memory_space<vmem>>, %arg3: memref<24x120xf32, #tpu.memory_space<vmem>>, %arg4: memref<24x1xf32, #tpu.memory_space<vmem>>, %arg5: memref<3x256x256xf32, #tpu.memory_space<vmem>>, %arg6: memref<24x72xf32, #tpu.memory_space<vmem>>, %arg7: memref<24x1xf32, #tpu.memory_space<vmem>>, %arg8: memref<24x256xf32, #tpu.memory_space<vmem>>) attributes {dimension_semantics = [#tpu.dimension_semantics<parallel>], iteration_bounds = array<i64: 1>, scalar_prefetch = 0 : i64, scratch_operands = 0 : i64, tpu.core_type = #tpu.core_type<tc>, window_params = [{transform_indices = @transform_0, window_bounds = array<i64: 40, 128>}, {pipeline_mode = #tpu.pipeline_mode<synchronous>, transform_indices = @transform_1, window_bounds = array<i64: 3, 128, 256>}, {pipeline_mode = #tpu.pipeline_mode<synchronous>, transform_indices = @transform_2, window_bounds = array<i64: 24, 120>}, {pipeline_mode = #tpu.pipeline_mode<synchronous>, transform_indices = @transform_3, window_bounds = array<i64: 24, 1>}, {pipeline_mode = #tpu.pipeline_mode<synchronous>, transform_indices = @transform_4, window_bounds = array<i64: 3, 256, 256>}, {pipeline_mode = #tpu.pipeline_mode<synchronous>, transform_indices = @transform_5, window_bounds = array<i64: 24, 72>}, {pipeline_mode = #tpu.pipeline_mode<synchronous>, transform_indices = @transform_6, window_bounds = array<i64: 24, 1>}, {transform_indices = @transform_7, window_bounds = array<i64: 24, 256>}]} {
    %c0 = arith.constant 0 : index
    %c0_0 = arith.constant 0 : index
    %0 = vector.load %arg1[%c0, %c0_0] : memref<40x128xf32, #tpu.memory_space<vmem>>, vector<40x128xf32>
    %c0_1 = arith.constant 0 : index
    %c0_2 = arith.constant 0 : index
    %c0_3 = arith.constant 0 : index
    %1 = vector.load %arg2[%c0_1, %c0_2, %c0_3] : memref<3x128x256xf32, #tpu.memory_space<vmem>>, vector<1x128x256xf32>
    %2 = vector.shape_cast %1 : vector<1x128x256xf32> to vector<128x256xf32>
    %cst = arith.constant dense<0.000000e+00> : vector<40x256xf32>
    %3 = tpu.matmul %0, %2, %cst {dimension_numbers = #tpu.dot_dimension_numbers<[1], [0], [0], [1], [0, 0, 1, 1], [], []>, precision = #tpu.contract_precision<fp32>} : vector<40x128xf32>, vector<128x256xf32>, vector<40x256xf32> -> vector<40x256xf32>
    %c1 = arith.constant 1 : index
    %c0_4 = arith.constant 0 : index
    %c0_5 = arith.constant 0 : index
    %4 = vector.load %arg2[%c1, %c0_4, %c0_5] : memref<3x128x256xf32, #tpu.memory_space<vmem>>, vector<1x128x256xf32>
    %5 = vector.shape_cast %4 : vector<1x128x256xf32> to vector<128x256xf32>
    %cst_6 = arith.constant dense<0.000000e+00> : vector<40x256xf32>
    %6 = tpu.matmul %0, %5, %cst_6 {dimension_numbers = #tpu.dot_dimension_numbers<[1], [0], [0], [1], [0, 0, 1, 1], [], []>, precision = #tpu.contract_precision<fp32>} : vector<40x128xf32>, vector<128x256xf32>, vector<40x256xf32> -> vector<40x256xf32>
    %c2 = arith.constant 2 : index
    %c0_7 = arith.constant 0 : index
    %c0_8 = arith.constant 0 : index
    %7 = vector.load %arg2[%c2, %c0_7, %c0_8] : memref<3x128x256xf32, #tpu.memory_space<vmem>>, vector<1x128x256xf32>
    %8 = vector.shape_cast %7 : vector<1x128x256xf32> to vector<128x256xf32>
    %cst_9 = arith.constant dense<0.000000e+00> : vector<40x256xf32>
    %9 = tpu.matmul %0, %8, %cst_9 {dimension_numbers = #tpu.dot_dimension_numbers<[1], [0], [0], [1], [0, 0, 1, 1], [], []>, precision = #tpu.contract_precision<fp32>} : vector<40x128xf32>, vector<128x256xf32>, vector<40x256xf32> -> vector<40x256xf32>
    %10 = tpu.concatenate %3, %6, %9 in 0 : vector<40x256xf32>, vector<40x256xf32>, vector<40x256xf32> -> vector<120x256xf32>
    %c0_10 = arith.constant 0 : index
    %c0_11 = arith.constant 0 : index
    %11 = vector.load %arg3[%c0_10, %c0_11] : memref<24x120xf32, #tpu.memory_space<vmem>>, vector<24x120xf32>
    %cst_12 = arith.constant dense<0.000000e+00> : vector<24x256xf32>
    %12 = tpu.matmul %11, %10, %cst_12 {dimension_numbers = #tpu.dot_dimension_numbers<[1], [0], [0], [1], [0, 0, 1, 1], [], []>, precision = #tpu.contract_precision<fp32>} : vector<24x120xf32>, vector<120x256xf32>, vector<24x256xf32> -> vector<24x256xf32>
    %c0_13 = arith.constant 0 : index
    %c0_14 = arith.constant 0 : index
    %13 = vector.load %arg4[%c0_13, %c0_14] : memref<24x1xf32, #tpu.memory_space<vmem>>, vector<24x1xf32>
    %14 = vector.broadcast %13 : vector<24x1xf32> to vector<24x256xf32>
    %15 = arith.addf %12, %14 : vector<24x256xf32>
    %cst_15 = arith.constant 0.000000e+00 : f32
    %16 = vector.broadcast %cst_15 : f32 to vector<24x256xf32>
    %17 = arith.cmpf oge, %15, %16 : vector<24x256xf32>
    %cst_16 = arith.constant 2.000000e-01 : f32
    %18 = vector.broadcast %cst_16 : f32 to vector<24x256xf32>
    %19 = arith.mulf %18, %15 : vector<24x256xf32>
    %20 = arith.select %17, %15, %19 : vector<24x256xi1>, vector<24x256xf32>
    %c0_17 = arith.constant 0 : index
    %c0_18 = arith.constant 0 : index
    %c0_19 = arith.constant 0 : index
    %21 = vector.load %arg5[%c0_17, %c0_18, %c0_19] : memref<3x256x256xf32, #tpu.memory_space<vmem>>, vector<1x256x256xf32>
    %22 = vector.shape_cast %21 : vector<1x256x256xf32> to vector<256x256xf32>
    %cst_20 = arith.constant dense<0.000000e+00> : vector<24x256xf32>
    %23 = tpu.matmul %20, %22, %cst_20 {dimension_numbers = #tpu.dot_dimension_numbers<[1], [0], [0], [1], [0, 0, 1, 1], [], []>, precision = #tpu.contract_precision<fp32>} : vector<24x256xf32>, vector<256x256xf32>, vector<24x256xf32> -> vector<24x256xf32>
    %c1_21 = arith.constant 1 : index
    %c0_22 = arith.constant 0 : index
    %c0_23 = arith.constant 0 : index
    %24 = vector.load %arg5[%c1_21, %c0_22, %c0_23] : memref<3x256x256xf32, #tpu.memory_space<vmem>>, vector<1x256x256xf32>
    %25 = vector.shape_cast %24 : vector<1x256x256xf32> to vector<256x256xf32>
    %cst_24 = arith.constant dense<0.000000e+00> : vector<24x256xf32>
    %26 = tpu.matmul %20, %25, %cst_24 {dimension_numbers = #tpu.dot_dimension_numbers<[1], [0], [0], [1], [0, 0, 1, 1], [], []>, precision = #tpu.contract_precision<fp32>} : vector<24x256xf32>, vector<256x256xf32>, vector<24x256xf32> -> vector<24x256xf32>
    %c2_25 = arith.constant 2 : index
    %c0_26 = arith.constant 0 : index
    %c0_27 = arith.constant 0 : index
    %27 = vector.load %arg5[%c2_25, %c0_26, %c0_27] : memref<3x256x256xf32, #tpu.memory_space<vmem>>, vector<1x256x256xf32>
    %28 = vector.shape_cast %27 : vector<1x256x256xf32> to vector<256x256xf32>
    %cst_28 = arith.constant dense<0.000000e+00> : vector<24x256xf32>
    %29 = tpu.matmul %20, %28, %cst_28 {dimension_numbers = #tpu.dot_dimension_numbers<[1], [0], [0], [1], [0, 0, 1, 1], [], []>, precision = #tpu.contract_precision<fp32>} : vector<24x256xf32>, vector<256x256xf32>, vector<24x256xf32> -> vector<24x256xf32>
    %30 = tpu.concatenate %23, %26, %29 in 0 : vector<24x256xf32>, vector<24x256xf32>, vector<24x256xf32> -> vector<72x256xf32>
    %c0_29 = arith.constant 0 : index
    %c0_30 = arith.constant 0 : index
    %31 = vector.load %arg6[%c0_29, %c0_30] : memref<24x72xf32, #tpu.memory_space<vmem>>, vector<24x72xf32>
    %cst_31 = arith.constant dense<0.000000e+00> : vector<24x256xf32>
    %32 = tpu.matmul %31, %30, %cst_31 {dimension_numbers = #tpu.dot_dimension_numbers<[1], [0], [0], [1], [0, 0, 1, 1], [], []>, precision = #tpu.contract_precision<fp32>} : vector<24x72xf32>, vector<72x256xf32>, vector<24x256xf32> -> vector<24x256xf32>
    %c0_32 = arith.constant 0 : index
    %c0_33 = arith.constant 0 : index
    %33 = vector.load %arg7[%c0_32, %c0_33] : memref<24x1xf32, #tpu.memory_space<vmem>>, vector<24x1xf32>
    %34 = vector.broadcast %33 : vector<24x1xf32> to vector<24x256xf32>
    %35 = arith.addf %32, %34 : vector<24x256xf32>
    %c0_34 = arith.constant 0 : index
    %c0_35 = arith.constant 0 : index
    %36 = vector.load %arg8[%c0_34, %c0_35] : memref<24x256xf32, #tpu.memory_space<vmem>>, vector<24x256xf32>
    tpu.vector_store %arg8[%c0_34, %c0_35], %35 {strides = array<i32>} : memref<24x256xf32, #tpu.memory_space<vmem>>, vector<24x256xf32>,
    return
  }
  func.func @transform_0(%arg0: i32) -> (i32, i32) {
    %c0_i32 = arith.constant 0 : i32
    %c0_i32_0 = arith.constant 0 : i32
    return %c0_i32, %arg0 : i32, i32
  }
  func.func @transform_1(%arg0: i32) -> (i32, i32, i32) {
    %c0_i32 = arith.constant 0 : i32
    %c0_i32_0 = arith.constant 0 : i32
    %c0_i32_1 = arith.constant 0 : i32
    %c0_i32_2 = arith.constant 0 : i32
    return %c0_i32, %c0_i32_0, %c0_i32_1 : i32, i32, i32
  }
  func.func @transform_2(%arg0: i32) -> (i32, i32) {
    %c0_i32 = arith.constant 0 : i32
    %c0_i32_0 = arith.constant 0 : i32
    %c0_i32_1 = arith.constant 0 : i32
    return %c0_i32, %c0_i32_0 : i32, i32
  }
  func.func @transform_3(%arg0: i32) -> (i32, i32) {
    %c0_i32 = arith.constant 0 : i32
    %c0_i32_0 = arith.constant 0 : i32
    %c0_i32_1 = arith.constant 0 : i32
    return %c0_i32, %c0_i32_0 : i32, i32
  }
  func.func @transform_4(%arg0: i32) -> (i32, i32, i32) {
    %c0_i32 = arith.constant 0 : i32
    %c0_i32_0 = arith.constant 0 : i32
    %c0_i32_1 = arith.constant 0 : i32
    %c0_i32_2 = arith.constant 0 : i32
    return %c0_i32, %c0_i32_0, %c0_i32_1 : i32, i32, i32
  }
  func.func @transform_5(%arg0: i32) -> (i32, i32) {
    %c0_i32 = arith.constant 0 : i32
    %c0_i32_0 = arith.constant 0 : i32
    %c0_i32_1 = arith.constant 0 : i32
    return %c0_i32, %c0_i32_0 : i32, i32
  }
  func.func @transform_6(%arg0: i32) -> (i32, i32) {
    %c0_i32 = arith.constant 0 : i32
    %c0_i32_0 = arith.constant 0 : i32
    %c0_i32_1 = arith.constant 0 : i32
    return %c0_i32, %c0_i32_0 : i32, i32
  }
  func.func @transform_7(%arg0: i32) -> (i32, i32) {
    %c0_i32 = arith.constant 0 : i32
    %c0_i32_0 = arith.constant 0 : i32
    return %c0_i32, %arg0 : i32, i32
  }
}

</mosaic_0001>

<bundles_post_ra>
// kernel: forward.1
= control target key start
LH: loop header
LB: loop body
LE: loop exit
PB: predicated region body
PF: predicated region fallthrough
CT: control target
= control target key end

     0   :  { %12 = vsyncpa [#allocation3], 0  ;;  %s16445_s0 = inlined_call_operand.vmem [shape: f32[40,128], index: 0, kind: input, shape index: {}]   ;;  %s16446_s1 = inlined_call_operand.hbm [shape: f32[3,128,256], index: 1, kind: input, shape index: {}]   ;;  %s16447_s2 = inlined_call_operand.vmem [shape: f32[24,120], index: 2, kind: input, shape index: {}]   ;;  %s16448_s3 = inlined_call_operand.vmem [shape: f32[24,1], index: 3, kind: input, shape index: {}]   ;;  %s16449_s4 = inlined_call_operand.hbm [shape: f32[3,256,256], index: 4, kind: input, shape index: {}]   ;;  %s16450_s5 = inlined_call_operand.vmem [shape: f32[24,72], index: 5, kind: input, shape index: {}]   ;;  %s16451_s6 = inlined_call_operand.vmem [shape: f32[24,1], index: 6, kind: input, shape index: {}]   ;;  %s16452_s7 = inlined_call_operand.vmem [shape: f32[24,256], index: 7, kind: output, shape index: {}]  }
   0x1   :  { %13 = vsyncpa [#allocation5], 0  ;;  %s9570_s24 = smov [#allocation2]  }
   0x2   :  { %s21_s25 = sshll.u32 %s9570_s24, 4  ;;  %s22_s25 = int_to_ptr.vmem [resolvable:$true] %s21_s25 }
   0x3   :  { %s9534_s26 = scalar_lea.vmem %s22_s25, 12288  ;;  %p9539_p1 = scmp.lt.s32.totalorder %s22_s25, %s22_s25 }
   0x4   :  { %p9535_p0 = scmp.ne.s32.totalorder %s22_s25, %s9534_s26  ;;  %p9540_p2 = scmp.lt.s32.totalorder %s9534_s26, %s9534_s26 }
   0x6   :  { %p9541_p3 = por %p9540_p2, %p9539_p1 }
   0x8   :  { %p9542_p4 = pnand %p9541_p3, %p9535_p0 }
   0xa   :  { %9545 = shalt.err (!%p9542_p4)
}
   0xb   :  { %s9571_s27 = smov 256   ;;  %s9572_s28 = smov 16  }
   0xc   :  { %27 = dma.hbm_to_vmem [thread:$0]  %s16446_s1, 12288, %s22_s25, [#allocation3], %s9571_s27, %s9571_s27, %s9572_s28  }
   0xd   :  { %s9573_s8 = smov [#allocation4]  }
   0xe   :  { %s37_s9 = sshll.u32 %s9573_s8, 4  ;;  %s38_s9 = int_to_ptr.vmem [resolvable:$true] %s37_s9 }
   0xf   :  { %s9554_s10 = scalar_lea.vmem %s38_s9, 24576  ;;  %p9559_p6 = scmp.lt.s32.totalorder %s38_s9, %s38_s9 }
  0x10   :  { %p9555_p5 = scmp.ne.s32.totalorder %s38_s9, %s9554_s10  ;;  %p9560_p7 = scmp.lt.s32.totalorder %s9554_s10, %s9554_s10 }
  0x12   :  { %p9561_p8 = por %p9560_p7, %p9559_p6 }
  0x14   :  { %p9562_p9 = pnand %p9561_p8, %p9555_p5 }
  0x16   :  { %9565 = shalt.err (!%p9562_p9)
}
  0x17   :  { %43 = dma.hbm_to_vmem [thread:$0]  %s16449_s4, 24576, %s38_s9, [#allocation5], %s9571_s27, %s9571_s27, %s9572_s28  }
  0x18   :  { %9566 = dma.done.wait [#allocation3], 12288  }
  0x19   :  { %9567 = vsyncadd [#allocation3], 4294955008 }
  0x1a   :  { %9568 = dma.done.wait [#allocation5], 24576  }
  0x1b   :  { %9569 = vsyncadd [#allocation5], 4294942720  ;;  %v16467_v0 = vmov 0.0   ;;  %v90_v1 = vld [vmem:[#allocation2 + $0xf8] sm:$0xff]  ;;  %v89_v2 = vld [vmem:[#allocation2 + $0xf0] sm:$0xff]  ;;  %vm3331_vm0 = vcmask 982016  }
  0x1c   :  { %187 = vmatprep.mubr.f32.mxu0 %v16467_v0  ;;  %467 = vmatprep.mubr.f32.mxu1 %v16467_v0  ;;  %v88_v3 = vld [vmem:[#allocation2 + $0xe8] sm:$0xff]  ;;  %v9624_v4 = vand.u32 4294901760, %v90_v1  ;;  %v9626_v5 = vand.u32 4294901760, %v89_v2  ;;  %v87_v7 = vld [vmem:[#allocation2 + $0xe0] sm:$0xff]  ;;  %v86_v8 = vld [vmem:[#allocation2 + $0xd8] sm:$0xff]  ;;  %vm8725_vm7 = vcmask 588800  }
  0x1d   :  { %v9628_v6 = vand.u32 4294901760, %v88_v3  ;;  %v85_v9 = vld [vmem:[#allocation2 + $0xd0] sm:$0xff]  ;;  %v9630_v10 = vand.u32 4294901760, %v87_v7  ;;  %v9632_v11 = vand.u32 4294901760, %v86_v8  ;;  %v84_v13 = vld [vmem:[#allocation2 + $0xc8] sm:$0xff]  ;;  %v83_v14 = vld [vmem:[#allocation2 + $0xc0] sm:$0xff] }
  0x1e   :  { %v9634_v12 = vand.u32 4294901760, %v85_v9  ;;  %v82_v15 = vld [vmem:[#allocation2 + $0xb8] sm:$0xff]  ;;  %92 = vmatprep.subr.mxu0 %v9624_v4  ;;  %v9637_v16 = vand.u32 4294901760, %v84_v13  ;;  %v9639_v17 = vand.u32 4294901760, %v83_v14  ;;  %v9644_v19 = vsub.f32 %v90_v1, %v9624_v4  ;;  %v9646_v20 = vld [vmem:[#allocation2 + $0xb0] sm:$0xff]  ;;  %v9648_v21 = vld [vmem:[#allocation2 + $0xa8] sm:$0xff] }
  0x1f   :  { %v9641_v18 = vand.u32 4294901760, %v82_v15  ;;  %v9650_v22 = vld [vmem:[#allocation2 + $0xa0] sm:$0xff]  ;;  %94 = vmatpush1.msra.mxu0 %v9626_v5  ;;  %v9654_v23 = vand.u32 4294901760, %v9646_v20  ;;  %v9657_v24 = vsub.f32 %v89_v2, %v9626_v5  ;;  %v9660_v25 = vand.u32 4294901760, %v9648_v21  ;;  %v9665_v27 = vld [vmem:[#allocation2 + $0x98] sm:$0xff]  ;;  %v9667_v28 = vld [vmem:[#allocation2 + $0x90] sm:$0xff] }
  0x20   :  { %v9663_v26 = vsub.f32 %v88_v3, %v9628_v6  ;;  %v9669_v29 = vld [vmem:[#allocation2 + $0x88] sm:$0xff]  ;;  %96 = vmatprep.subr.mxu0 %v9628_v6  ;;  %v16465_v30 = vand.u32 4294901760, %v9644_v19  ;;  %v9674_v31 = vand.u32 4294901760, %v9650_v22  ;;  %v9677_v32 = vsub.f32 %v87_v7, %v9630_v10  ;;  %v9691_v38 = vld [vmem:[#allocation2 + $0x80] sm:$0xff]  ;;  %v9715_v47 = vld [vmem:[#allocation2 + $0x78] sm:$0xff] }
  0x21   :  { %17474 = vst [vmem:[#allocation8_spill] sm:$0xff] %v9641_v18  ;;  %v9680_v33 = vand.u32 4294901760, %v9665_v27  ;;  %98 = vmatpush1.msra.mxu0 %v9630_v10  ;;  %v16464_v34 = vand.u32 4294901760, %v9657_v24  ;;  %v9686_v36 = vsub.f32 %v86_v8, %v9632_v11  ;;  %v9689_v37 = vand.u32 4294901760, %v9667_v28  ;;  %v9725_v52 = vld [vmem:[#allocation2 + $0x70] sm:$0xff]  ;;  %v9732_v57 = vld [vmem:[#allocation2 + $0x68] sm:$0xff] }
  0x22   :  { %17475 = vst [vmem:[#allocation9_spill] sm:$0xff] %v9674_v31  ;;  %v16462_v35 = vand.u32 4294901760, %v9663_v26  ;;  %100 = vmatprep.subr.mxu0 %v9632_v11  ;;  %v246_v39 = vsub.f32 %v9644_v19, %v16465_v30  ;;  %v16460_v40 = vand.u32 4294901760, %v9677_v32  ;;  %v9699_v41 = vsub.f32 %v85_v9, %v9634_v12  ;;  %v9744_v62 = vld [vmem:[#allocation2 + $0x60] sm:$0xff]  ;;  %v9756_v7 = vld [vmem:[#allocation2 + $0x58] sm:$0xff] }
  0x23   :  { %17476 = vst [vmem:[#allocation10_spill] sm:$0xff] %v9680_v33  ;;  %17477 = vst [vmem:[#allocation11_spill] sm:$0xff] %v9689_v37  ;;  %v9702_v42 = vand.u32 4294901760, %v9669_v29  ;;  %102 = vmatpush1.msra.mxu0 %v9634_v12  ;;  %v252_v43 = vsub.f32 %v9657_v24, %v16464_v34  ;;  %v16459_v45 = vand.u32 4294901760, %v9686_v36  ;;  %v9713_v46 = vsub.f32 %v84_v13, %v9637_v16  ;;  %v9857_v34 = vld [vmem:[#allocation2 + $0x20] sm:$0xff] }
  0x24   :  { %v258_v44 = vsub.f32 %v9663_v26, %v16462_v35  ;;  %104 = vmatprep.subr.mxu0 %v9637_v16  ;;  %v247_v48 = vand.u32 4294901760, %v246_v39  ;;  %v264_v49 = vsub.f32 %v9677_v32, %v16460_v40  ;;  %v16457_v50 = vand.u32 4294901760, %v9699_v41  ;;  %v9847_v35 = vld [vmem:[#allocation2 + $0x28] sm:$0xff] }
  0x25   :  { %17478 = vst [vmem:[#allocation12_spill] sm:$0xff] %v9702_v42  ;;  %v9723_v51 = vand.u32 4294901760, %v9691_v38  ;;  %106 = vmatpush1.msra.mxu0 %v9639_v17  ;;  %v253_v53 = vand.u32 4294901760, %v252_v43  ;;  %v270_v55 = vsub.f32 %v9686_v36, %v16459_v45  ;;  %v16455_v56 = vand.u32 4294901760, %v9713_v46  ;;  %v9834_v45 = vld [vmem:[#allocation2 + $0x30] sm:$0xff] }
  0x26   :  { %v259_v54 = vand.u32 4294901760, %v258_v44  ;;  %108 = vmatprep.subr.mxu0 %v9641_v18  ;;  %248 = vmatprep.subr.mxu1 %v247_v48  ;;  %v265_v58 = vand.u32 4294901760, %v264_v49  ;;  %v276_v59 = vsub.f32 %v9699_v41, %v16457_v50  ;;  %v9739_v60 = vsub.f32 %v83_v14, %v9639_v17 }
  0x27   :  { %17479 = vst [vmem:[#allocation13_spill] sm:$0xff] %v9723_v51  ;;  %v9742_v61 = vand.u32 4294901760, %v9715_v47  ;;  %110 = vmatpush1.msra.mxu0 %v9654_v23  ;;  %254 = vmatpush1.msra.mxu1 %v253_v53  ;;  %v271_v63 = vand.u32 4294901760, %v270_v55  ;;  %v282_v1 = vsub.f32 %v9713_v46, %v16455_v56  ;;  %v9751_v2 = vsub.f32 %v82_v15, %v9641_v18  ;;  %v9767_v15 = vld [vmem:[#allocation2 + $0x50] sm:$0xff] }
  0x28   :  { %v9754_v3 = vand.u32 4294901760, %v9725_v52  ;;  %112 = vmatprep.subr.mxu0 %v9660_v25  ;;  %260 = vmatprep.subr.mxu1 %v259_v54  ;;  %v277_v8 = vand.u32 4294901760, %v276_v59  ;;  %v16454_v9 = vand.u32 4294901760, %v9739_v60  ;;  %v9762_v13 = vsub.f32 %v9646_v20, %v9654_v23 }
  0x29   :  { %17480 = vst [vmem:[#allocation14_spill] sm:$0xff] %v9742_v61  ;;  %v9765_v14 = vand.u32 4294901760, %v9732_v57  ;;  %114 = vmatpush1.msra.mxu0 %v9674_v31  ;;  %266 = vmatpush1.msra.mxu1 %v265_v58  ;;  %v283_v39 = vand.u32 4294901760, %v282_v1  ;;  %v16453_v43 = vand.u32 4294901760, %v9751_v2  ;;  %v9773_v44 = vsub.f32 %v9648_v21, %v9660_v25  ;;  %v9790_v21 = vld [vmem:[#allocation2 + $0x48] sm:$0xff] }
  0x2a   :  { %17481 = vst [vmem:[#allocation15_spill] sm:$0xff] %v9754_v3  ;;  %v9776_v48 = vand.u32 4294901760, %v9744_v62  ;;  %116 = vmatprep.subr.mxu0 %v9680_v33  ;;  %272 = vmatprep.subr.mxu1 %v271_v63  ;;  %v288_v20 = vsub.f32 %v9739_v60, %v16454_v9  ;;  %v16456_v49 = vand.u32 4294901760, %v9762_v13  ;;  %v9785_v53 = vsub.f32 %v9650_v22, %v9674_v31  ;;  %v9813_v9 = vld [vmem:[#allocation2 + $0x40] sm:$0xff] }
  0x2b   :  { %17482 = vst [vmem:[#allocation16_spill] sm:$0xff] %v9765_v14  ;;  %v9788_v54 = vand.u32 4294901760, %v9756_v7  ;;  %118 = vmatpush1.msra.mxu0 %v9689_v37  ;;  %278 = vmatpush1.msra.mxu1 %v277_v8  ;;  %v294_v55 = vsub.f32 %v9751_v2, %v16453_v43  ;;  %v16458_v58 = vand.u32 4294901760, %v9773_v44  ;;  %v9799_v59 = vsub.f32 %v9665_v27, %v9680_v33 }
  0x2c   :  { %17483 = vst [vmem:[#allocation17_spill] sm:$0xff] %v9776_v48  ;;  %v9802_v22 = vand.u32 4294901760, %v9767_v15  ;;  %120 = vmatprep.subr.mxu0 %v9702_v42  ;;  %284 = vmatprep.subr.mxu1 %v283_v39  ;;  %v289_v63 = vand.u32 4294901760, %v288_v20  ;;  %v300_v1 = vsub.f32 %v9762_v13, %v16456_v49  ;;  %v16461_v8 = vand.u32 4294901760, %v9785_v53  ;;  %v9823_v49 = vld [vmem:[#allocation2 + $0x38] sm:$0xff] }
  0x2d   :  { %17484 = vst [vmem:[#allocation18_spill] sm:$0xff] %v9788_v54  ;;  %v9811_v43 = vsub.f32 %v9667_v28, %v9689_v37  ;;  %122 = vmatpush1.msra.mxu0 %v9723_v51  ;;  %v295_v27 = vand.u32 4294901760, %v294_v55  ;;  %v306_v39 = vsub.f32 %v9773_v44, %v16458_v58  ;;  %v16463_v20 = vand.u32 4294901760, %v9799_v59 }
  0x2e   :  { %17485 = vst [vmem:[#allocation19_spill] sm:$0xff] %v9802_v22  ;;  %v9821_v56 = vand.u32 4294901760, %v9790_v21  ;;  %290 = vmatpush1.msra.mxu1 %v289_v63  ;;  %124 = vmatprep.subr.mxu0 %v9742_v61  ;;  %v301_v28 = vand.u32 4294901760, %v300_v1  ;;  %v312_v50 = vsub.f32 %v9785_v53, %v16461_v8  ;;  %v9832_v58 = vsub.f32 %v9669_v29, %v9702_v42 }
  0x2f   :  { %v16466_v55 = vand.u32 4294901760, %v9811_v43  ;;  %296 = vmatprep.subr.mxu1 %v295_v27  ;;  %126 = vmatpush1.msra.mxu0 %v9754_v3  ;;  %v307_v40 = vand.u32 4294901760, %v306_v39  ;;  %v318_v63 = vsub.f32 %v9799_v59, %v16463_v20  ;;  %v9841_v1 = vand.u32 4294901760, %v9813_v9 }
  0x30   :  { %17486 = vst [vmem:[#allocation20_spill] sm:$0xff] %v9821_v56  ;;  %v9845_v8 = vsub.f32 %v9691_v38, %v9723_v51  ;;  %302 = vmatpush1.msra.mxu1 %v301_v28  ;;  %128 = vmatprep.subr.mxu0 %v9765_v14  ;;  %v313_v29 = vand.u32 4294901760, %v312_v50  ;;  %v16471_v39 = vand.u32 4294901760, %v9832_v58  ;;  %v9855_v20 = vand.u32 4294901760, %v9823_v49 }
  0x31   :  { %17487 = vst [vmem:[#allocation21_spill] sm:$0xff] %v9841_v1  ;;  %v324_v27 = vsub.f32 %v9811_v43, %v16466_v55  ;;  %308 = vmatprep.subr.mxu1 %v307_v40  ;;  %130 = vmatpush1.msra.mxu0 %v9776_v48  ;;  %v319_v38 = vand.u32 4294901760, %v318_v63  ;;  %v9863_v50 = vsub.f32 %v9715_v47, %v9742_v61  ;;  %v9866_v30 = vand.u32 4294901760, %v9834_v45  ;;  %v9868_v55 = vld [vmem:[#allocation2 + $0x18] sm:$0xff] }
  0x32   :  { %17488 = vst [vmem:[#allocation22_spill] sm:$0xff] %v9855_v20  ;;  %v16474_v28 = vand.u32 4294901760, %v9845_v8  ;;  %314 = vmatpush1.msra.mxu1 %v313_v29  ;;  %132 = vmatprep.subr.mxu0 %v9788_v54  ;;  %v330_v40 = vsub.f32 %v9832_v58, %v16471_v39  ;;  %v9876_v63 = vsub.f32 %v9725_v52, %v9754_v3  ;;  %v9879_v47 = vand.u32 4294901760, %v9847_v35  ;;  %v9893_v52 = vld [vmem:[#allocation2 + $0x10] sm:$0xff] }
  0x33   :  { %17489 = vst [vmem:[#allocation23_spill] sm:$0xff] %v9866_v30  ;;  %v325_v0 = vand.u32 4294901760, %v324_v27  ;;  %320 = vmatprep.subr.mxu1 %v319_v38  ;;  %134 = vmatpush1.msra.mxu0 %v9802_v22  ;;  %v9888_v61 = vsub.f32 %v9732_v57, %v9765_v14  ;;  %v9891_v39 = vand.u32 4294901760, %v9857_v34  ;;  %v9902_v27 = vand.u32 4294901760, %v9868_v55  ;;  %v9904_v57 = vld [vmem:[#allocation2 + $0x8] sm:$0xff] }
  0x34   :  { %17490 = vst [vmem:[#allocation24_spill] sm:$0xff] %v9879_v47  ;;  %v336_v29 = vsub.f32 %v9845_v8, %v16474_v28  ;;  %136 = vmatprep.subr.mxu0 %v9821_v56  ;;  %v331_v38 = vand.u32 4294901760, %v330_v40  ;;  %v9899_v28 = vsub.f32 %v9744_v62, %v9776_v48  ;;  %v17493_v51 = vand.u32 4294901760, %v9863_v50  ;;  %v9927_v40 = vld [vmem:[#allocation2] sm:$0xff] }
  0x35   :  { %17491 = vst [vmem:[#allocation25_spill] sm:$0xff] %v9891_v39  ;;  %326 = vmatpush1.msra.mxu1 %v325_v0  ;;  %138 = vmatpush1.msra.mxu0 %v9841_v1  ;;  %v9913_v3 = vsub.f32 %v9756_v7, %v9788_v54  ;;  %v17495_v62 = vand.u32 4294901760, %v9876_v63  ;;  %v9935_v42 = vand.u32 4294901760, %v9904_v57 }
  0x36   :  { %17492 = vst [vmem:[#allocation26_spill] sm:$0xff] %v9899_v28  ;;  %v337_v14 = vand.u32 4294901760, %v336_v29  ;;  %v342_v0 = vsub.f32 %v9863_v50, %v17493_v51  ;;  %332 = vmatprep.subr.mxu1 %v331_v38  ;;  %140 = vmatprep.subr.mxu0 %v9855_v20  ;;  %v9921_v29 = vand.u32 4294901760, %v9893_v52  ;;  %v9925_v51 = vsub.f32 %v9767_v15, %v9802_v22 }
  0x37   :  { %17494 = vst [vmem:[#allocation27_spill] sm:$0xff] %v9913_v3  ;;  %v348_v48 = vsub.f32 %v9876_v63, %v17495_v62  ;;  %142 = vmatpush1.msra.mxu0 %v9866_v30  ;;  %v17497_v38 = vand.u32 4294901760, %v9888_v61  ;;  %17498 = vst [vmem:[#allocation29_spill] sm:$0xff] %v9935_v42  ;;  %v17499_v15 = vand.u32 4294901760, %v9899_v28 }
  0x38   :  { %17496 = vst [vmem:[#allocation28_spill] sm:$0xff] %v9921_v29  ;;  %338 = vmatpush1.msra.mxu1 %v337_v14  ;;  %v343_v7 = vand.u32 4294901760, %v342_v0  ;;  %144 = vmatprep.subr.mxu0 %v9879_v47  ;;  %v9944_v0 = vsub.f32 %v9790_v21, %v9821_v56  ;;  %v9958_v14 = vsub.f32 %v9813_v9, %v9841_v1 }
  0x39   :  { %v354_v54 = vsub.f32 %v9888_v61, %v17497_v38  ;;  %v349_v37 = vand.u32 4294901760, %v348_v48  ;;  %v360_v22 = vsub.f32 %v9899_v28, %v17499_v15  ;;  %v54_v38 = vld [vmem:[%s16445_s0] sm:$0xff]  ;;  %146 = vmatpush1.msra.mxu0 %v9891_v39  ;;  %v17500_v48 = vand.u32 4294901760, %v9913_v3 }
  0x3a   :  { %344 = vmatprep.subr.mxu1 %v343_v7  ;;  %v9954_v15 = vand.u32 4294901760, %v9927_v40  ;;  %17501 = vst [vmem:[#allocation30_spill] sm:$0xff] %v9958_v14  ;;  %148 = vmatprep.subr.mxu0 %v9902_v27  ;;  %v17502_v7 = vand.u32 4294901760, %v9925_v51  ;;  %v16495_v56 = vand.u32 4294901760, %v9944_v0  ;;  %v16498_v9 = vand.u32 4294901760, %v9958_v14 }
  0x3b   :  { %v355_v62 = vand.u32 4294901760, %v354_v54  ;;  %v366_v33 = vsub.f32 %v9913_v3, %v17500_v48  ;;  %350 = vmatpush1.msra.mxu1 %v349_v37  ;;  %v361_v21 = vand.u32 4294901760, %v360_v22  ;;  %v9967_v48 = vsub.f32 %v9823_v49, %v9855_v20  ;;  %150 = vmatpush1.msra.mxu0 %v9921_v29 }
  0x3c   :  { %v372_v54 = vsub.f32 %v9925_v51, %v17502_v7  ;;  %v9971_v37 = vand.u32 4294901760, %v54_v38  ;;  %v9975_v22 = vsub.f32 %v9834_v45, %v9866_v30  ;;  %152 = vmatprep.subr.mxu0 %v9935_v42  ;;  %v378_v49 = vsub.f32 %v9944_v0, %v16495_v56 }
  0x3d   :  { %356 = vmatprep.subr.mxu1 %v355_v62  ;;  %v367_v3 = vand.u32 4294901760, %v366_v33  ;;  %v9984_v62 = vsub.f32 %v9847_v35, %v9879_v47  ;;  %154 = vmatpush1.msra.mxu0 %v9954_v15  ;;  %v384_v45 = vsub.f32 %v9958_v14, %v16498_v9  ;;  %v9996_v56 = vsub.f32 %v9857_v34, %v9891_v39 }
  0x3e   :  { %17503 = vst [vmem:[#allocation31_spill] sm:$0xff] %v9971_v37  ;;  %362 = vmatpush1.msra.mxu1 %v361_v21  ;;  %v373_v7 = vand.u32 4294901760, %v372_v54  ;;  %v9991_v21 = vsub.f32 %v54_v38, %v9971_v37  ;;  %v379_v33 = vand.u32 4294901760, %v378_v49  ;;  %v17505_v35 = vand.u32 4294901760, %v9967_v48  ;;  %505 = vmatprep.subr.mxu0 %v9644_v19 }
  0x3f   :  { %368 = vmatprep.subr.mxu1 %v367_v3  ;;  %v16503_v47 = vand.u32 4294901760, %v9984_v62  ;;  %v10005_v38 = vsub.f32 %v9868_v55, %v9902_v27  ;;  %v385_v9 = vand.u32 4294901760, %v384_v45  ;;  %v17507_v34 = vand.u32 4294901760, %v9975_v22  ;;  %v55_v45 = vld [vmem:[%s16445_s0 + $0x8] sm:$0xff] }
  0x40   :  { %17504 = vst [vmem:[#allocation32_spill] sm:$0xff] %v9991_v21  ;;  %374 = vmatpush1.msra.mxu1 %v373_v7  ;;  %v390_v3 = vsub.f32 %v9967_v48, %v17505_v35  ;;  %v10008_v54 = vand.u32 4294901760, %v9991_v21  ;;  %v16508_v49 = vand.u32 4294901760, %v9996_v56  ;;  %v10020_v55 = vsub.f32 %v9893_v52, %v9921_v29 }
  0x41   :  { %v396_v7 = vsub.f32 %v9975_v22, %v17507_v34  ;;  %380 = vmatprep.subr.mxu1 %v379_v33  ;;  %v402_v39 = vsub.f32 %v9984_v62, %v16503_v47  ;;  %v16509_v30 = vand.u32 4294901760, %v10005_v38  ;;  %v10032_v47 = vsub.f32 %v9904_v57, %v9935_v42 }
  0x42   :  { %17506 = vst [vmem:[#allocation33_spill] sm:$0xff] %v10008_v54  ;;  %v391_v35 = vand.u32 4294901760, %v390_v3  ;;  %386 = vmatpush1.msra.mxu1 %v385_v9  ;;  %v191_v34 = vsub.f32 %v9991_v21, %v10008_v54  ;;  %v408_v3 = vsub.f32 %v9996_v56, %v16508_v49  ;;  %v16512_v9 = vand.u32 4294901760, %v10020_v55 }
  0x43   :  { %v397_v33 = vand.u32 4294901760, %v396_v7  ;;  %v403_v52 = vand.u32 4294901760, %v402_v39  ;;  %v414_v29 = vsub.f32 %v10005_v38, %v16509_v30  ;;  %v10040_v54 = vsub.f32 %v9927_v40, %v9954_v15  ;;  %v56_v7 = vld [vmem:[%s16445_s0 + $0x10] sm:$0xff] }
  0x44   :  { %392 = vmatprep.subr.mxu1 %v391_v35  ;;  %v10045_v49 = vand.u32 4294901760, %v191_v34  ;;  %v409_v57 = vand.u32 4294901760, %v408_v3  ;;  %v16513_v39 = vand.u32 4294901760, %v10032_v47  ;;  %v10048_v35 = vand.u32 4294901760, %v55_v45 }
  0x45   :  { %17508 = vst [vmem:[#allocation34_spill] sm:$0xff] %v10040_v54  ;;  %398 = vmatpush1.msra.mxu1 %v397_v33  ;;  %v415_v30 = vand.u32 4294901760, %v414_v29  ;;  %v420_v42 = vsub.f32 %v10020_v55, %v16512_v9  ;;  %v16514_v40 = vand.u32 4294901760, %v10040_v54  ;;  %v10061_v3 = vand.u32 4294901760, %v56_v7 }
  0x46   :  { %17509 = vst [vmem:[#allocation35_spill] sm:$0xff] %v10045_v49  ;;  %17510 = vst [vmem:[#allocation36_spill] sm:$0xff] %v10048_v35  ;;  %404 = vmatprep.subr.mxu1 %v403_v52  ;;  %193 = vmatmul.mubr.f32.vlgmr.msra.gmra.mxu0 %v10045_v49  ;;  %v426_v34 = vsub.f32 %v10032_v47, %v16513_v39  ;;  %v10059_v33 = vsub.f32 %v55_v45, %v10048_v35  ;;  %v17513_v9 = vmov 0.0   ;;  %v57_v39 = vld [vmem:[%s16445_s0 + $0x18] sm:$0xff] }
  0x47   :  { %410 = vmatpush1.msra.mxu1 %v409_v57  ;;  %17512 = vst [vmem:[#allocation38_spill] sm:$0xff] %v10061_v3  ;;  %508 = vmatpush1.msra.mxu0 %v9657_v24  ;;  %v421_v29 = vand.u32 4294901760, %v420_v42  ;;  %v432_v52 = vsub.f32 %v10040_v54, %v16514_v40  ;;  %v10078_v42 = vsub.f32 %v56_v7, %v10061_v3 }
  0x48   :  { %17511 = vst [vmem:[#allocation37_spill] sm:$0xff] %v10059_v33  ;;  %416 = vmatprep.subr.mxu1 %v415_v30  ;;  %511 = vmatprep.subr.mxu0 %v9663_v26  ;;  %v427_v57 = vand.u32 4294901760, %v426_v34  ;;  %v10075_v30 = vand.u32 4294901760, %v10059_v33  ;;  %v10083_v34 = vand.u32 4294901760, %v57_v39 }
  0x49   :  { %198 = vmatprep.mubr.f32.mxu0 %v17513_v9  ;;  %514 = vmatpush1.msra.mxu0 %v9677_v32  ;;  %v433_v45 = vand.u32 4294901760, %v432_v52  ;;  %17515 = vst [vmem:[#allocation40_spill] sm:$0xff] %v10078_v42  ;;  %v58_v52 = vld [vmem:[%s16445_s0 + $0x20] sm:$0xff] }
  0x4a   :  { %422 = vmatpush1.msra.mxu1 %v421_v29  ;;  %517 = vmatprep.subr.mxu0 %v9686_v36  ;;  %17514 = vst [vmem:[#allocation39_spill] sm:$0xff] %v10075_v30  ;;  %17516 = vst [vmem:[#allocation41_spill] sm:$0xff] %v10083_v34  ;;  %v202_v7 = vsub.f32 %v10059_v33, %v10075_v30  ;;  %v10092_v29 = vand.u32 4294901760, %v10078_v42  ;;  %v10112_v49 = vand.u32 4294901760, %v58_v52 }
  0x4b   :  { %428 = vmatprep.subr.mxu1 %v427_v57  ;;  %520 = vmatpush1.msra.mxu0 %v9699_v41  ;;  %v10102_v57 = vsub.f32 %v57_v39, %v10083_v34 }
  0x4c   :  { %434 = vmatpush1.msra.mxu1 %v433_v45  ;;  %523 = vmatprep.subr.mxu0 %v9713_v46  ;;  %17517 = vst [vmem:[#allocation42_spill] sm:$0xff] %v10092_v29  ;;  %v10108_v45 = vand.u32 4294901760, %v202_v7  ;;  %v213_v40 = vsub.f32 %v10078_v42, %v10092_v29  ;;  %17520 = vst [vmem:[#allocation45_spill] sm:$0xff] %v10112_v49 }
  0x4d   :  { %469 = vmatmul.mubr.f32.vlgmr.msra.gmra.mxu1 %v9971_v37  ;;  %526 = vmatpush1.msra.mxu0 %v9739_v60  ;;  %17518 = vst [vmem:[#allocation43_spill] sm:$0xff] %v10102_v57  ;;  %v10119_v39 = vand.u32 4294901760, %v10102_v57  ;;  %v10128_v37 = vsub.f32 %v58_v52, %v10112_v49  ;;  %v17525_v52 = vld [vmem:[#allocation27_spill] sm:$0xff] }
  0x4e   :  { %673 = vmatprep.subr.mxu1 %v9624_v4  ;;  %529 = vmatprep.subr.mxu0 %v9751_v2  ;;  %17519 = vst [vmem:[#allocation44_spill] sm:$0xff] %v10108_v45  ;;  %v10125_v7 = vand.u32 4294901760, %v213_v40 }
  0x4f   :  { %675 = vmatpush1.msra.mxu1 %v9626_v5  ;;  %532 = vmatpush1.msra.mxu0 %v9762_v13  ;;  %17521 = vst [vmem:[#allocation46_spill] sm:$0xff] %v10119_v39  ;;  %17523 = vst [vmem:[#allocation48_spill] sm:$0xff] %v10128_v37  ;;  %v10141_v40 = vand.u32 4294901760, %v10128_v37 }
  0x50   :  { %677 = vmatprep.subr.mxu1 %v9628_v6  ;;  %535 = vmatprep.subr.mxu0 %v9773_v44  ;;  %17522 = vst [vmem:[#allocation47_spill] sm:$0xff] %v10125_v7 }
  0x51   :  { %679 = vmatpush1.msra.mxu1 %v9630_v10  ;;  %538 = vmatpush1.msra.mxu0 %v9785_v53  ;;  %17524 = vst [vmem:[#allocation49_spill] sm:$0xff] %v10141_v40 }
  0x52   :  { %681 = vmatprep.subr.mxu1 %v9632_v11  ;;  %541 = vmatprep.subr.mxu0 %v9799_v59 }
  0x53   :  { %683 = vmatpush1.msra.mxu1 %v9634_v12  ;;  %544 = vmatpush1.msra.mxu0 %v9811_v43 }
  0x54   :  { %685 = vmatprep.subr.mxu1 %v9637_v16  ;;  %547 = vmatprep.subr.mxu0 %v9832_v58 }
  0x55   :  { %687 = vmatpush1.msra.mxu1 %v9639_v17  ;;  %550 = vmatpush1.msra.mxu0 %v9845_v8 }
  0x56   :  { %689 = vmatprep.subr.mxu1 %v9641_v18  ;;  %204 = vmatmul.mubr.f32.gmra.mxu0 %v10108_v45  ;;  %v224_v18 = vsub.f32 %v10102_v57, %v10119_v39  ;;  %v17526_v45 = vld [vmem:[#allocation10_spill] sm:$0xff] }
  0x57   :  { %553 = vmatprep.subr.mxu0 %v9863_v50  ;;  %691 = vmatpush1.msra.mxu1 %v9654_v23 }
  0x58   :  { %556 = vmatpush1.msra.mxu0 %v9876_v63  ;;  %693 = vmatprep.subr.mxu1 %v9660_v25  ;;  %v10147_v39 = vand.u32 4294901760, %v224_v18  ;;  %v17531_v18 = vld [vmem:[#allocation14_spill] sm:$0xff] }
  0x59   :  { %559 = vmatprep.subr.mxu0 %v9888_v61  ;;  %209 = vmatprep.mubr.f32.mxu0 %v17513_v9 }
  0x5a   :  { %562 = vmatpush1.msra.mxu0 %v9899_v28  ;;  %695 = vmatpush1.msra.mxu1 %v9674_v31  ;;  %17527 = vst [vmem:[#allocation27_spill] sm:$0xff] %v10147_v39  ;;  %v17528_v28 = vld [vmem:[#allocation11_spill] sm:$0xff]  ;;  %v235_v31 = vsub.f32 %v10128_v37, %v10141_v40 }
  0x5b   :  { %215 = vmatmul.mubr.f32.gmra.mxu0 %v10125_v7  ;;  %474 = vmatprep.mubr.f32.mxu1 %v17513_v9  ;;  %v17529_v7 = vld [vmem:[#allocation12_spill] sm:$0xff]  ;;  %v17533_v40 = vld [vmem:[#allocation15_spill] sm:$0xff] }
  0x5c   :  { %565 = vmatprep.subr.mxu0 %v17525_v52  ;;  %697 = vmatprep.subr.mxu1 %v17526_v45  ;;  %v17530_v45 = vld [vmem:[#allocation13_spill] sm:$0xff] }
  0x5d   :  { %476 = vmatmul.mubr.f32.gmra.mxu1 %v10048_v35  ;;  %568 = vmatpush1.msra.mxu0 %v9925_v51  ;;  %v10163_v35 = vand.u32 4294901760, %v235_v31  ;;  %v17536_v31 = vld [vmem:[#allocation18_spill] sm:$0xff] }
  0x5e   :  { %699 = vmatpush1.msra.mxu1 %v17528_v28  ;;  %571 = vmatprep.subr.mxu0 %v9944_v0 }
  0x5f   :  { %701 = vmatprep.subr.mxu1 %v17529_v7  ;;  %220 = vmatprep.mubr.f32.mxu0 %v17513_v9  ;;  %17532 = vst [vmem:[#allocation11_spill] sm:$0xff] %v10163_v35 }
  0x60   :  { %574 = vmatpush1.msra.mxu0 %v9958_v14  ;;  %703 = vmatpush1.msra.mxu1 %v17530_v45  ;;  %v17534_v14 = vld [vmem:[#allocation16_spill] sm:$0xff] }
  0x61   :  { %226 = vmatmul.mubr.f32.gmra.mxu0 %v10147_v39  ;;  %481 = vmatprep.mubr.f32.mxu1 %v17513_v9  ;;  %v17535_v39 = vld [vmem:[#allocation17_spill] sm:$0xff] }
  0x62   :  { %577 = vmatprep.subr.mxu0 %v9967_v48  ;;  %705 = vmatprep.subr.mxu1 %v17531_v18 }
  0x63   :  { %483 = vmatmul.mubr.f32.gmra.mxu1 %v10061_v3  ;;  %580 = vmatpush1.msra.mxu0 %v9975_v22  ;;  %v17537_v3 = vld [vmem:[#allocation19_spill] sm:$0xff] }
  0x64   :  { %707 = vmatpush1.msra.mxu1 %v17533_v40  ;;  %583 = vmatprep.subr.mxu0 %v9984_v62 }
  0x65   :  { %709 = vmatprep.subr.mxu1 %v17534_v14  ;;  %231 = vmatprep.mubr.f32.mxu0 %v17513_v9  ;;  %v17538_v14 = vld [vmem:[#allocation20_spill] sm:$0xff] }
  0x66   :  { %586 = vmatpush1.msra.mxu0 %v9996_v56  ;;  %711 = vmatpush1.msra.mxu1 %v17535_v39 }
  0x67   :  { %237 = vmatmul.mubr.f32.gmra.mxu0 %v10163_v35  ;;  %488 = vmatprep.mubr.f32.mxu1 %v17513_v9  ;;  %v17539_v35 = vand.u32 4294901760, %v9644_v19  ;;  %v17546_v19 = vand.u32 4294901760, %v9686_v36  ;;  %v17552_v36 = vld [vmem:[#allocation33_spill] sm:$0xff] }
  0x68   :  { %589 = vmatprep.subr.mxu0 %v10005_v38  ;;  %713 = vmatprep.subr.mxu1 %v17536_v31 }
  0x69   :  { %490 = vmatmul.mubr.f32.gmra.mxu1 %v10083_v34  ;;  %592 = vmatpush1.msra.mxu0 %v10020_v55  ;;  %v17540_v34 = vld [vmem:[#allocation23_spill] sm:$0xff] }
  0x6a   :  { %715 = vmatpush1.msra.mxu1 %v17537_v3  ;;  %595 = vmatprep.subr.mxu0 %v10032_v47 }
  0x6b   :  { %717 = vmatprep.subr.mxu1 %v17538_v14  ;;  %598 = vmatpush1.msra.mxu0 %v10040_v54  ;;  %v17541_v14 = vand.u32 4294901760, %v9657_v24  ;;  %v17542_v54 = vld [vmem:[#allocation24_spill] sm:$0xff] }
  0x6c   :  { %631 = vmatprep.mubr.f32.mxu0 %v17513_v9  ;;  %719 = vmatpush1.msra.mxu1 %v9841_v1  ;;  %v17543_v1 = vand.u32 4294901760, %v9663_v26  ;;  %v17547_v24 = vld [vmem:[#allocation28_spill] sm:$0xff]  ;;  %v17549_v26 = vld [vmem:[#allocation29_spill] sm:$0xff] }
  0x6d   :  { %495 = vmatprep.mubr.f32.mxu1 %v17513_v9  ;;  %634 = vmatmul.mubr.f32.vlgmr.msra.gmra.mxu0 %v9991_v21  ;;  %v17544_v21 = vld [vmem:[#allocation25_spill] sm:$0xff] }
  0x6e   :  { %721 = vmatprep.subr.mxu1 %v9855_v20  ;;  %817 = vmatprep.subr.mxu0 %v17539_v35  ;;  %v17545_v20 = vand.u32 4294901760, %v9677_v32  ;;  %v17551_v32 = vand.u32 4294901760, %v9739_v60  ;;  %v17556_v60 = vand.u32 4294901760, %v9785_v53  ;;  %v17569_v53 = vld [vmem:[#allocation46_spill] sm:$0xff]  ;;  %v17576_v35 = vld [vmem:[#allocation49_spill] sm:$0xff] }
  0x6f   :  { %497 = vmatmul.mubr.f32.gmra.mxu1 %v10112_v49  ;;  %821 = vmatpush1.msra.mxu0 %v17541_v14  ;;  %v17548_v14 = vand.u32 4294901760, %v9699_v41  ;;  %v17553_v41 = vand.u32 4294901760, %v9751_v2  ;;  %v17564_v2 = vand.u32 4294901760, %v9888_v61  ;;  %v1174_v61 = vld [vmem:[#allocation2 + $0x1f8] sm:$0xff] }
  0x70   :  { %723 = vmatpush1.msra.mxu1 %v17540_v34  ;;  %825 = vmatprep.subr.mxu0 %v17543_v1  ;;  %v17550_v1 = vand.u32 4294901760, %v9713_v46  ;;  %v17554_v46 = vand.u32 4294901760, %v9762_v13 }
  0x71   :  { %725 = vmatprep.subr.mxu1 %v17542_v54  ;;  %639 = vmatprep.mubr.f32.mxu0 %v17513_v9 }
  0x72   :  { %727 = vmatpush1.msra.mxu1 %v17544_v21  ;;  %829 = vmatpush1.msra.mxu0 %v17545_v20  ;;  %v17555_v20 = vand.u32 4294901760, %v9773_v44  ;;  %v17568_v44 = vand.u32 4294901760, %v17525_v52 }
  0x73   :  { %729 = vmatprep.subr.mxu1 %v9902_v27  ;;  %642 = vmatmul.mubr.f32.gmra.mxu0 %v10059_v33 }
  0x74   :  { %833 = vmatprep.subr.mxu0 %v17546_v19  ;;  %731 = vmatpush1.msra.mxu1 %v17547_v24 }
  0x75   :  { %837 = vmatpush1.msra.mxu0 %v17548_v14  ;;  %733 = vmatprep.subr.mxu1 %v17549_v26  ;;  %v17580_v14 = vand.u32 4294901760, %v9996_v56 }
  0x76   :  { %841 = vmatprep.subr.mxu0 %v17550_v1  ;;  %647 = vmatprep.mubr.f32.mxu0 %v17513_v9  ;;  %v17581_v1 = vand.u32 4294901760, %v10005_v38  ;;  %v17584_v38 = vld [vmem:[#allocation20_spill] sm:$0xff] }
  0x77   :  { %735 = vmatpush1.msra.mxu1 %v9954_v15  ;;  %768 = vmatprep.mubr.f32.mxu1 %v17513_v9 }
  0x78   :  { %845 = vmatpush1.msra.mxu0 %v17551_v32  ;;  %772 = vmatmul.mubr.f32.vlgmr.msra.gmra.mxu1 %v17552_v36  ;;  %v17582_v32 = vand.u32 4294901760, %v10020_v55 }
  0x79   :  { %650 = vmatmul.mubr.f32.gmra.mxu0 %v10078_v42  ;;  %849 = vmatprep.subr.mxu0 %v17553_v41  ;;  %v1167_v41 = vld [vmem:[#allocation2 + $0x1c0] sm:$0xff] }
  0x7a   :  { %1011 = vmatprep.subr.mxu1 %v9624_v4  ;;  %853 = vmatpush1.msra.mxu0 %v17554_v46  ;;  %v17557_v4 = vand.u32 4294901760, %v9799_v59  ;;  %v17573_v59 = vld [vmem:[#allocation30_spill] sm:$0xff]  ;;  %v17583_v46 = vand.u32 4294901760, %v10032_v47  ;;  %v17588_v47 = vld [vmem:[#allocation31_spill] sm:$0xff] }
  0x7b   :  { %1013 = vmatpush1.msra.mxu1 %v9626_v5  ;;  %857 = vmatprep.subr.mxu0 %v17555_v20  ;;  %v17558_v5 = vand.u32 4294901760, %v9811_v43  ;;  %v17567_v43 = vld [vmem:[#allocation9_spill] sm:$0xff] }
  0x7c   :  { %1015 = vmatprep.subr.mxu1 %v9628_v6  ;;  %655 = vmatprep.mubr.f32.mxu0 %v17513_v9  ;;  %v17559_v6 = vand.u32 4294901760, %v9832_v58  ;;  %v17570_v58 = vld [vmem:[#allocation10_spill] sm:$0xff] }
  0x7d   :  { %777 = vmatprep.mubr.f32.mxu1 %v17513_v9  ;;  %861 = vmatpush1.msra.mxu0 %v17556_v60  ;;  %v17585_v60 = vld [vmem:[#allocation34_spill] sm:$0xff] }
  0x7e   :  { %1017 = vmatpush1.msra.mxu1 %v9630_v10  ;;  %658 = vmatmul.mubr.f32.gmra.mxu0 %v10102_v57  ;;  %v17560_v10 = vand.u32 4294901760, %v9845_v8  ;;  %v17574_v8 = vand.u32 4294901760, %v17573_v59  ;;  %v17586_v55 = vand.u32 4294901760, %v17585_v60  ;;  %v17608_v57 = vld [vmem:[#allocation41_spill] sm:$0xff] }
  0x7f   :  { %781 = vmatmul.mubr.f32.gmra.mxu1 %v10075_v30  ;;  %865 = vmatprep.subr.mxu0 %v17557_v4  ;;  %v1151_v30 = vld [vmem:[#allocation2 + $0x140] sm:$0xff] }
  0x80   :  { %1019 = vmatprep.subr.mxu1 %v9632_v11  ;;  %869 = vmatpush1.msra.mxu0 %v17558_v5  ;;  %v17561_v11 = vand.u32 4294901760, %v9863_v50  ;;  %v1173_v50 = vld [vmem:[#allocation2 + $0x1f0] sm:$0xff]  ;;  %v17587_v5 = vld [vmem:[#allocation21_spill] sm:$0xff] }
  0x81   :  { %1021 = vmatpush1.msra.mxu1 %v9634_v12  ;;  %873 = vmatprep.subr.mxu0 %v17559_v6  ;;  %v17562_v12 = vld [vmem:[#allocation8_spill] sm:$0xff]  ;;  %v10285_v52 = vand.u32 4294901760, %v1173_v50 }
  0x82   :  { %1023 = vmatprep.subr.mxu1 %v9637_v16  ;;  %663 = vmatprep.mubr.f32.mxu0 %v17513_v9  ;;  %v17563_v16 = vand.u32 4294901760, %v9876_v63  ;;  %v17575_v63 = vand.u32 4294901760, %v9967_v48  ;;  %v17579_v48 = vld [vmem:[#allocation16_spill] sm:$0xff] }
  0x83   :  { %786 = vmatprep.mubr.f32.mxu1 %v17513_v9  ;;  %877 = vmatpush1.msra.mxu0 %v17560_v10  ;;  %v10307_v56 = vsub.f32 %v1173_v50, %v10285_v52  ;;  %v10329_v10 = vand.u32 4294901760, %v1167_v41 }
  0x84   :  { %1025 = vmatpush1.msra.mxu1 %v9639_v17  ;;  %666 = vmatmul.mubr.f32.gmra.mxu0 %v10128_v37  ;;  %v17565_v17 = vld [vmem:[#allocation26_spill] sm:$0xff] }
  0x85   :  { %790 = vmatmul.mubr.f32.gmra.mxu1 %v10092_v29  ;;  %881 = vmatprep.subr.mxu0 %v17561_v11  ;;  %v17566_v13 = vand.u32 4294901760, %v17565_v17  ;;  %17590 = vst [vmem:[#allocation13_spill] sm:$0xff] %v10329_v10  ;;  %v16550_v17 = vand.u32 4294901760, %v10307_v56  ;;  %v1153_v37 = vld [vmem:[#allocation2 + $0x150] sm:$0xff] }
  0x86   :  { %1027 = vmatprep.subr.mxu1 %v17562_v12  ;;  %885 = vmatpush1.msra.mxu0 %v17563_v16  ;;  %v1165_v12 = vld [vmem:[#allocation2 + $0x1b0] sm:$0xff] }
  0x87   :  { %1029 = vmatpush1.msra.mxu1 %v9654_v23  ;;  %889 = vmatprep.subr.mxu0 %v17564_v2  ;;  %v17571_v23 = vand.u32 4294901760, %v9925_v51  ;;  %v1172_v51 = vld [vmem:[#allocation2 + $0x1e8] sm:$0xff]  ;;  %v17591_v16 = vld [vmem:[#allocation22_spill] sm:$0xff]  ;;  %v1166_v2 = vld [vmem:[#allocation2 + $0x1b8] sm:$0xff] }
  0x88   :  { %1031 = vmatprep.subr.mxu1 %v9660_v25  ;;  %795 = vmatprep.mubr.f32.mxu1 %v17513_v9  ;;  %v17572_v25 = vand.u32 4294901760, %v9944_v0  ;;  %v1171_v0 = vld [vmem:[#allocation2 + $0x1e0] sm:$0xff]  ;;  %v10290_v19 = vand.u32 4294901760, %v1172_v51  ;;  %v10354_v59 = vand.u32 4294901760, %v1166_v2 }
  0x89   :  { %893 = vmatpush1.msra.mxu0 %v17566_v13  ;;  %1033 = vmatpush1.msra.mxu1 %v17567_v43  ;;  %v1164_v13 = vld [vmem:[#allocation2 + $0x1a8] sm:$0xff] }
  0x8a   :  { %897 = vmatprep.subr.mxu0 %v17568_v44  ;;  %799 = vmatmul.mubr.f32.gmra.mxu1 %v17569_v53  ;;  %v10315_v20 = vsub.f32 %v1172_v51, %v10290_v19  ;;  %v1163_v44 = vld [vmem:[#allocation2 + $0x1a0] sm:$0xff]  ;;  %17593 = vst [vmem:[#allocation15_spill] sm:$0xff] %v10354_v59 }
  0x8b   :  { %1035 = vmatprep.subr.mxu1 %v17570_v58  ;;  %901 = vmatpush1.msra.mxu0 %v17571_v23  ;;  %v10369_v51 = vand.u32 4294901760, %v1163_v44 }
  0x8c   :  { %1037 = vmatpush1.msra.mxu1 %v17528_v28  ;;  %905 = vmatprep.subr.mxu0 %v17572_v25  ;;  %v10280_v28 = vand.u32 4294901760, %v1174_v61  ;;  %v16549_v43 = vand.u32 4294901760, %v10315_v20  ;;  %v10346_v25 = vand.u32 4294901760, %v1165_v12 }
  0x8d   :  { %1039 = vmatprep.subr.mxu1 %v17529_v7  ;;  %804 = vmatprep.mubr.f32.mxu1 %v17513_v9  ;;  %v17577_v7 = vand.u32 4294901760, %v9975_v22  ;;  %v1170_v22 = vld [vmem:[#allocation2 + $0x1d8] sm:$0xff]  ;;  %17595 = vst [vmem:[#allocation18_spill] sm:$0xff] %v10369_v51  ;;  %v10398_v60 = vsub.f32 %v1163_v44, %v10369_v51 }
  0x8e   :  { %909 = vmatpush1.msra.mxu0 %v17574_v8  ;;  %1041 = vmatpush1.msra.mxu1 %v17530_v45  ;;  %v17578_v45 = vand.u32 4294901760, %v9984_v62  ;;  %v10301_v62 = vsub.f32 %v1174_v61, %v10280_v28  ;;  %17592 = vst [vmem:[#allocation14_spill] sm:$0xff] %v10346_v25  ;;  %v10352_v61 = vsub.f32 %v1167_v41, %v10329_v10  ;;  %v1162_v8 = vld [vmem:[#allocation2 + $0x198] sm:$0xff] }
  0x8f   :  { %913 = vmatprep.subr.mxu0 %v17575_v63  ;;  %808 = vmatmul.mubr.f32.gmra.mxu1 %v17576_v35  ;;  %v10367_v63 = vand.u32 4294901760, %v1164_v13 }
  0x90   :  { %1043 = vmatprep.subr.mxu1 %v17531_v18  ;;  %917 = vmatpush1.msra.mxu0 %v17577_v7  ;;  %v10295_v18 = vand.u32 4294901760, %v1171_v0  ;;  %v16551_v11 = vand.u32 4294901760, %v10301_v62  ;;  %v1342_v7 = vsub.f32 %v10315_v20, %v16549_v43  ;;  %v16553_v41 = vand.u32 4294901760, %v10352_v61  ;;  %v1156_v43 = vld [vmem:[#allocation2 + $0x168] sm:$0xff] }
  0x91   :  { %1045 = vmatpush1.msra.mxu1 %v17533_v40  ;;  %921 = vmatprep.subr.mxu0 %v17578_v45  ;;  %v1169_v40 = vld [vmem:[#allocation2 + $0x1d0] sm:$0xff]  ;;  %17594 = vst [vmem:[#allocation17_spill] sm:$0xff] %v10367_v63 }
  0x92   :  { %1047 = vmatprep.subr.mxu1 %v17579_v48  ;;  %925 = vmatpush1.msra.mxu0 %v17580_v14  ;;  %v10323_v4 = vand.u32 4294901760, %v1169_v40  ;;  %v1161_v48 = vld [vmem:[#allocation2 + $0x190] sm:$0xff] }
  0x93   :  { %1049 = vmatpush1.msra.mxu1 %v17535_v39  ;;  %929 = vmatprep.subr.mxu0 %v17581_v1  ;;  %v1168_v39 = vld [vmem:[#allocation2 + $0x1c8] sm:$0xff] }
  0x94   :  { %1051 = vmatprep.subr.mxu1 %v17536_v31  ;;  %933 = vmatpush1.msra.mxu0 %v17582_v32  ;;  %v10312_v31 = vand.u32 4294901760, %v1170_v22  ;;  %v10327_v6 = vand.u32 4294901760, %v1168_v39  ;;  %v10344_v23 = vsub.f32 %v1169_v40, %v10323_v4  ;;  %v1160_v40 = vld [vmem:[#allocation2 + $0x188] sm:$0xff] }
  0x95   :  { %1053 = vmatpush1.msra.mxu1 %v17537_v3  ;;  %937 = vmatprep.subr.mxu0 %v17583_v46  ;;  %v10321_v3 = vsub.f32 %v1171_v0, %v10295_v18  ;;  %v17596_v0 = vld [vmem:[#allocation36_spill] sm:$0xff]  ;;  %v10393_v46 = vsub.f32 %v1166_v2, %v10354_v59  ;;  %v17600_v2 = vld [vmem:[#allocation38_spill] sm:$0xff] }
  0x96   :  { %1055 = vmatprep.subr.mxu1 %v17584_v38  ;;  %941 = vmatpush1.msra.mxu0 %v17586_v55  ;;  %17589 = vst [vmem:[#allocation12_spill] sm:$0xff] %v10327_v6  ;;  %v10339_v58 = vsub.f32 %v1170_v22, %v10312_v31  ;;  %v10360_v50 = vsub.f32 %v1168_v39, %v10327_v6  ;;  %v10385_v22 = vand.u32 4294901760, %v1162_v8  ;;  %v16548_v1 = vand.u32 4294901760, %v10344_v23  ;;  %v1159_v39 = vld [vmem:[#allocation2 + $0x180] sm:$0xff] }
  0x97   :  { %974 = vmatprep.mubr.f32.mxu0 %v17513_v9  ;;  %1057 = vmatpush1.msra.mxu1 %v17587_v5  ;;  %v10403_v55 = vsub.f32 %v1164_v13, %v10367_v63  ;;  %v1343_v5 = vand.u32 4294901760, %v1342_v7  ;;  %v17607_v29 = vand.u32 4294901760, %v10393_v46 }
  0x98   :  { %976 = vmatmul.mubr.f32.vlgmr.msra.gmra.mxu0 %v17588_v47  ;;  %1059 = vmatprep.subr.mxu1 %v17591_v16  ;;  %v16547_v45 = vand.u32 4294901760, %v10339_v58  ;;  %17597 = vst [vmem:[#allocation19_spill] sm:$0xff] %v10385_v22  ;;  %v10410_v16 = vand.u32 4294901760, %v1160_v40  ;;  %v1360_v13 = vsub.f32 %v10344_v23, %v16548_v1 }
  0x99   :  { %1176 = vmatprep.subr.mxu0 %v10280_v28  ;;  %1061 = vmatpush1.msra.mxu1 %v17540_v34  ;;  %v16546_v34 = vand.u32 4294901760, %v10321_v3 }
  0x9a   :  { %1178 = vmatpush1.msra.mxu0 %v10285_v52  ;;  %1063 = vmatprep.subr.mxu1 %v17542_v54  ;;  %v1330_v54 = vsub.f32 %v10301_v62, %v16551_v11  ;;  %17599 = vst [vmem:[#allocation24_spill] sm:$0xff] %v10410_v16  ;;  %v10447_v35 = vsub.f32 %v1160_v40, %v10410_v16 }
  0x9b   :  { %1180 = vmatprep.subr.mxu0 %v10290_v19  ;;  %981 = vmatprep.mubr.f32.mxu0 %v17513_v9  ;;  %v1348_v14 = vsub.f32 %v10321_v3, %v16546_v34  ;;  %v1155_v34 = vld [vmem:[#allocation2 + $0x160] sm:$0xff] }
  0x9c   :  { %1065 = vmatpush1.msra.mxu1 %v17544_v21  ;;  %1182 = vmatpush1.msra.mxu0 %v10295_v18  ;;  %v1336_v21 = vsub.f32 %v10307_v56, %v16550_v17  ;;  %v1331_v32 = vand.u32 4294901760, %v1330_v54  ;;  %v10417_v54 = vand.u32 4294901760, %v1159_v39  ;;  %v10431_v17 = vsub.f32 %v1162_v8, %v10385_v22 }
  0x9d   :  { %1067 = vmatprep.subr.mxu1 %v9902_v27  ;;  %983 = vmatmul.mubr.f32.gmra.mxu0 %v17596_v0  ;;  %v10380_v27 = vsub.f32 %v1165_v12, %v10346_v25  ;;  %v1354_v12 = vsub.f32 %v10339_v58, %v16547_v45  ;;  %v1349_v44 = vand.u32 4294901760, %v1348_v14  ;;  %v10427_v14 = vsub.f32 %v10352_v61, %v16553_v41 }
  0x9e   :  { %1184 = vmatprep.subr.mxu0 %v10312_v31  ;;  %1069 = vmatpush1.msra.mxu1 %v17547_v24  ;;  %v16552_v24 = vand.u32 4294901760, %v10360_v50  ;;  %v1337_v38 = vand.u32 4294901760, %v1336_v21  ;;  %17601 = vst [vmem:[#allocation25_spill] sm:$0xff] %v10417_v54  ;;  %v1158_v21 = vld [vmem:[#allocation2 + $0x178] sm:$0xff]  ;;  %v10444_v8 = vand.u32 4294901760, %v1155_v34 }
  0x9f   :  { %1186 = vmatpush1.msra.mxu0 %v10323_v4  ;;  %1071 = vmatprep.subr.mxu1 %v17549_v26  ;;  %v10400_v26 = vand.u32 4294901760, %v1161_v48  ;;  %v1355_v41 = vand.u32 4294901760, %v1354_v12  ;;  %v10442_v1 = vand.u32 4294901760, %v1158_v21  ;;  %v17605_v7 = vand.u32 4294901760, %v10380_v27 }
  0xa0   :  { %1188 = vmatprep.subr.mxu0 %v10327_v6  ;;  %988 = vmatprep.mubr.f32.mxu0 %v17513_v9  ;;  %v1366_v45 = vsub.f32 %v10360_v50, %v16552_v24  ;;  %17604 = vst [vmem:[#allocation8_spill] sm:$0xff] %v10444_v8  ;;  %v10459_v12 = vand.u32 4294901760, %v1156_v43  ;;  %v1154_v24 = vld [vmem:[#allocation2 + $0x158] sm:$0xff]  ;;  %v1373_v53 = vand.u32 4294901760, %v10427_v14  ;;  %v17610_v14 = vand.u32 4294901760, %v10398_v60 }
  0xa1   :  { %1073 = vmatpush1.msra.mxu1 %v9954_v15  ;;  %17598 = vst [vmem:[#allocation23_spill] sm:$0xff] %v10400_v26  ;;  %1106 = vmatprep.mubr.f32.mxu1 %v17513_v9  ;;  %v1157_v15 = vld [vmem:[#allocation2 + $0x170] sm:$0xff]  ;;  %17603 = vst [vmem:[#allocation29_spill] sm:$0xff] %v10442_v1  ;;  %v10483_v42 = vsub.f32 %v1155_v34, %v10444_v8 }
  0xa2   :  { %1190 = vmatpush1.msra.mxu0 %v10329_v10  ;;  %1108 = vmatmul.mubr.f32.vlgmr.msra.gmra.mxu1 %v17588_v47  ;;  %v10437_v11 = vand.u32 4294901760, %v1157_v15  ;;  %17606 = vst [vmem:[#allocation26_spill] sm:$0xff] %v10459_v12  ;;  %v1367_v40 = vand.u32 4294901760, %v1366_v45  ;;  %v10478_v36 = vsub.f32 %v10398_v60, %v17610_v14 }
  0xa3   :  { %990 = vmatmul.mubr.f32.gmra.mxu0 %v17600_v2  ;;  %1192 = vmatprep.subr.mxu0 %v10354_v59  ;;  %v1148_v59 = vld [vmem:[#allocation2 + $0x128] sm:$0xff] }
  0xa4   :  { %1332 = vmatprep.subr.mxu1 %v1331_v32  ;;  %1194 = vmatpush1.msra.mxu0 %v10346_v25  ;;  %v10435_v32 = vsub.f32 %v1161_v48, %v10400_v26  ;;  %17602 = vst [vmem:[#allocation28_spill] sm:$0xff] %v10437_v11  ;;  %v1361_v48 = vand.u32 4294901760, %v1360_v13  ;;  %v1378_v13 = vsub.f32 %v10393_v46, %v17607_v29  ;;  %v10493_v29 = vand.u32 4294901760, %v1153_v37 }
  0xa5   :  { %1338 = vmatpush1.msra.mxu1 %v1337_v38  ;;  %1196 = vmatprep.subr.mxu0 %v10367_v63  ;;  %v10452_v38 = vsub.f32 %v1159_v39, %v10417_v54  ;;  %v1152_v39 = vld [vmem:[#allocation2 + $0x148] sm:$0xff]  ;;  %v1397_v34 = vand.u32 4294901760, %v10478_v36 }
  0xa6   :  { %1344 = vmatprep.subr.mxu1 %v1343_v5  ;;  %995 = vmatprep.mubr.f32.mxu0 %v17513_v9  ;;  %v10457_v5 = vsub.f32 %v10380_v27, %v17605_v7  ;;  %v10470_v7 = vsub.f32 %v1157_v15, %v10437_v11  ;;  %v10485_v15 = vand.u32 4294901760, %v1154_v24  ;;  %17613 = vst [vmem:[#allocation30_spill] sm:$0xff] %v10493_v29  ;;  %v1379_v33 = vand.u32 4294901760, %v1378_v13 }
  0xa7   :  { %1113 = vmatprep.mubr.f32.mxu1 %v17513_v9  ;;  %1198 = vmatpush1.msra.mxu0 %v10369_v51  ;;  %v10502_v63 = vand.u32 4294901760, %v1152_v39 }
  0xa8   :  { %1350 = vmatpush1.msra.mxu1 %v1349_v44  ;;  %997 = vmatmul.mubr.f32.gmra.mxu0 %v17608_v57  ;;  %v17609_v44 = vand.u32 4294901760, %v10403_v55  ;;  %17611 = vst [vmem:[#allocation9_spill] sm:$0xff] %v10485_v15  ;;  %v1385_v14 = vand.u32 4294901760, %v10457_v5  ;;  %v10523_v36 = vsub.f32 %v1154_v24, %v10485_v15 }
  0xa9   :  { %1115 = vmatmul.mubr.f32.gmra.mxu1 %v17596_v0  ;;  %1200 = vmatprep.subr.mxu0 %v10385_v22  ;;  %v1149_v0 = vld [vmem:[#allocation2 + $0x130] sm:$0xff]  ;;  %v10495_v22 = vand.u32 4294901760, %v1151_v30  ;;  %17616 = vst [vmem:[#allocation20_spill] sm:$0xff] %v10502_v63 }
  0xaa   :  { %v1390_v45 = vsub.f32 %v10403_v55, %v17609_v44  ;;  %1356 = vmatprep.subr.mxu1 %v1355_v41  ;;  %v10489_v44 = vsub.f32 %v1158_v21, %v10442_v1  ;;  %1202 = vmatpush1.msra.mxu0 %v10400_v26  ;;  %v1150_v41 = vld [vmem:[#allocation2 + $0x138] sm:$0xff]  ;;  %v17615_v21 = vand.u32 4294901760, %v10431_v17  ;;  %v10513_v13 = vand.u32 4294901760, %v1149_v0  ;;  %v1147_v26 = vld [vmem:[#allocation2 + $0x120] sm:$0xff] }
  0xab   :  { %1362 = vmatpush1.msra.mxu1 %v1361_v48  ;;  %17614 = vst [vmem:[#allocation16_spill] sm:$0xff] %v10495_v22  ;;  %1204 = vmatprep.subr.mxu0 %v10410_v16  ;;  %v10505_v48 = vsub.f32 %v1156_v43, %v10459_v12  ;;  %v17618_v16 = vand.u32 4294901760, %v10435_v32  ;;  %v17619_v43 = vand.u32 4294901760, %v10447_v35  ;;  %v10519_v25 = vand.u32 4294901760, %v1150_v41 }
  0xac   :  { %17612 = vst [vmem:[#allocation10_spill] sm:$0xff] %v10489_v44  ;;  %1368 = vmatprep.subr.mxu1 %v1367_v40  ;;  %v1402_v51 = vsub.f32 %v10431_v17, %v17615_v21  ;;  %1002 = vmatprep.mubr.f32.mxu0 %v17513_v9  ;;  %v1391_v5 = vand.u32 4294901760, %v1390_v45  ;;  %v10539_v6 = vand.u32 4294901760, %v1147_v26  ;;  %v10548_v45 = vand.u32 4294901760, %v1148_v59 }
  0xad   :  { %17617 = vst [vmem:[#allocation34_spill] sm:$0xff] %v10505_v48  ;;  %1120 = vmatprep.mubr.f32.mxu1 %v17513_v9  ;;  %v1408_v40 = vsub.f32 %v10435_v32, %v17618_v16  ;;  %1206 = vmatpush1.msra.mxu0 %v10417_v54  ;;  %v1414_v21 = vsub.f32 %v10447_v35, %v17619_v43  ;;  %v17620_v43 = vand.u32 4294901760, %v10452_v38 }
  0xae   :  { %1374 = vmatpush1.msra.mxu1 %v1373_v53  ;;  %1004 = vmatmul.mubr.f32.gmra.mxu0 %v10112_v49  ;;  %v10528_v16 = vsub.f32 %v1153_v37, %v10493_v29  ;;  %v10531_v53 = vsub.f32 %v1151_v30, %v10495_v22  ;;  %v1403_v24 = vand.u32 4294901760, %v1402_v51  ;;  %v10542_v37 = vsub.f32 %v1152_v39, %v10502_v63  ;;  %v1145_v51 = vld [vmem:[#allocation2 + $0x110] sm:$0xff] }
  0xaf   :  { %1122 = vmatmul.mubr.f32.gmra.mxu1 %v17600_v2  ;;  %v1420_v54 = vsub.f32 %v10452_v38, %v17620_v43  ;;  %1208 = vmatprep.subr.mxu0 %v10442_v1  ;;  %v1146_v2 = vld [vmem:[#allocation2 + $0x118] sm:$0xff]  ;;  %v1409_v30 = vand.u32 4294901760, %v1408_v40  ;;  %v10546_v43 = vsub.f32 %v1149_v0, %v10513_v13  ;;  %v1415_v10 = vand.u32 4294901760, %v1414_v21 }
  0xb0   :  { %1380 = vmatprep.subr.mxu1 %v1379_v33  ;;  %1210 = vmatpush1.msra.mxu0 %v10437_v11  ;;  %v17622_v1 = vand.u32 4294901760, %v10489_v44  ;;  %v10557_v40 = vsub.f32 %v1150_v41, %v10519_v25  ;;  %v17623_v33 = vand.u32 4294901760, %v10470_v7  ;;  %v10564_v21 = vand.u32 4294901760, %v1146_v2 }
  0xb1   :  { %1386 = vmatpush1.msra.mxu1 %v1385_v14  ;;  %17621 = vst [vmem:[#allocation21_spill] sm:$0xff] %v10546_v43  ;;  %1212 = vmatprep.subr.mxu0 %v10459_v12  ;;  %v1144_v14 = vld [vmem:[#allocation2 + $0x108] sm:$0xff]  ;;  %v1421_v0 = vand.u32 4294901760, %v1420_v54  ;;  %v17624_v41 = vand.u32 4294901760, %v10505_v48  ;;  %v10574_v54 = vand.u32 4294901760, %v1145_v51 }
  0xb2   :  { %1392 = vmatprep.subr.mxu1 %v1391_v5  ;;  %v1426_v39 = vsub.f32 %v10489_v44, %v17622_v1  ;;  %1127 = vmatprep.mubr.f32.mxu1 %v17513_v9  ;;  %v1432_v5 = vsub.f32 %v10470_v7, %v17623_v33  ;;  %v1143_v1 = vld [vmem:[#allocation2 + $0x100] sm:$0xff]  ;;  %v10572_v44 = vsub.f32 %v1147_v26, %v10539_v6  ;;  %v17625_v33 = vand.u32 4294901760, %v10483_v42 }
  0xb3   :  { %1214 = vmatpush1.msra.mxu0 %v10444_v8  ;;  %1398 = vmatpush1.msra.mxu1 %v1397_v34  ;;  %v1438_v11 = vsub.f32 %v10505_v48, %v17624_v41  ;;  %v10581_v12 = vand.u32 4294901760, %v1144_v14  ;;  %v10585_v41 = vsub.f32 %v1148_v59, %v10548_v45  ;;  %v17627_v8 = vand.u32 4294901760, %v10523_v36 }
  0xb4   :  { %1216 = vmatprep.subr.mxu0 %v10485_v15  ;;  %1129 = vmatmul.mubr.f32.gmra.mxu1 %v17608_v57  ;;  %v1444_v34 = vsub.f32 %v10483_v42, %v17625_v33  ;;  %v1427_v26 = vand.u32 4294901760, %v1426_v39  ;;  %v1433_v33 = vand.u32 4294901760, %v1432_v5  ;;  %v17628_v15 = vand.u32 4294901760, %v10528_v16 }
  0xb5   :  { %1404 = vmatprep.subr.mxu1 %v1403_v24  ;;  %17626 = vst [vmem:[#allocation22_spill] sm:$0xff] %v10585_v41  ;;  %1218 = vmatpush1.msra.mxu0 %v10493_v29  ;;  %v1450_v57 = vsub.f32 %v10523_v36, %v17627_v8  ;;  %v10591_v24 = vand.u32 4294901760, %v1143_v1  ;;  %v10599_v29 = vsub.f32 %v1146_v2, %v10564_v21  ;;  %v1439_v8 = vand.u32 4294901760, %v1438_v11 }
  0xb6   :  { %1410 = vmatpush1.msra.mxu1 %v1409_v30  ;;  %1220 = vmatprep.subr.mxu0 %v10502_v63  ;;  %v1456_v59 = vsub.f32 %v10528_v16, %v17628_v15  ;;  %v10604_v30 = vsub.f32 %v1145_v51, %v10574_v54  ;;  %v17630_v39 = vand.u32 4294901760, %v10542_v37  ;;  %v1445_v15 = vand.u32 4294901760, %v1444_v34 }
  0xb7   :  { %1416 = vmatprep.subr.mxu1 %v1415_v10  ;;  %17629 = vst [vmem:[#allocation50_spill] sm:$0xff] %v10599_v29  ;;  %1134 = vmatprep.mubr.f32.mxu1 %v17513_v9  ;;  %v17631_v2 = vand.u32 4294901760, %v10531_v53  ;;  %v10616_v11 = vsub.f32 %v1144_v14, %v10581_v12  ;;  %v1451_v51 = vand.u32 4294901760, %v1450_v57  ;;  %v16609_v14 = vand.u32 4294901760, %v10599_v29 }
  0xb8   :  { %1222 = vmatpush1.msra.mxu0 %v10495_v22  ;;  %v1462_v10 = vsub.f32 %v10542_v37, %v17630_v39  ;;  %1422 = vmatpush1.msra.mxu1 %v1421_v0  ;;  %v10620_v39 = vsub.f32 %v1143_v1, %v10591_v24  ;;  %v17632_v0 = vand.u32 4294901760, %v10557_v40  ;;  %v17633_v57 = vand.u32 4294901760, %v10546_v43 }
  0xb9   :  { %1224 = vmatprep.subr.mxu0 %v10519_v25  ;;  %v1468_v48 = vsub.f32 %v10531_v53, %v17631_v2  ;;  %1136 = vmatmul.mubr.f32.gmra.mxu1 %v10112_v49  ;;  %v1457_v2 = vand.u32 4294901760, %v1456_v59  ;;  %v17634_v5 = vand.u32 4294901760, %v10585_v41  ;;  %v16608_v59 = vand.u32 4294901760, %v10616_v11 }
  0xba   :  { %1428 = vmatprep.subr.mxu1 %v1427_v26  ;;  %v1474_v34 = vsub.f32 %v10557_v40, %v17632_v0  ;;  %1226 = vmatpush1.msra.mxu0 %v10513_v13  ;;  %v1463_v26 = vand.u32 4294901760, %v1462_v10  ;;  %v1480_v1 = vsub.f32 %v10546_v43, %v17633_v57  ;;  %v17635_v10 = vand.u32 4294901760, %v10572_v44 }
  0xbb   :  { %1434 = vmatpush1.msra.mxu1 %v1433_v33  ;;  %1228 = vmatprep.subr.mxu0 %v10548_v45  ;;  %v1469_v0 = vand.u32 4294901760, %v1468_v48  ;;  %v1486_v33 = vsub.f32 %v10585_v41, %v17634_v5  ;;  %v16607_v22 = vand.u32 4294901760, %v10620_v39  ;;  %v1498_v48 = vsub.f32 %v10599_v29, %v16609_v14  ;;  %v17652_v14 = vld [vmem:[#allocation25_spill] sm:$0xff] }
  0xbc   :  { %1440 = vmatprep.subr.mxu1 %v1439_v8  ;;  %1230 = vmatpush1.msra.mxu0 %v10539_v6  ;;  %v1475_v8 = vand.u32 4294901760, %v1474_v34  ;;  %v1492_v57 = vsub.f32 %v10572_v44, %v17635_v10  ;;  %v1481_v5 = vand.u32 4294901760, %v1480_v1  ;;  %v17637_v1 = vld [vmem:[#allocation35_spill] sm:$0xff] }
  0xbd   :  { %1446 = vmatpush1.msra.mxu1 %v1445_v15  ;;  %1232 = vmatprep.subr.mxu0 %v10564_v21  ;;  %v17636_v15 = vand.u32 4294901760, %v10604_v30  ;;  %v1487_v34 = vand.u32 4294901760, %v1486_v33 }
  0xbe   :  { %1452 = vmatprep.subr.mxu1 %v1451_v51  ;;  %1234 = vmatpush1.msra.mxu0 %v10574_v54  ;;  %v1493_v10 = vand.u32 4294901760, %v1492_v57  ;;  %v17638_v57 = vld [vmem:[#allocation12_spill] sm:$0xff] }
  0xbf   :  { %1458 = vmatpush1.msra.mxu1 %v1457_v2  ;;  %1236 = vmatprep.subr.mxu0 %v10581_v12  ;;  %v1504_v51 = vsub.f32 %v10604_v30, %v17636_v15  ;;  %v1510_v2 = vsub.f32 %v10616_v11, %v16608_v59  ;;  %v1499_v15 = vand.u32 4294901760, %v1498_v48  ;;  %v17639_v48 = vld [vmem:[#allocation13_spill] sm:$0xff]  ;;  %v17651_v59 = vld [vmem:[#allocation24_spill] sm:$0xff] }
  0xc0   :  { %1464 = vmatprep.subr.mxu1 %v1463_v26  ;;  %1238 = vmatpush1.msra.mxu0 %v10591_v24  ;;  %v1516_v26 = vsub.f32 %v10620_v39, %v16607_v22  ;;  %v17650_v22 = vld [vmem:[#allocation23_spill] sm:$0xff] }
  0xc1   :  { %1470 = vmatpush1.msra.mxu1 %v1469_v0  ;;  %1271 = vmatprep.mubr.f32.mxu0 %v17513_v9  ;;  %v1505_v0 = vand.u32 4294901760, %v1504_v51  ;;  %v1511_v33 = vand.u32 4294901760, %v1510_v2  ;;  %v17641_v51 = vld [vmem:[#allocation10_spill] sm:$0xff] }
  0xc2   :  { %1476 = vmatprep.subr.mxu1 %v1475_v8  ;;  %1589 = vmatprep.subr.mxu0 %v10301_v62  ;;  %v1517_v8 = vand.u32 4294901760, %v1516_v26  ;;  %v17643_v2 = vld [vmem:[#allocation14_spill] sm:$0xff]  ;;  %v17645_v26 = vld [vmem:[#allocation17_spill] sm:$0xff] }
  0xc3   :  { %1277 = vmatmul.mubr.f32.vlgmr.msra.gmra.mxu0 %v17637_v1  ;;  %1482 = vmatpush1.msra.mxu1 %v1481_v5  ;;  %v17640_v5 = vld [vmem:[#allocation44_spill] sm:$0xff]  ;;  %v17655_v1 = vld [vmem:[#allocation38_spill] sm:$0xff] }
  0xc4   :  { %1592 = vmatpush1.msra.mxu0 %v10307_v56  ;;  %1488 = vmatprep.subr.mxu1 %v1487_v34  ;;  %v17642_v34 = vld [vmem:[#allocation15_spill] sm:$0xff] }
  0xc5   :  { %1595 = vmatprep.subr.mxu0 %v10315_v20  ;;  %1494 = vmatpush1.msra.mxu1 %v1493_v10  ;;  %v17644_v10 = vld [vmem:[#allocation34_spill] sm:$0xff] }
  0xc6   :  { %1598 = vmatpush1.msra.mxu0 %v10321_v3  ;;  %1500 = vmatprep.subr.mxu1 %v1499_v15  ;;  %v17646_v15 = vld [vmem:[#allocation18_spill] sm:$0xff] }
  0xc7   :  { %1601 = vmatprep.subr.mxu0 %v10339_v58  ;;  %1506 = vmatpush1.msra.mxu1 %v1505_v0  ;;  %v17647_v0 = vld [vmem:[#allocation47_spill] sm:$0xff] }
  0xc8   :  { %1604 = vmatpush1.msra.mxu0 %v10344_v23  ;;  %1512 = vmatprep.subr.mxu1 %v1511_v33  ;;  %v17648_v33 = vld [vmem:[#allocation19_spill] sm:$0xff] }
  0xc9   :  { %1607 = vmatprep.subr.mxu0 %v10360_v50  ;;  %1518 = vmatpush1.msra.mxu1 %v1517_v8  ;;  %v17649_v8 = vld [vmem:[#allocation36_spill] sm:$0xff] }
  0xca   :  { %1551 = vmatprep.mubr.f32.mxu1 %v17513_v9  ;;  %1610 = vmatpush1.msra.mxu0 %v10352_v61 }
  0xcb   :  { %1553 = vmatmul.mubr.f32.vlgmr.msra.gmra.mxu1 %v17588_v47  ;;  %1613 = vmatprep.subr.mxu0 %v10393_v46  ;;  %v17657_v47 = vld [vmem:[#allocation26_spill] sm:$0xff] }
  0xcc   :  { %1757 = vmatprep.subr.mxu1 %v10280_v28  ;;  %1616 = vmatpush1.msra.mxu0 %v10380_v27 }
  0xcd   :  { %1759 = vmatpush1.msra.mxu1 %v10285_v52  ;;  %1619 = vmatprep.subr.mxu0 %v10403_v55 }
  0xce   :  { %1761 = vmatprep.subr.mxu1 %v10290_v19  ;;  %1622 = vmatpush1.msra.mxu0 %v10398_v60 }
  0xcf   :  { %1763 = vmatpush1.msra.mxu1 %v10295_v18  ;;  %1625 = vmatprep.subr.mxu0 %v10431_v17 }
  0xd0   :  { %1765 = vmatprep.subr.mxu1 %v10312_v31  ;;  %1628 = vmatpush1.msra.mxu0 %v10435_v32 }
  0xd1   :  { %1767 = vmatpush1.msra.mxu1 %v10323_v4  ;;  %1631 = vmatprep.subr.mxu0 %v10447_v35 }
  0xd2   :  { %1769 = vmatprep.subr.mxu1 %v17638_v57  ;;  %1282 = vmatprep.mubr.f32.mxu0 %v17513_v9 }
  0xd3   :  { %1634 = vmatpush1.msra.mxu0 %v10452_v38  ;;  %1771 = vmatpush1.msra.mxu1 %v17639_v48 }
  0xd4   :  { %1288 = vmatmul.mubr.f32.gmra.mxu0 %v17640_v5  ;;  %1637 = vmatprep.subr.mxu0 %v17641_v51  ;;  %v17654_v5 = vld [vmem:[#allocation29_spill] sm:$0xff] }
  0xd5   :  { %1773 = vmatprep.subr.mxu1 %v17642_v34  ;;  %1640 = vmatpush1.msra.mxu0 %v10470_v7 }
  0xd6   :  { %1775 = vmatpush1.msra.mxu1 %v17643_v2  ;;  %1643 = vmatprep.subr.mxu0 %v17644_v10 }
  0xd7   :  { %1777 = vmatprep.subr.mxu1 %v17645_v26  ;;  %1293 = vmatprep.mubr.f32.mxu0 %v17513_v9 }
  0xd8   :  { %1646 = vmatpush1.msra.mxu0 %v10483_v42  ;;  %1779 = vmatpush1.msra.mxu1 %v17646_v15 }
  0xd9   :  { %1299 = vmatmul.mubr.f32.gmra.mxu0 %v17647_v0  ;;  %1558 = vmatprep.mubr.f32.mxu1 %v17513_v9  ;;  %v17653_v0 = vld [vmem:[#allocation27_spill] sm:$0xff] }
  0xda   :  { %1649 = vmatprep.subr.mxu0 %v10523_v36  ;;  %1781 = vmatprep.subr.mxu1 %v17648_v33 }
  0xdb   :  { %1560 = vmatmul.mubr.f32.gmra.mxu1 %v17649_v8  ;;  %1652 = vmatpush1.msra.mxu0 %v10528_v16  ;;  %v17656_v8 = vld [vmem:[#allocation28_spill] sm:$0xff] }
  0xdc   :  { %1783 = vmatpush1.msra.mxu1 %v17650_v22  ;;  %1655 = vmatprep.subr.mxu0 %v10542_v37 }
  0xdd   :  { %1785 = vmatprep.subr.mxu1 %v17651_v59  ;;  %1304 = vmatprep.mubr.f32.mxu0 %v17513_v9 }
  0xde   :  { %1658 = vmatpush1.msra.mxu0 %v10531_v53  ;;  %1787 = vmatpush1.msra.mxu1 %v17652_v14  ;;  %v17659_v14 = vld [vmem:[#allocation11_spill] sm:$0xff] }
  0xdf   :  { %1310 = vmatmul.mubr.f32.gmra.mxu0 %v17653_v0  ;;  %1565 = vmatprep.mubr.f32.mxu1 %v17513_v9  ;;  %v17658_v0 = vld [vmem:[#allocation8_spill] sm:$0xff] }
  0xe0   :  { %1661 = vmatprep.subr.mxu0 %v10557_v40  ;;  %1789 = vmatprep.subr.mxu1 %v17654_v5 }
  0xe1   :  { %1567 = vmatmul.mubr.f32.gmra.mxu1 %v17655_v1  ;;  %1664 = vmatpush1.msra.mxu0 %v10546_v43  ;;  %v17660_v1 = vld [vmem:[#allocation9_spill] sm:$0xff] }
  0xe2   :  { %1791 = vmatpush1.msra.mxu1 %v17656_v8  ;;  %1667 = vmatprep.subr.mxu0 %v10585_v41  ;;  %v17661_v43 = vld [vmem:[#allocation41_spill] sm:$0xff]  ;;  %v17662_v41 = vld [vmem:[#allocation30_spill] sm:$0xff] }
  0xe3   :  { %1793 = vmatprep.subr.mxu1 %v17657_v47  ;;  %1315 = vmatprep.mubr.f32.mxu0 %v17513_v9 }
  0xe4   :  { %1670 = vmatpush1.msra.mxu0 %v10572_v44  ;;  %1795 = vmatpush1.msra.mxu1 %v17658_v0 }
  0xe5   :  { %1321 = vmatmul.mubr.f32.gmra.mxu0 %v17659_v14  ;;  %1572 = vmatprep.mubr.f32.mxu1 %v17513_v9  ;;  %v17663_v14 = vld [vmem:[#allocation16_spill] sm:$0xff] }
  0xe6   :  { %1673 = vmatprep.subr.mxu0 %v10599_v29  ;;  %1797 = vmatprep.subr.mxu1 %v17660_v1  ;;  %v17664_v29 = vld [vmem:[#allocation32_spill] sm:$0xff] }
  0xe7   :  { %1574 = vmatmul.mubr.f32.gmra.mxu1 %v17661_v43  ;;  %1676 = vmatpush1.msra.mxu0 %v10604_v30  ;;  %v17665_v43 = vand.u32 4294901760, %v10301_v62  ;;  %v17669_v62 = vld [vmem:[#allocation37_spill] sm:$0xff] }
  0xe8   :  { %1799 = vmatpush1.msra.mxu1 %v17662_v41  ;;  %1679 = vmatprep.subr.mxu0 %v10616_v11 }
  0xe9   :  { %1801 = vmatprep.subr.mxu1 %v10502_v63  ;;  %1682 = vmatpush1.msra.mxu0 %v10620_v39  ;;  %v17666_v63 = vand.u32 4294901760, %v10307_v56  ;;  %v17671_v56 = vand.u32 4294901760, %v10344_v23  ;;  %v17676_v23 = vand.u32 4294901760, %v10393_v46  ;;  %v17684_v46 = vand.u32 4294901760, %v10447_v35 }
  0xea   :  { %1715 = vmatprep.mubr.f32.mxu0 %v17513_v9  ;;  %1803 = vmatpush1.msra.mxu1 %v17663_v14  ;;  %v17667_v14 = vand.u32 4294901760, %v10315_v20  ;;  %v17672_v20 = vand.u32 4294901760, %v10360_v50  ;;  %v17677_v50 = vand.u32 4294901760, %v10380_v27  ;;  %v17681_v27 = vld [vmem:[#allocation39_spill] sm:$0xff]  ;;  %v17689_v35 = vand.u32 4294901760, %v10470_v7  ;;  %v17693_v7 = vld [vmem:[#allocation46_spill] sm:$0xff] }
  0xeb   :  { %1579 = vmatprep.mubr.f32.mxu1 %v17513_v9  ;;  %1718 = vmatmul.mubr.f32.vlgmr.msra.gmra.mxu0 %v17664_v29  ;;  %v17668_v29 = vand.u32 4294901760, %v10321_v3  ;;  %v17673_v3 = vand.u32 4294901760, %v10352_v61  ;;  %v17679_v61 = vand.u32 4294901760, %v10398_v60  ;;  %v17690_v60 = vand.u32 4294901760, %v17644_v10 }
  0xec   :  { %1805 = vmatprep.subr.mxu1 %v10519_v25  ;;  %1901 = vmatprep.subr.mxu0 %v17665_v43  ;;  %v17670_v43 = vand.u32 4294901760, %v10339_v58  ;;  %v17674_v58 = vld [vmem:[#allocation40_spill] sm:$0xff] }
  0xed   :  { %1581 = vmatmul.mubr.f32.gmra.mxu1 %v10112_v49  ;;  %1905 = vmatpush1.msra.mxu0 %v17666_v63  ;;  %v17675_v63 = vld [vmem:[#allocation33_spill] sm:$0xff] }
  0xee   :  { %1807 = vmatpush1.msra.mxu1 %v10513_v13  ;;  %1909 = vmatprep.subr.mxu0 %v17667_v14  ;;  %v2257_v14 = vld [vmem:[#allocation2 + $0x2f0] sm:$0xff] }
  0xef   :  { %1809 = vmatprep.subr.mxu1 %v10548_v45  ;;  %1723 = vmatprep.mubr.f32.mxu0 %v17513_v9 }
  0xf0   :  { %1811 = vmatpush1.msra.mxu1 %v10539_v6  ;;  %1913 = vmatpush1.msra.mxu0 %v17668_v29  ;;  %v17678_v29 = vand.u32 4294901760, %v10403_v55  ;;  %v17691_v55 = vand.u32 4294901760, %v10483_v42  ;;  %v17695_v42 = vand.u32 4294901760, %v10542_v37  ;;  %v2255_v37 = vld [vmem:[#allocation2 + $0x2e0] sm:$0xff] }
  0xf1   :  { %1813 = vmatprep.subr.mxu1 %v10564_v21  ;;  %1726 = vmatmul.mubr.f32.gmra.mxu0 %v17669_v62  ;;  %v2236_v62 = vld [vmem:[#allocation2 + $0x248] sm:$0xff] }
  0xf2   :  { %1917 = vmatprep.subr.mxu0 %v17670_v43  ;;  %1815 = vmatpush1.msra.mxu1 %v10574_v54  ;;  %v17702_v43 = vld [vmem:[#allocation22_spill] sm:$0xff] }
  0xf3   :  { %1921 = vmatpush1.msra.mxu0 %v17671_v56  ;;  %1817 = vmatprep.subr.mxu1 %v10581_v12  ;;  %v17703_v56 = vand.u32 4294901760, %v17702_v43 }
  0xf4   :  { %1925 = vmatprep.subr.mxu0 %v17672_v20  ;;  %1731 = vmatprep.mubr.f32.mxu0 %v17513_v9 }
  0xf5   :  { %1819 = vmatpush1.msra.mxu1 %v10591_v24  ;;  %1852 = vmatprep.mubr.f32.mxu1 %v17513_v9 }
  0xf6   :  { %1929 = vmatpush1.msra.mxu0 %v17673_v3  ;;  %1856 = vmatmul.mubr.f32.vlgmr.msra.gmra.mxu1 %v17675_v63  ;;  %v2253_v3 = vld [vmem:[#allocation2 + $0x2d0] sm:$0xff] }
  0xf7   :  { %1734 = vmatmul.mubr.f32.gmra.mxu0 %v17674_v58  ;;  %1933 = vmatprep.subr.mxu0 %v17676_v23  ;;  %v17704_v23 = vand.u32 4294901760, %v10572_v44  ;;  %v10863_v44 = vand.u32 4294901760, %v2253_v3 }
  0xf8   :  { %2095 = vmatprep.subr.mxu1 %v10280_v28  ;;  %1937 = vmatpush1.msra.mxu0 %v17677_v50  ;;  %v17680_v28 = vld [vmem:[#allocation43_spill] sm:$0xff]  ;;  %v10852_v50 = vand.u32 4294901760, %v2255_v37 }
  0xf9   :  { %2097 = vmatpush1.msra.mxu1 %v10285_v52  ;;  %1941 = vmatprep.subr.mxu0 %v17678_v29  ;;  %v17682_v52 = vand.u32 4294901760, %v10431_v17  ;;  %v17687_v17 = vld [vmem:[#allocation42_spill] sm:$0xff]  ;;  %17709 = vst [vmem:[#allocation13_spill] sm:$0xff] %v10863_v44 }
  0xfa   :  { %2099 = vmatprep.subr.mxu1 %v10290_v19  ;;  %1739 = vmatprep.mubr.f32.mxu0 %v17513_v9  ;;  %v17683_v19 = vand.u32 4294901760, %v10435_v32  ;;  %v2258_v32 = vld [vmem:[#allocation2 + $0x2f8] sm:$0xff] }
  0xfb   :  { %1861 = vmatprep.mubr.f32.mxu1 %v17513_v9  ;;  %1945 = vmatpush1.msra.mxu0 %v17679_v61 }
  0xfc   :  { %2101 = vmatpush1.msra.mxu1 %v10295_v18  ;;  %1742 = vmatmul.mubr.f32.gmra.mxu0 %v17680_v28  ;;  %v17685_v18 = vand.u32 4294901760, %v10452_v38  ;;  %v17692_v38 = vand.u32 4294901760, %v10523_v36  ;;  %v17696_v36 = vand.u32 4294901760, %v10531_v53 }
  0xfd   :  { %1865 = vmatmul.mubr.f32.gmra.mxu1 %v17681_v27  ;;  %1949 = vmatprep.subr.mxu0 %v17682_v52 }
  0xfe   :  { %2103 = vmatprep.subr.mxu1 %v10312_v31  ;;  %1953 = vmatpush1.msra.mxu0 %v17683_v19  ;;  %v17686_v31 = vld [vmem:[#allocation48_spill] sm:$0xff]  ;;  %v17708_v19 = vand.u32 4294901760, %v10604_v30 }
  0xff   :  { %2105 = vmatpush1.msra.mxu1 %v10323_v4  ;;  %1957 = vmatprep.subr.mxu0 %v17684_v46  ;;  %v17688_v4 = vand.u32 4294901760, %v17641_v51  ;;  %v10826_v51 = vand.u32 4294901760, %v2257_v14  ;;  %v17710_v46 = vand.u32 4294901760, %v10616_v11 }
 0x100   :  { %2107 = vmatprep.subr.mxu1 %v17638_v57  ;;  %1747 = vmatprep.mubr.f32.mxu0 %v17513_v9  ;;  %v17694_v57 = vand.u32 4294901760, %v10528_v16  ;;  %v17698_v16 = vand.u32 4294901760, %v10557_v40  ;;  %v2254_v40 = vld [vmem:[#allocation2 + $0x2d8] sm:$0xff] }
 0x101   :  { %1870 = vmatprep.mubr.f32.mxu1 %v17513_v9  ;;  %1961 = vmatpush1.msra.mxu0 %v17685_v18  ;;  %v10845_v20 = vsub.f32 %v2257_v14, %v10826_v51  ;;  %v10857_v61 = vand.u32 4294901760, %v2254_v40  ;;  %v17711_v18 = vld [vmem:[#allocation20_spill] sm:$0xff]  ;;  %v2249_v14 = vld [vmem:[#allocation2 + $0x2b0] sm:$0xff] }
 0x102   :  { %2109 = vmatpush1.msra.mxu1 %v17639_v48  ;;  %1750 = vmatmul.mubr.f32.gmra.mxu0 %v17686_v31  ;;  %v10818_v48 = vand.u32 4294901760, %v2258_v32 }
 0x103   :  { %1874 = vmatmul.mubr.f32.gmra.mxu1 %v17687_v17  ;;  %1965 = vmatprep.subr.mxu0 %v17688_v4  ;;  %17707 = vst [vmem:[#allocation12_spill] sm:$0xff] %v10857_v61  ;;  %v2250_v4 = vld [vmem:[#allocation2 + $0x2b8] sm:$0xff]  ;;  %v2239_v17 = vld [vmem:[#allocation2 + $0x260] sm:$0xff] }
 0x104   :  { %2111 = vmatprep.subr.mxu1 %v17642_v34  ;;  %1969 = vmatpush1.msra.mxu0 %v17689_v35  ;;  %v17697_v34 = vld [vmem:[#allocation25_spill] sm:$0xff]  ;;  %v11049_v31 = vand.u32 4294901760, %v2239_v17 }
 0x105   :  { %2113 = vmatpush1.msra.mxu1 %v17643_v2  ;;  %1973 = vmatprep.subr.mxu0 %v17690_v60  ;;  %v17712_v60 = vand.u32 4294901760, %v10620_v39 }
 0x106   :  { %2115 = vmatprep.subr.mxu1 %v17645_v26  ;;  %1879 = vmatprep.mubr.f32.mxu1 %v17513_v9  ;;  %v194_v2 = vpop.f32.mrf.mxu0  ;;  %v17699_v26 = vld [vmem:[#allocation49_spill] sm:$0xff]  ;;  %17742 = vst [vmem:[#allocation51_spill] sm:$0xff] %v11049_v31 }
 0x107   :  { %1977 = vmatpush1.msra.mxu0 %v17691_v55  ;;  %2117 = vmatpush1.msra.mxu1 %v17646_v15  ;;  %v17700_v15 = vld [vmem:[#allocation21_spill] sm:$0xff]  ;;  %v17715_v55 = vld [vmem:[#allocation16_spill] sm:$0xff] }
 0x108   :  { %1981 = vmatprep.subr.mxu0 %v17692_v38  ;;  %1883 = vmatmul.mubr.f32.gmra.mxu1 %v17693_v7  ;;  %v10880_v11 = vpop.f32.mrf.mxu0 }
 0x109   :  { %2119 = vmatprep.subr.mxu1 %v17648_v33  ;;  %1985 = vmatpush1.msra.mxu0 %v17694_v57  ;;  %v17701_v33 = vand.u32 4294901760, %v17700_v15  ;;  %17714 = vst [vmem:[#allocation15_spill] sm:$0xff] %v10880_v11  ;;  %v10892_v57 = vsub.f32 %v2254_v40, %v10857_v61  ;;  %v2245_v15 = vld [vmem:[#allocation2 + $0x290] sm:$0xff] }
 0x10a   :  { %2121 = vmatpush1.msra.mxu1 %v17650_v22  ;;  %1989 = vmatprep.subr.mxu0 %v17695_v42  ;;  %v2256_v22 = vld [vmem:[#allocation2 + $0x2e8] sm:$0xff]  ;;  %v10897_v42 = vsub.f32 %v2253_v3, %v10863_v44 }
 0x10b   :  { %2123 = vmatprep.subr.mxu1 %v17651_v59  ;;  %1888 = vmatprep.mubr.f32.mxu1 %v17513_v9  ;;  %v10834_v59 = vsub.f32 %v2258_v32, %v10818_v48  ;;  %v17716_v32 = vld [vmem:[#allocation31_spill] sm:$0xff]  ;;  %v2244_v3 = vld [vmem:[#allocation2 + $0x288] sm:$0xff] }
 0x10c   :  { %1993 = vmatpush1.msra.mxu0 %v17696_v36  ;;  %2125 = vmatpush1.msra.mxu1 %v17697_v34  ;;  %v10899_v36 = vand.u32 4294901760, %v2250_v4 }
 0x10d   :  { %1997 = vmatprep.subr.mxu0 %v17698_v16  ;;  %v470_v10 = vpop.f32.mrf.mxu1  ;;  %1892 = vmatmul.mubr.f32.gmra.mxu1 %v17699_v26  ;;  %v16617_v52 = vand.u32 4294901760, %v10834_v59 }
 0x10e   :  { %2127 = vmatprep.subr.mxu1 %v17654_v5  ;;  %v10836_v53 = vadd.f32 %v470_v10, %v194_v2  ;;  %2001 = vmatpush1.msra.mxu0 %v17701_v33  ;;  %v10847_v5 = vand.u32 4294901760, %v2256_v22  ;;  %17718 = vst [vmem:[#allocation34_spill] sm:$0xff] %v10899_v36  ;;  %v2247_v2 = vld [vmem:[#allocation2 + $0x2a0] sm:$0xff]  ;;  %v10911_v10 = vand.u32 4294901760, %v2249_v14 }
 0x10f   :  { %2129 = vmatpush1.msra.mxu1 %v17656_v8  ;;  %2005 = vmatprep.subr.mxu0 %v17703_v56  ;;  %v17705_v8 = vld [vmem:[#allocation50_spill] sm:$0xff]  ;;  %v10889_v39 = vsub.f32 %v10834_v59, %v16617_v52  ;;  %v16619_v56 = vand.u32 4294901760, %v10892_v57 }
 0x110   :  { %2131 = vmatprep.subr.mxu1 %v17657_v47  ;;  %2009 = vmatpush1.msra.mxu0 %v17704_v23  ;;  %v17706_v29 = vand.u32 4294901760, %v17705_v8  ;;  %v2252_v47 = vld [vmem:[#allocation2 + $0x2c8] sm:$0xff]  ;;  %v10870_v35 = vsub.f32 %v2256_v22, %v10847_v5  ;;  %17719 = vst [vmem:[#allocation17_spill] sm:$0xff] %v10911_v10  ;;  %v10930_v8 = vand.u32 4294901760, %v2247_v2 }
 0x111   :  { %2133 = vmatpush1.msra.mxu1 %v17658_v0  ;;  %v2251_v0 = vld [vmem:[#allocation2 + $0x2c0] sm:$0xff]  ;;  %2058 = vmatprep.mubr.f32.mxu0 %v17513_v9  ;;  %v10878_v30 = vand.u32 4294901760, %v2252_v47  ;;  %v2248_v22 = vld [vmem:[#allocation2 + $0x2a8] sm:$0xff] }
 0x112   :  { %2013 = vmatprep.subr.mxu0 %v17706_v29  ;;  %2135 = vmatprep.subr.mxu1 %v17660_v1  ;;  %v16616_v1 = vand.u32 4294901760, %v10845_v20  ;;  %v10884_v38 = vand.u32 4294901760, %v2251_v0  ;;  %v10928_v23 = vand.u32 4294901760, %v2248_v22  ;;  %17722 = vst [vmem:[#allocation23_spill] sm:$0xff] %v10930_v8  ;;  %v2242_v29 = vld [vmem:[#allocation2 + $0x278] sm:$0xff] }
 0x113   :  { %2017 = vmatpush1.msra.mxu0 %v17708_v19  ;;  %2137 = vmatpush1.msra.mxu1 %v17662_v41  ;;  %v10876_v41 = vsub.f32 %v2255_v37, %v10852_v50  ;;  %17713 = vst [vmem:[#allocation10_spill] sm:$0xff] %v10878_v30  ;;  %v10915_v33 = vsub.f32 %v2252_v47, %v10878_v30  ;;  %v2243_v47 = vld [vmem:[#allocation2 + $0x280] sm:$0xff]  ;;  %v10936_v19 = vpop.f32.mrf.mxu1 }
 0x114   :  { %2021 = vmatprep.subr.mxu0 %v17710_v46  ;;  %2139 = vmatprep.subr.mxu1 %v17711_v18  ;;  %17717 = vst [vmem:[#allocation14_spill] sm:$0xff] %v10884_v38  ;;  %v10906_v16 = vsub.f32 %v10845_v20, %v16616_v1  ;;  %v10922_v43 = vsub.f32 %v2251_v0, %v10884_v38  ;;  %17721 = vst [vmem:[#allocation19_spill] sm:$0xff] %v10928_v23  ;;  %v17724_v46 = vld [vmem:[#allocation36_spill] sm:$0xff] }
 0x115   :  { %2025 = vmatpush1.msra.mxu0 %v17712_v60  ;;  %2141 = vmatpush1.msra.mxu1 %v17715_v55  ;;  %v16618_v37 = vand.u32 4294901760, %v10876_v41  ;;  %17723 = vst [vmem:[#allocation24_spill] sm:$0xff] %v10936_v19  ;;  %v10948_v55 = vand.u32 4294901760, %v2245_v15  ;;  %v10989_v19 = vsub.f32 %v2248_v22, %v10928_v23 }
 0x116   :  { %2060 = vmatmul.mubr.f32.vlgmr.msra.gmra.mxu0 %v17716_v32  ;;  %2143 = vmatprep.subr.mxu1 %v10519_v25  ;;  %v205_v34 = vpop.f32.mrf.mxu0  ;;  %v16615_v25 = vand.u32 4294901760, %v10870_v35  ;;  %v17738_v26 = vand.u32 4294901760, %v10922_v43 }
 0x117   :  { %2260 = vmatprep.subr.mxu0 %v10818_v48  ;;  %2145 = vmatpush1.msra.mxu1 %v10513_v13  ;;  %v2246_v13 = vld [vmem:[#allocation2 + $0x298] sm:$0xff]  ;;  %17726 = vst [vmem:[#allocation28_spill] sm:$0xff] %v10948_v55 }
 0x118   :  { %2262 = vmatpush1.msra.mxu0 %v10826_v51  ;;  %2147 = vmatprep.subr.mxu1 %v10548_v45  ;;  %v10917_v40 = vpop.f32.mrf.mxu0  ;;  %v2415_v45 = vand.u32 4294901760, %v10889_v39  ;;  %v2426_v18 = vsub.f32 %v10870_v35, %v16615_v25  ;;  %v10946_v60 = vand.u32 4294901760, %v2246_v13  ;;  %v10958_v39 = vsub.f32 %v10876_v41, %v16618_v37 }
 0x119   :  { %2264 = vmatprep.subr.mxu0 %v10847_v5  ;;  %17720 = vst [vmem:[#allocation18_spill] sm:$0xff] %v10917_v40  ;;  %2065 = vmatprep.mubr.f32.mxu0 %v17513_v9  ;;  %v17730_v25 = vand.u32 4294901760, %v10897_v42 }
 0x11a   :  { %2149 = vmatpush1.msra.mxu1 %v10539_v6  ;;  %2266 = vmatpush1.msra.mxu0 %v10852_v50  ;;  %v10934_v6 = vsub.f32 %v2250_v4, %v10899_v36  ;;  %17725 = vst [vmem:[#allocation29_spill] sm:$0xff] %v10946_v60  ;;  %v10953_v4 = vsub.f32 %v2249_v14, %v10911_v10  ;;  %v10972_v14 = vand.u32 4294901760, %v2243_v47  ;;  %v2433_v22 = vand.u32 4294901760, %v10958_v39 }
 0x11b   :  { %2151 = vmatprep.subr.mxu1 %v10564_v21  ;;  %v10938_v0 = vpop.f32.mrf.mxu0  ;;  %2067 = vmatmul.mubr.f32.gmra.mxu0 %v17724_v46  ;;  %v2421_v21 = vand.u32 4294901760, %v10906_v16  ;;  %v10960_v16 = vand.u32 4294901760, %v2244_v3 }
 0x11c   :  { %2268 = vmatprep.subr.mxu0 %v10857_v61  ;;  %2153 = vmatpush1.msra.mxu1 %v10574_v54  ;;  %v10970_v54 = vsub.f32 %v10892_v57, %v16619_v56  ;;  %17729 = vst [vmem:[#allocation9_spill] sm:$0xff] %v10972_v14  ;;  %v11019_v39 = vsub.f32 %v2243_v47, %v10972_v14  ;;  %v2240_v47 = vld [vmem:[#allocation2 + $0x268] sm:$0xff] }
 0x11d   :  { %2270 = vmatpush1.msra.mxu0 %v10863_v44  ;;  %17727 = vst [vmem:[#allocation26_spill] sm:$0xff] %v10960_v16  ;;  %v477_v1 = vpop.f32.mrf.mxu1  ;;  %v10963_v52 = vpop.f32.mrf.mxu0  ;;  %2155 = vmatprep.subr.mxu1 %v10581_v12  ;;  %v10980_v12 = vsub.f32 %v2247_v2, %v10930_v8  ;;  %v17734_v2 = vand.u32 4294901760, %v10915_v33 }
 0x11e   :  { %17728 = vst [vmem:[#allocation8_spill] sm:$0xff] %v10963_v52  ;;  %2272 = vmatprep.subr.mxu0 %v10878_v30  ;;  %v10975_v40 = vadd.f32 %v477_v1, %v205_v34  ;;  %2072 = vmatprep.mubr.f32.mxu0 %v17513_v9  ;;  %v10985_v52 = vsub.f32 %v10897_v42, %v17730_v25  ;;  %v17733_v25 = vld [vmem:[#allocation38_spill] sm:$0xff]  ;;  %17737 = vst [vmem:[#allocation50_spill] sm:$0xff] %v11019_v39  ;;  %v2234_v30 = vld [vmem:[#allocation2 + $0x238] sm:$0xff] }
 0x11f   :  { %2157 = vmatpush1.msra.mxu1 %v10591_v24  ;;  %v10991_v37 = vpop.f32.mrf.mxu1  ;;  %2190 = vmatprep.mubr.f32.mxu1 %v17513_v9  ;;  %v2427_v24 = vand.u32 4294901760, %v2426_v18  ;;  %v10996_v1 = vsub.f32 %v2245_v15, %v10948_v55  ;;  %v10999_v34 = vsub.f32 %v2246_v13, %v10946_v60  ;;  %v11007_v56 = vsub.f32 %v10915_v33, %v17734_v2  ;;  %v2241_v18 = vld [vmem:[#allocation2 + $0x270] sm:$0xff] }
 0x120   :  { %17731 = vst [vmem:[#allocation30_spill] sm:$0xff] %v10991_v37  ;;  %2274 = vmatpush1.msra.mxu0 %v10884_v38  ;;  %2192 = vmatmul.mubr.f32.vlgmr.msra.gmra.mxu1 %v17716_v32  ;;  %v11009_v37 = vand.u32 4294901760, %v2242_v29  ;;  %v11012_v15 = vsub.f32 %v2244_v3, %v10960_v16  ;;  %v2439_v13 = vand.u32 4294901760, %v10970_v54  ;;  %v11024_v2 = vsub.f32 %v10922_v43, %v17738_v26  ;;  %v2235_v38 = vld [vmem:[#allocation2 + $0x240] sm:$0xff] }
 0x121   :  { %17732 = vst [vmem:[#allocation25_spill] sm:$0xff] %v10996_v1  ;;  %2074 = vmatmul.mubr.f32.gmra.mxu0 %v17733_v25  ;;  %v11014_v11 = vpop.f32.mrf.mxu0  ;;  %2276 = vmatprep.subr.mxu0 %v10899_v36  ;;  %v2445_v3 = vand.u32 4294901760, %v10985_v52  ;;  %v11039_v7 = vand.u32 4294901760, %v2241_v18  ;;  %v2451_v27 = vand.u32 4294901760, %v11007_v56  ;;  %v11064_v56 = vand.u32 4294901760, %v2240_v47 }
 0x122   :  { %17735 = vst [vmem:[#allocation21_spill] sm:$0xff] %v11009_v37  ;;  %17736 = vst [vmem:[#allocation22_spill] sm:$0xff] %v11012_v15  ;;  %2416 = vmatprep.subr.mxu1 %v2415_v45  ;;  %2278 = vmatpush1.msra.mxu0 %v10911_v10  ;;  %v17739_v45 = vand.u32 4294901760, %v10934_v6  ;;  %v11053_v58 = vsub.f32 %v2242_v29, %v11009_v37  ;;  %v11131_v44 = vand.u32 4294901760, %v2235_v38 }
 0x123   :  { %2422 = vmatpush1.msra.mxu1 %v2421_v21  ;;  %v484_v26 = vpop.f32.mrf.mxu1  ;;  %v11036_v28 = vpop.f32.mrf.mxu0  ;;  %2280 = vmatprep.subr.mxu0 %v10928_v23  ;;  %17741 = vst [vmem:[#allocation16_spill] sm:$0xff] %v11039_v7  ;;  %v2238_v21 = vld [vmem:[#allocation2 + $0x258] sm:$0xff]  ;;  %17746 = vst [vmem:[#allocation54_spill] sm:$0xff] %v11064_v56  ;;  %v17747_v23 = vld [vmem:[#allocation41_spill] sm:$0xff] }
 0x124   :  { %v11032_v54 = vsub.f32 %v10934_v6, %v17739_v45  ;;  %17740 = vst [vmem:[#allocation20_spill] sm:$0xff] %v11036_v28  ;;  %2428 = vmatprep.subr.mxu1 %v2427_v24  ;;  %v11044_v45 = vadd.f32 %v484_v26, %v10938_v0  ;;  %2079 = vmatprep.mubr.f32.mxu0 %v17513_v9  ;;  %v2237_v28 = vld [vmem:[#allocation2 + $0x250] sm:$0xff]  ;;  %17743 = vst [vmem:[#allocation52_spill] sm:$0xff] %v11053_v58  ;;  %v2457_v0 = vand.u32 4294901760, %v11024_v2 }
 0x125   :  { %2197 = vmatprep.mubr.f32.mxu1 %v17513_v9  ;;  %v11055_v52 = vpop.f32.mrf.mxu1  ;;  %2282 = vmatpush1.msra.mxu0 %v10930_v8  ;;  %v17745_v26 = vand.u32 4294901760, %v10953_v4  ;;  %v11080_v8 = vand.u32 4294901760, %v2238_v21  ;;  %v11086_v24 = vsub.f32 %v2241_v18, %v11039_v7  ;;  %v11104_v18 = vand.u32 4294901760, %v2236_v62  ;;  %17760 = vst [vmem:[#allocation61_spill] sm:$0xff] %v11131_v44 }
 0x126   :  { %17744 = vst [vmem:[#allocation53_spill] sm:$0xff] %v11055_v52  ;;  %2434 = vmatpush1.msra.mxu1 %v2433_v22  ;;  %2081 = vmatmul.mubr.f32.gmra.mxu0 %v17747_v23  ;;  %v2463_v29 = vand.u32 4294901760, %v11032_v54  ;;  %v17748_v22 = vand.u32 4294901760, %v10989_v19  ;;  %v17749_v52 = vand.u32 4294901760, %v10980_v12  ;;  %v17752_v54 = vand.u32 4294901760, %v10999_v34 }
 0x127   :  { %v11062_v63 = vsub.f32 %v10953_v4, %v17745_v26  ;;  %2199 = vmatmul.mubr.f32.gmra.mxu1 %v17724_v46  ;;  %17750 = vst [vmem:[#allocation55_spill] sm:$0xff] %v11080_v8  ;;  %v11082_v10 = vpop.f32.mrf.mxu0  ;;  %2284 = vmatprep.subr.mxu0 %v10946_v60  ;;  %17751 = vst [vmem:[#allocation56_spill] sm:$0xff] %v11086_v24  ;;  %v11093_v46 = vand.u32 4294901760, %v2237_v28  ;;  %v17757_v60 = vand.u32 4294901760, %v11012_v15 }
 0x128   :  { %v11073_v2 = vsub.f32 %v10989_v19, %v17748_v22  ;;  %v11078_v26 = vsub.f32 %v10980_v12, %v17749_v52  ;;  %2440 = vmatprep.subr.mxu1 %v2439_v13  ;;  %v11091_v22 = vsub.f32 %v10999_v34, %v17752_v54  ;;  %v17754_v52 = vand.u32 4294901760, %v10996_v1  ;;  %2286 = vmatpush1.msra.mxu0 %v10948_v55 }
 0x129   :  { %17753 = vst [vmem:[#allocation57_spill] sm:$0xff] %v11093_v46  ;;  %2446 = vmatpush1.msra.mxu1 %v2445_v3  ;;  %v11102_v13 = vsub.f32 %v2239_v17, %v11049_v31  ;;  %17756 = vst [vmem:[#allocation59_spill] sm:$0xff] %v11104_v18  ;;  %v11109_v54 = vsub.f32 %v11012_v15, %v17757_v60  ;;  %v491_v61 = vpop.f32.mrf.mxu1  ;;  %2288 = vmatprep.subr.mxu0 %v10960_v16  ;;  %v17758_v3 = vand.u32 4294901760, %v11019_v39  ;;  %v11125_v15 = vpop.f32.mrf.mxu0 }
 0x12a   :  { %v11098_v36 = vsub.f32 %v10996_v1, %v17754_v52  ;;  %2452 = vmatprep.subr.mxu1 %v2451_v27  ;;  %v2469_v52 = vand.u32 4294901760, %v11062_v63  ;;  %v11120_v55 = vsub.f32 %v2240_v47, %v11064_v56  ;;  %v11123_v60 = vadd.f32 %v491_v61, %v11014_v11  ;;  %17759 = vst [vmem:[#allocation60_spill] sm:$0xff] %v11125_v15  ;;  %v2230_v1 = vld [vmem:[#allocation2 + $0x218] sm:$0xff] }
 0x12b   :  { %17755 = vst [vmem:[#allocation58_spill] sm:$0xff] %v11102_v13  ;;  %v11117_v17 = vsub.f32 %v11019_v39, %v17758_v3  ;;  %2086 = vmatprep.mubr.f32.mxu0 %v17513_v9  ;;  %2204 = vmatprep.mubr.f32.mxu1 %v17513_v9  ;;  %v2475_v27 = vand.u32 4294901760, %v11073_v2  ;;  %v2481_v63 = vand.u32 4294901760, %v11078_v26  ;;  %v2233_v3 = vld [vmem:[#allocation2 + $0x230] sm:$0xff]  ;;  %v11134_v16 = vsub.f32 %v2238_v21, %v11080_v8  ;;  %v11136_v47 = vpop.f32.mrf.mxu1  ;;  %v2232_v26 = vld [vmem:[#allocation2 + $0x228] sm:$0xff] }
 0x12c   :  { %17762 = vst [vmem:[#allocation63_spill] sm:$0xff] %v11136_v47  ;;  %2290 = vmatpush1.msra.mxu0 %v10972_v14  ;;  %2458 = vmatpush1.msra.mxu1 %v2457_v0  ;;  %v2487_v61 = vand.u32 4294901760, %v11091_v22  ;;  %v11141_v11 = vsub.f32 %v2237_v28, %v11093_v46  ;;  %v2493_v2 = vand.u32 4294901760, %v11098_v36  ;;  %v11144_v15 = vand.u32 4294901760, %v2234_v30  ;;  %v2231_v28 = vld [vmem:[#allocation2 + $0x220] sm:$0xff] }
 0x12d   :  { %17761 = vst [vmem:[#allocation62_spill] sm:$0xff] %v11134_v16  ;;  %2088 = vmatmul.mubr.f32.gmra.mxu0 %v10112_v49  ;;  %2206 = vmatmul.mubr.f32.gmra.mxu1 %v17733_v25  ;;  %v2499_v21 = vand.u32 4294901760, %v11109_v54  ;;  %v17763_v47 = vand.u32 4294901760, %v11053_v58  ;;  %v11156_v14 = vsub.f32 %v2236_v62, %v11104_v18  ;;  %v2505_v36 = vand.u32 4294901760, %v11117_v17 }
 0x12e   :  { %2292 = vmatprep.subr.mxu0 %v11009_v37  ;;  %2464 = vmatprep.subr.mxu1 %v2463_v29  ;;  %v11160_v39 = vand.u32 4294901760, %v2233_v3  ;;  %v11166_v22 = vsub.f32 %v2235_v38, %v11131_v44  ;;  %v11168_v62 = vand.u32 4294901760, %v2232_v26  ;;  %v2229_v37 = vld [vmem:[#allocation2 + $0x210] sm:$0xff]  ;;  %v11175_v25 = vand.u32 4294901760, %v2231_v28 }
 0x12f   :  { %v11152_v0 = vsub.f32 %v11053_v58, %v17763_v47  ;;  %v635_v47 = vpop.f32.mrf.mxu0  ;;  %2294 = vmatpush1.msra.mxu0 %v11039_v7  ;;  %2470 = vmatpush1.msra.mxu1 %v2469_v52  ;;  %v498_v58 = vpop.f32.mrf.mxu1  ;;  %v2228_v52 = vld [vmem:[#allocation2 + $0x208] sm:$0xff]  ;;  %v11179_v38 = vsub.f32 %v2234_v30, %v11144_v15  ;;  %v11192_v54 = vand.u32 4294901760, %v2230_v1 }
 0x130   :  { %17764 = vst [vmem:[#allocation64_spill] sm:$0xff] %v11166_v22  ;;  %v11172_v17 = vadd.f32 %v635_v47, %v10836_v53  ;;  %2296 = vmatprep.subr.mxu0 %v11064_v56  ;;  %2476 = vmatprep.subr.mxu1 %v2475_v27  ;;  %v11182_v7 = vadd.f32 %v498_v58, %v11082_v10  ;;  %v17766_v27 = vand.u32 4294901760, %v11086_v24  ;;  %v2227_v56 = vld [vmem:[#allocation2 + $0x200] sm:$0xff]  ;;  %v17767_v10 = vand.u32 4294901760, %v11120_v55 }
 0x131   :  { %v11184_v29 = vpop.f32.mrf.mxu0  ;;  %2211 = vmatprep.mubr.f32.mxu1 %v17513_v9  ;;  %2298 = vmatpush1.msra.mxu0 %v11049_v31  ;;  %v2511_v53 = vand.u32 4294901760, %v11152_v0  ;;  %v11197_v58 = vsub.f32 %v2233_v3, %v11160_v39  ;;  %v17768_v0 = vand.u32 4294901760, %v11102_v13  ;;  %v17773_v3 = vand.u32 4294901760, %v11156_v14 }
 0x132   :  { %17765 = vst [vmem:[#allocation65_spill] sm:$0xff] %v11184_v29  ;;  %v2516_v47 = vsub.f32 %v11086_v24, %v17766_v27  ;;  %2482 = vmatpush1.msra.mxu1 %v2481_v63  ;;  %2300 = vmatprep.subr.mxu0 %v11080_v8  ;;  %v2522_v29 = vsub.f32 %v11120_v55, %v17767_v10  ;;  %v11205_v27 = vand.u32 4294901760, %v2229_v37  ;;  %v17769_v63 = vand.u32 4294901760, %v11134_v16 }
 0x133   :  { %v2528_v31 = vsub.f32 %v11102_v13, %v17768_v0  ;;  %2213 = vmatmul.mubr.f32.gmra.mxu1 %v17747_v23  ;;  %2488 = vmatprep.subr.mxu1 %v2487_v61  ;;  %v11211_v8 = vand.u32 4294901760, %v2228_v52  ;;  %v11215_v24 = vsub.f32 %v2232_v26, %v11168_v62  ;;  %v11219_v10 = vsub.f32 %v2231_v28, %v11175_v25 }
 0x134   :  { %v2534_v30 = vsub.f32 %v11134_v16, %v17769_v63  ;;  %2302 = vmatpush1.msra.mxu0 %v11093_v46  ;;  %2494 = vmatpush1.msra.mxu1 %v2493_v2  ;;  %v17772_v0 = vand.u32 4294901760, %v11141_v11  ;;  %v11224_v23 = vand.u32 4294901760, %v2227_v56  ;;  %v643_v16 = vpop.f32.mrf.mxu0  ;;  %v2517_v26 = vand.u32 4294901760, %v2516_v47 }
 0x135   :  { %17770 = vst [vmem:[#allocation66_spill] sm:$0xff] %v11215_v24  ;;  %17771 = vst [vmem:[#allocation67_spill] sm:$0xff] %v11219_v10  ;;  %2304 = vmatprep.subr.mxu0 %v11104_v18  ;;  %2500 = vmatprep.subr.mxu1 %v2499_v21  ;;  %v2546_v2 = vsub.f32 %v11156_v14, %v17773_v3  ;;  %v11232_v28 = vsub.f32 %v2230_v1, %v11192_v54  ;;  %v2529_v1 = vand.u32 4294901760, %v2528_v31 }
 0x136   :  { %v2540_v61 = vsub.f32 %v11141_v11, %v17772_v0  ;;  %v11235_v46 = vadd.f32 %v643_v16, %v10975_v40  ;;  %2218 = vmatprep.mubr.f32.mxu1 %v17513_v9  ;;  %2306 = vmatpush1.msra.mxu0 %v11131_v44  ;;  %v2523_v0 = vand.u32 4294901760, %v2522_v29  ;;  %v11240_v63 = vsub.f32 %v2229_v37, %v11205_v27  ;;  %v11243_v47 = vpop.f32.mrf.mxu0  ;;  %v11253_v29 = vpop.f32.mrf.mxu1 }
 0x137   :  { %17774 = vst [vmem:[#allocation68_spill] sm:$0xff] %v11243_v47  ;;  %2506 = vmatpush1.msra.mxu1 %v2505_v36  ;;  %2308 = vmatprep.subr.mxu0 %v11144_v15  ;;  %v17775_v3 = vand.u32 4294901760, %v11166_v22  ;;  %v11251_v44 = vsub.f32 %v2228_v52, %v11211_v8  ;;  %17776 = vst [vmem:[#allocation69_spill] sm:$0xff] %v11253_v29  ;;  %v2535_v37 = vand.u32 4294901760, %v2534_v30  ;;  %v17778_v31 = vand.u32 4294901760, %v11179_v38 }
 0x138   :  { %2220 = vmatmul.mubr.f32.gmra.mxu1 %v10112_v49  ;;  %2512 = vmatprep.subr.mxu1 %v2511_v53  ;;  %v11257_v36 = vsub.f32 %v2227_v56, %v11224_v23  ;;  %v2541_v52 = vand.u32 4294901760, %v2540_v61  ;;  %v2547_v16 = vand.u32 4294901760, %v2546_v2  ;;  %v773_v49 = vpop.f32.mrf.mxu1  ;;  %v17779_v56 = vand.u32 4294901760, %v11197_v58 }
 0x139   :  { %v2552_v40 = vsub.f32 %v11166_v22, %v17775_v3  ;;  %v2558_v21 = vsub.f32 %v11179_v38, %v17778_v31  ;;  %2310 = vmatpush1.msra.mxu0 %v11160_v39  ;;  %2518 = vmatpush1.msra.mxu1 %v2517_v26  ;;  %v651_v47 = vpop.f32.mrf.mxu0  ;;  %v16675_v30 = vand.u32 4294901760, %v11240_v63  ;;  %v11272_v3 = vadd.f32 %v773_v49, %v11172_v17 }
 0x13a   :  { %17777 = vst [vmem:[#allocation70_spill] sm:$0xff] %v11257_v36  ;;  %2312 = vmatprep.subr.mxu0 %v11168_v62  ;;  %2524 = vmatprep.subr.mxu1 %v2523_v0  ;;  %v2564_v53 = vsub.f32 %v11197_v58, %v17779_v56  ;;  %v652_v31 = vadd.f32 %v651_v47, %v11044_v45  ;;  %v17780_v26 = vand.u32 4294901760, %v11215_v24  ;;  %v16676_v0 = vand.u32 4294901760, %v11251_v44  ;;  %v11281_v56 = vpop.f32.mrf.mxu1 }
 0x13b   :  { %2314 = vmatpush1.msra.mxu0 %v11175_v25  ;;  %2530 = vmatpush1.msra.mxu1 %v2529_v1  ;;  %v2553_v61 = vand.u32 4294901760, %v2552_v40  ;;  %v11279_v29 = vpop.f32.mrf.mxu0  ;;  %17782 = vst [vmem:[#allocation72_spill] sm:$0xff] %v11281_v56  ;;  %v2559_v45 = vand.u32 4294901760, %v2558_v21  ;;  %v17783_v49 = vand.u32 4294901760, %v11219_v10  ;;  %v17784_v1 = vand.u32 4294901760, %v11232_v28 }
 0x13c   :  { %v2570_v2 = vsub.f32 %v11215_v24, %v17780_v26  ;;  %17781 = vst [vmem:[#allocation71_spill] sm:$0xff] %v11279_v29  ;;  %2316 = vmatprep.subr.mxu0 %v11192_v54  ;;  %2536 = vmatprep.subr.mxu1 %v2535_v37  ;;  %v2565_v26 = vand.u32 4294901760, %v2564_v53  ;;  %v2588_v21 = vsub.f32 %v11240_v63, %v16675_v30 }
 0x13d   :  { %v2576_v17 = vsub.f32 %v11219_v10, %v17783_v49  ;;  %2318 = vmatpush1.msra.mxu0 %v11205_v27  ;;  %2542 = vmatpush1.msra.mxu1 %v2541_v52  ;;  %v2582_v40 = vsub.f32 %v11232_v28, %v17784_v1  ;;  %v2594_v52 = vsub.f32 %v11251_v44, %v16676_v0 }
 0x13e   :  { %2320 = vmatprep.subr.mxu0 %v11211_v8  ;;  %2548 = vmatprep.subr.mxu1 %v2547_v16  ;;  %v2571_v37 = vand.u32 4294901760, %v2570_v2  ;;  %v659_v49 = vpop.f32.mrf.mxu0  ;;  %v17785_v16 = vand.u32 4294901760, %v11257_v36 }
 0x13f   :  { %2322 = vmatpush1.msra.mxu0 %v11224_v23  ;;  %2554 = vmatpush1.msra.mxu1 %v2553_v61  ;;  %v782_v47 = vpop.f32.mrf.mxu1  ;;  %v2577_v1 = vand.u32 4294901760, %v2576_v17  ;;  %v660_v30 = vadd.f32 %v659_v49, %v11123_v60  ;;  %v17786_v61 = vld [vmem:[#allocation35_spill] sm:$0xff]  ;;  %v2583_v2 = vand.u32 4294901760, %v2582_v40  ;;  %v2595_v60 = vand.u32 4294901760, %v2594_v52  ;;  %v17791_v52 = vld [vmem:[#allocation12_spill] sm:$0xff]  ;;  %v17792_v49 = vld [vmem:[#allocation25_spill] sm:$0xff] }
 0x140   :  { %2355 = vmatprep.mubr.f32.mxu0 %v17513_v9  ;;  %2560 = vmatprep.subr.mxu1 %v2559_v45  ;;  %v2600_v53 = vsub.f32 %v11257_v36, %v17785_v16  ;;  %v11306_v29 = vadd.f32 %v782_v47, %v11235_v46  ;;  %v11310_v0 = vpop.f32.mrf.mxu0  ;;  %v2589_v45 = vand.u32 4294901760, %v2588_v21  ;;  %v17794_v16 = vld [vmem:[#allocation22_spill] sm:$0xff] }
 0x141   :  { %2673 = vmatprep.subr.mxu0 %v10834_v59  ;;  %2361 = vmatmul.mubr.f32.vlgmr.msra.gmra.mxu0 %v17786_v61  ;;  %17787 = vst [vmem:[#allocation35_spill] sm:$0xff] %v11310_v0  ;;  %v11312_v56 = vpop.f32.mrf.mxu1  ;;  %v17796_v61 = vld [vmem:[#allocation50_spill] sm:$0xff] }
 0x142   :  { %17788 = vst [vmem:[#allocation73_spill] sm:$0xff] %v11312_v56  ;;  %2566 = vmatpush1.msra.mxu1 %v2565_v26  ;;  %2676 = vmatpush1.msra.mxu0 %v10845_v20  ;;  %v2601_v46 = vand.u32 4294901760, %v2600_v53  ;;  %v17795_v53 = vld [vmem:[#allocation10_spill] sm:$0xff]  ;;  %v17808_v56 = vld [vmem:[#allocation29_spill] sm:$0xff] }
 0x143   :  { %2572 = vmatprep.subr.mxu1 %v2571_v37  ;;  %2679 = vmatprep.subr.mxu0 %v10870_v35 }
 0x144   :  { %2578 = vmatpush1.msra.mxu1 %v2577_v1  ;;  %2682 = vmatpush1.msra.mxu0 %v10876_v41  ;;  %v667_v17 = vpop.f32.mrf.mxu0  ;;  %v17793_v1 = vld [vmem:[#allocation13_spill] sm:$0xff] }
 0x145   :  { %2584 = vmatprep.subr.mxu1 %v2583_v2  ;;  %2685 = vmatprep.subr.mxu0 %v10892_v57  ;;  %v791_v47 = vpop.f32.mrf.mxu1  ;;  %v668_v40 = vadd.f32 %v667_v17, %v11182_v7  ;;  %v17800_v17 = vld [vmem:[#allocation34_spill] sm:$0xff] }
 0x146   :  { %2590 = vmatpush1.msra.mxu1 %v2589_v45  ;;  %2688 = vmatpush1.msra.mxu0 %v10897_v42  ;;  %v11320_v26 = vadd.f32 %v791_v47, %v652_v31  ;;  %v17797_v45 = vld [vmem:[#allocation14_spill] sm:$0xff]  ;;  %v17801_v47 = vld [vmem:[#allocation56_spill] sm:$0xff] }
 0x147   :  { %2596 = vmatprep.subr.mxu1 %v2595_v60  ;;  %2691 = vmatprep.subr.mxu0 %v10915_v33  ;;  %v11323_v21 = vpop.f32.mrf.mxu1  ;;  %v17798_v60 = vld [vmem:[#allocation44_spill] sm:$0xff] }
 0x148   :  { %17789 = vst [vmem:[#allocation74_spill] sm:$0xff] %v11323_v21  ;;  %2602 = vmatpush1.msra.mxu1 %v2601_v46  ;;  %2635 = vmatprep.mubr.f32.mxu1 %v17513_v9  ;;  %v17799_v46 = vld [vmem:[#allocation52_spill] sm:$0xff]  ;;  %v17807_v21 = vld [vmem:[#allocation62_spill] sm:$0xff] }
 0x149   :  { %2694 = vmatpush1.msra.mxu0 %v10922_v43  ;;  %2637 = vmatmul.mubr.f32.vlgmr.msra.gmra.mxu1 %v17716_v32  ;;  %v17809_v32 = vld [vmem:[#allocation36_spill] sm:$0xff] }
 0x14a   :  { %2697 = vmatprep.subr.mxu0 %v10934_v6  ;;  %2841 = vmatprep.subr.mxu1 %v10818_v48  ;;  %v800_v7 = vpop.f32.mrf.mxu1 }
 0x14b   :  { %2700 = vmatpush1.msra.mxu0 %v10953_v4  ;;  %2843 = vmatpush1.msra.mxu1 %v10826_v51  ;;  %v11334_v31 = vadd.f32 %v800_v7, %v660_v30  ;;  %v17802_v7 = vld [vmem:[#allocation17_spill] sm:$0xff] }
 0x14c   :  { %2703 = vmatprep.subr.mxu0 %v10989_v19  ;;  %2845 = vmatprep.subr.mxu1 %v10847_v5  ;;  %v11338_v37 = vpop.f32.mrf.mxu1 }
 0x14d   :  { %2706 = vmatpush1.msra.mxu0 %v10980_v12  ;;  %2847 = vmatpush1.msra.mxu1 %v10852_v50  ;;  %17790 = vst [vmem:[#allocation75_spill] sm:$0xff] %v11338_v37  ;;  %v17803_v37 = vld [vmem:[#allocation19_spill] sm:$0xff] }
 0x14e   :  { %2709 = vmatprep.subr.mxu0 %v10999_v34  ;;  %2849 = vmatprep.subr.mxu1 %v17791_v52 }
 0x14f   :  { %2712 = vmatpush1.msra.mxu0 %v17792_v49  ;;  %2851 = vmatpush1.msra.mxu1 %v17793_v1  ;;  %v809_v30 = vpop.f32.mrf.mxu1 }
 0x150   :  { %2715 = vmatprep.subr.mxu0 %v17794_v16  ;;  %2853 = vmatprep.subr.mxu1 %v17795_v53  ;;  %v11348_v2 = vadd.f32 %v809_v30, %v668_v40  ;;  %v11360_v40 = vpop.f32.mrf.mxu0  ;;  %v17805_v30 = vld [vmem:[#allocation23_spill] sm:$0xff] }
 0x151   :  { %2366 = vmatprep.mubr.f32.mxu0 %v17513_v9  ;;  %2718 = vmatpush1.msra.mxu0 %v17796_v61  ;;  %17804 = vst [vmem:[#allocation12_spill] sm:$0xff] %v11360_v40 }
 0x152   :  { %2855 = vmatpush1.msra.mxu1 %v17797_v45  ;;  %2372 = vmatmul.mubr.f32.gmra.mxu0 %v17798_v60  ;;  %v17806_v60 = vld [vmem:[#allocation47_spill] sm:$0xff] }
 0x153   :  { %2721 = vmatprep.subr.mxu0 %v17799_v46  ;;  %2857 = vmatprep.subr.mxu1 %v17800_v17 }
 0x154   :  { %2724 = vmatpush1.msra.mxu0 %v17801_v47  ;;  %2859 = vmatpush1.msra.mxu1 %v17802_v7 }
 0x155   :  { %2727 = vmatprep.subr.mxu0 %v11120_v55  ;;  %2861 = vmatprep.subr.mxu1 %v17803_v37 }
 0x156   :  { %2377 = vmatprep.mubr.f32.mxu0 %v17513_v9  ;;  %2730 = vmatpush1.msra.mxu0 %v11102_v13  ;;  %v17810_v13 = vld [vmem:[#allocation28_spill] sm:$0xff] }
 0x157   :  { %2863 = vmatpush1.msra.mxu1 %v17805_v30  ;;  %2383 = vmatmul.mubr.f32.gmra.mxu0 %v17806_v60  ;;  %v17812_v60 = vld [vmem:[#allocation26_spill] sm:$0xff] }
 0x158   :  { %2642 = vmatprep.mubr.f32.mxu1 %v17513_v9  ;;  %2733 = vmatprep.subr.mxu0 %v17807_v21  ;;  %v977_v0 = vpop.f32.mrf.mxu0  ;;  %v17813_v21 = vld [vmem:[#allocation9_spill] sm:$0xff] }
 0x159   :  { %2865 = vmatprep.subr.mxu1 %v17808_v56  ;;  %2644 = vmatmul.mubr.f32.gmra.mxu1 %v17809_v32  ;;  %v978_v37 = vadd.f32 %v977_v0, %v11272_v3  ;;  %v17814_v56 = vld [vmem:[#allocation27_spill] sm:$0xff]  ;;  %v17815_v0 = vld [vmem:[#allocation21_spill] sm:$0xff] }
 0x15a   :  { %2736 = vmatpush1.msra.mxu0 %v11141_v11  ;;  %2867 = vmatpush1.msra.mxu1 %v17810_v13  ;;  %v11371_v40 = vpop.f32.mrf.mxu0 }
 0x15b   :  { %17811 = vst [vmem:[#allocation25_spill] sm:$0xff] %v11371_v40  ;;  %2739 = vmatprep.subr.mxu0 %v11156_v14  ;;  %2869 = vmatprep.subr.mxu1 %v17812_v60  ;;  %v17816_v40 = vld [vmem:[#allocation38_spill] sm:$0xff]  ;;  %v17817_v60 = vld [vmem:[#allocation16_spill] sm:$0xff] }
 0x15c   :  { %2388 = vmatprep.mubr.f32.mxu0 %v17513_v9  ;;  %2742 = vmatpush1.msra.mxu0 %v11166_v22 }
 0x15d   :  { %2871 = vmatpush1.msra.mxu1 %v17813_v21  ;;  %2394 = vmatmul.mubr.f32.gmra.mxu0 %v17814_v56  ;;  %v984_v3 = vpop.f32.mrf.mxu0  ;;  %v17819_v56 = vld [vmem:[#allocation54_spill] sm:$0xff]  ;;  %v11390_v21 = vpop.f32.mrf.mxu1 }
 0x15e   :  { %2649 = vmatprep.mubr.f32.mxu1 %v17513_v9  ;;  %2745 = vmatprep.subr.mxu0 %v11179_v38  ;;  %v985_v32 = vadd.f32 %v984_v3, %v11306_v29  ;;  %17820 = vst [vmem:[#allocation22_spill] sm:$0xff] %v11390_v21  ;;  %v17825_v21 = vld [vmem:[#allocation41_spill] sm:$0xff] }
 0x15f   :  { %2873 = vmatprep.subr.mxu1 %v17815_v0  ;;  %2651 = vmatmul.mubr.f32.gmra.mxu1 %v17816_v40  ;;  %v11386_v22 = vpop.f32.mrf.mxu0  ;;  %v17821_v0 = vld [vmem:[#allocation51_spill] sm:$0xff] }
 0x160   :  { %2748 = vmatpush1.msra.mxu0 %v11197_v58  ;;  %2875 = vmatpush1.msra.mxu1 %v17817_v60  ;;  %17818 = vst [vmem:[#allocation13_spill] sm:$0xff] %v11386_v22  ;;  %v17822_v40 = vld [vmem:[#allocation11_spill] sm:$0xff] }
 0x161   :  { %2751 = vmatprep.subr.mxu0 %v11215_v24  ;;  %2877 = vmatprep.subr.mxu1 %v17819_v56  ;;  %v17824_v56 = vld [vmem:[#allocation55_spill] sm:$0xff] }
 0x162   :  { %2399 = vmatprep.mubr.f32.mxu0 %v17513_v9  ;;  %2754 = vmatpush1.msra.mxu0 %v11219_v10  ;;  %v1109_v3 = vpop.f32.mrf.mxu1 }
 0x163   :  { %2879 = vmatpush1.msra.mxu1 %v17821_v0  ;;  %2405 = vmatmul.mubr.f32.gmra.mxu0 %v17822_v40  ;;  %v991_v29 = vpop.f32.mrf.mxu0  ;;  %v11399_v24 = vadd.f32 %v1109_v3, %v978_v37  ;;  %v17828_v40 = vld [vmem:[#allocation57_spill] sm:$0xff]  ;;  %v17830_v3 = vld [vmem:[#allocation32_spill] sm:$0xff] }
 0x164   :  { %2656 = vmatprep.mubr.f32.mxu1 %v17513_v9  ;;  %2757 = vmatprep.subr.mxu0 %v11232_v28  ;;  %v992_v22 = vadd.f32 %v991_v29, %v11320_v26  ;;  %v11405_v10 = vpop.f32.mrf.mxu1  ;;  %v17829_v26 = vld [vmem:[#allocation61_spill] sm:$0xff] }
 0x165   :  { %17823 = vst [vmem:[#allocation10_spill] sm:$0xff] %v11399_v24  ;;  %2881 = vmatprep.subr.mxu1 %v17824_v56  ;;  %2658 = vmatmul.mubr.f32.gmra.mxu1 %v17825_v21  ;;  %v11403_v60 = vpop.f32.mrf.mxu0  ;;  %17827 = vst [vmem:[#allocation14_spill] sm:$0xff] %v11405_v10  ;;  %v17832_v24 = vand.u32 4294901760, %v10834_v59  ;;  %v17833_v21 = vld [vmem:[#allocation45_spill] sm:$0xff]  ;;  %v17836_v59 = vand.u32 4294901760, %v10876_v41 }
 0x166   :  { %17826 = vst [vmem:[#allocation50_spill] sm:$0xff] %v11403_v60  ;;  %2760 = vmatpush1.msra.mxu0 %v11240_v63  ;;  %2883 = vmatpush1.msra.mxu1 %v17828_v40 }
 0x167   :  { %2763 = vmatprep.subr.mxu0 %v11251_v44  ;;  %2885 = vmatprep.subr.mxu1 %v11104_v18  ;;  %v17834_v18 = vand.u32 4294901760, %v10845_v20  ;;  %v17838_v20 = vand.u32 4294901760, %v10892_v57  ;;  %v17841_v57 = vand.u32 4294901760, %v10922_v43  ;;  %v17846_v43 = vand.u32 4294901760, %v10989_v19 }
 0x168   :  { %2766 = vmatpush1.msra.mxu0 %v11257_v36  ;;  %2799 = vmatprep.mubr.f32.mxu0 %v17513_v9  ;;  %v998_v37 = vpop.f32.mrf.mxu0  ;;  %v17850_v19 = vand.u32 4294901760, %v10999_v34  ;;  %v17854_v34 = vld [vmem:[#allocation48_spill] sm:$0xff] }
 0x169   :  { %2887 = vmatpush1.msra.mxu1 %v17829_v26  ;;  %2663 = vmatprep.mubr.f32.mxu1 %v17513_v9  ;;  %v1116_v29 = vpop.f32.mrf.mxu1  ;;  %v999_v60 = vadd.f32 %v998_v37, %v11334_v31  ;;  %v17835_v31 = vand.u32 4294901760, %v10870_v35  ;;  %v17837_v37 = vld [vmem:[#allocation37_spill] sm:$0xff] }
 0x16a   :  { %2802 = vmatmul.mubr.f32.vlgmr.msra.gmra.mxu0 %v17830_v3  ;;  %2889 = vmatprep.subr.mxu1 %v11144_v15  ;;  %v11418_v10 = vadd.f32 %v1116_v29, %v985_v32  ;;  %v11423_v36 = vpop.f32.mrf.mxu0  ;;  %v17839_v29 = vand.u32 4294901760, %v10897_v42  ;;  %v17840_v3 = vand.u32 4294901760, %v10915_v33  ;;  %v17843_v42 = vld [vmem:[#allocation33_spill] sm:$0xff] }
 0x16b   :  { %2985 = vmatprep.subr.mxu0 %v17832_v24  ;;  %2665 = vmatmul.mubr.f32.gmra.mxu1 %v17833_v21  ;;  %v11425_v26 = vpop.f32.mrf.mxu1 }
 0x16c   :  { %17831 = vst [vmem:[#allocation44_spill] sm:$0xff] %v11418_v10  ;;  %2891 = vmatpush1.msra.mxu1 %v11160_v39  ;;  %2989 = vmatpush1.msra.mxu0 %v17834_v18 }
 0x16d   :  { %2893 = vmatprep.subr.mxu1 %v11168_v62  ;;  %2993 = vmatprep.subr.mxu0 %v17835_v31  ;;  %v17844_v31 = vand.u32 4294901760, %v10934_v6 }
 0x16e   :  { %2807 = vmatprep.mubr.f32.mxu0 %v17513_v9  ;;  %2895 = vmatpush1.msra.mxu1 %v11175_v25  ;;  %v1005_v32 = vpop.f32.mrf.mxu0 }
 0x16f   :  { %2997 = vmatpush1.msra.mxu0 %v17836_v59  ;;  %2897 = vmatprep.subr.mxu1 %v11192_v54  ;;  %v1123_v24 = vpop.f32.mrf.mxu1  ;;  %v1006_v18 = vadd.f32 %v1005_v32, %v11348_v2  ;;  %v17845_v59 = vand.u32 4294901760, %v10953_v4  ;;  %v17848_v4 = vld [vmem:[#allocation43_spill] sm:$0xff] }
 0x170   :  { %2810 = vmatmul.mubr.f32.gmra.mxu0 %v17837_v37  ;;  %3001 = vmatprep.subr.mxu0 %v17838_v20  ;;  %v11442_v35 = vadd.f32 %v1123_v24, %v992_v22  ;;  %v17842_v22 = vld [vmem:[#allocation40_spill] sm:$0xff]  ;;  %v17868_v37 = vld [vmem:[#allocation26_spill] sm:$0xff]  ;;  %v11520_v20 = vpop.f32.mrf.mxu0 }
 0x171   :  { %2899 = vmatpush1.msra.mxu1 %v11205_v27  ;;  %3005 = vmatpush1.msra.mxu0 %v17839_v29  ;;  %v11447_v41 = vpop.f32.mrf.mxu1 }
 0x172   :  { %2901 = vmatprep.subr.mxu1 %v11211_v8  ;;  %3009 = vmatprep.subr.mxu0 %v17840_v3  ;;  %v17871_v3 = vld [vmem:[#allocation9_spill] sm:$0xff] }
 0x173   :  { %2815 = vmatprep.mubr.f32.mxu0 %v17513_v9  ;;  %2903 = vmatpush1.msra.mxu1 %v11224_v23 }
 0x174   :  { %2936 = vmatprep.mubr.f32.mxu1 %v17513_v9  ;;  %3013 = vmatpush1.msra.mxu0 %v17841_v57  ;;  %v1130_v2 = vpop.f32.mrf.mxu1 }
 0x175   :  { %2818 = vmatmul.mubr.f32.gmra.mxu0 %v17842_v22  ;;  %2940 = vmatmul.mubr.f32.vlgmr.msra.gmra.mxu1 %v17843_v42  ;;  %v11462_v33 = vadd.f32 %v1130_v2, %v999_v60  ;;  %v17874_v22 = vld [vmem:[#allocation21_spill] sm:$0xff]  ;;  %v17875_v2 = vand.u32 4294901760, %v11197_v58  ;;  %v17883_v58 = vand.u32 4294901760, %v11240_v63 }
 0x176   :  { %3017 = vmatprep.subr.mxu0 %v17844_v31  ;;  %3179 = vmatprep.subr.mxu1 %v10818_v48  ;;  %v11467_v32 = vpop.f32.mrf.mxu1  ;;  %v17847_v48 = vand.u32 4294901760, %v10980_v12  ;;  %v17852_v12 = vand.u32 4294901760, %v17794_v16  ;;  %v17858_v16 = vand.u32 4294901760, %v11120_v55  ;;  %v17867_v55 = vand.u32 4294901760, %v11156_v14  ;;  %v17873_v14 = vld [vmem:[#allocation49_spill] sm:$0xff]  ;;  %v17876_v31 = vld [vmem:[#allocation16_spill] sm:$0xff] }
 0x177   :  { %3021 = vmatpush1.msra.mxu0 %v17845_v59  ;;  %3181 = vmatpush1.msra.mxu1 %v10826_v51  ;;  %v17849_v51 = vld [vmem:[#allocation39_spill] sm:$0xff]  ;;  %v17877_v59 = vld [vmem:[#allocation66_spill] sm:$0xff] }
 0x178   :  { %3025 = vmatprep.subr.mxu0 %v17846_v43  ;;  %3183 = vmatprep.subr.mxu1 %v10847_v5  ;;  %v17851_v5 = vand.u32 4294901760, %v17792_v49  ;;  %v17856_v49 = vand.u32 4294901760, %v17799_v46  ;;  %v17862_v46 = vld [vmem:[#allocation62_spill] sm:$0xff]  ;;  %v17878_v43 = vand.u32 4294901760, %v17877_v59 }
 0x179   :  { %2823 = vmatprep.mubr.f32.mxu0 %v17513_v9  ;;  %2945 = vmatprep.mubr.f32.mxu1 %v17513_v9  ;;  %v1137_v6 = vpop.f32.mrf.mxu1  ;;  %v17863_v24 = vand.u32 4294901760, %v17862_v46 }
 0x17a   :  { %3029 = vmatpush1.msra.mxu0 %v17847_v48  ;;  %3185 = vmatpush1.msra.mxu1 %v10852_v50  ;;  %v11479_v60 = vadd.f32 %v1137_v6, %v1006_v18  ;;  %v17853_v50 = vand.u32 4294901760, %v17796_v61  ;;  %v17860_v61 = vld [vmem:[#allocation58_spill] sm:$0xff]  ;;  %v17869_v18 = vld [vmem:[#allocation64_spill] sm:$0xff] }
 0x17b   :  { %2826 = vmatmul.mubr.f32.gmra.mxu0 %v17848_v4  ;;  %2949 = vmatmul.mubr.f32.gmra.mxu1 %v17849_v51  ;;  %v17870_v29 = vand.u32 4294901760, %v17869_v18  ;;  %v17879_v48 = vld [vmem:[#allocation54_spill] sm:$0xff]  ;;  %v17882_v4 = vand.u32 4294901760, %v11232_v28  ;;  %v17884_v51 = vand.u32 4294901760, %v11251_v44  ;;  %v17888_v28 = vld [vmem:[#allocation61_spill] sm:$0xff] }
 0x17c   :  { %3033 = vmatprep.subr.mxu0 %v17850_v19  ;;  %3187 = vmatprep.subr.mxu1 %v17791_v52  ;;  %v17855_v52 = vld [vmem:[#allocation42_spill] sm:$0xff]  ;;  %v17885_v19 = vld [vmem:[#allocation59_spill] sm:$0xff] }
 0x17d   :  { %3037 = vmatpush1.msra.mxu0 %v17851_v5  ;;  %3189 = vmatpush1.msra.mxu1 %v17793_v1  ;;  %v17857_v1 = vand.u32 4294901760, %v17801_v47  ;;  %v17865_v47 = vld [vmem:[#allocation29_spill] sm:$0xff] }
 0x17e   :  { %3041 = vmatprep.subr.mxu0 %v17852_v12  ;;  %3191 = vmatprep.subr.mxu1 %v17795_v53  ;;  %v17859_v53 = vld [vmem:[#allocation19_spill] sm:$0xff]  ;;  %v17886_v12 = vld [vmem:[#allocation70_spill] sm:$0xff] }
 0x17f   :  { %2831 = vmatprep.mubr.f32.mxu0 %v17513_v9  ;;  %2954 = vmatprep.mubr.f32.mxu1 %v17513_v9 }
 0x180   :  { %3045 = vmatpush1.msra.mxu0 %v17853_v50  ;;  %3193 = vmatpush1.msra.mxu1 %v17797_v45  ;;  %v17861_v45 = vand.u32 4294901760, %v17860_v61  ;;  %v17887_v50 = vand.u32 4294901760, %v17886_v12 }
 0x181   :  { %2834 = vmatmul.mubr.f32.gmra.mxu0 %v17854_v34  ;;  %2958 = vmatmul.mubr.f32.gmra.mxu1 %v17855_v52 }
 0x182   :  { %3049 = vmatprep.subr.mxu0 %v17856_v49  ;;  %3195 = vmatprep.subr.mxu1 %v17800_v17  ;;  %v17864_v17 = vld [vmem:[#allocation46_spill] sm:$0xff] }
 0x183   :  { %3053 = vmatpush1.msra.mxu0 %v17857_v1  ;;  %3197 = vmatpush1.msra.mxu1 %v17802_v7  ;;  %v17866_v7 = vand.u32 4294901760, %v11141_v11  ;;  %v17872_v11 = vand.u32 4294901760, %v11179_v38  ;;  %v17880_v38 = vld [vmem:[#allocation67_spill] sm:$0xff] }
 0x184   :  { %3057 = vmatprep.subr.mxu0 %v17858_v16  ;;  %3199 = vmatprep.subr.mxu1 %v17859_v53  ;;  %v17881_v6 = vand.u32 4294901760, %v17880_v38 }
 0x185   :  { %2963 = vmatprep.mubr.f32.mxu1 %v17513_v9  ;;  %3061 = vmatpush1.msra.mxu0 %v17861_v45 }
 0x186   :  { %3201 = vmatpush1.msra.mxu1 %v17805_v30  ;;  %3065 = vmatprep.subr.mxu0 %v17863_v24  ;;  %v11522_v30 = vpop.f32.mrf.mxu1 }
 0x187   :  { %2967 = vmatmul.mubr.f32.gmra.mxu1 %v17864_v17  ;;  %3203 = vmatprep.subr.mxu1 %v17865_v47 }
 0x188   :  { %3069 = vmatpush1.msra.mxu0 %v17866_v7  ;;  %3205 = vmatpush1.msra.mxu1 %v17810_v13  ;;  %v1278_v13 = vpop.f32.mrf.mxu0 }
 0x189   :  { %3073 = vmatprep.subr.mxu0 %v17867_v55  ;;  %3207 = vmatprep.subr.mxu1 %v17868_v37 }
 0x18a   :  { %2972 = vmatprep.mubr.f32.mxu1 %v17513_v9  ;;  %3077 = vmatpush1.msra.mxu0 %v17870_v29  ;;  %v11552_v5 = vpop.f32.mrf.mxu0 }
 0x18b   :  { %3209 = vmatpush1.msra.mxu1 %v17871_v3  ;;  %3081 = vmatprep.subr.mxu0 %v17872_v11  ;;  %v1554_v57 = vpop.f32.mrf.mxu1 }
 0x18c   :  { %2976 = vmatmul.mubr.f32.gmra.mxu1 %v17873_v14  ;;  %3211 = vmatprep.subr.mxu1 %v17874_v22  ;;  %v11532_v42 = vadd.f32 %v1554_v57, %v1278_v13 }
 0x18d   :  { %3085 = vmatpush1.msra.mxu0 %v17875_v2  ;;  %3213 = vmatpush1.msra.mxu1 %v17876_v31 }
 0x18e   :  { %3089 = vmatprep.subr.mxu0 %v17878_v43  ;;  %3215 = vmatprep.subr.mxu1 %v17879_v48 }
 0x18f   :  { %3093 = vmatpush1.msra.mxu0 %v17881_v6  ;;  %3217 = vmatpush1.msra.mxu1 %v17821_v0  ;;  %v17889_v0 = vld [vmem:[#allocation31_spill] sm:$0xff] }
 0x190   :  { %3097 = vmatprep.subr.mxu0 %v17882_v4  ;;  %3219 = vmatprep.subr.mxu1 %v17824_v56  ;;  %v17890_v56 = vld [vmem:[#allocation36_spill] sm:$0xff] }
 0x191   :  { %3101 = vmatpush1.msra.mxu0 %v17883_v58  ;;  %3221 = vmatpush1.msra.mxu1 %v17828_v40  ;;  %v11570_v40 = vpop.f32.mrf.mxu1 }
 0x192   :  { %3105 = vmatprep.subr.mxu0 %v17884_v51  ;;  %3223 = vmatprep.subr.mxu1 %v17885_v19 }
 0x193   :  { %3109 = vmatpush1.msra.mxu0 %v17887_v50  ;;  %3142 = vmatprep.mubr.f32.mxu0 %v17513_v9 }
 0x194   :  { %3225 = vmatpush1.msra.mxu1 %v17888_v28  ;;  %3144 = vmatmul.mubr.f32.vlgmr.msra.gmra.mxu0 %v17889_v0  ;;  %v1289_v63 = vpop.f32.mrf.mxu0 }
 0x195   :  { %3227 = vmatprep.subr.mxu1 %v11144_v15  ;;  %3149 = vmatprep.mubr.f32.mxu0 %v17513_v9 }
 0x196   :  { %3229 = vmatpush1.msra.mxu1 %v11160_v39  ;;  %3274 = vmatprep.mubr.f32.mxu1 %v17513_v9  ;;  %v11563_v44 = vpop.f32.mrf.mxu0 }
 0x197   :  { %3231 = vmatprep.subr.mxu1 %v11168_v62  ;;  %v17891_v62 = vld [vmem:[#allocation38_spill] sm:$0xff] }
 0x198   :  { %3233 = vmatpush1.msra.mxu1 %v11175_v25  ;;  %3151 = vmatmul.mubr.f32.gmra.mxu0 %v17890_v56 }
 0x199   :  { %3235 = vmatprep.subr.mxu1 %v11192_v54  ;;  %3156 = vmatprep.mubr.f32.mxu0 %v17513_v9  ;;  %v1300_v15 = vpop.f32.mrf.mxu0 }
 0x19a   :  { %3237 = vmatpush1.msra.mxu1 %v11205_v27  ;;  %v17892_v27 = vld [vmem:[#allocation41_spill] sm:$0xff] }
 0x19b   :  { %3239 = vmatprep.subr.mxu1 %v11211_v8  ;;  %v1561_v39 = vpop.f32.mrf.mxu1  ;;  %v11574_v34 = vpop.f32.mrf.mxu0 }
 0x19c   :  { %3241 = vmatpush1.msra.mxu1 %v11224_v23  ;;  %3158 = vmatmul.mubr.f32.gmra.mxu0 %v17891_v62  ;;  %v1562_v25 = vadd.f32 %v1561_v39, %v1289_v63 }
 0x19d   :  { %3276 = vmatmul.mubr.f32.vlgmr.msra.gmra.mxu1 %v17889_v0  ;;  %3163 = vmatprep.mubr.f32.mxu0 %v17513_v9  ;;  %v11580_v54 = vpop.f32.mrf.mxu1 }
 0x19e   :  { %3281 = vmatprep.mubr.f32.mxu1 %v17513_v9 }
 0x19f   :  { %v1311_v52 = vpop.f32.mrf.mxu0 }
 0x1a0   :  { %3165 = vmatmul.mubr.f32.gmra.mxu0 %v17892_v27 }
 0x1a1   :  { %3283 = vmatmul.mubr.f32.gmra.mxu1 %v17890_v56  ;;  %3170 = vmatprep.mubr.f32.mxu0 %v17513_v9  ;;  %v1568_v8 = vpop.f32.mrf.mxu1  ;;  %v11586_v23 = vpop.f32.mrf.mxu0 }
 0x1a2   :  { %3288 = vmatprep.mubr.f32.mxu1 %v17513_v9  ;;  %v1569_v49 = vadd.f32 %v1568_v8, %v1300_v15 }
 0x1a3   :  { %v11589_v1 = vpop.f32.mrf.mxu1 }
 0x1a4   :  { %3172 = vmatmul.mubr.f32.gmra.mxu0 %v17833_v21 }
 0x1a5   :  { %3290 = vmatmul.mubr.f32.gmra.mxu1 %v17891_v62  ;;  %v1322_v16 = vpop.f32.mrf.mxu0  ;;  %3435 = vmatprep.mubr.f32.mxu0 %v17513_v9 }
 0x1a6   :  { %3295 = vmatprep.mubr.f32.mxu1 %v17513_v9 }
 0x1a7   :  { %v1575_v53 = vpop.f32.mrf.mxu1  ;;  %v11595_v45 = vpop.f32.mrf.mxu0 }
 0x1a8   :  { %v1576_v61 = vadd.f32 %v1575_v53, %v1311_v52 }
 0x1a9   :  { %3297 = vmatmul.mubr.f32.gmra.mxu1 %v17892_v27  ;;  %v11598_v46 = vpop.f32.mrf.mxu1 }
 0x1aa   :  { %3302 = vmatprep.mubr.f32.mxu1 %v17513_v9 }
 0x1ab   :  { %v1719_v24 = vpop.f32.mrf.mxu0 }
 0x1ac   :  { %v1720_v17 = vadd.f32 %v1719_v24, %v11532_v42 }
 0x1ad   :  { %3304 = vmatmul.mubr.f32.gmra.mxu1 %v17833_v21  ;;  %v1582_v47 = vpop.f32.mrf.mxu1  ;;  %v11603_v55 = vpop.f32.mrf.mxu0 }
 0x1ae   :  { %v1583_v7 = vadd.f32 %v1582_v47, %v1322_v16  ;;  %3683 = vmatprep.mubr.f32.mxu1 %v17513_v9 }
 0x1af   :  { %v11608_v3 = vpop.f32.mrf.mxu1 }
 0x1b1   :  { %v1727_v37 = vpop.f32.mrf.mxu0 }
 0x1b2   :  { %v1728_v18 = vadd.f32 %v1727_v37, %v1562_v25 }
 0x1b3   :  { %v11606_v29 = vpop.f32.mrf.mxu0 }
 0x1b6   :  { %v1857_v13 = vpop.f32.mrf.mxu1 }
 0x1b7   :  { %v1735_v11 = vpop.f32.mrf.mxu0  ;;  %v1858_v14 = vadd.f32 %v1857_v13, %v1720_v17 }
 0x1b8   :  { %v1736_v57 = vadd.f32 %v1735_v11, %v1569_v49  ;;  %v11612_v21 = vpop.f32.mrf.mxu1 }
 0x1b9   :  { %v11610_v22 = vpop.f32.mrf.mxu0 }
 0x1bc   :  { %v1743_v42 = vpop.f32.mrf.mxu0 }
 0x1bd   :  { %v1866_v2 = vpop.f32.mrf.mxu1  ;;  %v1744_v31 = vadd.f32 %v1743_v42, %v1576_v61 }
 0x1be   :  { %v1867_v59 = vadd.f32 %v1866_v2, %v1728_v18  ;;  %v11614_v43 = vpop.f32.mrf.mxu0 }
 0x1bf   :  { %v11616_v48 = vpop.f32.mrf.mxu1 }
 0x1c2   :  { %v1751_v38 = vpop.f32.mrf.mxu0 }
 0x1c3   :  { %v1875_v6 = vpop.f32.mrf.mxu1  ;;  %v1752_v4 = vadd.f32 %v1751_v38, %v1583_v7 }
 0x1c4   :  { %v1876_v58 = vadd.f32 %v1875_v6, %v1736_v57  ;;  %v11622_v63 = vpop.f32.mrf.mxu0 }
 0x1c5   :  { %v11618_v51 = vpop.f32.mrf.mxu1 }
 0x1c8   :  { %v1884_v19 = vpop.f32.mrf.mxu1 }
 0x1c9   :  { %v1885_v12 = vadd.f32 %v1884_v19, %v1744_v31 }
 0x1ca   :  { %v11620_v50 = vpop.f32.mrf.mxu1 }
 0x1cd   :  { %v1893_v28 = vpop.f32.mrf.mxu1 }
 0x1ce   :  { %v1894_v0 = vadd.f32 %v1893_v28, %v1752_v4 }
 0x1cf   :  { %v11628_v27 = vpop.f32.mrf.mxu1 }
 0x1d6   :  { %v2061_v56 = vpop.f32.mrf.mxu0 }
 0x1d7   :  { %v2062_v15 = vadd.f32 %v2061_v56, %v1858_v14 }
 0x1d8   :  { %v11624_v39 = vpop.f32.mrf.mxu0 }
 0x1db   :  { %v2068_v62 = vpop.f32.mrf.mxu0 }
 0x1dc   :  { %v2069_v25 = vadd.f32 %v2068_v62, %v1867_v59 }
 0x1dd   :  { %v11626_v52 = vpop.f32.mrf.mxu0 }
 0x1e0   :  { %v2193_v49 = vpop.f32.mrf.mxu1 }
 0x1e1   :  { %v2075_v8 = vpop.f32.mrf.mxu0  ;;  %v11630_v53 = vadd.f32 %v2193_v49, %v2062_v15 }
 0x1e2   :  { %v2076_v16 = vadd.f32 %v2075_v8, %v1876_v58  ;;  %v11634_v24 = vpop.f32.mrf.mxu1 }
 0x1e3   :  { %v11632_v61 = vpop.f32.mrf.mxu0 }
 0x1e6   :  { %v2082_v17 = vpop.f32.mrf.mxu0 }
 0x1e7   :  { %v2200_v47 = vpop.f32.mrf.mxu1  ;;  %v2083_v7 = vadd.f32 %v2082_v17, %v1885_v12 }
 0x1e8   :  { %v11636_v37 = vadd.f32 %v2200_v47, %v2069_v25  ;;  %v11638_v18 = vpop.f32.mrf.mxu0 }
 0x1e9   :  { %v11640_v11 = vpop.f32.mrf.mxu1 }
 0x1ed   :  { %v2089_v13 = vpop.f32.mrf.mxu0  ;;  %v2207_v57 = vpop.f32.mrf.mxu1 }
 0x1ee   :  { %v2090_v14 = vadd.f32 %v2089_v13, %v1894_v0  ;;  %v11642_v42 = vadd.f32 %v2207_v57, %v2076_v16 }
 0x1ef   :  { %v11644_v2 = vpop.f32.mrf.mxu1  ;;  %v11652_v58 = vpop.f32.mrf.mxu0 }
 0x1f0   :  { %17893 = vst [vmem:[#allocation52_spill] sm:$0xff] %v11642_v42 }
 0x1f3   :  { %v2214_v31 = vpop.f32.mrf.mxu1 }
 0x1f4   :  { %v11646_v59 = vadd.f32 %v2214_v31, %v2083_v7 }
 0x1f5   :  { %v11648_v38 = vpop.f32.mrf.mxu1 }
 0x1f6   :  { %17894 = vst [vmem:[#allocation34_spill] sm:$0xff] %v11646_v59  ;;  %17895 = vst [vmem:[#allocation56_spill] sm:$0xff] %v11648_v38 }
 0x1f8   :  { %v2221_v6 = vpop.f32.mrf.mxu1 }
 0x1f9   :  { %v11650_v4 = vadd.f32 %v2221_v6, %v2090_v14 }
 0x1fa   :  { %v11658_v28 = vpop.f32.mrf.mxu1 }
 0x1fb   :  { %17896 = vst [vmem:[#allocation17_spill] sm:$0xff] %v11650_v4  ;;  %17898 = vst [vmem:[#allocation47_spill] sm:$0xff] %v11658_v28 }
 0x201   :  { %v11654_v19 = vpop.f32.mrf.mxu0 }
 0x203   :  { %v11656_v12 = vpop.f32.mrf.mxu0 }
 0x204   :  { %17897 = vst [vmem:[#allocation23_spill] sm:$0xff] %v11656_v12 }
 0x209   :  { %v11662_v56 = vpop.f32.mrf.mxu1 }
 0x20b   :  { %v11666_v62 = vpop.f32.mrf.mxu1 }
 0x20c   :  { %17901 = vst [vmem:[#allocation51_spill] sm:$0xff] %v11666_v62  ;;  %v17944_v62 = vld [vmem:[#allocation63_spill] sm:$0xff] }
 0x212   :  { %v11660_v0 = vpop.f32.mrf.mxu0 }
 0x213   :  { %17899 = vst [vmem:[#allocation28_spill] sm:$0xff] %v11660_v0  ;;  %v17943_v0 = vld [vmem:[#allocation20_spill] sm:$0xff] }
 0x214   :  { %v11664_v15 = vpop.f32.mrf.mxu0 }
 0x215   :  { %17900 = vst [vmem:[#allocation27_spill] sm:$0xff] %v11664_v15  ;;  %v17934_v15 = vld [vmem:[#allocation65_spill] sm:$0xff] }
 0x217   :  { %v11668_v25 = vpop.f32.mrf.mxu0 }
 0x218   :  { %17902 = vst [vmem:[#allocation11_spill] sm:$0xff] %v11668_v25 }
 0x219   :  { %v11670_v8 = vpop.f32.mrf.mxu1  ;;  %v11672_v49 = vpop.f32.mrf.mxu0 }
 0x21a   :  { %17903 = vst [vmem:[#allocation55_spill] sm:$0xff] %v11670_v8  ;;  %17904 = vst [vmem:[#allocation57_spill] sm:$0xff] %v11672_v49  ;;  %v17941_v8 = vld [vmem:[#allocation73_spill] sm:$0xff] }
 0x21b   :  { %v11674_v16 = vpop.f32.mrf.mxu1 }
 0x21c   :  { %17905 = vst [vmem:[#allocation32_spill] sm:$0xff] %v11674_v16  ;;  %v17933_v16 = vld [vmem:[#allocation30_spill] sm:$0xff] }
 0x21d   :  { %v11676_v17 = vpop.f32.mrf.mxu0 }
 0x21e   :  { %17906 = vst [vmem:[#allocation45_spill] sm:$0xff] %v11676_v17  ;;  %v17937_v17 = vld [vmem:[#allocation72_spill] sm:$0xff] }
 0x21f   :  { %v11678_v47 = vpop.f32.mrf.mxu1  ;;  %v11680_v7 = vpop.f32.mrf.mxu0 }
 0x220   :  { %17907 = vst [vmem:[#allocation37_spill] sm:$0xff] %v11678_v47  ;;  %17908 = vst [vmem:[#allocation40_spill] sm:$0xff] %v11680_v7 }
 0x221   :  { %v11682_v13 = vpop.f32.mrf.mxu1 }
 0x222   :  { %17909 = vst [vmem:[#allocation33_spill] sm:$0xff] %v11682_v13 }
 0x223   :  { %v11684_v57 = vpop.f32.mrf.mxu0 }
 0x224   :  { %17910 = vst [vmem:[#allocation43_spill] sm:$0xff] %v11684_v57 }
 0x225   :  { %v11686_v14 = vpop.f32.mrf.mxu1  ;;  %v11688_v31 = vpop.f32.mrf.mxu0 }
 0x226   :  { %17911 = vst [vmem:[#allocation39_spill] sm:$0xff] %v11686_v14  ;;  %17912 = vst [vmem:[#allocation48_spill] sm:$0xff] %v11688_v31 }
 0x227   :  { %v11690_v6 = vpop.f32.mrf.mxu1 }
 0x228   :  { %17913 = vst [vmem:[#allocation42_spill] sm:$0xff] %v11690_v6 }
 0x22a   :  { %v11692_v9 = vpop.f32.mrf.mxu0 }
 0x22b   :  { %17914 = vst [vmem:[#allocation19_spill] sm:$0xff] %v11692_v9  ;;  %v11694_v59 = vpop.f32.mrf.mxu1 }
 0x22c   :  { %17915 = vst [vmem:[#allocation58_spill] sm:$0xff] %v11694_v59  ;;  %v11696_v4 = vpop.f32.mrf.mxu0 }
 0x22d   :  { %17916 = vst [vmem:[#allocation62_spill] sm:$0xff] %v11696_v4  ;;  %v11698_v42 = vpop.f32.mrf.mxu1 }
 0x22e   :  { %17917 = vst [vmem:[#allocation46_spill] sm:$0xff] %v11698_v42 }
 0x230   :  { %v11700_v38 = vpop.f32.mrf.mxu0 }
 0x231   :  { %17918 = vst [vmem:[#allocation29_spill] sm:$0xff] %v11700_v38  ;;  %v17929_v38 = vld [vmem:[#allocation15_spill] sm:$0xff] }
 0x232   :  { %v11704_v7 = vpop.f32.mrf.mxu0 }
 0x233   :  { %17920 = vst [vmem:[#allocation64_spill] sm:$0xff] %v11704_v7 }
 0x235   :  { %v11702_v28 = vpop.f32.mrf.mxu1  ;;  %v11708_v47 = vpop.f32.mrf.mxu0 }
 0x236   :  { %17919 = vst [vmem:[#allocation26_spill] sm:$0xff] %v11702_v28  ;;  %17922 = vst [vmem:[#allocation49_spill] sm:$0xff] %v11708_v47  ;;  %v17930_v28 = vld [vmem:[#allocation24_spill] sm:$0xff] }
 0x237   :  { %v11706_v57 = vpop.f32.mrf.mxu1  ;;  %v11712_v6 = vpop.f32.mrf.mxu0  ;;  %v473_v25 = vadd.f32 %v17930_v28, %v17929_v38  ;;  %v17942_v28 = vld [vmem:[#allocation25_spill] sm:$0xff] }
 0x238   :  { %17921 = vst [vmem:[#allocation9_spill] sm:$0xff] %v11706_v57  ;;  %17924 = vst [vmem:[#allocation16_spill] sm:$0xff] %v11712_v6  ;;  %v17932_v57 = vld [vmem:[#allocation18_spill] sm:$0xff]  ;;  %v17936_v6 = vld [vmem:[#allocation68_spill] sm:$0xff] }
 0x239   :  { %v480_v47 = vadd.f32 %v17933_v16, %v17932_v57  ;;  %v494_v16 = vadd.f32 %v17944_v62, %v17943_v0  ;;  %v17945_v57 = vld [vmem:[#allocation71_spill] sm:$0xff]  ;;  %v17956_v0 = vld [vmem:[#allocation74_spill] sm:$0xff] }
 0x23b   :  { %v11710_v31 = vpop.f32.mrf.mxu1  ;;  %v11716_v59 = vpop.f32.mrf.mxu0 }
 0x23c   :  { %17923 = vst [vmem:[#allocation21_spill] sm:$0xff] %v11710_v31  ;;  %17926 = vst [vmem:[#allocation54_spill] sm:$0xff] %v11716_v59  ;;  %v638_v31 = vadd.f32 %v17934_v15, %v473_v25 }
 0x23d   :  { %v11714_v9 = vpop.f32.mrf.mxu1  ;;  %v11720_v42 = vpop.f32.mrf.mxu0 }
 0x23e   :  { %17925 = vst [vmem:[#allocation66_spill] sm:$0xff] %v11714_v9  ;;  %17928 = vst [vmem:[#allocation59_spill] sm:$0xff] %v11720_v42  ;;  %v646_v9 = vadd.f32 %v17936_v6, %v480_v47  ;;  %v776_v59 = vadd.f32 %v17937_v17, %v638_v31  ;;  %v17940_v42 = vld [vmem:[#allocation53_spill] sm:$0xff] }
 0x23f   :  { %v17948_v47 = vld [vmem:[#allocation69_spill] sm:$0xff] }
 0x240   :  { %v785_v38 = vadd.f32 %v17941_v8, %v646_v9  ;;  %v17949_v17 = vld [vmem:[#allocation13_spill] sm:$0xff] }
 0x241   :  { %v11718_v4 = vpop.f32.mrf.mxu1  ;;  %v11729_v14 = vpop.f32.mrf.mxu0 }
 0x242   :  { %17927 = vst [vmem:[#allocation67_spill] sm:$0xff] %v11718_v4  ;;  %17935 = vst [vmem:[#allocation61_spill] sm:$0xff] %v11729_v14  ;;  %v17939_v4 = vld [vmem:[#allocation8_spill] sm:$0xff]  ;;  %v987_v31 = vadd.f32 %v17949_v17, %v785_v38  ;;  %v11764_v38 = vand.u32 4294901760, %v11442_v35 }
 0x243   :  { %v11724_v7 = vpop.f32.mrf.mxu1  ;;  %v487_v49 = vadd.f32 %v17940_v42, %v17939_v4  ;;  %v11742_v25 = vpop.f32.mrf.mxu0  ;;  %v17947_v14 = vld [vmem:[#allocation60_spill] sm:$0xff]  ;;  %v17952_v42 = vld [vmem:[#allocation14_spill] sm:$0xff] }
 0x244   :  { %17931 = vst [vmem:[#allocation70_spill] sm:$0xff] %v11724_v7  ;;  %v980_v7 = vadd.f32 %v17942_v28, %v776_v59  ;;  %17946 = vst [vmem:[#allocation36_spill] sm:$0xff] %v11742_v25  ;;  %v501_v6 = vadd.f32 %v17948_v47, %v17947_v14  ;;  %v17955_v59 = vld [vmem:[#allocation35_spill] sm:$0xff]  ;;  %v17957_v28 = vld [vmem:[#allocation12_spill] sm:$0xff]  ;;  %v11761_v14 = vadd.f32 %v11425_v26, %v987_v31  ;;  %v11779_v26 = vand.u32 4294901760, %v11418_v10 }
 0x245   :  { %v654_v15 = vadd.f32 %v17945_v57, %v487_v49  ;;  %v662_v8 = vadd.f32 %v17955_v59, %v494_v16  ;;  %17959 = vst [vmem:[#allocation18_spill] sm:$0xff] %v11764_v38  ;;  %v17960_v47 = vld [vmem:[#allocation75_spill] sm:$0xff] }
 0x246   :  { %v11751_v4 = vadd.f32 %v17952_v42, %v980_v7  ;;  %v670_v57 = vadd.f32 %v17957_v28, %v501_v6  ;;  %17958 = vst [vmem:[#allocation24_spill] sm:$0xff] %v11761_v14  ;;  %v17961_v7 = vld [vmem:[#allocation50_spill] sm:$0xff]  ;;  %17965 = vst [vmem:[#allocation68_spill] sm:$0xff] %v11779_v26  ;;  %v11798_v28 = vsub.f32 %v11442_v35, %v11764_v38  ;;  %v11813_v35 = vand.u32 4294901760, %v11479_v60  ;;  %v17992_v38 = vld [vmem:[#allocation16_spill] sm:$0xff] }
 0x247   :  { %v11733_v13 = vpop.f32.mrf.mxu1  ;;  %v794_v62 = vadd.f32 %v17956_v0, %v654_v15  ;;  %v803_v17 = vadd.f32 %v17960_v47, %v662_v8  ;;  %v18000_v26 = vld [vmem:[#allocation59_spill] sm:$0xff] }
 0x248   :  { %17938 = vst [vmem:[#allocation31_spill] sm:$0xff] %v11733_v13  ;;  %v17950_v13 = vld [vmem:[#allocation10_spill] sm:$0xff]  ;;  %17953 = vst [vmem:[#allocation41_spill] sm:$0xff] %v11751_v4  ;;  %v11776_v6 = vand.u32 4294901760, %v11751_v4 }
 0x249   :  { %v11748_v12 = vand.u32 4294901760, %v17950_v13  ;;  %v11753_v9 = vpop.f32.mrf.mxu1  ;;  %v994_v42 = vadd.f32 %v17961_v7, %v794_v62  ;;  %v1001_v59 = vadd.f32 %v11423_v36, %v803_v17  ;;  %v11794_v62 = vand.u32 4294901760, %v11761_v14  ;;  %17966 = vst [vmem:[#allocation72_spill] sm:$0xff] %v11798_v28  ;;  %17967 = vst [vmem:[#allocation8_spill] sm:$0xff] %v11813_v35 }
 0x24a   :  { %17954 = vst [vmem:[#allocation15_spill] sm:$0xff] %v11753_v9  ;;  %v17962_v9 = vld [vmem:[#allocation22_spill] sm:$0xff]  ;;  %17964 = vst [vmem:[#allocation65_spill] sm:$0xff] %v11776_v6  ;;  %v17997_v6 = vld [vmem:[#allocation64_spill] sm:$0xff] }
 0x24b   :  { %17951 = vst [vmem:[#allocation38_spill] sm:$0xff] %v11748_v12  ;;  %v812_v16 = vadd.f32 %v17962_v9, %v670_v57  ;;  %v11773_v15 = vsub.f32 %v17950_v13, %v11748_v12  ;;  %v11785_v8 = vadd.f32 %v11447_v41, %v994_v42  ;;  %v1557_v9 = vadd.f32 %v11570_v40, %v11552_v5 }
 0x24c   :  { %v11781_v31 = vpop.f32.mrf.mxu1  ;;  %v1564_v13 = vadd.f32 %v11580_v54, %v11563_v44  ;;  %v1571_v41 = vadd.f32 %v11589_v1, %v11574_v34  ;;  %v11804_v57 = vadd.f32 %v11467_v32, %v1001_v59  ;;  %v1578_v5 = vadd.f32 %v11598_v46, %v11586_v23 }
 0x24d   :  { %17963 = vst [vmem:[#allocation30_spill] sm:$0xff] %v11773_v15  ;;  %v1008_v36 = vadd.f32 %v11520_v20, %v812_v16  ;;  %v1722_v44 = vadd.f32 %v11603_v55, %v1557_v9  ;;  %v1585_v34 = vadd.f32 %v11608_v3, %v11595_v45  ;;  %v11824_v23 = vand.u32 4294901760, %v11785_v8 }
 0x24e   :  { %v1730_v40 = vadd.f32 %v11606_v29, %v1564_v13  ;;  %v1738_v32 = vadd.f32 %v11610_v22, %v1571_v41  ;;  %v11821_v1 = vpop.f32.mrf.mxu1  ;;  %v1746_v55 = vadd.f32 %v11614_v43, %v1578_v5  ;;  %v11837_v22 = vand.u32 4294901760, %v11636_v37  ;;  %v17975_v5 = vld [vmem:[#allocation51_spill] sm:$0xff] }
 0x24f   :  { %v11816_v20 = vadd.f32 %v11522_v30, %v1008_v36  ;;  %17968 = vst [vmem:[#allocation53_spill] sm:$0xff] %v11824_v23  ;;  %v1860_v46 = vadd.f32 %v11612_v21, %v1722_v44  ;;  %v11832_v30 = vand.u32 4294901760, %v11462_v33  ;;  %v1754_v45 = vadd.f32 %v11622_v63, %v1585_v34  ;;  %v17976_v44 = vld [vmem:[#allocation28_spill] sm:$0xff] }
 0x250   :  { %v1869_v29 = vadd.f32 %v11616_v48, %v1730_v40  ;;  %v1878_v3 = vadd.f32 %v11618_v51, %v1738_v32  ;;  %17970 = vst [vmem:[#allocation25_spill] sm:$0xff] %v11837_v22  ;;  %v11842_v21 = vand.u32 4294901760, %v11804_v57  ;;  %v1887_v43 = vadd.f32 %v11620_v50, %v1746_v55  ;;  %v17977_v40 = vld [vmem:[#allocation55_spill] sm:$0xff]  ;;  %v17978_v32 = vld [vmem:[#allocation57_spill] sm:$0xff] }
 0x251   :  { %17969 = vst [vmem:[#allocation73_spill] sm:$0xff] %v11832_v30  ;;  %v2064_v48 = vadd.f32 %v11624_v39, %v1860_v46  ;;  %v11849_v63 = vsub.f32 %v11479_v60, %v11813_v35  ;;  %v11852_v51 = vand.u32 4294901760, %v11816_v20  ;;  %v1896_v16 = vadd.f32 %v11628_v27, %v1754_v45  ;;  %v17980_v55 = vld [vmem:[#allocation45_spill] sm:$0xff]  ;;  %v17982_v45 = vld [vmem:[#allocation27_spill] sm:$0xff] }
 0x252   :  { %17971 = vst [vmem:[#allocation20_spill] sm:$0xff] %v11842_v21  ;;  %v2071_v7 = vadd.f32 %v11626_v52, %v1869_v29  ;;  %v2078_v59 = vadd.f32 %v11632_v61, %v1878_v3  ;;  %v11859_v50 = vand.u32 4294901760, %v11630_v53  ;;  %v11865_v52 = vadd.f32 %v11638_v18, %v1887_v43  ;;  %v17974_v18 = vld [vmem:[#allocation23_spill] sm:$0xff]  ;;  %v17999_v35 = vld [vmem:[#allocation9_spill] sm:$0xff] }
 0x253   :  { %17972 = vst [vmem:[#allocation63_spill] sm:$0xff] %v11852_v51  ;;  %v11862_v39 = vadd.f32 %v11634_v24, %v2064_v48  ;;  %v11872_v27 = vsub.f32 %v11636_v37, %v11837_v22  ;;  %v11875_v61 = vadd.f32 %v11652_v58, %v1896_v16  ;;  %v2639_v24 = vadd.f32 %v11662_v56, %v11654_v19  ;;  %v17979_v37 = vld [vmem:[#allocation33_spill] sm:$0xff]  ;;  %v17981_v58 = vld [vmem:[#allocation39_spill] sm:$0xff]  ;;  %v17986_v56 = vld [vmem:[#allocation40_spill] sm:$0xff] }
 0x254   :  { %v11757_v49 = vpop.f32.mrf.mxu0  ;;  %17973 = vst [vmem:[#allocation71_spill] sm:$0xff] %v11859_v50  ;;  %v11868_v60 = vadd.f32 %v11640_v11, %v2071_v7  ;;  %v11878_v36 = vadd.f32 %v11644_v2, %v2078_v59  ;;  %v2641_v11 = vadd.f32 %v17975_v5, %v17974_v18  ;;  %v2646_v34 = vadd.f32 %v17977_v40, %v17976_v44  ;;  %v17983_v2 = vld [vmem:[#allocation32_spill] sm:$0xff]  ;;  %v17984_v43 = vld [vmem:[#allocation11_spill] sm:$0xff]  ;;  %v17985_v48 = vld [vmem:[#allocation37_spill] sm:$0xff] }
 0x255   :  { %v2655_v46 = vadd.f32 %v17979_v37, %v17978_v32  ;;  %v2660_v29 = vadd.f32 %v17981_v58, %v17980_v55  ;;  %v2648_v3 = vadd.f32 %v17983_v2, %v17982_v45  ;;  %v2653_v19 = vadd.f32 %v17985_v48, %v17984_v43  ;;  %v17987_v7 = vld [vmem:[#allocation42_spill] sm:$0xff]  ;;  %v17988_v59 = vld [vmem:[#allocation19_spill] sm:$0xff]  ;;  %v17994_v45 = vld [vmem:[#allocation48_spill] sm:$0xff] }
 0x256   :  { %v11768_v25 = vpop.f32.mrf.mxu0  ;;  %v2662_v16 = vadd.f32 %v17987_v7, %v17986_v56  ;;  %v2804_v18 = vadd.f32 %v17988_v59, %v2639_v24  ;;  %v17989_v44 = vld [vmem:[#allocation43_spill] sm:$0xff]  ;;  %v17990_v40 = vld [vmem:[#allocation58_spill] sm:$0xff]  ;;  %v17996_v43 = vld [vmem:[#allocation29_spill] sm:$0xff] }
 0x257   :  { %v2667_v15 = vadd.f32 %v17990_v40, %v17989_v44  ;;  %v17991_v32 = vld [vmem:[#allocation62_spill] sm:$0xff]  ;;  %v2822_v55 = vadd.f32 %v17992_v38, %v2655_v46  ;;  %v2812_v48 = vadd.f32 %v17996_v43, %v2646_v34  ;;  %v2814_v56 = vadd.f32 %v17997_v6, %v2648_v3  ;;  %v17998_v7 = vld [vmem:[#allocation49_spill] sm:$0xff]  ;;  %v3313_v6 = vld [vmem:[%s16448_s3] sm:$0xff] }
 0x258   :  { %v11791_v0 = vpop.f32.mrf.mxu0  ;;  %v2806_v37 = vadd.f32 %v17991_v32, %v2641_v11  ;;  %v17993_v58 = vld [vmem:[#allocation54_spill] sm:$0xff]  ;;  %v2820_v24 = vadd.f32 %v17998_v7, %v2653_v19  ;;  %v2830_v44 = vadd.f32 %v18000_v26, %v2662_v16  ;;  %v18002_v32 = vld [vmem:[#allocation31_spill] sm:$0xff] }
 0x259   :  { %v2828_v28 = vadd.f32 %v17993_v58, %v2660_v29  ;;  %v17995_v2 = vld [vmem:[#allocation46_spill] sm:$0xff]  ;;  %v18004_v58 = vld [vmem:[#allocation61_spill] sm:$0xff]  ;;  %v18007_v26 = vld [vmem:[#allocation15_spill] sm:$0xff] }
 0x25a   :  { %v11810_v54 = vpop.f32.mrf.mxu0  ;;  %v2669_v4 = vadd.f32 %v17995_v2, %v17994_v45  ;;  %v2944_v10 = vadd.f32 %v17999_v35, %v2806_v37  ;;  %v18001_v40 = vld [vmem:[#allocation70_spill] sm:$0xff]  ;;  %v2836_v14 = vadd.f32 %v18004_v58, %v2667_v15  ;;  %v18005_v45 = vld [vmem:[#allocation67_spill] sm:$0xff]  ;;  %v11920_v35 = vand.u32 4294901760, %v11862_v39  ;;  %v18008_v37 = vld [vmem:[#allocation21_spill] sm:$0xff] }
 0x25b   :  { %v2962_v11 = vadd.f32 %v18001_v40, %v2822_v55  ;;  %v2969_v38 = vadd.f32 %v18002_v32, %v2828_v28  ;;  %v18003_v46 = vld [vmem:[#allocation66_spill] sm:$0xff]  ;;  %v2960_v2 = vadd.f32 %v18005_v45, %v2820_v24  ;;  %v2971_v3 = vadd.f32 %v18007_v26, %v2830_v44  ;;  %v18009_v55 = vld [vmem:[#allocation36_spill] sm:$0xff] }
 0x25c   :  { %v11829_v47 = vpop.f32.mrf.mxu0  ;;  %v2953_v29 = vadd.f32 %v18003_v46, %v2814_v56  ;;  %18006 = vst [vmem:[#allocation60_spill] sm:$0xff] %v11920_v35  ;;  %v9575_v28 = vmov 0   ;;  %v2951_v15 = vadd.f32 %v18008_v37, %v2812_v48  ;;  %v2838_v56 = vadd.f32 %v18009_v55, %v2669_v4  ;;  %v18010_v4 = vld [vmem:[#allocation26_spill] sm:$0xff] }
 0x25d   :  { %v11839_v17 = vpop.f32.mrf.mxu1  ;;  %9524 = vset.pattern.permute.xlu0 %v9575_v28  ;;  %9525 = vset.pattern.permute.xlu1 %v9575_v28  ;;  %v2978_v7 = vadd.f32 %v11781_v31, %v2836_v14  ;;  %v3160_v24 = vadd.f32 %v11829_v47, %v2960_v2  ;;  %v2942_v48 = vadd.f32 %v18010_v4, %v2804_v18  ;;  %v8707_v2 = vld [vmem:[%s16451_s6] sm:$0xff]  ;;  %v8709_v55 = vld [vmem:[%s16451_s6 + $0x10] sm:$0xff] }
 0x25e   :  { %v3161_v42 = vpop.f32.mrf.mxu0  ;;  %3318 = vperm.xlu0 %9524, %v3313_v6   ;;  %v3155_v32 = vadd.f32 %v11810_v54, %v2953_v29  ;;  %v3148_v14 = vadd.f32 %v11768_v25, %v2944_v10  ;;  %v3153_v31 = vadd.f32 %v11791_v0, %v2951_v15 }
 0x25f   :  { %v11856_v9 = vpop.f32.mrf.mxu1  ;;  %v3162_v19 = vadd.f32 %v3161_v42, %v2962_v11  ;;  %v3314_v42 = vld [vmem:[%s16448_s3 + $0x8] sm:$0xff] }
 0x260   :  { %v3166_v13 = vpop.f32.mrf.mxu0  ;;  %v3280_v18 = vadd.f32 %v11856_v9, %v3148_v14  ;;  %v18012_v9 = vld [vmem:[#allocation47_spill] sm:$0xff] }
 0x261   :  { %v11882_v41 = vpop.f32.mrf.mxu1  ;;  %v3167_v16 = vadd.f32 %v3166_v13, %v2969_v38  ;;  %v3315_v13 = vld [vmem:[%s16448_s3 + $0x10] sm:$0xff] }
 0x262   :  { %v3168_v5 = vpop.f32.mrf.mxu0  ;;  %3328 = vperm.xlu1 %9525, %v3315_v13   ;;  %v3285_v10 = vadd.f32 %v11882_v41, %v3153_v31  ;;  %3323 = vperm.xlu0 %9524, %v3314_v42   ;;  %v2224_v41 = vadd.f32 %v18012_v9, %v11875_v61  ;;  %v11972_v61 = vand.u32 4294901760, %v11878_v36  ;;  %v18016_v13 = vld [vmem:[#allocation52_spill] sm:$0xff] }
 0x263   :  { %v3286_v12 = vpop.f32.mrf.mxu1  ;;  %v3169_v46 = vadd.f32 %v3168_v5, %v2971_v3  ;;  %v2980_v5 = vadd.f32 %v11821_v1, %v2838_v56  ;;  %v11992_v4 = vand.u32 4294901760, %v18016_v13 }
 0x264   :  { %v3173_v34 = vpop.f32.mrf.mxu0  ;;  %v3287_v38 = vadd.f32 %v3286_v12, %v3155_v32 }
 0x265   :  { %v3291_v59 = vpop.f32.mrf.mxu1  ;;  %v3174_v29 = vadd.f32 %v3173_v34, %v2978_v7  ;;  %v8708_v34 = vld [vmem:[%s16451_s6 + $0x8] sm:$0xff]  ;;  %v11976_v7 = vand.u32 4294901760, %v3285_v10  ;;  %18017 = vst [vmem:[#allocation14_spill] sm:$0xff] %v11992_v4 }
 0x266   :  { %v3292_v47 = vadd.f32 %v3291_v59, %v3160_v24  ;;  %v3175_v11 = vpop.f32.mrf.mxu0  ;;  %8712 = vperm.xlu1 %9525, %v8707_v2   ;;  %8717 = vperm.xlu0 %9524, %v8708_v34  }
 0x267   :  { %v3293_v43 = vpop.f32.mrf.mxu1  ;;  %v3176_v59 = vadd.f32 %v3175_v11, %v2980_v5  ;;  %v18018_v5 = vld [vmem:[#allocation17_spill] sm:$0xff] }
 0x268   :  { %v3294_v58 = vadd.f32 %v3293_v43, %v3162_v19  ;;  %v3146_v43 = vadd.f32 %v11757_v49, %v2942_v48  ;;  %v11954_v49 = vand.u32 4294901760, %v11868_v60  ;;  %v11959_v3 = vand.u32 4294901760, %v3292_v47 }
 0x269   :  { %v3298_v40 = vpop.f32.mrf.mxu1 }
 0x26a   :  { %v3299_v44 = vadd.f32 %v3298_v40, %v3167_v16  ;;  %v11946_v6 = vand.u32 4294901760, %v3294_v58  ;;  %18011 = vst [vmem:[#allocation69_spill] sm:$0xff] %v11954_v49  ;;  %v3278_v26 = vadd.f32 %v11839_v17, %v3146_v43  ;;  %v11961_v16 = vand.u32 4294901760, %v3287_v38  ;;  %v18014_v17 = vld [vmem:[#allocation56_spill] sm:$0xff]  ;;  %8722 = vperm.xlu1 %9525, %v8709_v55  }
 0x26b   :  { %v3300_v54 = vpop.f32.mrf.mxu1  ;;  %v2217_v56 = vadd.f32 %v18014_v17, %v11865_v52  ;;  %v11981_v40 = vand.u32 4294901760, %v3280_v18  ;;  %v11994_v52 = vand.u32 4294901760, %v2224_v41  ;;  %v3310_v17 = vld [vmem:[%s16447_s2] sm:$0xff]  ;;  %v12089_v55 = vsub.f32 %v18016_v13, %v11992_v4 }
 0x26c   :  { %v3301_v45 = vadd.f32 %v3300_v54, %v3169_v46  ;;  %v11944_v25 = vand.u32 4294901760, %v3299_v44  ;;  %18013 = vst [vmem:[#allocation13_spill] sm:$0xff] %v11961_v16  ;;  %v11984_v32 = vsub.f32 %v3294_v58, %v11946_v6  ;;  %v11996_v48 = vand.u32 4294901760, %v3278_v26 }
 0x26d   :  { %v3305_v0 = vpop.f32.mrf.mxu1  ;;  %18015 = vst [vmem:[#allocation10_spill] sm:$0xff] %v11981_v40  ;;  %v12002_v14 = vsub.f32 %v3287_v38, %v11961_v16  ;;  %v12012_v54 = vsub.f32 %v11878_v36, %v11972_v61  ;;  %v12025_v2 = vsub.f32 %v3280_v18, %v11981_v40  ;;  %v12042_v18 = vsub.f32 %v2224_v41, %v11994_v52 }
 0x26e   :  { %v11948_v12 = vand.u32 4294901760, %v3301_v45  ;;  %v3306_v1 = vadd.f32 %v3305_v0, %v3174_v29  ;;  %v11979_v24 = vsub.f32 %v3299_v44, %v11944_v25  ;;  %v11999_v44 = vsub.f32 %v3292_v47, %v11959_v3  ;;  %v18019_v0 = vld [vmem:[#allocation34_spill] sm:$0xff] }
 0x26f   :  { %v3307_v19 = vpop.f32.mrf.mxu1  ;;  %v12015_v47 = vand.u32 4294901760, %v18018_v5  ;;  %v12018_v29 = vsub.f32 %v3285_v10, %v11976_v7  ;;  %v16706_v43 = vand.u32 4294901760, %v11984_v32  ;;  %v12034_v10 = vsub.f32 %v3278_v26, %v11996_v48 }
 0x270   :  { %v11964_v28 = vsub.f32 %v3301_v45, %v11948_v12  ;;  %v11966_v37 = vand.u32 4294901760, %v3306_v1  ;;  %v3308_v15 = vadd.f32 %v3307_v19, %v3176_v59  ;;  %v16705_v38 = vand.u32 4294901760, %v11979_v24 }
 0x271   :  { %v12022_v45 = vand.u32 4294901760, %v2217_v56  ;;  %v12031_v59 = vand.u32 4294901760, %v18019_v0  ;;  %v18023_v13 = vand.u32 4294901760, %v12025_v2 }
 0x272   :  { %v11987_v46 = vsub.f32 %v3306_v1, %v11966_v37  ;;  %v11989_v42 = vand.u32 4294901760, %v3308_v15  ;;  %v16702_v11 = vand.u32 4294901760, %v11964_v28  ;;  %v16709_v1 = vand.u32 4294901760, %v11999_v44 }
 0x273   :  { %18020 = vst [vmem:[#allocation35_spill] sm:$0xff] %v12031_v59  ;;  %v3492_v41 = vsub.f32 %v11979_v24, %v16705_v38  ;;  %v12074_v38 = vsub.f32 %v18019_v0, %v12031_v59  ;;  %v18024_v0 = vand.u32 4294901760, %v12034_v10 }
 0x274   :  { %v16703_v58 = vand.u32 4294901760, %v11987_v46  ;;  %v12006_v31 = vsub.f32 %v3308_v15, %v11989_v42  ;;  %3344 = vmatprep.subr.mxu0 %v11989_v42  ;;  %v3486_v26 = vsub.f32 %v11964_v28, %v16702_v11  ;;  %v12054_v15 = vsub.f32 %v18018_v5, %v12015_v47 }
 0x275   :  { %3346 = vmatpush1.msra.mxu0 %v11966_v37  ;;  %v12065_v11 = vsub.f32 %v2217_v56, %v12022_v45  ;;  %v3504_v56 = vsub.f32 %v11999_v44, %v16709_v1 }
 0x276   :  { %3348 = vmatprep.subr.mxu0 %v11948_v12  ;;  %v16704_v36 = vand.u32 4294901760, %v12006_v31  ;;  %v3480_v34 = vsub.f32 %v11987_v46, %v16703_v58  ;;  %v3498_v58 = vsub.f32 %v11984_v32, %v16706_v43  ;;  %v18021_v43 = vand.u32 4294901760, %v12002_v14 }
 0x277   :  { %3350 = vmatpush1.msra.mxu0 %v11944_v25  ;;  %v18027_v1 = vand.u32 4294901760, %v12054_v15 }
 0x278   :  { %3352 = vmatprep.subr.mxu0 %v11946_v6  ;;  %v3474_v9 = vsub.f32 %v12006_v31, %v16704_v36  ;;  %v3481_v19 = vand.u32 4294901760, %v3480_v34  ;;  %v3510_v36 = vsub.f32 %v12002_v14, %v18021_v43  ;;  %v18022_v34 = vand.u32 4294901760, %v12018_v29 }
 0x279   :  { %3354 = vmatpush1.msra.mxu0 %v11959_v3  ;;  %v12098_v43 = vsub.f32 %v11868_v60, %v11954_v49  ;;  %v3505_v60 = vand.u32 4294901760, %v3504_v56 }
 0x27a   :  { %3356 = vmatprep.subr.mxu0 %v11961_v16  ;;  %v3475_v5 = vand.u32 4294901760, %v3474_v9  ;;  %v3487_v9 = vand.u32 4294901760, %v3486_v26  ;;  %v3333_v16 = vsel %vm3331_vm0, %v3310_v17, 0  ;;  %v3493_v26 = vand.u32 4294901760, %v3492_v41 }
 0x27b   :  { %3358 = vmatpush1.msra.mxu0 %v11976_v7  ;;  %v3499_v17 = vand.u32 4294901760, %v3498_v58  ;;  %v12110_v41 = vand.u32 4294901760, %v3333_v16  ;;  %v12114_v58 = vsub.f32 %v11862_v39, %v11920_v35  ;;  %v3540_v39 = vsub.f32 %v12054_v15, %v18027_v1 }
 0x27c   :  { %3360 = vmatprep.subr.mxu0 %v11981_v40  ;;  %3476 = vmatprep.subr.mxu1 %v3475_v5  ;;  %v3516_v40 = vsub.f32 %v12018_v29, %v18022_v34  ;;  %v3522_v5 = vsub.f32 %v12025_v2, %v18023_v13  ;;  %v18026_v13 = vand.u32 4294901760, %v12042_v18 }
 0x27d   :  { %3362 = vmatpush1.msra.mxu0 %v11996_v48  ;;  %3482 = vmatpush1.msra.mxu1 %v3481_v19  ;;  %v3528_v19 = vsub.f32 %v12034_v10, %v18024_v0  ;;  %18025 = vst [vmem:[#allocation74_spill] sm:$0xff] %v12110_v41  ;;  %v16714_v0 = vand.u32 4294901760, %v12098_v43 }
 0x27e   :  { %3364 = vmatprep.subr.mxu0 %v11994_v52  ;;  %3488 = vmatprep.subr.mxu1 %v3487_v9  ;;  %v3511_v9 = vand.u32 4294901760, %v3510_v36  ;;  %v3534_v34 = vsub.f32 %v12042_v18, %v18026_v13  ;;  %v3517_v36 = vand.u32 4294901760, %v3516_v40  ;;  %v3523_v13 = vand.u32 4294901760, %v3522_v5 }
 0x27f   :  { %3366 = vmatpush1.msra.mxu0 %v12015_v47  ;;  %3494 = vmatpush1.msra.mxu1 %v3493_v26  ;;  %v12123_v26 = vsub.f32 %v11630_v53, %v11859_v50  ;;  %v18028_v53 = vand.u32 4294901760, %v12065_v11  ;;  %v12149_v5 = vsub.f32 %v11804_v57, %v11842_v21 }
 0x280   :  { %3368 = vmatprep.subr.mxu0 %v12022_v45  ;;  %3500 = vmatprep.subr.mxu1 %v3499_v17  ;;  %v12132_v17 = vsub.f32 %v11816_v20, %v11852_v51  ;;  %v3529_v20 = vand.u32 4294901760, %v3528_v19  ;;  %v12158_v19 = vsub.f32 %v11462_v33, %v11832_v30  ;;  %v3570_v33 = vsub.f32 %v12098_v43, %v16714_v0 }
 0x281   :  { %3370 = vmatpush1.msra.mxu0 %v12031_v59  ;;  %3506 = vmatpush1.msra.mxu1 %v3505_v60  ;;  %v3546_v56 = vsub.f32 %v12065_v11, %v18028_v53  ;;  %v18029_v59 = vand.u32 4294901760, %v12074_v38  ;;  %v12145_v60 = vsub.f32 %v3333_v16, %v12110_v41  ;;  %v18030_v53 = vand.u32 4294901760, %v12012_v54 }
 0x282   :  { %3372 = vmatprep.subr.mxu0 %v11972_v61  ;;  %3512 = vmatprep.subr.mxu1 %v3511_v9  ;;  %v3535_v9 = vand.u32 4294901760, %v3534_v34  ;;  %v3541_v34 = vand.u32 4294901760, %v3540_v39 }
 0x283   :  { %v3552_v40 = vsub.f32 %v12074_v38, %v18029_v59  ;;  %3374 = vmatpush1.msra.mxu0 %v11992_v4  ;;  %3518 = vmatpush1.msra.mxu1 %v3517_v36  ;;  %v3558_v1 = vsub.f32 %v12012_v54, %v18030_v53  ;;  %v18031_v36 = vand.u32 4294901760, %v12089_v55  ;;  %v3547_v53 = vand.u32 4294901760, %v3546_v56  ;;  %v18033_v56 = vld [vmem:[#allocation24_spill] sm:$0xff] }
 0x284   :  { %3376 = vmatprep.subr.mxu0 %v11954_v49  ;;  %3524 = vmatprep.subr.mxu1 %v3523_v13  ;;  %v12167_v13 = vsub.f32 %v11785_v8, %v11824_v23  ;;  %v18032_v59 = vand.u32 4294901760, %v11872_v27  ;;  %v18043_v4 = vld [vmem:[#allocation72_spill] sm:$0xff] }
 0x285   :  { %v3564_v57 = vsub.f32 %v12089_v55, %v18031_v36  ;;  %3378 = vmatpush1.msra.mxu0 %v11837_v22  ;;  %3530 = vmatpush1.msra.mxu1 %v3529_v20  ;;  %v3553_v8 = vand.u32 4294901760, %v3552_v40  ;;  %v3559_v0 = vand.u32 4294901760, %v3558_v1  ;;  %v18034_v36 = vand.u32 4294901760, %v12114_v58  ;;  %v18038_v22 = vld [vmem:[#allocation8_spill] sm:$0xff] }
 0x286   :  { %3380 = vmatprep.subr.mxu0 %v11920_v35  ;;  %3536 = vmatprep.subr.mxu1 %v3535_v9  ;;  %v3576_v39 = vsub.f32 %v11872_v27, %v18032_v59  ;;  %v12182_v9 = vsub.f32 %v18033_v56, %v11794_v62  ;;  %v18035_v35 = vld [vmem:[#allocation68_spill] sm:$0xff]  ;;  %v18037_v20 = vand.u32 4294901760, %v12123_v26 }
 0x287   :  { %3382 = vmatpush1.msra.mxu0 %v11859_v50  ;;  %3542 = vmatpush1.msra.mxu1 %v3541_v34  ;;  %v3582_v16 = vsub.f32 %v12114_v58, %v18034_v36  ;;  %v18036_v50 = vld [vmem:[#allocation44_spill] sm:$0xff]  ;;  %v3565_v1 = vand.u32 4294901760, %v3564_v57  ;;  %v3571_v36 = vand.u32 4294901760, %v3570_v33 }
 0x288   :  { %3384 = vmatprep.subr.mxu0 %v11852_v51  ;;  %3548 = vmatprep.subr.mxu1 %v3547_v53  ;;  %v12191_v34 = vsub.f32 %v18036_v50, %v18035_v35  ;;  %v3588_v56 = vsub.f32 %v12123_v26, %v18037_v20  ;;  %v18039_v53 = vld [vmem:[#allocation65_spill] sm:$0xff]  ;;  %v18042_v50 = vand.u32 4294901760, %v12132_v17 }
 0x289   :  { %3386 = vmatpush1.msra.mxu0 %v18038_v22  ;;  %3554 = vmatpush1.msra.mxu1 %v3553_v8  ;;  %v18040_v51 = vld [vmem:[#allocation41_spill] sm:$0xff]  ;;  %v18044_v22 = vand.u32 4294901760, %v11849_v63  ;;  %v18045_v8 = vand.u32 4294901760, %v12145_v60  ;;  %v3583_v33 = vand.u32 4294901760, %v3582_v16 }
 0x28a   :  { %v12200_v49 = vsub.f32 %v18040_v51, %v18039_v53  ;;  %3388 = vmatprep.subr.mxu0 %v11842_v21  ;;  %3560 = vmatprep.subr.mxu1 %v3559_v0  ;;  %v3594_v40 = vsub.f32 %v12132_v17, %v18042_v50  ;;  %v3577_v51 = vand.u32 4294901760, %v3576_v39  ;;  %v18046_v50 = vand.u32 4294901760, %v12149_v5 }
 0x28b   :  { %v3600_v57 = vsub.f32 %v11849_v63, %v18044_v22  ;;  %3390 = vmatpush1.msra.mxu0 %v11832_v30  ;;  %3566 = vmatpush1.msra.mxu1 %v3565_v1  ;;  %v3439_v0 = vsub.f32 %v12145_v60, %v18045_v8  ;;  %v18047_v30 = vand.u32 4294901760, %v12158_v19  ;;  %v18048_v1 = vld [vmem:[#allocation18_spill] sm:$0xff]  ;;  %v3589_v8 = vand.u32 4294901760, %v3588_v56 }
 0x28c   :  { %18041 = vst [vmem:[#allocation12_spill] sm:$0xff] %v12200_v49  ;;  %3392 = vmatprep.subr.mxu0 %v11824_v23  ;;  %3572 = vmatprep.subr.mxu1 %v3571_v36  ;;  %v3606_v20 = vsub.f32 %v12149_v5, %v18046_v50  ;;  %v3595_v16 = vand.u32 4294901760, %v3594_v40  ;;  %v18049_v36 = vand.u32 4294901760, %v12167_v13  ;;  %v18050_v23 = vld [vmem:[#allocation30_spill] sm:$0xff]  ;;  %v18051_v21 = vand.u32 4294901760, %v18043_v4  ;;  %v3311_v40 = vld [vmem:[%s16447_s2 + $0x8] sm:$0xff] }
 0x28d   :  { %v3612_v39 = vsub.f32 %v12158_v19, %v18047_v30  ;;  %3394 = vmatpush1.msra.mxu0 %v18048_v1  ;;  %3578 = vmatpush1.msra.mxu1 %v3577_v51  ;;  %v3601_v56 = vand.u32 4294901760, %v3600_v57  ;;  %v3440_v51 = vand.u32 4294901760, %v3439_v0  ;;  %v18053_v59 = vand.u32 4294901760, %v12191_v34 }
 0x28e   :  { %3396 = vmatprep.subr.mxu0 %v11794_v62  ;;  %3584 = vmatprep.subr.mxu1 %v3583_v33  ;;  %v3618_v50 = vsub.f32 %v12167_v13, %v18049_v36  ;;  %v3624_v30 = vsub.f32 %v18043_v4, %v18051_v21  ;;  %v3607_v33 = vand.u32 4294901760, %v3606_v20  ;;  %v18052_v36 = vand.u32 4294901760, %v12182_v9 }
 0x28f   :  { %3398 = vmatpush1.msra.mxu0 %v18035_v35  ;;  %3590 = vmatpush1.msra.mxu1 %v3589_v8  ;;  %v3636_v21 = vsub.f32 %v12191_v34, %v18053_v59  ;;  %v18054_v35 = vld [vmem:[#allocation38_spill] sm:$0xff]  ;;  %v3613_v57 = vand.u32 4294901760, %v3612_v39  ;;  %v18055_v8 = vand.u32 4294901760, %v12200_v49 }
 0x290   :  { %3400 = vmatprep.subr.mxu0 %v18039_v53  ;;  %3596 = vmatprep.subr.mxu1 %v3595_v16  ;;  %v3630_v22 = vsub.f32 %v12182_v9, %v18052_v36  ;;  %v3619_v0 = vand.u32 4294901760, %v3618_v50  ;;  %v3336_v16 = vsel %vm3331_vm0, %v3311_v40, 0  ;;  %v18056_v36 = vand.u32 4294901760, %v18050_v23  ;;  %v3312_v50 = vld [vmem:[%s16447_s2 + $0x10] sm:$0xff] }
 0x291   :  { %3402 = vmatpush1.msra.mxu0 %v18054_v35  ;;  %3602 = vmatpush1.msra.mxu1 %v3601_v56  ;;  %v3642_v20 = vsub.f32 %v12200_v49, %v18055_v8  ;;  %v3625_v59 = vand.u32 4294901760, %v3624_v30  ;;  %v3637_v56 = vand.u32 4294901760, %v3636_v21  ;;  %v12259_v40 = vand.u32 4294901760, %v3336_v16 }
 0x292   :  { %3608 = vmatprep.subr.mxu1 %v3607_v33  ;;  %3709 = vmatprep.subr.mxu0 %v12006_v31  ;;  %v3648_v53 = vsub.f32 %v18050_v23, %v18056_v36  ;;  %v3631_v39 = vand.u32 4294901760, %v3630_v22  ;;  %v3339_v22 = vsel %vm3331_vm0, %v3312_v50, 0  ;;  %v18061_v50 = vld [vmem:[#allocation35_spill] sm:$0xff] }
 0x293   :  { %3441 = vmatmul.mubr.f32.vlgmr.msra.gmra.mxu0 %v3440_v51  ;;  %3614 = vmatpush1.msra.mxu1 %v3613_v57  ;;  %18057 = vst [vmem:[#allocation75_spill] sm:$0xff] %v12259_v40  ;;  %v3643_v51 = vand.u32 4294901760, %v3642_v20  ;;  %v12267_v33 = vsub.f32 %v3336_v16, %v12259_v40  ;;  %v12271_v21 = vand.u32 4294901760, %v3339_v22  ;;  %v18059_v16 = vld [vmem:[#allocation10_spill] sm:$0xff] }
 0x294   :  { %3712 = vmatpush1.msra.mxu0 %v11987_v46  ;;  %3620 = vmatprep.subr.mxu1 %v3619_v0  ;;  %v3649_v30 = vand.u32 4294901760, %v3648_v53  ;;  %v18058_v0 = vld [vmem:[#allocation13_spill] sm:$0xff] }
 0x295   :  { %3715 = vmatprep.subr.mxu0 %v11964_v28  ;;  %3626 = vmatpush1.msra.mxu1 %v3625_v59  ;;  %v16736_v53 = vand.u32 4294901760, %v12267_v33  ;;  %v12283_v57 = vsub.f32 %v3339_v22, %v12271_v21  ;;  %v18064_v22 = vld [vmem:[#allocation25_spill] sm:$0xff] }
 0x296   :  { %3718 = vmatpush1.msra.mxu0 %v11979_v24  ;;  %3632 = vmatprep.subr.mxu1 %v3631_v39  ;;  %v18060_v39 = vmov 0.0  }
 0x297   :  { %3721 = vmatprep.subr.mxu0 %v11984_v32  ;;  %3638 = vmatpush1.msra.mxu1 %v3637_v56  ;;  %v3450_v8 = vsub.f32 %v12267_v33, %v16736_v53  ;;  %v16735_v20 = vand.u32 4294901760, %v12283_v57  ;;  %v18070_v53 = vand.u32 4294901760, %v12006_v31  ;;  %v18075_v31 = vand.u32 4294901760, %v11979_v24 }
 0x298   :  { %3724 = vmatpush1.msra.mxu0 %v11999_v44  ;;  %3644 = vmatprep.subr.mxu1 %v3643_v51  ;;  %v18062_v51 = vld [vmem:[#allocation14_spill] sm:$0xff]  ;;  %v18081_v24 = vand.u32 4294901760, %v12018_v29 }
 0x299   :  { %3727 = vmatprep.subr.mxu0 %v12002_v14  ;;  %3650 = vmatpush1.msra.mxu1 %v3649_v30  ;;  %v3451_v36 = vand.u32 4294901760, %v3450_v8  ;;  %v3461_v59 = vsub.f32 %v12283_v57, %v16735_v20  ;;  %v18063_v30 = vld [vmem:[#allocation69_spill] sm:$0xff]  ;;  %v18065_v8 = vld [vmem:[#allocation60_spill] sm:$0xff] }
 0x29a   :  { %3730 = vmatpush1.msra.mxu0 %v12018_v29  ;;  %3685 = vmatmul.mubr.f32.vlgmr.msra.gmra.mxu1 %v12110_v41  ;;  %v18069_v20 = vld [vmem:[#allocation20_spill] sm:$0xff]  ;;  %v18071_v41 = vld [vmem:[#allocation73_spill] sm:$0xff]  ;;  %v18086_v29 = vand.u32 4294901760, %v12054_v15 }
 0x29b   :  { %3733 = vmatprep.subr.mxu0 %v12025_v2  ;;  %3857 = vmatprep.subr.mxu1 %v11989_v42  ;;  %v3462_v56 = vand.u32 4294901760, %v3461_v59  ;;  %v18067_v59 = vld [vmem:[#allocation63_spill] sm:$0xff] }
 0x29c   :  { %3736 = vmatpush1.msra.mxu0 %v12034_v10  ;;  %3859 = vmatpush1.msra.mxu1 %v11966_v37 }
 0x29d   :  { %3739 = vmatprep.subr.mxu0 %v12042_v18  ;;  %3861 = vmatprep.subr.mxu1 %v11948_v12 }
 0x29e   :  { %3742 = vmatpush1.msra.mxu0 %v12054_v15  ;;  %3863 = vmatpush1.msra.mxu1 %v11944_v25  ;;  %v18107_v15 = vld [vmem:[#allocation30_spill] sm:$0xff] }
 0x29f   :  { %3745 = vmatprep.subr.mxu0 %v12065_v11  ;;  %3865 = vmatprep.subr.mxu1 %v11946_v6 }
 0x2a0   :  { %3748 = vmatpush1.msra.mxu0 %v12074_v38  ;;  %3867 = vmatpush1.msra.mxu1 %v11959_v3 }
 0x2a1   :  { %3751 = vmatprep.subr.mxu0 %v12012_v54  ;;  %3869 = vmatprep.subr.mxu1 %v18058_v0 }
 0x2a2   :  { %3754 = vmatpush1.msra.mxu0 %v12089_v55  ;;  %3871 = vmatpush1.msra.mxu1 %v11976_v7 }
 0x2a3   :  { %3757 = vmatprep.subr.mxu0 %v12098_v43  ;;  %3873 = vmatprep.subr.mxu1 %v18059_v16 }
 0x2a4   :  { %3760 = vmatpush1.msra.mxu0 %v11872_v27  ;;  %3875 = vmatpush1.msra.mxu1 %v11996_v48 }
 0x2a5   :  { %3763 = vmatprep.subr.mxu0 %v12114_v58  ;;  %3877 = vmatprep.subr.mxu1 %v11994_v52 }
 0x2a6   :  { %3766 = vmatpush1.msra.mxu0 %v12123_v26  ;;  %3879 = vmatpush1.msra.mxu1 %v12015_v47 }
 0x2a7   :  { %3769 = vmatprep.subr.mxu0 %v12132_v17  ;;  %3881 = vmatprep.subr.mxu1 %v12022_v45 }
 0x2a8   :  { %3446 = vmatprep.mubr.f32.mxu0 %v18060_v39  ;;  %3772 = vmatpush1.msra.mxu0 %v11849_v63 }
 0x2a9   :  { %3883 = vmatpush1.msra.mxu1 %v18061_v50  ;;  %3452 = vmatmul.mubr.f32.gmra.mxu0 %v3451_v36  ;;  %v18066_v36 = vld [vmem:[#allocation71_spill] sm:$0xff] }
 0x2aa   :  { %3775 = vmatprep.subr.mxu0 %v12149_v5  ;;  %3885 = vmatprep.subr.mxu1 %v11972_v61 }
 0x2ab   :  { %3778 = vmatpush1.msra.mxu0 %v12158_v19  ;;  %3887 = vmatpush1.msra.mxu1 %v18062_v51 }
 0x2ac   :  { %3781 = vmatprep.subr.mxu0 %v12167_v13  ;;  %3889 = vmatprep.subr.mxu1 %v18063_v30 }
 0x2ad   :  { %3457 = vmatprep.mubr.f32.mxu0 %v18060_v39  ;;  %3784 = vmatpush1.msra.mxu0 %v18043_v4 }
 0x2ae   :  { %3891 = vmatpush1.msra.mxu1 %v18064_v22  ;;  %3463 = vmatmul.mubr.f32.gmra.mxu0 %v3462_v56  ;;  %v18068_v56 = vld [vmem:[#allocation8_spill] sm:$0xff] }
 0x2af   :  { %3787 = vmatprep.subr.mxu0 %v12182_v9  ;;  %3893 = vmatprep.subr.mxu1 %v18065_v8 }
 0x2b0   :  { %3790 = vmatpush1.msra.mxu0 %v12191_v34  ;;  %3895 = vmatpush1.msra.mxu1 %v18066_v36 }
 0x2b1   :  { %3690 = vmatprep.mubr.f32.mxu1 %v18060_v39  ;;  %3793 = vmatprep.subr.mxu0 %v12200_v49  ;;  %v18072_v49 = vand.u32 4294901760, %v11987_v46  ;;  %v18077_v46 = vld [vmem:[#allocation68_spill] sm:$0xff] }
 0x2b2   :  { %3897 = vmatprep.subr.mxu1 %v18067_v59  ;;  %3692 = vmatmul.mubr.f32.gmra.mxu1 %v12259_v40  ;;  %v18073_v40 = vld [vmem:[#allocation53_spill] sm:$0xff] }
 0x2b3   :  { %3796 = vmatpush1.msra.mxu0 %v18050_v23  ;;  %3829 = vmatprep.mubr.f32.mxu0 %v18060_v39  ;;  %v18074_v23 = vand.u32 4294901760, %v11964_v28  ;;  %v18079_v28 = vld [vmem:[#allocation65_spill] sm:$0xff] }
 0x2b4   :  { %3899 = vmatpush1.msra.mxu1 %v18068_v56  ;;  %3832 = vmatmul.mubr.f32.vlgmr.msra.gmra.mxu0 %v12145_v60 }
 0x2b5   :  { %3901 = vmatprep.subr.mxu1 %v18069_v20  ;;  %3981 = vmatprep.subr.mxu0 %v18070_v53  ;;  %v18080_v53 = vand.u32 4294901760, %v12002_v14  ;;  %v18084_v14 = vand.u32 4294901760, %v12034_v10  ;;  %v18105_v10 = vld [vmem:[#allocation12_spill] sm:$0xff] }
 0x2b6   :  { %3903 = vmatpush1.msra.mxu1 %v18071_v41  ;;  %3985 = vmatpush1.msra.mxu0 %v18072_v49  ;;  %v18076_v49 = vand.u32 4294901760, %v11984_v32  ;;  %v18082_v32 = vand.u32 4294901760, %v12145_v60 }
 0x2b7   :  { %3697 = vmatprep.mubr.f32.mxu1 %v18060_v39  ;;  %3905 = vmatprep.subr.mxu1 %v18073_v40 }
 0x2b8   :  { %3989 = vmatprep.subr.mxu0 %v18074_v23  ;;  %3699 = vmatmul.mubr.f32.gmra.mxu1 %v12271_v21  ;;  %v18078_v23 = vand.u32 4294901760, %v11999_v44  ;;  %v18083_v44 = vand.u32 4294901760, %v12025_v2  ;;  %v18087_v2 = vand.u32 4294901760, %v12065_v11  ;;  %v18092_v11 = vand.u32 4294901760, %v12098_v43  ;;  %v18110_v43 = vld [vmem:[#allocation75_spill] sm:$0xff] }
 0x2b9   :  { %3837 = vmatprep.mubr.f32.mxu0 %v18060_v39  ;;  %3907 = vmatpush1.msra.mxu1 %v18048_v1 }
 0x2ba   :  { %3993 = vmatpush1.msra.mxu0 %v18075_v31  ;;  %3909 = vmatprep.subr.mxu1 %v11794_v62  ;;  %v18085_v31 = vand.u32 4294901760, %v12042_v18  ;;  %v18106_v18 = vand.u32 4294901760, %v18105_v10 }
 0x2bb   :  { %3840 = vmatmul.mubr.f32.gmra.mxu0 %v12267_v33  ;;  %3997 = vmatprep.subr.mxu0 %v18076_v49 }
 0x2bc   :  { %3911 = vmatpush1.msra.mxu1 %v18077_v46  ;;  %4001 = vmatpush1.msra.mxu0 %v18078_v23 }
 0x2bd   :  { %3913 = vmatprep.subr.mxu1 %v18079_v28  ;;  %4005 = vmatprep.subr.mxu0 %v18080_v53 }
 0x2be   :  { %3845 = vmatprep.mubr.f32.mxu0 %v18060_v39  ;;  %3915 = vmatpush1.msra.mxu1 %v18054_v35 }
 0x2bf   :  { %3948 = vmatprep.mubr.f32.mxu1 %v18060_v39  ;;  %4009 = vmatpush1.msra.mxu0 %v18081_v24 }
 0x2c0   :  { %3848 = vmatmul.mubr.f32.gmra.mxu0 %v12283_v57  ;;  %3952 = vmatmul.mubr.f32.vlgmr.msra.gmra.mxu1 %v18082_v32 }
 0x2c1   :  { %4013 = vmatprep.subr.mxu0 %v18083_v44  ;;  %4155 = vmatprep.subr.mxu1 %v11989_v42  ;;  %v18088_v42 = vand.u32 4294901760, %v12267_v33  ;;  %v4310_v33 = vld [vmem:[#allocation4 + $0xc0] sm:$0xff] }
 0x2c2   :  { %4017 = vmatpush1.msra.mxu0 %v18084_v14  ;;  %4157 = vmatpush1.msra.mxu1 %v11966_v37  ;;  %v18089_v37 = vand.u32 4294901760, %v12074_v38  ;;  %v18097_v38 = vand.u32 4294901760, %v12132_v17  ;;  %v4315_v17 = vld [vmem:[#allocation4 + $0xe8] sm:$0xff] }
 0x2c3   :  { %4021 = vmatprep.subr.mxu0 %v18085_v31  ;;  %4159 = vmatprep.subr.mxu1 %v11948_v12  ;;  %v18090_v12 = vand.u32 4294901760, %v12012_v54  ;;  %v18095_v54 = vand.u32 4294901760, %v12114_v58  ;;  %v4317_v58 = vld [vmem:[#allocation4 + $0xf8] sm:$0xff] }
 0x2c4   :  { %3957 = vmatprep.mubr.f32.mxu1 %v18060_v39  ;;  %4025 = vmatpush1.msra.mxu0 %v18086_v29  ;;  %v12450_v60 = vand.u32 4294901760, %v4317_v58 }
 0x2c5   :  { %4161 = vmatpush1.msra.mxu1 %v11944_v25  ;;  %4029 = vmatprep.subr.mxu0 %v18087_v2  ;;  %v18091_v25 = vand.u32 4294901760, %v12089_v55  ;;  %v18109_v55 = vld [vmem:[#allocation74_spill] sm:$0xff] }
 0x2c6   :  { %3961 = vmatmul.mubr.f32.gmra.mxu1 %v18088_v42  ;;  %4163 = vmatprep.subr.mxu1 %v11946_v6  ;;  %v18093_v6 = vand.u32 4294901760, %v12283_v57  ;;  %18111 = vst [vmem:[#allocation50_spill] sm:$0xff] %v12450_v60  ;;  %v12465_v57 = vsub.f32 %v4317_v58, %v12450_v60  ;;  %v4304_v58 = vld [vmem:[#allocation4 + $0x90] sm:$0xff] }
 0x2c7   :  { %4033 = vmatpush1.msra.mxu0 %v18089_v37  ;;  %4165 = vmatpush1.msra.mxu1 %v11959_v3  ;;  %v18094_v3 = vand.u32 4294901760, %v11872_v27  ;;  %v18098_v27 = vand.u32 4294901760, %v11849_v63  ;;  %v18102_v63 = vand.u32 4294901760, %v18043_v4  ;;  %v18108_v4 = vand.u32 4294901760, %v18107_v15 }
 0x2c8   :  { %4037 = vmatprep.subr.mxu0 %v18090_v12  ;;  %4167 = vmatprep.subr.mxu1 %v18058_v0  ;;  %18112 = vst [vmem:[#allocation22_spill] sm:$0xff] %v12465_v57 }
 0x2c9   :  { %3966 = vmatprep.mubr.f32.mxu1 %v18060_v39  ;;  %4041 = vmatpush1.msra.mxu0 %v18091_v25 }
 0x2ca   :  { %4169 = vmatpush1.msra.mxu1 %v11976_v7  ;;  %4045 = vmatprep.subr.mxu0 %v18092_v11  ;;  %v18096_v7 = vand.u32 4294901760, %v12123_v26  ;;  %v4316_v26 = vld [vmem:[#allocation4 + $0xf0] sm:$0xff] }
 0x2cb   :  { %3970 = vmatmul.mubr.f32.gmra.mxu1 %v18093_v6  ;;  %4171 = vmatprep.subr.mxu1 %v18059_v16 }
 0x2cc   :  { %4049 = vmatpush1.msra.mxu0 %v18094_v3  ;;  %4173 = vmatpush1.msra.mxu1 %v11996_v48  ;;  %v18099_v48 = vand.u32 4294901760, %v12149_v5  ;;  %v12452_v5 = vand.u32 4294901760, %v4316_v26 }
 0x2cd   :  { %4053 = vmatprep.subr.mxu0 %v18095_v54  ;;  %4175 = vmatprep.subr.mxu1 %v11994_v52  ;;  %v18100_v52 = vand.u32 4294901760, %v12158_v19  ;;  %v4314_v19 = vld [vmem:[#allocation4 + $0xe0] sm:$0xff]  ;;  %v4309_v54 = vld [vmem:[#allocation4 + $0xb8] sm:$0xff] }
 0x2ce   :  { %4057 = vmatpush1.msra.mxu0 %v18096_v7  ;;  %4177 = vmatpush1.msra.mxu1 %v12015_v47  ;;  %v18101_v47 = vand.u32 4294901760, %v12167_v13  ;;  %v4313_v13 = vld [vmem:[#allocation4 + $0xd8] sm:$0xff]  ;;  %v12468_v0 = vsub.f32 %v4316_v26, %v12452_v5  ;;  %v4308_v7 = vld [vmem:[#allocation4 + $0xb0] sm:$0xff] }
 0x2cf   :  { %4061 = vmatprep.subr.mxu0 %v18097_v38  ;;  %4179 = vmatprep.subr.mxu1 %v12022_v45  ;;  %v18103_v45 = vand.u32 4294901760, %v12182_v9  ;;  %v4312_v9 = vld [vmem:[#allocation4 + $0xd0] sm:$0xff] }
 0x2d0   :  { %4065 = vmatpush1.msra.mxu0 %v18098_v27  ;;  %4181 = vmatpush1.msra.mxu1 %v18061_v50  ;;  %v12539_v27 = vand.u32 4294901760, %v4309_v54 }
 0x2d1   :  { %4069 = vmatprep.subr.mxu0 %v18099_v48  ;;  %4183 = vmatprep.subr.mxu1 %v11972_v61  ;;  %v18104_v61 = vand.u32 4294901760, %v12191_v34  ;;  %v12457_v34 = vand.u32 4294901760, %v4314_v19  ;;  %v12541_v48 = vand.u32 4294901760, %v4308_v7 }
 0x2d2   :  { %4073 = vmatpush1.msra.mxu0 %v18100_v52  ;;  %4185 = vmatpush1.msra.mxu1 %v18062_v51 }
 0x2d3   :  { %4077 = vmatprep.subr.mxu0 %v18101_v47  ;;  %4187 = vmatprep.subr.mxu1 %v18063_v30  ;;  %v12479_v50 = vsub.f32 %v4314_v19, %v12457_v34  ;;  %v4307_v47 = vld [vmem:[#allocation4 + $0xa8] sm:$0xff] }
 0x2d4   :  { %4081 = vmatpush1.msra.mxu0 %v18102_v63  ;;  %4189 = vmatpush1.msra.mxu1 %v18064_v22  ;;  %v12487_v22 = vand.u32 4294901760, %v4310_v33  ;;  %v4306_v63 = vld [vmem:[#allocation4 + $0xa0] sm:$0xff]  ;;  %v12549_v10 = vand.u32 4294901760, %v4307_v47  ;;  %v4303_v19 = vld [vmem:[#allocation4 + $0x88] sm:$0xff] }
 0x2d5   :  { %4085 = vmatprep.subr.mxu0 %v18103_v45  ;;  %4191 = vmatprep.subr.mxu1 %v18065_v8  ;;  %v16761_v8 = vand.u32 4294901760, %v12465_v57  ;;  %v12544_v45 = vsub.f32 %v4309_v54, %v12539_v27 }
 0x2d6   :  { %4089 = vmatpush1.msra.mxu0 %v18104_v61  ;;  %4193 = vmatpush1.msra.mxu1 %v18066_v36  ;;  %v16759_v36 = vand.u32 4294901760, %v12468_v0  ;;  %v12502_v23 = vsub.f32 %v4310_v33, %v12487_v22  ;;  %v12547_v61 = vsub.f32 %v4308_v7, %v12541_v48  ;;  %v4299_v7 = vld [vmem:[#allocation4 + $0x68] sm:$0xff] }
 0x2d7   :  { %4093 = vmatprep.subr.mxu0 %v18106_v18  ;;  %4195 = vmatprep.subr.mxu1 %v18067_v59  ;;  %18115 = vst [vmem:[#allocation28_spill] sm:$0xff] %v12544_v45  ;;  %v4305_v18 = vld [vmem:[#allocation4 + $0x98] sm:$0xff]  ;;  %v16749_v15 = vand.u32 4294901760, %v12544_v45 }
 0x2d8   :  { %4097 = vmatpush1.msra.mxu0 %v18108_v4  ;;  %4130 = vmatprep.mubr.f32.mxu0 %v18060_v39  ;;  %18114 = vst [vmem:[#allocation51_spill] sm:$0xff] %v12502_v23  ;;  %v4536_v53 = vsub.f32 %v12468_v0, %v16759_v36  ;;  %v16751_v29 = vand.u32 4294901760, %v12502_v23  ;;  %18116 = vst [vmem:[#allocation55_spill] sm:$0xff] %v12547_v61  ;;  %v16747_v4 = vand.u32 4294901760, %v12547_v61  ;;  %v12564_v26 = vand.u32 4294901760, %v4305_v18 }
 0x2d9   :  { %4197 = vmatpush1.msra.mxu1 %v18068_v56  ;;  %4132 = vmatmul.mubr.f32.vlgmr.msra.gmra.mxu0 %v18109_v55  ;;  %v16757_v56 = vand.u32 4294901760, %v12479_v50 }
 0x2da   :  { %4199 = vmatprep.subr.mxu1 %v18069_v20  ;;  %4137 = vmatprep.mubr.f32.mxu0 %v18060_v39  ;;  %v4537_v42 = vand.u32 4294901760, %v4536_v53  ;;  %v4572_v11 = vsub.f32 %v12502_v23, %v16751_v29  ;;  %v12578_v53 = vsub.f32 %v4305_v18, %v12564_v26  ;;  %v4298_v18 = vld [vmem:[#allocation4 + $0x60] sm:$0xff] }
 0x2db   :  { %4201 = vmatpush1.msra.mxu1 %v18071_v41  ;;  %4246 = vmatprep.mubr.f32.mxu1 %v18060_v39  ;;  %v12454_v41 = vand.u32 4294901760, %v4315_v17  ;;  %v4548_v44 = vsub.f32 %v12479_v50, %v16757_v56 }
 0x2dc   :  { %4203 = vmatprep.subr.mxu1 %v18073_v40  ;;  %v12461_v40 = vand.u32 4294901760, %v4312_v9  ;;  %4351 = vmatprep.subr.mxu0 %v12450_v60  ;;  %v4573_v52 = vand.u32 4294901760, %v4572_v11  ;;  %18119 = vst [vmem:[#allocation45_spill] sm:$0xff] %v12578_v53  ;;  %v16743_v11 = vand.u32 4294901760, %v12578_v53 }
 0x2dd   :  { %4205 = vmatpush1.msra.mxu1 %v18048_v1  ;;  %4139 = vmatmul.mubr.f32.gmra.mxu0 %v18110_v43  ;;  %v12459_v1 = vand.u32 4294901760, %v4313_v13  ;;  %v12471_v20 = vsub.f32 %v4315_v17, %v12454_v41  ;;  %v4549_v25 = vand.u32 4294901760, %v4548_v44  ;;  %v12566_v17 = vand.u32 4294901760, %v4304_v58 }
 0x2de   :  { %4207 = vmatprep.subr.mxu1 %v11794_v62  ;;  %4144 = vmatprep.mubr.f32.mxu0 %v18060_v39  ;;  %v4311_v62 = vld [vmem:[#allocation4 + $0xc8] sm:$0xff]  ;;  %v12485_v30 = vsub.f32 %v4312_v9, %v12461_v40  ;;  %v4584_v9 = vsub.f32 %v12547_v61, %v16747_v4  ;;  %v12583_v44 = vand.u32 4294901760, %v4303_v19 }
 0x2df   :  { %4209 = vmatpush1.msra.mxu1 %v18077_v46  ;;  %v12473_v16 = vand.u32 4294901760, %v4311_v62  ;;  %v12482_v51 = vsub.f32 %v4313_v13, %v12459_v1  ;;  %4353 = vmatpush1.msra.mxu0 %v12452_v5  ;;  %v4578_v13 = vsub.f32 %v12544_v45, %v16749_v15 }
 0x2e0   :  { %4211 = vmatprep.subr.mxu1 %v18079_v28  ;;  %v16753_v46 = vand.u32 4294901760, %v12485_v30  ;;  %4355 = vmatprep.subr.mxu0 %v12454_v41  ;;  %v4530_v28 = vsub.f32 %v12465_v57, %v16761_v8 }
 0x2e1   :  { %4213 = vmatpush1.msra.mxu1 %v18054_v35  ;;  %4146 = vmatmul.mubr.f32.gmra.mxu0 %v12271_v21  ;;  %v16758_v35 = vand.u32 4294901760, %v12471_v20  ;;  %v12494_v59 = vsub.f32 %v4311_v62, %v12473_v16  ;;  %v16755_v49 = vand.u32 4294901760, %v12482_v51 }
 0x2e2   :  { %4248 = vmatmul.mubr.f32.vlgmr.msra.gmra.mxu1 %v18109_v55  ;;  %4357 = vmatpush1.msra.mxu0 %v12457_v34  ;;  %v4560_v31 = vsub.f32 %v12485_v30, %v16753_v46  ;;  %v4531_v2 = vand.u32 4294901760, %v4530_v28  ;;  %v12558_v55 = vsub.f32 %v4307_v47, %v12549_v10  ;;  %v4302_v28 = vld [vmem:[#allocation4 + $0x80] sm:$0xff] }
 0x2e3   :  { %18113 = vst [vmem:[#allocation23_spill] sm:$0xff] %v12494_v59  ;;  %4253 = vmatprep.mubr.f32.mxu1 %v18060_v39  ;;  %v4542_v24 = vsub.f32 %v12471_v20, %v16758_v35  ;;  %v16752_v32 = vand.u32 4294901760, %v12494_v59  ;;  %v4554_v14 = vsub.f32 %v12482_v51, %v16755_v49  ;;  %4359 = vmatprep.subr.mxu0 %v12459_v1  ;;  %v4292_v49 = vld [vmem:[#allocation4 + $0x30] sm:$0xff] }
 0x2e4   :  { %4361 = vmatpush1.msra.mxu0 %v12461_v40  ;;  %4532 = vmatprep.subr.mxu1 %v4531_v2  ;;  %v4561_v3 = vand.u32 4294901760, %v4560_v31  ;;  %18117 = vst [vmem:[#allocation57_spill] sm:$0xff] %v12558_v55  ;;  %v16746_v62 = vand.u32 4294901760, %v12558_v55  ;;  %v4301_v31 = vld [vmem:[#allocation4 + $0x78] sm:$0xff]  ;;  %v4579_v2 = vand.u32 4294901760, %v4578_v13 }
 0x2e5   :  { %v4543_v37 = vand.u32 4294901760, %v4542_v24  ;;  %v4566_v12 = vsub.f32 %v12494_v59, %v16752_v32  ;;  %4363 = vmatprep.subr.mxu0 %v12473_v16  ;;  %v4555_v6 = vand.u32 4294901760, %v4554_v14  ;;  %4538 = vmatpush1.msra.mxu1 %v4537_v42  ;;  %v12581_v24 = vsub.f32 %v4304_v58, %v12566_v17 }
 0x2e6   :  { %4255 = vmatmul.mubr.f32.gmra.mxu1 %v18110_v43  ;;  %4365 = vmatpush1.msra.mxu0 %v12487_v22  ;;  %v12585_v14 = vand.u32 4294901760, %v4302_v28  ;;  %v4585_v42 = vand.u32 4294901760, %v4584_v9  ;;  %v12604_v47 = vand.u32 4294901760, %v4301_v31  ;;  %v4602_v58 = vsub.f32 %v12578_v53, %v16743_v11  ;;  %v4296_v11 = vld [vmem:[#allocation4 + $0x50] sm:$0xff] }
 0x2e7   :  { %4260 = vmatprep.mubr.f32.mxu1 %v18060_v39  ;;  %4544 = vmatprep.subr.mxu1 %v4543_v37  ;;  %v4567_v38 = vand.u32 4294901760, %v4566_v12  ;;  %18120 = vst [vmem:[#allocation39_spill] sm:$0xff] %v12581_v24  ;;  %v4590_v37 = vsub.f32 %v12558_v55, %v16746_v62  ;;  %v12646_v29 = vand.u32 4294901760, %v4296_v11  ;;  %v12686_v39 = vand.u32 4294901760, %v4292_v49 }
 0x2e8   :  { %4550 = vmatpush1.msra.mxu1 %v4549_v25  ;;  %4367 = vmatprep.subr.mxu0 %v12539_v27  ;;  %18121 = vst [vmem:[#allocation27_spill] sm:$0xff] %v12585_v14  ;;  %v4300_v25 = vld [vmem:[#allocation4 + $0x70] sm:$0xff]  ;;  %v12601_v54 = vsub.f32 %v4302_v28, %v12585_v14  ;;  %18124 = vst [vmem:[#allocation37_spill] sm:$0xff] %v12604_v47  ;;  %v12618_v28 = vsub.f32 %v4301_v31, %v12604_v47 }
 0x2e9   :  { %4556 = vmatprep.subr.mxu1 %v4555_v6  ;;  %4369 = vmatpush1.msra.mxu0 %v12541_v48  ;;  %v16744_v6 = vand.u32 4294901760, %v12581_v24  ;;  %18133 = vst [vmem:[#allocation48_spill] sm:$0xff] %v12646_v29  ;;  %18141 = vst [vmem:[#allocation31_spill] sm:$0xff] %v12686_v39 }
 0x2ea   :  { %4262 = vmatmul.mubr.f32.gmra.mxu1 %v12271_v21  ;;  %v12551_v21 = vand.u32 4294901760, %v4306_v63  ;;  %4371 = vmatprep.subr.mxu0 %v12549_v10  ;;  %18123 = vst [vmem:[#allocation11_spill] sm:$0xff] %v12601_v54  ;;  %v16750_v9 = vand.u32 4294901760, %v12601_v54  ;;  %18126 = vst [vmem:[#allocation42_spill] sm:$0xff] %v12618_v28 }
 0x2eb   :  { %4562 = vmatpush1.msra.mxu1 %v4561_v3  ;;  %v12598_v3 = vsub.f32 %v4303_v19, %v12583_v44  ;;  %v4608_v19 = vsub.f32 %v12581_v24, %v16744_v6  ;;  %v4603_v6 = vand.u32 4294901760, %v4602_v58  ;;  %v4295_v58 = vld [vmem:[#allocation4 + $0x48] sm:$0xff] }
 0x2ec   :  { %4568 = vmatprep.subr.mxu1 %v4567_v38  ;;  %v12561_v43 = vsub.f32 %v4306_v63, %v12551_v21  ;;  %4373 = vmatpush1.msra.mxu0 %v12551_v21  ;;  %v4591_v38 = vand.u32 4294901760, %v4590_v37  ;;  %v12606_v63 = vand.u32 4294901760, %v4300_v25  ;;  %v12625_v37 = vand.u32 4294901760, %v4298_v18 }
 0x2ed   :  { %4574 = vmatpush1.msra.mxu1 %v4573_v52  ;;  %4375 = vmatprep.subr.mxu0 %v12564_v26  ;;  %18122 = vst [vmem:[#allocation32_spill] sm:$0xff] %v12598_v3  ;;  %v16748_v13 = vand.u32 4294901760, %v12598_v3  ;;  %v4620_v31 = vsub.f32 %v12601_v54, %v16750_v9  ;;  %v3329_v54 = vpop.permute.xlu1 %3328 }
 0x2ee   :  { %18118 = vst [vmem:[#allocation33_spill] sm:$0xff] %v12561_v43  ;;  %v16745_v33 = vand.u32 4294901760, %v12561_v43  ;;  %4377 = vmatpush1.msra.mxu0 %v12566_v17  ;;  %4580 = vmatprep.subr.mxu1 %v4579_v2  ;;  %18125 = vst [vmem:[#allocation40_spill] sm:$0xff] %v12606_v63  ;;  %v12621_v2 = vsub.f32 %v4300_v25, %v12606_v63  ;;  %v16754_v25 = vand.u32 4294901760, %v12618_v28 }
 0x2ef   :  { %4379 = vmatprep.subr.mxu0 %v12583_v44  ;;  %4586 = vmatpush1.msra.mxu1 %v4585_v42  ;;  %v12623_v42 = vand.u32 4294901760, %v4299_v7  ;;  %18129 = vst [vmem:[#allocation58_spill] sm:$0xff] %v12625_v37  ;;  %v4621_v15 = vand.u32 4294901760, %v4620_v31  ;;  %v12661_v31 = vsub.f32 %v4296_v11, %v12646_v29 }
 0x2f0   :  { %v4596_v12 = vsub.f32 %v12561_v43, %v16745_v33  ;;  %4381 = vmatpush1.msra.mxu0 %v12585_v14  ;;  %4592 = vmatprep.subr.mxu1 %v4591_v38  ;;  %18127 = vst [vmem:[#allocation19_spill] sm:$0xff] %v12621_v2  ;;  %v4609_v33 = vand.u32 4294901760, %v4608_v19  ;;  %v4614_v38 = vsub.f32 %v12598_v3, %v16748_v13  ;;  %v16756_v62 = vand.u32 4294901760, %v12621_v2  ;;  %v4294_v19 = vld [vmem:[#allocation4 + $0x40] sm:$0xff] }
 0x2f1   :  { %18128 = vst [vmem:[#allocation43_spill] sm:$0xff] %v12623_v42  ;;  %4383 = vmatprep.subr.mxu0 %v12604_v47  ;;  %v12638_v4 = vsub.f32 %v4299_v7, %v12623_v42  ;;  %v4626_v7 = vsub.f32 %v12618_v28, %v16754_v25  ;;  %18135 = vst [vmem:[#allocation29_spill] sm:$0xff] %v12661_v31  ;;  %v12665_v46 = vand.u32 4294901760, %v4294_v19  ;;  %v4293_v25 = vld [vmem:[#allocation4 + $0x38] sm:$0xff]  ;;  %v16771_v35 = vand.u32 4294901760, %v12661_v31 }
 0x2f2   :  { %v4597_v52 = vand.u32 4294901760, %v4596_v12  ;;  %v4297_v12 = vld [vmem:[#allocation4 + $0x58] sm:$0xff]  ;;  %4385 = vmatpush1.msra.mxu0 %v12606_v63  ;;  %v4615_v13 = vand.u32 4294901760, %v4614_v38 }
 0x2f3   :  { %18130 = vst [vmem:[#allocation62_spill] sm:$0xff] %v12638_v4  ;;  %4387 = vmatprep.subr.mxu0 %v12623_v42  ;;  %v12644_v9 = vand.u32 4294901760, %v4297_v12  ;;  %v16760_v32 = vand.u32 4294901760, %v12638_v4  ;;  %18137 = vst [vmem:[#allocation49_spill] sm:$0xff] %v12665_v46 }
 0x2f4   :  { %4598 = vmatpush1.msra.mxu1 %v4597_v52  ;;  %v12641_v52 = vsub.f32 %v4298_v18, %v12625_v37  ;;  %4389 = vmatpush1.msra.mxu0 %v12625_v37  ;;  %v4632_v18 = vsub.f32 %v12621_v2, %v16756_v62  ;;  %v4627_v62 = vand.u32 4294901760, %v4626_v7  ;;  %v4291_v7 = vld [vmem:[#allocation4 + $0x28] sm:$0xff] }
 0x2f5   :  { %4604 = vmatprep.subr.mxu1 %v4603_v6  ;;  %18132 = vst [vmem:[#allocation54_spill] sm:$0xff] %v12644_v9  ;;  %v12658_v38 = vsub.f32 %v4297_v12, %v12644_v9  ;;  %4391 = vmatprep.subr.mxu0 %v12644_v9 }
 0x2f6   :  { %18131 = vst [vmem:[#allocation16_spill] sm:$0xff] %v12641_v52  ;;  %4610 = vmatpush1.msra.mxu1 %v4609_v33  ;;  %v16762_v6 = vand.u32 4294901760, %v12641_v52  ;;  %v12663_v33 = vand.u32 4294901760, %v4295_v58  ;;  %v4633_v56 = vand.u32 4294901760, %v4632_v18  ;;  %4393 = vmatpush1.msra.mxu0 %v12646_v29  ;;  %v4290_v18 = vld [vmem:[#allocation4 + $0x20] sm:$0xff] }
 0x2f7   :  { %4616 = vmatprep.subr.mxu1 %v4615_v13  ;;  %18134 = vst [vmem:[#allocation46_spill] sm:$0xff] %v12658_v38  ;;  %v4638_v13 = vsub.f32 %v12638_v4, %v16760_v32  ;;  %v16768_v12 = vand.u32 4294901760, %v12658_v38  ;;  %v12705_v4 = vand.u32 4294901760, %v4290_v18 }
 0x2f8   :  { %18136 = vst [vmem:[#allocation64_spill] sm:$0xff] %v12663_v33  ;;  %4622 = vmatpush1.msra.mxu1 %v4621_v15  ;;  %v4644_v11 = vsub.f32 %v12641_v52, %v16762_v6  ;;  %v12678_v36 = vsub.f32 %v4295_v58, %v12663_v33  ;;  %v12681_v15 = vsub.f32 %v4294_v19, %v12665_v46  ;;  %v12684_v6 = vand.u32 4294901760, %v4293_v25 }
 0x2f9   :  { %4395 = vmatprep.subr.mxu0 %v12663_v33  ;;  %4628 = vmatprep.subr.mxu1 %v4627_v62  ;;  %v4639_v32 = vand.u32 4294901760, %v4638_v13  ;;  %v4650_v58 = vsub.f32 %v12658_v38, %v16768_v12  ;;  %v4656_v19 = vsub.f32 %v12661_v31, %v16771_v35  ;;  %18145 = vst [vmem:[#allocation15_spill] sm:$0xff] %v12705_v4  ;;  %v4289_v12 = vld [vmem:[#allocation4 + $0x18] sm:$0xff]  ;;  %v4288_v38 = vld [vmem:[#allocation4 + $0x10] sm:$0xff] }
 0x2fa   :  { %18138 = vst [vmem:[#allocation9_spill] sm:$0xff] %v12678_v36  ;;  %18139 = vst [vmem:[#allocation59_spill] sm:$0xff] %v12681_v15  ;;  %v4645_v8 = vand.u32 4294901760, %v4644_v11  ;;  %4397 = vmatpush1.msra.mxu0 %v12665_v46  ;;  %4634 = vmatpush1.msra.mxu1 %v4633_v56  ;;  %v12698_v13 = vsub.f32 %v4293_v25, %v12684_v6  ;;  %v12701_v11 = vsub.f32 %v4292_v49, %v12686_v39 }
 0x2fb   :  { %18140 = vst [vmem:[#allocation70_spill] sm:$0xff] %v12684_v6  ;;  %4640 = vmatprep.subr.mxu1 %v4639_v32  ;;  %v12703_v56 = vand.u32 4294901760, %v4291_v7  ;;  %4399 = vmatprep.subr.mxu0 %v12684_v6  ;;  %v4651_v35 = vand.u32 4294901760, %v4650_v58  ;;  %v4657_v52 = vand.u32 4294901760, %v4656_v19  ;;  %v18146_v62 = vand.u32 4294901760, %v12678_v36  ;;  %v4287_v58 = vld [vmem:[#allocation4 + $0x8] sm:$0xff] }
 0x2fc   :  { %18142 = vst [vmem:[#allocation66_spill] sm:$0xff] %v12698_v13  ;;  %18143 = vst [vmem:[#allocation61_spill] sm:$0xff] %v12701_v11  ;;  %4646 = vmatpush1.msra.mxu1 %v4645_v8  ;;  %v18147_v25 = vand.u32 4294901760, %v12681_v15  ;;  %4401 = vmatpush1.msra.mxu0 %v12686_v39  ;;  %v16786_v31 = vand.u32 4294901760, %v12698_v13  ;;  %v16789_v2 = vand.u32 4294901760, %v12701_v11  ;;  %v12721_v8 = vsub.f32 %v4290_v18, %v12705_v4  ;;  %v4286_v19 = vld [vmem:[#allocation4] sm:$0xff] }
 0x2fd   :  { %18144 = vst [vmem:[#allocation67_spill] sm:$0xff] %v12703_v56  ;;  %v4662_v32 = vsub.f32 %v12678_v36, %v18146_v62  ;;  %v12718_v28 = vsub.f32 %v4291_v7, %v12703_v56  ;;  %4403 = vmatprep.subr.mxu0 %v12703_v56  ;;  %4652 = vmatprep.subr.mxu1 %v4651_v35 }
 0x2fe   :  { %v4668_v49 = vsub.f32 %v12681_v15, %v18147_v25  ;;  %18149 = vst [vmem:[#allocation36_spill] sm:$0xff] %v12721_v8  ;;  %v12724_v25 = vand.u32 4294901760, %v4289_v12  ;;  %v12726_v15 = vand.u32 4294901760, %v4288_v38  ;;  %4405 = vmatpush1.msra.mxu0 %v12705_v4  ;;  %4658 = vmatpush1.msra.mxu1 %v4657_v52  ;;  %v4674_v7 = vsub.f32 %v12698_v13, %v16786_v31  ;;  %v4349_v31 = vld [vmem:[#allocation4 + $0x1f8] sm:$0xff]  ;;  %v4348_v13 = vld [vmem:[#allocation4 + $0x1f0] sm:$0xff] }
 0x2ff   :  { %18148 = vst [vmem:[#allocation21_spill] sm:$0xff] %v12718_v28  ;;  %v4663_v62 = vand.u32 4294901760, %v4662_v32  ;;  %v4680_v18 = vsub.f32 %v12701_v11, %v16789_v2  ;;  %v12743_v52 = vand.u32 4294901760, %v4287_v58  ;;  %v12745_v4 = vand.u32 4294901760, %v4286_v19 }
 0x300   :  { %v4669_v36 = vand.u32 4294901760, %v4668_v49  ;;  %18150 = vst [vmem:[#allocation26_spill] sm:$0xff] %v12724_v25  ;;  %18151 = vst [vmem:[#allocation47_spill] sm:$0xff] %v12726_v15  ;;  %v12738_v32 = vsub.f32 %v4289_v12, %v12724_v25  ;;  %v12741_v49 = vsub.f32 %v4288_v38, %v12726_v15  ;;  %4407 = vmatprep.subr.mxu0 %v12724_v25  ;;  %v4675_v2 = vand.u32 4294901760, %v4674_v7  ;;  %v4347_v7 = vld [vmem:[#allocation4 + $0x1e8] sm:$0xff] }
 0x301   :  { %4664 = vmatprep.subr.mxu1 %v4663_v62  ;;  %18154 = vst [vmem:[#allocation17_spill] sm:$0xff] %v12743_v52  ;;  %18155 = vst [vmem:[#allocation34_spill] sm:$0xff] %v12745_v4  ;;  %v4681_v56 = vand.u32 4294901760, %v4680_v18  ;;  %v18156_v35 = vand.u32 4294901760, %v12718_v28  ;;  %v18157_v12 = vand.u32 4294901760, %v12721_v8  ;;  %4409 = vmatpush1.msra.mxu0 %v12726_v15  ;;  %v12758_v6 = vsub.f32 %v4287_v58, %v12743_v52  ;;  %v4346_v18 = vld [vmem:[#allocation4 + $0x1e0] sm:$0xff] }
 0x302   :  { %18152 = vst [vmem:[#allocation56_spill] sm:$0xff] %v12738_v32  ;;  %18153 = vst [vmem:[#allocation52_spill] sm:$0xff] %v12741_v49  ;;  %4670 = vmatpush1.msra.mxu1 %v4669_v36  ;;  %v16804_v11 = vand.u32 4294901760, %v12738_v32  ;;  %v16807_v39 = vand.u32 4294901760, %v12741_v49  ;;  %v12761_v36 = vsub.f32 %v4286_v19, %v12745_v4  ;;  %4411 = vmatprep.subr.mxu0 %v12743_v52 }
 0x303   :  { %v4686_v62 = vsub.f32 %v12718_v28, %v18156_v35  ;;  %v4692_v38 = vsub.f32 %v12721_v8, %v18157_v12  ;;  %18158 = vst [vmem:[#allocation24_spill] sm:$0xff] %v12758_v6  ;;  %4676 = vmatprep.subr.mxu1 %v4675_v2  ;;  %v12764_v12 = vand.u32 4294901760, %v4349_v31  ;;  %v12766_v8 = vand.u32 4294901760, %v4348_v13  ;;  %4413 = vmatpush1.msra.mxu0 %v12745_v4 }
 0x304   :  { %18159 = vst [vmem:[#allocation44_spill] sm:$0xff] %v12761_v36  ;;  %4682 = vmatpush1.msra.mxu1 %v4681_v56  ;;  %v4698_v58 = vsub.f32 %v12738_v32, %v16804_v11  ;;  %v4704_v19 = vsub.f32 %v12741_v49, %v16807_v39  ;;  %v12783_v56 = vand.u32 4294901760, %v4347_v7  ;;  %v12785_v4 = vand.u32 4294901760, %v4346_v18  ;;  %v4345_v11 = vld [vmem:[#allocation4 + $0x1d8] sm:$0xff]  ;;  %v4344_v32 = vld [vmem:[#allocation4 + $0x1d0] sm:$0xff] }
 0x305   :  { %v4687_v35 = vand.u32 4294901760, %v4686_v62  ;;  %v4693_v28 = vand.u32 4294901760, %v4692_v38  ;;  %18160 = vst [vmem:[#allocation41_spill] sm:$0xff] %v12764_v12  ;;  %18161 = vst [vmem:[#allocation72_spill] sm:$0xff] %v12766_v8  ;;  %v12778_v62 = vsub.f32 %v4349_v31, %v12764_v12  ;;  %v12781_v38 = vsub.f32 %v4348_v13, %v12766_v8  ;;  %4415 = vmatprep.subr.mxu0 %v12764_v12 }
 0x306   :  { %18164 = vst [vmem:[#allocation13_spill] sm:$0xff] %v12783_v56  ;;  %18165 = vst [vmem:[#allocation10_spill] sm:$0xff] %v12785_v4  ;;  %v4699_v39 = vand.u32 4294901760, %v4698_v58  ;;  %v4705_v52 = vand.u32 4294901760, %v4704_v19  ;;  %v18166_v2 = vand.u32 4294901760, %v12758_v6  ;;  %v18167_v31 = vand.u32 4294901760, %v12761_v36  ;;  %4417 = vmatpush2.msra.mxu0 %v12766_v8 }
 0x307   :  { %4688 = vmatprep.subr.mxu1 %v4687_v35  ;;  %18162 = vst [vmem:[#allocation18_spill] sm:$0xff] %v12778_v62  ;;  %18163 = vst [vmem:[#allocation38_spill] sm:$0xff] %v12781_v38  ;;  %v16822_v49 = vand.u32 4294901760, %v12778_v62  ;;  %v16825_v15 = vand.u32 4294901760, %v12781_v38  ;;  %v12798_v25 = vsub.f32 %v4347_v7, %v12783_v56  ;;  %v4343_v58 = vld [vmem:[#allocation4 + $0x1c8] sm:$0xff]  ;;  %v4342_v19 = vld [vmem:[#allocation4 + $0x1c0] sm:$0xff]  ;;  %4419 = vmatprep.subr.mxu0 %v12783_v56 }
 0x308   :  { %4694 = vmatpush1.msra.mxu1 %v4693_v28  ;;  %v4710_v35 = vsub.f32 %v12758_v6, %v18166_v2  ;;  %v4716_v13 = vsub.f32 %v12761_v36, %v18167_v31  ;;  %v12801_v28 = vsub.f32 %v4346_v18, %v12785_v4  ;;  %v12804_v31 = vand.u32 4294901760, %v4345_v11  ;;  %4421 = vmatpush2.msra.mxu0 %v12785_v4 }
 0x309   :  { %18168 = vst [vmem:[#allocation35_spill] sm:$0xff] %v12798_v25  ;;  %4700 = vmatprep.subr.mxu1 %v4699_v39  ;;  %v12806_v36 = vand.u32 4294901760, %v4344_v32  ;;  %v4722_v7 = vsub.f32 %v12778_v62, %v16822_v49  ;;  %v4728_v18 = vsub.f32 %v12781_v38, %v16825_v15  ;;  %v12825_v4 = vand.u32 4294901760, %v4342_v19  ;;  %v4341_v49 = vld [vmem:[#allocation4 + $0x1b8] sm:$0xff]  ;;  %v4340_v62 = vld [vmem:[#allocation4 + $0x1b0] sm:$0xff] }
 0x30a   :  { %18169 = vst [vmem:[#allocation14_spill] sm:$0xff] %v12801_v28  ;;  %v4711_v2 = vand.u32 4294901760, %v4710_v35  ;;  %v4717_v6 = vand.u32 4294901760, %v4716_v13  ;;  %18170 = vst [vmem:[#allocation69_spill] sm:$0xff] %v12804_v31  ;;  %4706 = vmatpush1.msra.mxu1 %v4705_v52  ;;  %v12818_v35 = vsub.f32 %v4345_v11, %v12804_v31  ;;  %v12823_v52 = vand.u32 4294901760, %v4343_v58  ;;  %4423 = vmatprep.subr.mxu0 %v12804_v31 }
 0x30b   :  { %18171 = vst [vmem:[#allocation25_spill] sm:$0xff] %v12806_v36  ;;  %v12821_v13 = vsub.f32 %v4344_v32, %v12806_v36  ;;  %18175 = vst [vmem:[#allocation8_spill] sm:$0xff] %v12825_v4  ;;  %v4723_v15 = vand.u32 4294901760, %v4722_v7  ;;  %v4729_v56 = vand.u32 4294901760, %v4728_v18  ;;  %v18176_v39 = vand.u32 4294901760, %v12798_v25  ;;  %4425 = vmatpush2.msra.mxu0 %v12806_v36  ;;  %v4339_v7 = vld [vmem:[#allocation4 + $0x1a8] sm:$0xff] }
 0x30c   :  { %4712 = vmatprep.subr.mxu1 %v4711_v2  ;;  %18172 = vst [vmem:[#allocation60_spill] sm:$0xff] %v12818_v35  ;;  %18174 = vst [vmem:[#allocation63_spill] sm:$0xff] %v12823_v52  ;;  %v18177_v11 = vand.u32 4294901760, %v12801_v28  ;;  %v16840_v38 = vand.u32 4294901760, %v12818_v35  ;;  %v12838_v12 = vsub.f32 %v4343_v58, %v12823_v52  ;;  %v4338_v18 = vld [vmem:[#allocation4 + $0x1a0] sm:$0xff]  ;;  %4427 = vmatprep.subr.mxu0 %v12823_v52 }
 0x30d   :  { %18173 = vst [vmem:[#allocation71_spill] sm:$0xff] %v12821_v13  ;;  %4718 = vmatpush1.msra.mxu1 %v4717_v6  ;;  %v4734_v2 = vsub.f32 %v12798_v25, %v18176_v39  ;;  %v16843_v8 = vand.u32 4294901760, %v12821_v13  ;;  %v12841_v6 = vsub.f32 %v4342_v19, %v12825_v4  ;;  %4429 = vmatpush2.msra.mxu0 %v12825_v4  ;;  %v12865_v4 = vand.u32 4294901760, %v4338_v18 }
 0x30e   :  { %v4740_v32 = vsub.f32 %v12801_v28, %v18177_v11  ;;  %18178 = vst [vmem:[#allocation20_spill] sm:$0xff] %v12838_v12  ;;  %4724 = vmatprep.subr.mxu1 %v4723_v15  ;;  %v12844_v11 = vand.u32 4294901760, %v4341_v49  ;;  %v12846_v28 = vand.u32 4294901760, %v4340_v62  ;;  %v4746_v58 = vsub.f32 %v12818_v35, %v16840_v38  ;;  %v4337_v38 = vld [vmem:[#allocation4 + $0x198] sm:$0xff]  ;;  %v4336_v35 = vld [vmem:[#allocation4 + $0x190] sm:$0xff] }
 0x30f   :  { %18179 = vst [vmem:[#allocation73_spill] sm:$0xff] %v12841_v6  ;;  %v4735_v39 = vand.u32 4294901760, %v4734_v2  ;;  %4730 = vmatpush2.msra.mxu1 %v4729_v56  ;;  %v4752_v19 = vsub.f32 %v12821_v13, %v16843_v8  ;;  %v12863_v56 = vand.u32 4294901760, %v4339_v7  ;;  %18185 = vst [vmem:[#allocation74_spill] sm:$0xff] %v12865_v4  ;;  %v18186_v15 = vand.u32 4294901760, %v12838_v12 }
 0x310   :  { %v4741_v25 = vand.u32 4294901760, %v4740_v32  ;;  %18180 = vst [vmem:[#allocation53_spill] sm:$0xff] %v12844_v11  ;;  %18181 = vst [vmem:[#allocation68_spill] sm:$0xff] %v12846_v28  ;;  %v12858_v2 = vsub.f32 %v4341_v49, %v12844_v11  ;;  %v12861_v32 = vsub.f32 %v4340_v62, %v12846_v28  ;;  %4431 = vmatprep.subr.mxu0 %v12844_v11  ;;  %v4747_v8 = vand.u32 4294901760, %v4746_v58  ;;  %v4335_v58 = vld [vmem:[#allocation4 + $0x188] sm:$0xff] }
 0x311   :  { %4736 = vmatprep.subr.mxu1 %v4735_v39  ;;  %18184 = vst [vmem:[#allocation30_spill] sm:$0xff] %v12863_v56  ;;  %v4753_v52 = vand.u32 4294901760, %v4752_v19  ;;  %v4758_v39 = vsub.f32 %v12838_v12, %v18186_v15  ;;  %v18187_v49 = vand.u32 4294901760, %v12841_v6  ;;  %4433 = vmatpush2.msra.mxu0 %v12846_v28  ;;  %v12878_v31 = vsub.f32 %v4339_v7, %v12863_v56  ;;  %v4334_v19 = vld [vmem:[#allocation4 + $0x180] sm:$0xff] }
 0x312   :  { %18182 = vst [vmem:[#allocation65_spill] sm:$0xff] %v12858_v2  ;;  %18183 = vst [vmem:[#allocation12_spill] sm:$0xff] %v12861_v32  ;;  %4742 = vmatpush2.msra.mxu1 %v4741_v25  ;;  %v16858_v13 = vand.u32 4294901760, %v12858_v2  ;;  %v16861_v36 = vand.u32 4294901760, %v12861_v32  ;;  %v12881_v25 = vsub.f32 %v4338_v18, %v12865_v4  ;;  %4435 = vmatprep.subr.mxu0 %v12863_v56 }
 0x313   :  { %v4764_v62 = vsub.f32 %v12841_v6, %v18187_v49  ;;  %18188 = vst [vmem:[#allocation75_spill] sm:$0xff] %v12878_v31  ;;  %4748 = vmatprep.subr.mxu1 %v4747_v8  ;;  %v4759_v15 = vand.u32 4294901760, %v4758_v39  ;;  %v12884_v49 = vand.u32 4294901760, %v4337_v38  ;;  %v12886_v6 = vand.u32 4294901760, %v4336_v35  ;;  %4437 = vmatpush2.msra.mxu0 %v12865_v4 }
 0x314   :  { %18189 = vst [vmem:[#allocation76_spill] sm:$0xff] %v12881_v25  ;;  %4754 = vmatpush2.msra.mxu1 %v4753_v52  ;;  %v4770_v7 = vsub.f32 %v12858_v2, %v16858_v13  ;;  %v4776_v18 = vsub.f32 %v12861_v32, %v16861_v36  ;;  %v12903_v52 = vand.u32 4294901760, %v4335_v58  ;;  %v12905_v4 = vand.u32 4294901760, %v4334_v19  ;;  %v4333_v13 = vld [vmem:[#allocation4 + $0x178] sm:$0xff]  ;;  %v4332_v2 = vld [vmem:[#allocation4 + $0x170] sm:$0xff] }
 0x315   :  { %v4765_v12 = vand.u32 4294901760, %v4764_v62  ;;  %18190 = vst [vmem:[#allocation77_spill] sm:$0xff] %v12884_v49  ;;  %18191 = vst [vmem:[#allocation78_spill] sm:$0xff] %v12886_v6  ;;  %4760 = vmatprep.subr.mxu1 %v4759_v15  ;;  %v12898_v39 = vsub.f32 %v4337_v38, %v12884_v49  ;;  %v12901_v62 = vsub.f32 %v4336_v35, %v12886_v6  ;;  %4439 = vmatprep.subr.mxu0 %v12884_v49 }
 0x316   :  { %18194 = vst [vmem:[#allocation81_spill] sm:$0xff] %v12903_v52  ;;  %18195 = vst [vmem:[#allocation82_spill] sm:$0xff] %v12905_v4  ;;  %v4771_v36 = vand.u32 4294901760, %v4770_v7  ;;  %v4777_v56 = vand.u32 4294901760, %v4776_v18  ;;  %v18196_v8 = vand.u32 4294901760, %v12878_v31  ;;  %v18197_v38 = vand.u32 4294901760, %v12881_v25  ;;  %4441 = vmatpush2.msra.mxu0 %v12886_v6 }
 0x317   :  { %18192 = vst [vmem:[#allocation79_spill] sm:$0xff] %v12898_v39  ;;  %18193 = vst [vmem:[#allocation80_spill] sm:$0xff] %v12901_v62  ;;  %4766 = vmatpush2.msra.mxu1 %v4765_v12  ;;  %v16876_v32 = vand.u32 4294901760, %v12898_v39  ;;  %v16879_v28 = vand.u32 4294901760, %v12901_v62  ;;  %v12918_v11 = vsub.f32 %v4335_v58, %v12903_v52  ;;  %v12921_v12 = vsub.f32 %v4334_v19, %v12905_v4  ;;  %v4331_v7 = vld [vmem:[#allocation4 + $0x168] sm:$0xff]  ;;  %v4330_v18 = vld [vmem:[#allocation4 + $0x160] sm:$0xff] }
 0x318   :  { %v4782_v15 = vsub.f32 %v12878_v31, %v18196_v8  ;;  %v4788_v35 = vsub.f32 %v12881_v25, %v18197_v38  ;;  %4443 = vmatprep.subr.mxu0 %v12903_v52  ;;  %4772 = vmatprep.subr.mxu1 %v4771_v36  ;;  %v12924_v38 = vand.u32 4294901760, %v4333_v13  ;;  %v12926_v25 = vand.u32 4294901760, %v4332_v2 }
 0x319   :  { %18198 = vst [vmem:[#allocation83_spill] sm:$0xff] %v12918_v11  ;;  %18199 = vst [vmem:[#allocation84_spill] sm:$0xff] %v12921_v12  ;;  %4445 = vmatpush2.msra.mxu0 %v12905_v4  ;;  %4778 = vmatpush2.msra.mxu1 %v4777_v56  ;;  %v4794_v58 = vsub.f32 %v12898_v39, %v16876_v32  ;;  %v4800_v19 = vsub.f32 %v12901_v62, %v16879_v28  ;;  %v12943_v56 = vand.u32 4294901760, %v4331_v7  ;;  %v4329_v32 = vld [vmem:[#allocation4 + $0x158] sm:$0xff]  ;;  %v4328_v39 = vld [vmem:[#allocation4 + $0x150] sm:$0xff] }
 0x31a   :  { %v4783_v8 = vand.u32 4294901760, %v4782_v15  ;;  %v4789_v31 = vand.u32 4294901760, %v4788_v35  ;;  %18200 = vst [vmem:[#allocation85_spill] sm:$0xff] %v12924_v38  ;;  %18201 = vst [vmem:[#allocation86_spill] sm:$0xff] %v12926_v25  ;;  %v12938_v15 = vsub.f32 %v4333_v13, %v12924_v38  ;;  %v12941_v35 = vsub.f32 %v4332_v2, %v12926_v25  ;;  %4447 = vmatprep.subr.mxu0 %v12924_v38 }
 0x31b   :  { %18204 = vst [vmem:[#allocation89_spill] sm:$0xff] %v12943_v56  ;;  %v12945_v4 = vand.u32 4294901760, %v4330_v18  ;;  %v4795_v28 = vand.u32 4294901760, %v4794_v58  ;;  %v4801_v52 = vand.u32 4294901760, %v4800_v19  ;;  %v18206_v36 = vand.u32 4294901760, %v12918_v11  ;;  %4449 = vmatpush2.msra.mxu0 %v12926_v25  ;;  %v4327_v58 = vld [vmem:[#allocation4 + $0x148] sm:$0xff] }
 0x31c   :  { %4784 = vmatprep.subr.mxu1 %v4783_v8  ;;  %18202 = vst [vmem:[#allocation87_spill] sm:$0xff] %v12938_v15  ;;  %18203 = vst [vmem:[#allocation88_spill] sm:$0xff] %v12941_v35  ;;  %v18207_v13 = vand.u32 4294901760, %v12921_v12  ;;  %v16894_v62 = vand.u32 4294901760, %v12938_v15  ;;  %v16897_v6 = vand.u32 4294901760, %v12941_v35  ;;  %v12958_v49 = vsub.f32 %v4331_v7, %v12943_v56  ;;  %v4326_v19 = vld [vmem:[#allocation4 + $0x140] sm:$0xff]  ;;  %4451 = vmatprep.subr.mxu0 %v12943_v56 }
 0x31d   :  { %18205 = vst [vmem:[#allocation90_spill] sm:$0xff] %v12945_v4  ;;  %4790 = vmatpush2.msra.mxu1 %v4789_v31  ;;  %v4806_v8 = vsub.f32 %v12918_v11, %v18206_v36  ;;  %v12961_v31 = vsub.f32 %v4330_v18, %v12945_v4  ;;  %4453 = vmatpush2.msra.mxu0 %v12945_v4  ;;  %v12985_v4 = vand.u32 4294901760, %v4326_v19 }
 0x31e   :  { %v4812_v2 = vsub.f32 %v12921_v12, %v18207_v13  ;;  %18208 = vst [vmem:[#allocation91_spill] sm:$0xff] %v12958_v49  ;;  %4796 = vmatprep.subr.mxu1 %v4795_v28  ;;  %v12964_v13 = vand.u32 4294901760, %v4329_v32  ;;  %v12966_v12 = vand.u32 4294901760, %v4328_v39  ;;  %v4818_v7 = vsub.f32 %v12938_v15, %v16894_v62  ;;  %v4325_v62 = vld [vmem:[#allocation4 + $0x138] sm:$0xff]  ;;  %v4324_v15 = vld [vmem:[#allocation4 + $0x130] sm:$0xff] }
 0x31f   :  { %18209 = vst [vmem:[#allocation92_spill] sm:$0xff] %v12961_v31  ;;  %v4807_v36 = vand.u32 4294901760, %v4806_v8  ;;  %4802 = vmatpush2.msra.mxu1 %v4801_v52  ;;  %v4824_v18 = vsub.f32 %v12941_v35, %v16897_v6  ;;  %v12983_v52 = vand.u32 4294901760, %v4327_v58  ;;  %18215 = vst [vmem:[#allocation98_spill] sm:$0xff] %v12985_v4  ;;  %v18216_v28 = vand.u32 4294901760, %v12958_v49 }
 0x320   :  { %v4813_v11 = vand.u32 4294901760, %v4812_v2  ;;  %18210 = vst [vmem:[#allocation93_spill] sm:$0xff] %v12964_v13  ;;  %18211 = vst [vmem:[#allocation94_spill] sm:$0xff] %v12966_v12  ;;  %v12978_v8 = vsub.f32 %v4329_v32, %v12964_v13  ;;  %v12981_v2 = vsub.f32 %v4328_v39, %v12966_v12  ;;  %4455 = vmatprep.subr.mxu0 %v12964_v13  ;;  %v4819_v6 = vand.u32 4294901760, %v4818_v7  ;;  %v4323_v7 = vld [vmem:[#allocation4 + $0x128] sm:$0xff] }
 0x321   :  { %4808 = vmatprep.subr.mxu1 %v4807_v36  ;;  %18214 = vst [vmem:[#allocation97_spill] sm:$0xff] %v12983_v52  ;;  %v4825_v56 = vand.u32 4294901760, %v4824_v18  ;;  %v4830_v36 = vsub.f32 %v12958_v49, %v18216_v28  ;;  %v18217_v32 = vand.u32 4294901760, %v12961_v31  ;;  %4457 = vmatpush2.msra.mxu0 %v12966_v12  ;;  %v12998_v38 = vsub.f32 %v4327_v58, %v12983_v52  ;;  %v4322_v18 = vld [vmem:[#allocation4 + $0x120] sm:$0xff] }
 0x322   :  { %18212 = vst [vmem:[#allocation95_spill] sm:$0xff] %v12978_v8  ;;  %18213 = vst [vmem:[#allocation96_spill] sm:$0xff] %v12981_v2  ;;  %4814 = vmatpush2.msra.mxu1 %v4813_v11  ;;  %v16912_v35 = vand.u32 4294901760, %v12978_v8  ;;  %v16915_v25 = vand.u32 4294901760, %v12981_v2  ;;  %v13001_v11 = vsub.f32 %v4326_v19, %v12985_v4  ;;  %4459 = vmatprep.subr.mxu0 %v12983_v52 }
 0x323   :  { %v4836_v39 = vsub.f32 %v12961_v31, %v18217_v32  ;;  %18218 = vst [vmem:[#allocation99_spill] sm:$0xff] %v12998_v38  ;;  %4820 = vmatprep.subr.mxu1 %v4819_v6  ;;  %v4831_v28 = vand.u32 4294901760, %v4830_v36  ;;  %v13004_v32 = vand.u32 4294901760, %v4325_v62  ;;  %v13006_v31 = vand.u32 4294901760, %v4324_v15  ;;  %4461 = vmatpush2.msra.mxu0 %v12985_v4 }
 0x324   :  { %18219 = vst [vmem:[#allocation100_spill] sm:$0xff] %v13001_v11  ;;  %4826 = vmatpush2.msra.mxu1 %v4825_v56  ;;  %v4842_v58 = vsub.f32 %v12978_v8, %v16912_v35  ;;  %v4848_v19 = vsub.f32 %v12981_v2, %v16915_v25  ;;  %v13023_v56 = vand.u32 4294901760, %v4323_v7  ;;  %v13025_v4 = vand.u32 4294901760, %v4322_v18  ;;  %v4321_v35 = vld [vmem:[#allocation4 + $0x118] sm:$0xff]  ;;  %v4320_v8 = vld [vmem:[#allocation4 + $0x110] sm:$0xff] }
 0x325   :  { %v4837_v49 = vand.u32 4294901760, %v4836_v39  ;;  %18220 = vst [vmem:[#allocation101_spill] sm:$0xff] %v13004_v32  ;;  %18221 = vst [vmem:[#allocation102_spill] sm:$0xff] %v13006_v31  ;;  %4832 = vmatprep.subr.mxu1 %v4831_v28  ;;  %v13018_v36 = vsub.f32 %v4325_v62, %v13004_v32  ;;  %v13021_v39 = vsub.f32 %v4324_v15, %v13006_v31  ;;  %4463 = vmatprep.subr.mxu0 %v13004_v32 }
 0x326   :  { %18224 = vst [vmem:[#allocation105_spill] sm:$0xff] %v13023_v56  ;;  %18225 = vst [vmem:[#allocation106_spill] sm:$0xff] %v13025_v4  ;;  %v4843_v25 = vand.u32 4294901760, %v4842_v58  ;;  %v4849_v52 = vand.u32 4294901760, %v4848_v19  ;;  %v18226_v6 = vand.u32 4294901760, %v12998_v38  ;;  %v18227_v62 = vand.u32 4294901760, %v13001_v11  ;;  %4465 = vmatpush2.msra.mxu0 %v13006_v31 }
 0x327   :  { %18222 = vst [vmem:[#allocation103_spill] sm:$0xff] %v13018_v36  ;;  %18223 = vst [vmem:[#allocation104_spill] sm:$0xff] %v13021_v39  ;;  %4838 = vmatpush2.msra.mxu1 %v4837_v49  ;;  %v16930_v2 = vand.u32 4294901760, %v13018_v36  ;;  %v16931_v12 = vand.u32 4294901760, %v13021_v39  ;;  %v13038_v13 = vsub.f32 %v4323_v7, %v13023_v56  ;;  %v13041_v49 = vsub.f32 %v4322_v18, %v13025_v4  ;;  %v4319_v58 = vld [vmem:[#allocation4 + $0x108] sm:$0xff]  ;;  %v4318_v19 = vld [vmem:[#allocation4 + $0x100] sm:$0xff] }
 0x328   :  { %v4854_v28 = vsub.f32 %v12998_v38, %v18226_v6  ;;  %v4860_v15 = vsub.f32 %v13001_v11, %v18227_v62  ;;  %4467 = vmatprep.subr.mxu0 %v13023_v56  ;;  %4844 = vmatprep.subr.mxu1 %v4843_v25  ;;  %v13044_v62 = vand.u32 4294901760, %v4321_v35  ;;  %v13046_v11 = vand.u32 4294901760, %v4320_v8 }
 0x329   :  { %18228 = vst [vmem:[#allocation107_spill] sm:$0xff] %v13038_v13  ;;  %18229 = vst [vmem:[#allocation108_spill] sm:$0xff] %v13041_v49  ;;  %4469 = vmatpush2.msra.mxu0 %v13025_v4  ;;  %4850 = vmatpush2.msra.mxu1 %v4849_v52  ;;  %v4866_v7 = vsub.f32 %v13018_v36, %v16930_v2  ;;  %v4872_v18 = vsub.f32 %v13021_v39, %v16931_v12  ;;  %v16936_v56 = vand.u32 4294901760, %v13038_v13 }
 0x32a   :  { %v4855_v6 = vand.u32 4294901760, %v4854_v28  ;;  %v4861_v38 = vand.u32 4294901760, %v4860_v15  ;;  %18230 = vst [vmem:[#allocation109_spill] sm:$0xff] %v13044_v62  ;;  %18231 = vst [vmem:[#allocation110_spill] sm:$0xff] %v13046_v11  ;;  %v13058_v28 = vsub.f32 %v4321_v35, %v13044_v62  ;;  %v13061_v15 = vsub.f32 %v4320_v8, %v13046_v11  ;;  %4471 = vmatprep.subr.mxu0 %v13044_v62 }
 0x32b   :  { %v13063_v52 = vand.u32 4294901760, %v4319_v58  ;;  %v13065_v4 = vand.u32 4294901760, %v4318_v19  ;;  %v4867_v2 = vand.u32 4294901760, %v4866_v7  ;;  %v4873_v12 = vand.u32 4294901760, %v4872_v18  ;;  %4473 = vmatpush2.msra.mxu0 %v13046_v11 }
 0x32c   :  { %4856 = vmatprep.subr.mxu1 %v4855_v6  ;;  %18232 = vst [vmem:[#allocation111_spill] sm:$0xff] %v13058_v28  ;;  %18233 = vst [vmem:[#allocation112_spill] sm:$0xff] %v13061_v15  ;;  %v4878_v25 = vsub.f32 %v13038_v13, %v16936_v56  ;;  %v18236_v6 = vand.u32 4294901760, %v13041_v49  ;;  %v16938_v8 = vand.u32 4294901760, %v13058_v28  ;;  %v16937_v39 = vand.u32 4294901760, %v13061_v15 }
 0x32d   :  { %18234 = vst [vmem:[#allocation113_spill] sm:$0xff] %v13063_v52  ;;  %18235 = vst [vmem:[#allocation114_spill] sm:$0xff] %v13065_v4  ;;  %4862 = vmatpush2.msra.mxu1 %v4861_v38  ;;  %v13078_v36 = vsub.f32 %v4319_v58, %v13063_v52  ;;  %v13081_v38 = vsub.f32 %v4318_v19, %v13065_v4  ;;  %4475 = vmatprep.subr.mxu0 %v13063_v52 }
 0x32e   :  { %v4884_v35 = vsub.f32 %v13041_v49, %v18236_v6  ;;  %4868 = vmatprep.subr.mxu1 %v4867_v2  ;;  %v4879_v7 = vand.u32 4294901760, %v4878_v25  ;;  %4477 = vmatpush2.msra.mxu0 %v13065_v4  ;;  %v4890_v6 = vsub.f32 %v13058_v28, %v16938_v8  ;;  %v4896_v58 = vsub.f32 %v13061_v15, %v16937_v39 }
 0x32f   :  { %18237 = vst [vmem:[#allocation115_spill] sm:$0xff] %v13078_v36  ;;  %18238 = vst [vmem:[#allocation116_spill] sm:$0xff] %v13081_v38  ;;  %4874 = vmatpush2.msra.mxu1 %v4873_v12  ;;  %v16944_v56 = vand.u32 4294901760, %v13078_v36  ;;  %v16951_v19 = vand.u32 4294901760, %v13081_v38  ;;  %4938 = vmatprep.subr.mxu0 %v12465_v57 }
 0x330   :  { %v4885_v18 = vand.u32 4294901760, %v4884_v35  ;;  %4880 = vmatprep.subr.mxu1 %v4879_v7  ;;  %v4891_v2 = vand.u32 4294901760, %v4890_v6  ;;  %v4897_v25 = vand.u32 4294901760, %v4896_v58 }
 0x331   :  { %v4902_v12 = vsub.f32 %v13078_v36, %v16944_v56  ;;  %v4908_v35 = vsub.f32 %v13081_v38, %v16951_v19  ;;  %v3319_v38 = vpop.permute.xlu0 %3318 }
 0x332   :  { %4886 = vmatpush2.msra.mxu1 %v4885_v18 }
 0x333   :  { %4892 = vmatprep.subr.mxu1 %v4891_v2  ;;  %v4903_v39 = vand.u32 4294901760, %v4902_v12  ;;  %v4909_v8 = vand.u32 4294901760, %v4908_v35 }
 0x334   :  { %4898 = vmatpush2.msra.mxu1 %v4897_v25 }
 0x335   :  { %4904 = vmatprep.subr.mxu1 %v4903_v39  ;;  %v3324_v52 = vpop.permute.xlu0 %3323 }
 0x336   :  { %4910 = vmatpush2.msra.mxu1 %v4909_v8 }
 0x337   :  { %5160 = vmatprep.subr.mxu1 %v12450_v60 }
 0x353   :  { %v3442_v7 = vpop.f32.mrf.mxu0 }
 0x354   :  { %v3443_v11 = vadd.f32 %v3442_v7, %v3319_v38 }
 0x355   :  { %v3444_v18 = vpop.f32.mrf.mxu0 }
 0x356   :  { %v3445_v32 = vadd.f32 %v3444_v18, %v3319_v38 }
 0x35a   :  { %v3686_v58 = vpop.f32.mrf.mxu1 }
 0x35b   :  { %v3687_v3 = vadd.f32 %v3686_v58, %v3443_v11 }
 0x35c   :  { %v3688_v15 = vpop.f32.mrf.mxu1 }
 0x35d   :  { %v3689_v37 = vadd.f32 %v3688_v15, %v3445_v32 }
 0x369   :  { %v3453_v6 = vpop.f32.mrf.mxu0 }
 0x36a   :  { %v3454_v46 = vadd.f32 %v3453_v6, %v3324_v52 }
 0x36b   :  { %v3455_v57 = vpop.f32.mrf.mxu0 }
 0x36c   :  { %v3456_v24 = vadd.f32 %v3455_v57, %v3324_v52 }
 0x36e   :  { %v3464_v28 = vpop.f32.mrf.mxu0 }
 0x36f   :  { %v3465_v9 = vadd.f32 %v3464_v28, %v3329_v54 }
 0x370   :  { %v3466_v36 = vpop.f32.mrf.mxu0 }
 0x371   :  { %v3467_v7 = vadd.f32 %v3466_v36, %v3329_v54 }
 0x372   :  { %v3693_v56 = vpop.f32.mrf.mxu1 }
 0x373   :  { %v3694_v43 = vadd.f32 %v3693_v56, %v3454_v46 }
 0x374   :  { %v3695_v49 = vpop.f32.mrf.mxu1  ;;  %v3833_v13 = vpop.f32.mrf.mxu0 }
 0x375   :  { %v3834_v42 = vadd.f32 %v3833_v13, %v3687_v3  ;;  %v3696_v45 = vadd.f32 %v3695_v49, %v3456_v24 }
 0x376   :  { %v3835_v2 = vpop.f32.mrf.mxu0 }
 0x377   :  { %v3836_v61 = vadd.f32 %v3835_v2, %v3689_v37 }
 0x378   :  { %v3700_v19 = vpop.f32.mrf.mxu1 }
 0x379   :  { %v3701_v23 = vadd.f32 %v3700_v19, %v3465_v9 }
 0x37a   :  { %v3702_v12 = vpop.f32.mrf.mxu1 }
 0x37b   :  { %v3841_v35 = vpop.f32.mrf.mxu0  ;;  %v3703_v32 = vadd.f32 %v3702_v12, %v3467_v7 }
 0x37c   :  { %v3842_v38 = vadd.f32 %v3841_v35, %v3694_v43 }
 0x37d   :  { %v3843_v39 = vpop.f32.mrf.mxu0 }
 0x37e   :  { %v3844_v59 = vadd.f32 %v3843_v39, %v3696_v45 }
 0x380   :  { %v3953_v25 = vpop.f32.mrf.mxu1  ;;  %v3849_v60 = vpop.f32.mrf.mxu0 }
 0x381   :  { %v3954_v63 = vadd.f32 %v3953_v25, %v3834_v42  ;;  %v3850_v46 = vadd.f32 %v3849_v60, %v3701_v23 }
 0x382   :  { %v3955_v8 = vpop.f32.mrf.mxu1  ;;  %v3851_v62 = vpop.f32.mrf.mxu0 }
 0x383   :  { %v3956_v18 = vadd.f32 %v3955_v8, %v3836_v61  ;;  %v3852_v54 = vadd.f32 %v3851_v62, %v3703_v32 }
 0x386   :  { %v3962_v4 = vpop.f32.mrf.mxu1 }
 0x387   :  { %v3963_v58 = vadd.f32 %v3962_v4, %v3842_v38 }
 0x388   :  { %v3964_v31 = vpop.f32.mrf.mxu1 }
 0x389   :  { %v3965_v3 = vadd.f32 %v3964_v31, %v3844_v59 }
 0x38b   :  { %v3971_v53 = vpop.f32.mrf.mxu1 }
 0x38c   :  { %v3972_v9 = vadd.f32 %v3971_v53, %v3850_v46 }
 0x38d   :  { %v3973_v14 = vpop.f32.mrf.mxu1 }
 0x399   :  { %v4133_v33 = vpop.f32.mrf.mxu0 }
 0x39a   :  { %v4134_v6 = vadd.f32 %v4133_v33, %v3954_v63 }
 0x39b   :  { %v4135_v29 = vpop.f32.mrf.mxu0 }
 0x39c   :  { %v4136_v57 = vadd.f32 %v4135_v29, %v3956_v18  ;;  %v3974_v29 = vadd.f32 %v3973_v14, %v3852_v54 }
 0x39d   :  { %v4140_v55 = vpop.f32.mrf.mxu0 }
 0x39e   :  { %v4141_v37 = vadd.f32 %v4140_v55, %v3963_v58 }
 0x39f   :  { %v4142_v47 = vpop.f32.mrf.mxu0 }
 0x3a0   :  { %v4143_v36 = vadd.f32 %v4142_v47, %v3965_v3 }
 0x3a1   :  { %v4147_v28 = vpop.f32.mrf.mxu0 }
 0x3a2   :  { %v4249_v11 = vpop.f32.mrf.mxu1  ;;  %v4148_v33 = vadd.f32 %v4147_v28, %v3972_v9 }
 0x3a3   :  { %v4250_v52 = vadd.f32 %v4249_v11, %v4134_v6  ;;  %v4149_v63 = vpop.f32.mrf.mxu0 }
 0x3a4   :  { %v4251_v13 = vpop.f32.mrf.mxu1  ;;  %v4150_v53 = vadd.f32 %v4149_v63, %v3974_v29 }
 0x3a5   :  { %vm4268_vm1 = vcmp.ge.f32.partialorder %v4250_v52, 0.0  ;;  %v4274_v42 = vmul.f32 0.2, %v4250_v52  ;;  %v4252_v24 = vadd.f32 %v4251_v13, %v4136_v57 }
 0x3a6   :  { %v4256_v43 = vpop.f32.mrf.mxu1 }
 0x3a7   :  { %v4280_v61 = vsel %vm4268_vm1, %v4250_v52, %v4274_v42  ;;  %vm4269_vm2 = vcmp.ge.f32.partialorder %v4252_v24, 0.0  ;;  %v4275_v45 = vmul.f32 0.2, %v4252_v24  ;;  %v4257_v4 = vadd.f32 %v4256_v43, %v4141_v37 }
 0x3a8   :  { %v13101_v56 = vand.u32 4294901760, %v4280_v61  ;;  %v4258_v60 = vpop.f32.mrf.mxu1 }
 0x3a9   :  { %v4281_v59 = vsel %vm4269_vm2, %v4252_v24, %v4275_v45  ;;  %vm4270_vm3 = vcmp.ge.f32.partialorder %v4257_v4, 0.0  ;;  %v4276_v23 = vmul.f32 0.2, %v4257_v4  ;;  %v4259_v55 = vadd.f32 %v4258_v60, %v4143_v36  ;;  %v18262_v60 = vld [vmem:[#allocation23_spill] sm:$0xff] }
 0x3aa   :  { %18239 = vst [vmem:[#allocation117_spill] sm:$0xff] %v13101_v56  ;;  %v13104_v31 = vsub.f32 %v4280_v61, %v13101_v56  ;;  %v13106_v47 = vand.u32 4294901760, %v4281_v59  ;;  %v4263_v49 = vpop.f32.mrf.mxu1 }
 0x3ab   :  { %v4282_v62 = vsel %vm4270_vm3, %v4257_v4, %v4276_v23  ;;  %vm4271_vm4 = vcmp.ge.f32.partialorder %v4259_v55, 0.0  ;;  %v4277_v15 = vmul.f32 0.2, %v4259_v55  ;;  %v4264_v19 = vadd.f32 %v4263_v49, %v4148_v33  ;;  %v18264_v23 = vld [vmem:[#allocation51_spill] sm:$0xff]  ;;  %v18267_v49 = vld [vmem:[#allocation37_spill] sm:$0xff] }
 0x3ac   :  { %18240 = vst [vmem:[#allocation118_spill] sm:$0xff] %v13104_v31  ;;  %18241 = vst [vmem:[#allocation119_spill] sm:$0xff] %v13106_v47  ;;  %v13109_v14 = vand.u32 4294901760, %v13104_v31  ;;  %v13112_v2 = vsub.f32 %v4281_v59, %v13106_v47  ;;  %v13114_v12 = vand.u32 4294901760, %v4282_v62  ;;  %v4265_v35 = vpop.f32.mrf.mxu1  ;;  %4912 = vmatprep.mubr.f32.mxu1 %v13106_v47  ;;  %v18263_v59 = vld [vmem:[#allocation27_spill] sm:$0xff] }
 0x3ad   :  { %v4283_v25 = vsel %vm4271_vm4, %v4259_v55, %v4277_v15  ;;  %vm4272_vm5 = vcmp.ge.f32.partialorder %v4264_v19, 0.0  ;;  %v4278_v39 = vmul.f32 0.2, %v4264_v19  ;;  %v4266_v8 = vadd.f32 %v4265_v35, %v4150_v53  ;;  %4914 = vmatmul.mubr.f32.vlgmr.msra.gmra.mxu1 %v13101_v56  ;;  %v18266_v53 = vld [vmem:[#allocation28_spill] sm:$0xff]  ;;  %v18269_v15 = vld [vmem:[#allocation55_spill] sm:$0xff] }
 0x3ae   :  { %18242 = vst [vmem:[#allocation120_spill] sm:$0xff] %v13109_v14  ;;  %18243 = vst [vmem:[#allocation121_spill] sm:$0xff] %v13112_v2  ;;  %v13119_v7 = vsub.f32 %v4282_v62, %v13114_v12  ;;  %v13121_v38 = vand.u32 4294901760, %v4283_v25  ;;  %5162 = vmatpush1.msra.mxu1 %v12452_v5  ;;  %v13125_v18 = vand.u32 4294901760, %v13112_v2  ;;  %v4487_v52 = vsub.f32 %v13104_v31, %v13109_v14  ;;  %v18268_v62 = vld [vmem:[#allocation40_spill] sm:$0xff]  ;;  %v18271_v35 = vld [vmem:[#allocation43_spill] sm:$0xff] }
 0x3af   :  { %18244 = vst [vmem:[#allocation122_spill] sm:$0xff] %v13114_v12  ;;  %v4284_v6 = vsel %vm4272_vm5, %v4264_v19, %v4278_v39  ;;  %vm4273_vm6 = vcmp.ge.f32.partialorder %v4266_v8, 0.0  ;;  %v4279_v11 = vmul.f32 0.2, %v4266_v8  ;;  %5164 = vmatprep.subr.mxu1 %v12454_v41  ;;  %v18270_v19 = vld [vmem:[#allocation57_spill] sm:$0xff]  ;;  %v18273_v39 = vld [vmem:[#allocation58_spill] sm:$0xff] }
 0x3b0   :  { %18245 = vst [vmem:[#allocation123_spill] sm:$0xff] %v13119_v7  ;;  %18246 = vst [vmem:[#allocation124_spill] sm:$0xff] %v13121_v38  ;;  %v13129_v58 = vsub.f32 %v4283_v25, %v13121_v38  ;;  %v13131_v57 = vand.u32 4294901760, %v4284_v6  ;;  %5166 = vmatpush1.msra.mxu1 %v12457_v34  ;;  %4920 = vmatprep.mubr.f32.mxu1 %v13121_v38  ;;  %v4481_v28 = vsub.f32 %v13112_v2, %v13125_v18  ;;  %v18272_v25 = vld [vmem:[#allocation33_spill] sm:$0xff]  ;;  %v18296_v56 = vld [vmem:[#allocation59_spill] sm:$0xff] }
 0x3b1   :  { %18247 = vst [vmem:[#allocation125_spill] sm:$0xff] %v13125_v18  ;;  %v4285_v32 = vsel %vm4273_vm6, %v4266_v8, %v4279_v11  ;;  %5168 = vmatprep.subr.mxu1 %v12459_v1  ;;  %4922 = vmatmul.mubr.f32.gmra.mxu1 %v13114_v12  ;;  %v13150_v37 = vand.u32 4294901760, %v13119_v7  ;;  %v13161_v54 = vand.u32 4294901760, %v4487_v52  ;;  %v18274_v8 = vld [vmem:[#allocation45_spill] sm:$0xff]  ;;  %v18276_v11 = vld [vmem:[#allocation39_spill] sm:$0xff]  ;;  %v18278_v52 = vld [vmem:[#allocation32_spill] sm:$0xff] }
 0x3b2   :  { %18248 = vst [vmem:[#allocation126_spill] sm:$0xff] %v13129_v58  ;;  %18249 = vst [vmem:[#allocation127_spill] sm:$0xff] %v13131_v57  ;;  %v13141_v46 = vand.u32 4294901760, %v4285_v32  ;;  %5170 = vmatpush1.msra.mxu1 %v12461_v40  ;;  %v13144_v3 = vand.u32 4294901760, %v4481_v28  ;;  %v13147_v13 = vand.u32 4294901760, %v13129_v58  ;;  %v13153_v42 = vsub.f32 %v4284_v6, %v13131_v57  ;;  %v18275_v6 = vld [vmem:[#allocation54_spill] sm:$0xff] }
 0x3b3   :  { %18253 = vst [vmem:[#allocation131_spill] sm:$0xff] %v13150_v37  ;;  %5172 = vmatprep.subr.mxu1 %v12473_v16  ;;  %18256 = vst [vmem:[#allocation134_spill] sm:$0xff] %v13161_v54  ;;  %v4503_v43 = vsub.f32 %v13119_v7, %v13150_v37  ;;  %v18277_v28 = vld [vmem:[#allocation48_spill] sm:$0xff]  ;;  %v18294_v12 = vld [vmem:[#allocation9_spill] sm:$0xff] }
 0x3b4   :  { %18250 = vst [vmem:[#allocation128_spill] sm:$0xff] %v13141_v46  ;;  %18251 = vst [vmem:[#allocation129_spill] sm:$0xff] %v13144_v3  ;;  %v13157_v24 = vsub.f32 %v4285_v32, %v13141_v46  ;;  %5174 = vmatpush1.msra.mxu1 %v12487_v22  ;;  %4483 = vmatprep.mubr.f32.mxu0 %v13144_v3  ;;  %v4497_v9 = vsub.f32 %v13129_v58, %v13147_v13  ;;  %v13179_v63 = vand.u32 4294901760, %v13153_v42  ;;  %v18279_v32 = vld [vmem:[#allocation64_spill] sm:$0xff]  ;;  %v18291_v3 = vld [vmem:[#allocation26_spill] sm:$0xff] }
 0x3b5   :  { %18252 = vst [vmem:[#allocation130_spill] sm:$0xff] %v13147_v13  ;;  %18254 = vst [vmem:[#allocation132_spill] sm:$0xff] %v13153_v42  ;;  %4928 = vmatprep.mubr.f32.mxu1 %v13141_v46  ;;  %5176 = vmatprep.subr.mxu1 %v12539_v27  ;;  %v13189_v4 = vand.u32 4294901760, %v4503_v43  ;;  %v18281_v43 = vld [vmem:[#allocation49_spill] sm:$0xff]  ;;  %v18293_v46 = vld [vmem:[#allocation47_spill] sm:$0xff] }
 0x3b6   :  { %18255 = vst [vmem:[#allocation133_spill] sm:$0xff] %v13157_v24  ;;  %4489 = vmatmul.mubr.f32.vlgmr.msra.gmra.mxu0 %v13161_v54  ;;  %4930 = vmatmul.mubr.f32.gmra.mxu1 %v13131_v57  ;;  %v13169_v36 = vand.u32 4294901760, %v4497_v9  ;;  %v13174_v61 = vand.u32 4294901760, %v13157_v24  ;;  %18259 = vst [vmem:[#allocation137_spill] sm:$0xff] %v13179_v63  ;;  %v4519_v33 = vsub.f32 %v13153_v42, %v13179_v63  ;;  %v18280_v9 = vld [vmem:[#allocation11_spill] sm:$0xff]  ;;  %v18290_v54 = vld [vmem:[#allocation46_spill] sm:$0xff] }
 0x3b7   :  { %4941 = vmatpush1.msra.mxu0 %v12468_v0  ;;  %5178 = vmatpush1.msra.mxu1 %v12541_v48  ;;  %18260 = vst [vmem:[#allocation138_spill] sm:$0xff] %v13189_v4  ;;  %v18292_v57 = vld [vmem:[#allocation29_spill] sm:$0xff] }
 0x3b8   :  { %18257 = vst [vmem:[#allocation135_spill] sm:$0xff] %v13169_v36  ;;  %18258 = vst [vmem:[#allocation136_spill] sm:$0xff] %v13174_v61  ;;  %4944 = vmatprep.subr.mxu0 %v12471_v20  ;;  %5180 = vmatprep.subr.mxu1 %v12549_v10  ;;  %v4513_v45 = vsub.f32 %v13157_v24, %v13174_v61  ;;  %v13205_v55 = vand.u32 4294901760, %v4519_v33  ;;  %v18283_v33 = vld [vmem:[#allocation70_spill] sm:$0xff]  ;;  %v18295_v38 = vld [vmem:[#allocation17_spill] sm:$0xff] }
 0x3b9   :  { %5290 = vmatprep.mubr.f32.mxu1 %v13125_v18  ;;  %4947 = vmatpush1.msra.mxu0 %v12479_v50  ;;  %v18288_v18 = vld [vmem:[#allocation16_spill] sm:$0xff] }
 0x3ba   :  { %5182 = vmatpush1.msra.mxu1 %v12551_v21  ;;  %4499 = vmatprep.mubr.f32.mxu0 %v13169_v36  ;;  %v13193_v29 = vand.u32 4294901760, %v4513_v45  ;;  %18265 = vst [vmem:[#allocation23_spill] sm:$0xff] %v13205_v55  ;;  %v18282_v45 = vld [vmem:[#allocation42_spill] sm:$0xff]  ;;  %v18289_v36 = vld [vmem:[#allocation15_spill] sm:$0xff] }
 0x3bb   :  { %4950 = vmatprep.subr.mxu0 %v12482_v51  ;;  %5184 = vmatprep.subr.mxu1 %v12564_v26 }
 0x3bc   :  { %18261 = vst [vmem:[#allocation139_spill] sm:$0xff] %v13193_v29  ;;  %4505 = vmatmul.mubr.f32.gmra.mxu0 %v13189_v4  ;;  %5186 = vmatpush1.msra.mxu1 %v12566_v17  ;;  %v18287_v4 = vld [vmem:[#allocation67_spill] sm:$0xff] }
 0x3bd   :  { %4953 = vmatpush1.msra.mxu0 %v12485_v30  ;;  %5188 = vmatprep.subr.mxu1 %v12583_v44 }
 0x3be   :  { %4956 = vmatprep.subr.mxu0 %v18262_v60  ;;  %5190 = vmatpush1.msra.mxu1 %v18263_v59 }
 0x3bf   :  { %4959 = vmatpush1.msra.mxu0 %v18264_v23  ;;  %4515 = vmatprep.mubr.f32.mxu0 %v13193_v29  ;;  %v18286_v29 = vld [vmem:[#allocation62_spill] sm:$0xff] }
 0x3c0   :  { %4962 = vmatprep.subr.mxu0 %v18266_v53  ;;  %5192 = vmatprep.subr.mxu1 %v18267_v49 }
 0x3c1   :  { %4521 = vmatmul.mubr.f32.gmra.mxu0 %v13205_v55  ;;  %5194 = vmatpush1.msra.mxu1 %v18268_v62  ;;  %v18285_v55 = vld [vmem:[#allocation31_spill] sm:$0xff] }
 0x3c2   :  { %4965 = vmatpush1.msra.mxu0 %v18269_v15  ;;  %5130 = vmatprep.mubr.f32.mxu0 %v13112_v2  ;;  %v18284_v2 = vld [vmem:[#allocation19_spill] sm:$0xff] }
 0x3c3   :  { %4968 = vmatprep.subr.mxu0 %v18270_v19  ;;  %5196 = vmatprep.subr.mxu1 %v18271_v35 }
 0x3c4   :  { %4971 = vmatpush1.msra.mxu0 %v18272_v25  ;;  %5198 = vmatpush1.msra.mxu1 %v18273_v39 }
 0x3c5   :  { %4974 = vmatprep.subr.mxu0 %v18274_v8  ;;  %5200 = vmatprep.subr.mxu1 %v18275_v6 }
 0x3c6   :  { %4977 = vmatpush1.msra.mxu0 %v18276_v11  ;;  %5202 = vmatpush1.msra.mxu1 %v18277_v28 }
 0x3c7   :  { %4980 = vmatprep.subr.mxu0 %v18278_v52  ;;  %5204 = vmatprep.subr.mxu1 %v18279_v32 }
 0x3c8   :  { %4983 = vmatpush1.msra.mxu0 %v18280_v9  ;;  %5206 = vmatpush1.msra.mxu1 %v18281_v43 }
 0x3c9   :  { %4986 = vmatprep.subr.mxu0 %v18282_v45  ;;  %5208 = vmatprep.subr.mxu1 %v18283_v33 }
 0x3ca   :  { %4989 = vmatpush1.msra.mxu0 %v18284_v2  ;;  %5210 = vmatpush1.msra.mxu1 %v18285_v55 }
 0x3cb   :  { %4992 = vmatprep.subr.mxu0 %v18286_v29  ;;  %5212 = vmatprep.subr.mxu1 %v18287_v4  ;;  %v18297_v29 = vld [vmem:[#allocation34_spill] sm:$0xff] }
 0x3cc   :  { %4995 = vmatpush1.msra.mxu0 %v18288_v18  ;;  %5214 = vmatpush1.msra.mxu1 %v18289_v36  ;;  %v18298_v4 = vld [vmem:[#allocation66_spill] sm:$0xff]  ;;  %v18299_v18 = vld [vmem:[#allocation41_spill] sm:$0xff] }
 0x3cd   :  { %4998 = vmatprep.subr.mxu0 %v18290_v54  ;;  %5216 = vmatprep.subr.mxu1 %v18291_v3  ;;  %v18300_v36 = vld [vmem:[#allocation61_spill] sm:$0xff]  ;;  %v18301_v54 = vld [vmem:[#allocation72_spill] sm:$0xff] }
 0x3ce   :  { %5001 = vmatpush1.msra.mxu0 %v18292_v57  ;;  %5218 = vmatpush1.msra.mxu1 %v18293_v46  ;;  %v18302_v3 = vld [vmem:[#allocation21_spill] sm:$0xff]  ;;  %v18304_v46 = vld [vmem:[#allocation36_spill] sm:$0xff] }
 0x3cf   :  { %5004 = vmatprep.subr.mxu0 %v18294_v12  ;;  %5220 = vmatprep.subr.mxu1 %v18295_v38  ;;  %v18303_v57 = vld [vmem:[#allocation13_spill] sm:$0xff]  ;;  %v18305_v12 = vld [vmem:[#allocation10_spill] sm:$0xff]  ;;  %v18306_v38 = vld [vmem:[#allocation56_spill] sm:$0xff] }
 0x3d0   :  { %5007 = vmatpush1.msra.mxu0 %v18296_v56  ;;  %5222 = vmatpush1.msra.mxu1 %v18297_v29  ;;  %v18307_v56 = vld [vmem:[#allocation69_spill] sm:$0xff]  ;;  %v18308_v29 = vld [vmem:[#allocation52_spill] sm:$0xff] }
 0x3d1   :  { %5010 = vmatprep.subr.mxu0 %v18298_v4  ;;  %5224 = vmatprep.subr.mxu1 %v18299_v18  ;;  %v18309_v4 = vld [vmem:[#allocation25_spill] sm:$0xff]  ;;  %v18310_v18 = vld [vmem:[#allocation24_spill] sm:$0xff] }
 0x3d2   :  { %5013 = vmatpush1.msra.mxu0 %v18300_v36  ;;  %5226 = vmatpush2.msra.mxu1 %v18301_v54  ;;  %v18311_v36 = vld [vmem:[#allocation63_spill] sm:$0xff]  ;;  %v18312_v54 = vld [vmem:[#allocation44_spill] sm:$0xff] }
 0x3d3   :  { %5016 = vmatprep.subr.mxu0 %v18302_v3  ;;  %5228 = vmatprep.subr.mxu1 %v18303_v57  ;;  %v18313_v3 = vld [vmem:[#allocation8_spill] sm:$0xff]  ;;  %v18314_v57 = vld [vmem:[#allocation18_spill] sm:$0xff] }
 0x3d4   :  { %5019 = vmatpush1.msra.mxu0 %v18304_v46  ;;  %5230 = vmatpush2.msra.mxu1 %v18305_v12  ;;  %v18315_v46 = vld [vmem:[#allocation53_spill] sm:$0xff]  ;;  %v18316_v12 = vld [vmem:[#allocation38_spill] sm:$0xff] }
 0x3d5   :  { %5022 = vmatprep.subr.mxu0 %v18306_v38  ;;  %5232 = vmatprep.subr.mxu1 %v18307_v56  ;;  %v18317_v38 = vld [vmem:[#allocation68_spill] sm:$0xff]  ;;  %v18318_v56 = vld [vmem:[#allocation35_spill] sm:$0xff] }
 0x3d6   :  { %5025 = vmatpush1.msra.mxu0 %v18308_v29  ;;  %5234 = vmatpush2.msra.mxu1 %v18309_v4  ;;  %v18319_v29 = vld [vmem:[#allocation30_spill] sm:$0xff] }
 0x3d7   :  { %5028 = vmatprep.subr.mxu0 %v18310_v18  ;;  %5236 = vmatprep.subr.mxu1 %v18311_v36  ;;  %v18320_v4 = vld [vmem:[#allocation14_spill] sm:$0xff]  ;;  %v18322_v36 = vld [vmem:[#allocation60_spill] sm:$0xff] }
 0x3d8   :  { %5031 = vmatpush1.msra.mxu0 %v18312_v54  ;;  %5238 = vmatpush2.msra.mxu1 %v18313_v3  ;;  %v18321_v18 = vld [vmem:[#allocation74_spill] sm:$0xff]  ;;  %v18323_v54 = vld [vmem:[#allocation77_spill] sm:$0xff]  ;;  %v18324_v3 = vld [vmem:[#allocation71_spill] sm:$0xff] }
 0x3d9   :  { %5034 = vmatprep.subr.mxu0 %v18314_v57  ;;  %5240 = vmatprep.subr.mxu1 %v18315_v46  ;;  %v18325_v57 = vld [vmem:[#allocation78_spill] sm:$0xff]  ;;  %v18326_v46 = vld [vmem:[#allocation20_spill] sm:$0xff] }
 0x3da   :  { %5037 = vmatpush2.msra.mxu0 %v18316_v12  ;;  %5242 = vmatpush2.msra.mxu1 %v18317_v38  ;;  %v18327_v12 = vld [vmem:[#allocation81_spill] sm:$0xff] }
 0x3db   :  { %5040 = vmatprep.subr.mxu0 %v18318_v56  ;;  %5244 = vmatprep.subr.mxu1 %v18319_v29  ;;  %v18328_v38 = vld [vmem:[#allocation73_spill] sm:$0xff]  ;;  %v18329_v56 = vld [vmem:[#allocation82_spill] sm:$0xff] }
 0x3dc   :  { %5043 = vmatpush2.msra.mxu0 %v18320_v4  ;;  %5246 = vmatpush2.msra.mxu1 %v18321_v18  ;;  %v18330_v29 = vld [vmem:[#allocation65_spill] sm:$0xff]  ;;  %v18332_v18 = vld [vmem:[#allocation12_spill] sm:$0xff] }
 0x3dd   :  { %5046 = vmatprep.subr.mxu0 %v18322_v36  ;;  %5248 = vmatprep.subr.mxu1 %v18323_v54  ;;  %v18331_v4 = vld [vmem:[#allocation85_spill] sm:$0xff]  ;;  %v18333_v36 = vld [vmem:[#allocation86_spill] sm:$0xff]  ;;  %v18334_v54 = vld [vmem:[#allocation75_spill] sm:$0xff] }
 0x3de   :  { %5049 = vmatpush2.msra.mxu0 %v18324_v3  ;;  %5250 = vmatpush2.msra.mxu1 %v18325_v57  ;;  %v18335_v3 = vld [vmem:[#allocation89_spill] sm:$0xff]  ;;  %v18336_v57 = vld [vmem:[#allocation76_spill] sm:$0xff] }
 0x3df   :  { %5052 = vmatprep.subr.mxu0 %v18326_v46  ;;  %5252 = vmatprep.subr.mxu1 %v18327_v12  ;;  %v18337_v46 = vld [vmem:[#allocation90_spill] sm:$0xff]  ;;  %v18338_v12 = vld [vmem:[#allocation79_spill] sm:$0xff] }
 0x3e0   :  { %5055 = vmatpush2.msra.mxu0 %v18328_v38  ;;  %5254 = vmatpush2.msra.mxu1 %v18329_v56  ;;  %v18339_v38 = vld [vmem:[#allocation93_spill] sm:$0xff]  ;;  %v18340_v56 = vld [vmem:[#allocation80_spill] sm:$0xff] }
 0x3e1   :  { %5058 = vmatprep.subr.mxu0 %v18330_v29  ;;  %5256 = vmatprep.subr.mxu1 %v18331_v4  ;;  %v18341_v29 = vld [vmem:[#allocation94_spill] sm:$0xff]  ;;  %v18342_v4 = vld [vmem:[#allocation83_spill] sm:$0xff] }
 0x3e2   :  { %5061 = vmatpush2.msra.mxu0 %v18332_v18  ;;  %5258 = vmatpush2.msra.mxu1 %v18333_v36  ;;  %v18343_v18 = vld [vmem:[#allocation97_spill] sm:$0xff]  ;;  %v18344_v36 = vld [vmem:[#allocation84_spill] sm:$0xff] }
 0x3e3   :  { %5064 = vmatprep.subr.mxu0 %v18334_v54  ;;  %5260 = vmatprep.subr.mxu1 %v18335_v3  ;;  %v18345_v54 = vld [vmem:[#allocation98_spill] sm:$0xff]  ;;  %v18346_v3 = vld [vmem:[#allocation87_spill] sm:$0xff] }
 0x3e4   :  { %5067 = vmatpush2.msra.mxu0 %v18336_v57  ;;  %5262 = vmatpush2.msra.mxu1 %v18337_v46  ;;  %v18347_v57 = vld [vmem:[#allocation101_spill] sm:$0xff]  ;;  %v18348_v46 = vld [vmem:[#allocation88_spill] sm:$0xff] }
 0x3e5   :  { %5070 = vmatprep.subr.mxu0 %v18338_v12  ;;  %5264 = vmatprep.subr.mxu1 %v18339_v38  ;;  %v18349_v12 = vld [vmem:[#allocation102_spill] sm:$0xff]  ;;  %v18350_v38 = vld [vmem:[#allocation91_spill] sm:$0xff] }
 0x3e6   :  { %5073 = vmatpush2.msra.mxu0 %v18340_v56  ;;  %5266 = vmatpush2.msra.mxu1 %v18341_v29  ;;  %v18351_v56 = vld [vmem:[#allocation105_spill] sm:$0xff]  ;;  %v18352_v29 = vld [vmem:[#allocation92_spill] sm:$0xff] }
 0x3e7   :  { %5076 = vmatprep.subr.mxu0 %v18342_v4  ;;  %5268 = vmatprep.subr.mxu1 %v18343_v18  ;;  %v18353_v4 = vld [vmem:[#allocation106_spill] sm:$0xff]  ;;  %v18354_v18 = vld [vmem:[#allocation95_spill] sm:$0xff] }
 0x3e8   :  { %5079 = vmatpush2.msra.mxu0 %v18344_v36  ;;  %5270 = vmatpush2.msra.mxu1 %v18345_v54  ;;  %v18355_v36 = vld [vmem:[#allocation109_spill] sm:$0xff]  ;;  %v18356_v54 = vld [vmem:[#allocation96_spill] sm:$0xff] }
 0x3e9   :  { %5082 = vmatprep.subr.mxu0 %v18346_v3  ;;  %5272 = vmatprep.subr.mxu1 %v18347_v57  ;;  %v18357_v3 = vld [vmem:[#allocation110_spill] sm:$0xff]  ;;  %v18358_v57 = vld [vmem:[#allocation99_spill] sm:$0xff] }
 0x3ea   :  { %5085 = vmatpush2.msra.mxu0 %v18348_v46  ;;  %5274 = vmatpush2.msra.mxu1 %v18349_v12  ;;  %v18359_v46 = vld [vmem:[#allocation113_spill] sm:$0xff]  ;;  %v18360_v12 = vld [vmem:[#allocation100_spill] sm:$0xff] }
 0x3eb   :  { %5088 = vmatprep.subr.mxu0 %v18350_v38  ;;  %5276 = vmatprep.subr.mxu1 %v18351_v56  ;;  %v18361_v38 = vld [vmem:[#allocation114_spill] sm:$0xff]  ;;  %v18362_v56 = vld [vmem:[#allocation103_spill] sm:$0xff] }
 0x3ec   :  { %5091 = vmatpush2.msra.mxu0 %v18352_v29  ;;  %5278 = vmatpush2.msra.mxu1 %v18353_v4  ;;  %v18363_v4 = vld [vmem:[#allocation50_spill] sm:$0xff] }
 0x3ed   :  { %5094 = vmatprep.subr.mxu0 %v18354_v18  ;;  %5280 = vmatprep.subr.mxu1 %v18355_v36  ;;  %v18364_v18 = vld [vmem:[#allocation104_spill] sm:$0xff] }
 0x3ee   :  { %5097 = vmatpush2.msra.mxu0 %v18356_v54  ;;  %5282 = vmatpush2.msra.mxu1 %v18357_v3  ;;  %v18365_v3 = vld [vmem:[#allocation107_spill] sm:$0xff] }
 0x3ef   :  { %5100 = vmatprep.subr.mxu0 %v18358_v57  ;;  %5284 = vmatprep.subr.mxu1 %v18359_v46  ;;  %v18366_v46 = vld [vmem:[#allocation108_spill] sm:$0xff] }
 0x3f0   :  { %5103 = vmatpush2.msra.mxu0 %v18360_v12  ;;  %5286 = vmatpush2.msra.mxu1 %v18361_v38  ;;  %v18367_v38 = vld [vmem:[#allocation111_spill] sm:$0xff] }
 0x3f1   :  { %5106 = vmatprep.subr.mxu0 %v18362_v56  ;;  %5294 = vmatmul.mubr.f32.vlgmr.msra.gmra.mxu1 %v13109_v14 }
 0x3f2   :  { %5606 = vmatprep.subr.mxu1 %v18363_v4  ;;  %5109 = vmatpush2.msra.mxu0 %v18364_v18  ;;  %v18368_v4 = vld [vmem:[#allocation112_spill] sm:$0xff] }
 0x3f3   :  { %5302 = vmatprep.mubr.f32.mxu1 %v13147_v13  ;;  %5608 = vmatpush1.msra.mxu1 %v12452_v5  ;;  %v18369_v5 = vld [vmem:[#allocation115_spill] sm:$0xff]  ;;  %v18513_v13 = vld [vmem:[#allocation101_spill] sm:$0xff] }
 0x3f4   :  { %5112 = vmatprep.subr.mxu0 %v18365_v3  ;;  %5610 = vmatprep.subr.mxu1 %v12454_v41  ;;  %v18370_v41 = vld [vmem:[#allocation116_spill] sm:$0xff] }
 0x3f5   :  { %5115 = vmatpush2.msra.mxu0 %v18366_v46  ;;  %5612 = vmatpush1.msra.mxu1 %v12457_v34  ;;  %v18371_v34 = vld [vmem:[#allocation22_spill] sm:$0xff] }
 0x3f6   :  { %5118 = vmatprep.subr.mxu0 %v18367_v38  ;;  %5306 = vmatmul.mubr.f32.gmra.mxu1 %v13150_v37 }
 0x3f7   :  { %5614 = vmatprep.subr.mxu1 %v12459_v1  ;;  %5121 = vmatpush2.msra.mxu0 %v18368_v4  ;;  %v18372_v1 = vand.u32 4294901760, %v18371_v34  ;;  %v18411_v34 = vld [vmem:[#allocation61_spill] sm:$0xff] }
 0x3f8   :  { %5314 = vmatprep.mubr.f32.mxu1 %v13174_v61  ;;  %5616 = vmatpush1.msra.mxu1 %v12461_v40  ;;  %v18373_v40 = vand.u32 4294901760, %v12468_v0  ;;  %v18377_v0 = vand.u32 4294901760, %v12485_v30  ;;  %v18381_v30 = vand.u32 4294901760, %v18269_v15  ;;  %v18511_v61 = vld [vmem:[#allocation87_spill] sm:$0xff] }
 0x3f9   :  { %5124 = vmatprep.subr.mxu0 %v18369_v5  ;;  %5618 = vmatprep.subr.mxu1 %v12473_v16  ;;  %v18374_v16 = vand.u32 4294901760, %v12471_v20  ;;  %v18378_v20 = vand.u32 4294901760, %v18262_v60  ;;  %v18388_v60 = vand.u32 4294901760, %v18282_v45  ;;  %v18512_v37 = vand.u32 4294901760, %v18511_v61  ;;  %v18518_v61 = vld [vmem:[#allocation102_spill] sm:$0xff] }
 0x3fa   :  { %5127 = vmatpush2.msra.mxu0 %v18370_v41  ;;  %5620 = vmatpush1.msra.mxu1 %v12487_v22  ;;  %v18375_v22 = vand.u32 4294901760, %v12479_v50  ;;  %v18379_v50 = vand.u32 4294901760, %v18264_v23  ;;  %v18390_v23 = vld [vmem:[#allocation62_spill] sm:$0xff] }
 0x3fb   :  { %5133 = vmatmul.mubr.f32.vlgmr.msra.gmra.mxu0 %v13104_v31  ;;  %5318 = vmatmul.mubr.f32.gmra.mxu1 %v13179_v63  ;;  %v18502_v63 = vld [vmem:[#allocation97_spill] sm:$0xff] }
 0x3fc   :  { %5327 = vmatprep.subr.mxu0 %v18372_v1  ;;  %5622 = vmatprep.subr.mxu1 %v12539_v27  ;;  %v18376_v27 = vand.u32 4294901760, %v12482_v51  ;;  %v18380_v51 = vand.u32 4294901760, %v18266_v53  ;;  %v18391_v53 = vand.u32 4294901760, %v18390_v23  ;;  %v18412_v1 = vand.u32 4294901760, %v18411_v34  ;;  %v18426_v23 = vld [vmem:[#allocation24_spill] sm:$0xff] }
 0x3fd   :  { %5140 = vmatprep.mubr.f32.mxu0 %v13129_v58  ;;  %5331 = vmatpush1.msra.mxu0 %v18373_v40  ;;  %v18413_v40 = vld [vmem:[#allocation72_spill] sm:$0xff] }
 0x3fe   :  { %5624 = vmatpush1.msra.mxu1 %v12541_v48  ;;  %5734 = vmatprep.mubr.f32.mxu1 %v13106_v47  ;;  %v18382_v48 = vand.u32 4294901760, %v18270_v19  ;;  %v18395_v19 = vld [vmem:[#allocation15_spill] sm:$0xff] }
 0x3ff   :  { %5335 = vmatprep.subr.mxu0 %v18374_v16  ;;  %5626 = vmatprep.subr.mxu1 %v12549_v10  ;;  %v18383_v10 = vand.u32 4294901760, %v18272_v25  ;;  %v18414_v16 = vld [vmem:[#allocation21_spill] sm:$0xff] }
 0x400   :  { %5339 = vmatpush1.msra.mxu0 %v18375_v22  ;;  %5628 = vmatpush1.msra.mxu1 %v12551_v21  ;;  %v18384_v21 = vand.u32 4294901760, %v18274_v8  ;;  %v18399_v8 = vld [vmem:[#allocation29_spill] sm:$0xff]  ;;  %v18415_v22 = vand.u32 4294901760, %v18414_v16  ;;  %v5783_v16 = vld [vmem:[#allocation4 + $0x2c0] sm:$0xff] }
 0x401   :  { %5143 = vmatmul.mubr.f32.gmra.mxu0 %v13119_v7  ;;  %5343 = vmatprep.subr.mxu0 %v18376_v27  ;;  %v18416_v27 = vld [vmem:[#allocation13_spill] sm:$0xff]  ;;  %v18497_v7 = vld [vmem:[#allocation94_spill] sm:$0xff] }
 0x402   :  { %5630 = vmatprep.subr.mxu1 %v12564_v26  ;;  %5150 = vmatprep.mubr.f32.mxu0 %v13157_v24  ;;  %v18385_v26 = vand.u32 4294901760, %v18276_v11 }
 0x403   :  { %5347 = vmatpush1.msra.mxu0 %v18377_v0  ;;  %5632 = vmatpush1.msra.mxu1 %v12566_v17  ;;  %v18386_v17 = vand.u32 4294901760, %v18278_v52  ;;  %v18405_v52 = vld [vmem:[#allocation59_spill] sm:$0xff] }
 0x404   :  { %5351 = vmatprep.subr.mxu0 %v18378_v20  ;;  %5634 = vmatprep.subr.mxu1 %v12583_v44  ;;  %v18387_v44 = vand.u32 4294901760, %v18280_v9  ;;  %v18407_v9 = vld [vmem:[#allocation34_spill] sm:$0xff]  ;;  %v5790_v0 = vld [vmem:[#allocation4 + $0x2f8] sm:$0xff]  ;;  %v18417_v20 = vld [vmem:[#allocation36_spill] sm:$0xff] }
 0x405   :  { %5355 = vmatpush1.msra.mxu0 %v18379_v50  ;;  %5636 = vmatpush1.msra.mxu1 %v18263_v59  ;;  %v18389_v59 = vand.u32 4294901760, %v18284_v2  ;;  %v18400_v2 = vand.u32 4294901760, %v18399_v8  ;;  %v18418_v50 = vand.u32 4294901760, %v18417_v20  ;;  %v18432_v8 = vld [vmem:[#allocation18_spill] sm:$0xff] }
 0x406   :  { %5153 = vmatmul.mubr.f32.gmra.mxu0 %v13153_v42  ;;  %5359 = vmatprep.subr.mxu0 %v18380_v51  ;;  %v18419_v51 = vld [vmem:[#allocation10_spill] sm:$0xff]  ;;  %v18495_v42 = vld [vmem:[#allocation80_spill] sm:$0xff] }
 0x407   :  { %5638 = vmatprep.subr.mxu1 %v18267_v49  ;;  %5363 = vmatpush1.msra.mxu0 %v18381_v30  ;;  %v18392_v49 = vld [vmem:[#allocation67_spill] sm:$0xff]  ;;  %v18420_v30 = vld [vmem:[#allocation56_spill] sm:$0xff]  ;;  %v18446_v20 = vld [vmem:[#allocation74_spill] sm:$0xff]  ;;  %v18496_v24 = vand.u32 4294901760, %v18495_v42 }
 0x408   :  { %5581 = vmatprep.mubr.f32.mxu0 %v13106_v47  ;;  %5640 = vmatpush1.msra.mxu1 %v18268_v62  ;;  %v18393_v62 = vld [vmem:[#allocation16_spill] sm:$0xff] }
 0x409   :  { %5367 = vmatprep.subr.mxu0 %v18382_v48  ;;  %5642 = vmatprep.subr.mxu1 %v18271_v35  ;;  %v18394_v15 = vand.u32 4294901760, %v18393_v62  ;;  %v18396_v35 = vld [vmem:[#allocation46_spill] sm:$0xff]  ;;  %v18421_v48 = vand.u32 4294901760, %v18420_v30  ;;  %v5787_v62 = vld [vmem:[#allocation4 + $0x2e0] sm:$0xff] }
 0x40a   :  { %5371 = vmatpush1.msra.mxu0 %v18383_v10  ;;  %5644 = vmatpush1.msra.mxu1 %v18273_v39  ;;  %v18397_v25 = vand.u32 4294901760, %v18396_v35  ;;  %v18398_v39 = vld [vmem:[#allocation26_spill] sm:$0xff]  ;;  %v18422_v10 = vld [vmem:[#allocation69_spill] sm:$0xff]  ;;  %v18431_v35 = vld [vmem:[#allocation8_spill] sm:$0xff] }
 0x40b   :  { %5375 = vmatprep.subr.mxu0 %v18384_v21  ;;  %5646 = vmatprep.subr.mxu1 %v18275_v6  ;;  %v18401_v6 = vld [vmem:[#allocation47_spill] sm:$0xff]  ;;  %v5789_v21 = vld [vmem:[#allocation4 + $0x2f0] sm:$0xff]  ;;  %v18449_v30 = vld [vmem:[#allocation60_spill] sm:$0xff] }
 0x40c   :  { %5379 = vmatpush1.msra.mxu0 %v18385_v26  ;;  %5648 = vmatpush1.msra.mxu1 %v18277_v28  ;;  %v18404_v28 = vld [vmem:[#allocation17_spill] sm:$0xff]  ;;  %v18423_v26 = vld [vmem:[#allocation52_spill] sm:$0xff] }
 0x40d   :  { %5383 = vmatprep.subr.mxu0 %v18386_v17  ;;  %5650 = vmatprep.subr.mxu1 %v18279_v32  ;;  %v18406_v32 = vand.u32 4294901760, %v18405_v52  ;;  %v18424_v17 = vand.u32 4294901760, %v18423_v26 }
 0x40e   :  { %5387 = vmatpush1.msra.mxu0 %v18387_v44  ;;  %5652 = vmatpush1.msra.mxu1 %v18281_v43  ;;  %v18408_v43 = vld [vmem:[#allocation66_spill] sm:$0xff]  ;;  %v18425_v44 = vld [vmem:[#allocation25_spill] sm:$0xff] }
 0x40f   :  { %5391 = vmatprep.subr.mxu0 %v18388_v60  ;;  %5654 = vmatprep.subr.mxu1 %v18283_v33  ;;  %v18409_v45 = vand.u32 4294901760, %v18408_v43  ;;  %v18410_v33 = vld [vmem:[#allocation41_spill] sm:$0xff]  ;;  %v13423_v60 = vand.u32 4294901760, %v5790_v0  ;;  %v13444_v43 = vand.u32 4294901760, %v5787_v62 }
 0x410   :  { %5395 = vmatpush1.msra.mxu0 %v18389_v59  ;;  %5656 = vmatpush1.msra.mxu1 %v18285_v55  ;;  %v18402_v55 = vld [vmem:[#allocation9_spill] sm:$0xff] }
 0x411   :  { %5399 = vmatprep.subr.mxu0 %v18391_v53  ;;  %5658 = vmatprep.subr.mxu1 %v18392_v49  ;;  %v18403_v11 = vand.u32 4294901760, %v18402_v55  ;;  %v5788_v59 = vld [vmem:[#allocation4 + $0x2e8] sm:$0xff]  ;;  %v18427_v53 = vand.u32 4294901760, %v18426_v23  ;;  %v18428_v49 = vld [vmem:[#allocation63_spill] sm:$0xff]  ;;  %18439 = vst [vmem:[#allocation51_spill] sm:$0xff] %v13444_v43 }
 0x412   :  { %5403 = vmatpush1.msra.mxu0 %v18394_v15  ;;  %5660 = vmatpush1.msra.mxu1 %v18395_v19  ;;  %v18429_v15 = vld [vmem:[#allocation44_spill] sm:$0xff]  ;;  %v13436_v55 = vand.u32 4294901760, %v5788_v59  ;;  %v18454_v23 = vld [vmem:[#allocation71_spill] sm:$0xff] }
 0x413   :  { %5407 = vmatprep.subr.mxu0 %v18397_v25  ;;  %5662 = vmatprep.subr.mxu1 %v18398_v39  ;;  %v18430_v19 = vand.u32 4294901760, %v18429_v15  ;;  %v13431_v25 = vand.u32 4294901760, %v5789_v21  ;;  %v5786_v39 = vld [vmem:[#allocation4 + $0x2d8] sm:$0xff]  ;;  %v13472_v15 = vsub.f32 %v5787_v62, %v13444_v43 }
 0x414   :  { %5411 = vmatpush1.msra.mxu0 %v18400_v2  ;;  %5664 = vmatpush1.msra.mxu1 %v18401_v6  ;;  %v18433_v2 = vand.u32 4294901760, %v18432_v8  ;;  %v18434_v6 = vld [vmem:[#allocation53_spill] sm:$0xff]  ;;  %v13463_v26 = vsub.f32 %v5788_v59, %v13436_v55  ;;  %v18459_v8 = vld [vmem:[#allocation20_spill] sm:$0xff] }
 0x415   :  { %5415 = vmatprep.subr.mxu0 %v18403_v11  ;;  %5666 = vmatprep.subr.mxu1 %v18404_v28  ;;  %v5785_v11 = vld [vmem:[#allocation4 + $0x2d0] sm:$0xff]  ;;  %18457 = vst [vmem:[#allocation43_spill] sm:$0xff] %v13472_v15  ;;  %v18461_v59 = vld [vmem:[#allocation81_spill] sm:$0xff] }
 0x416   :  { %5419 = vmatpush1.msra.mxu0 %v18406_v32  ;;  %5668 = vmatpush1.msra.mxu1 %v18407_v9  ;;  %v18435_v28 = vld [vmem:[#allocation38_spill] sm:$0xff]  ;;  %v18437_v32 = vld [vmem:[#allocation68_spill] sm:$0xff]  ;;  %v13442_v9 = vsub.f32 %v5790_v0, %v13423_v60  ;;  %v13457_v0 = vand.u32 4294901760, %v5785_v11  ;;  %18452 = vst [vmem:[#allocation55_spill] sm:$0xff] %v13463_v26 }
 0x417   :  { %5423 = vmatprep.subr.mxu0 %v18409_v45  ;;  %5670 = vmatprep.subr.mxu1 %v18410_v33  ;;  %v18436_v52 = vand.u32 4294901760, %v18435_v28  ;;  %v5784_v45 = vld [vmem:[#allocation4 + $0x2c8] sm:$0xff]  ;;  %v18440_v33 = vld [vmem:[#allocation35_spill] sm:$0xff] }
 0x418   :  { %5427 = vmatpush1.msra.mxu0 %v18412_v1  ;;  %5672 = vmatpush2.msra.mxu1 %v18413_v40  ;;  %18438 = vst [vmem:[#allocation27_spill] sm:$0xff] %v13442_v9  ;;  %v18441_v34 = vand.u32 4294901760, %v18440_v33  ;;  %v18442_v1 = vld [vmem:[#allocation30_spill] sm:$0xff]  ;;  %v13449_v40 = vand.u32 4294901760, %v5786_v39  ;;  %18448 = vst [vmem:[#allocation40_spill] sm:$0xff] %v13457_v0 }
 0x419   :  { %5431 = vmatprep.subr.mxu0 %v18415_v22  ;;  %5674 = vmatprep.subr.mxu1 %v18416_v27  ;;  %v18444_v22 = vld [vmem:[#allocation14_spill] sm:$0xff] }
 0x41a   :  { %5435 = vmatpush1.msra.mxu0 %v18418_v50  ;;  %5676 = vmatpush2.msra.mxu1 %v18419_v51  ;;  %18443 = vst [vmem:[#allocation28_spill] sm:$0xff] %v13449_v40  ;;  %v18445_v27 = vand.u32 4294901760, %v18444_v22  ;;  %v13455_v50 = vsub.f32 %v5789_v21, %v13431_v25  ;;  %v5782_v51 = vld [vmem:[#allocation4 + $0x2b8] sm:$0xff]  ;;  %v17031_v21 = vand.u32 4294901760, %v13442_v9 }
 0x41b   :  { %5439 = vmatprep.subr.mxu0 %v18421_v48  ;;  %5678 = vmatprep.subr.mxu1 %v18422_v10  ;;  %v18450_v48 = vand.u32 4294901760, %v18449_v30  ;;  %v18451_v10 = vld [vmem:[#allocation77_spill] sm:$0xff]  ;;  %v13482_v28 = vand.u32 4294901760, %v5782_v51 }
 0x41c   :  { %5443 = vmatpush1.msra.mxu0 %v18424_v17  ;;  %5680 = vmatpush2.msra.mxu1 %v18425_v44  ;;  %18447 = vst [vmem:[#allocation37_spill] sm:$0xff] %v13455_v50  ;;  %v13465_v17 = vand.u32 4294901760, %v5784_v45  ;;  %v5781_v44 = vld [vmem:[#allocation4 + $0x2b0] sm:$0xff]  ;;  %v17032_v62 = vand.u32 4294901760, %v13455_v50 }
 0x41d   :  { %5447 = vmatprep.subr.mxu0 %v18427_v53  ;;  %5682 = vmatprep.subr.mxu1 %v18428_v49  ;;  %v18455_v53 = vand.u32 4294901760, %v18454_v23  ;;  %v18456_v49 = vld [vmem:[#allocation78_spill] sm:$0xff]  ;;  %18463 = vst [vmem:[#allocation45_spill] sm:$0xff] %v13482_v28  ;;  %v13491_v22 = vand.u32 4294901760, %v5781_v44 }
 0x41e   :  { %5451 = vmatpush1.msra.mxu0 %v18430_v19  ;;  %5684 = vmatpush2.msra.mxu1 %v18431_v35  ;;  %18453 = vst [vmem:[#allocation57_spill] sm:$0xff] %v13465_v17  ;;  %v13474_v19 = vand.u32 4294901760, %v5783_v16  ;;  %v5780_v35 = vld [vmem:[#allocation4 + $0x2a8] sm:$0xff] }
 0x41f   :  { %5455 = vmatprep.subr.mxu0 %v18433_v2  ;;  %5686 = vmatprep.subr.mxu1 %v18434_v6  ;;  %v18460_v2 = vand.u32 4294901760, %v18459_v8  ;;  %v13480_v6 = vsub.f32 %v5786_v39, %v13449_v40  ;;  %18468 = vst [vmem:[#allocation39_spill] sm:$0xff] %v13491_v22  ;;  %v18471_v39 = vld [vmem:[#allocation85_spill] sm:$0xff]  ;;  %v13500_v23 = vand.u32 4294901760, %v5780_v35 }
 0x420   :  { %5459 = vmatpush2.msra.mxu0 %v18436_v52  ;;  %5688 = vmatpush2.msra.mxu1 %v18437_v32  ;;  %18458 = vst [vmem:[#allocation33_spill] sm:$0xff] %v13474_v19  ;;  %v5779_v52 = vld [vmem:[#allocation4 + $0x2a0] sm:$0xff]  ;;  %v18464_v32 = vld [vmem:[#allocation73_spill] sm:$0xff] }
 0x421   :  { %5463 = vmatprep.subr.mxu0 %v18441_v34  ;;  %5690 = vmatprep.subr.mxu1 %v18442_v1  ;;  %18462 = vst [vmem:[#allocation58_spill] sm:$0xff] %v13480_v6  ;;  %v18465_v33 = vand.u32 4294901760, %v18464_v32  ;;  %v18466_v34 = vld [vmem:[#allocation82_spill] sm:$0xff]  ;;  %v13489_v1 = vsub.f32 %v5785_v11, %v13457_v0  ;;  %18473 = vst [vmem:[#allocation32_spill] sm:$0xff] %v13500_v23  ;;  %v13512_v32 = vsub.f32 %v5783_v16, %v13474_v19 }
 0x422   :  { %5467 = vmatpush2.msra.mxu0 %v18445_v27  ;;  %5692 = vmatpush2.msra.mxu1 %v18446_v20  ;;  %v5778_v27 = vld [vmem:[#allocation4 + $0x298] sm:$0xff]  ;;  %v18469_v20 = vld [vmem:[#allocation65_spill] sm:$0xff]  ;;  %v18476_v11 = vld [vmem:[#allocation86_spill] sm:$0xff]  ;;  %v18503_v42 = vand.u32 4294901760, %v13480_v6 }
 0x423   :  { %5471 = vmatprep.subr.mxu0 %v18450_v48  ;;  %5694 = vmatprep.subr.mxu1 %v18451_v10  ;;  %18467 = vst [vmem:[#allocation54_spill] sm:$0xff] %v13489_v1  ;;  %v18470_v30 = vand.u32 4294901760, %v18469_v20  ;;  %v13498_v10 = vsub.f32 %v5784_v45, %v13465_v17  ;;  %18477 = vst [vmem:[#allocation64_spill] sm:$0xff] %v13512_v32  ;;  %v13514_v45 = vand.u32 4294901760, %v5779_v52  ;;  %v18486_v16 = vld [vmem:[#allocation90_spill] sm:$0xff] }
 0x424   :  { %5475 = vmatpush2.msra.mxu0 %v18455_v53  ;;  %5696 = vmatpush2.msra.mxu1 %v18456_v49  ;;  %v5777_v53 = vld [vmem:[#allocation4 + $0x290] sm:$0xff]  ;;  %v18474_v49 = vld [vmem:[#allocation12_spill] sm:$0xff] }
 0x425   :  { %5479 = vmatprep.subr.mxu0 %v18460_v2  ;;  %5698 = vmatprep.subr.mxu1 %v18461_v59  ;;  %18472 = vst [vmem:[#allocation48_spill] sm:$0xff] %v13498_v10  ;;  %v18475_v8 = vand.u32 4294901760, %v18474_v49  ;;  %v13508_v2 = vsub.f32 %v13442_v9, %v17031_v21  ;;  %18478 = vst [vmem:[#allocation11_spill] sm:$0xff] %v13514_v45  ;;  %v13521_v49 = vsub.f32 %v5782_v51, %v13482_v28  ;;  %v5775_v51 = vld [vmem:[#allocation4 + $0x280] sm:$0xff]  ;;  %v18544_v9 = vld [vmem:[#allocation114_spill] sm:$0xff] }
 0x426   :  { %5483 = vmatpush2.msra.mxu0 %v18465_v33  ;;  %5700 = vmatpush2.msra.mxu1 %v18466_v34  ;;  %v5776_v33 = vld [vmem:[#allocation4 + $0x288] sm:$0xff]  ;;  %v18479_v34 = vld [vmem:[#allocation75_spill] sm:$0xff]  ;;  %v13531_v59 = vsub.f32 %v13455_v50, %v17032_v62  ;;  %v13564_v62 = vsub.f32 %v5779_v52, %v13514_v45  ;;  %v18506_v52 = vld [vmem:[#allocation84_spill] sm:$0xff]  ;;  %v18543_v50 = vand.u32 4294901760, %v18360_v12 }
 0x427   :  { %5487 = vmatprep.subr.mxu0 %v18470_v30  ;;  %5702 = vmatprep.subr.mxu1 %v18471_v39  ;;  %v18480_v20 = vand.u32 4294901760, %v18479_v34  ;;  %v18481_v30 = vld [vmem:[#allocation89_spill] sm:$0xff]  ;;  %18482 = vst [vmem:[#allocation49_spill] sm:$0xff] %v13521_v49  ;;  %v18489_v39 = vld [vmem:[#allocation79_spill] sm:$0xff]  ;;  %v13549_v34 = vsub.f32 %v5780_v35, %v13500_v23  ;;  %v18507_v31 = vand.u32 4294901760, %v18506_v52  ;;  %v18514_v52 = vand.u32 4294901760, %v13498_v10 }
 0x428   :  { %5491 = vmatpush2.msra.mxu0 %v18475_v8  ;;  %5704 = vmatpush2.msra.mxu1 %v18476_v11  ;;  %v13523_v8 = vand.u32 4294901760, %v5778_v27  ;;  %v18484_v11 = vld [vmem:[#allocation76_spill] sm:$0xff]  ;;  %v18490_v48 = vand.u32 4294901760, %v18489_v39  ;;  %v18498_v39 = vand.u32 4294901760, %v13472_v15  ;;  %18499 = vst [vmem:[#allocation109_spill] sm:$0xff] %v13564_v62  ;;  %v18500_v35 = vld [vmem:[#allocation83_spill] sm:$0xff] }
 0x429   :  { %5495 = vmatprep.subr.mxu0 %v18480_v20  ;;  %5706 = vmatprep.subr.mxu1 %v18481_v30  ;;  %v18485_v21 = vand.u32 4294901760, %v18484_v11  ;;  %v13535_v20 = vsub.f32 %v5781_v44, %v13491_v22  ;;  %v13537_v30 = vand.u32 4294901760, %v5777_v53  ;;  %v18491_v11 = vld [vmem:[#allocation93_spill] sm:$0xff]  ;;  %18493 = vst [vmem:[#allocation31_spill] sm:$0xff] %v13549_v34  ;;  %v13551_v44 = vand.u32 4294901760, %v5776_v33 }
 0x42a   :  { %18483 = vst [vmem:[#allocation42_spill] sm:$0xff] %v13523_v8  ;;  %5708 = vmatpush2.msra.mxu1 %v18486_v16  ;;  %v18501_v58 = vand.u32 4294901760, %v18500_v35  ;;  %v18508_v35 = vld [vmem:[#allocation98_spill] sm:$0xff]  ;;  %v18549_v12 = vld [vmem:[#allocation117_spill] sm:$0xff] }
 0x42b   :  { %5499 = vmatpush2.msra.mxu0 %v18485_v21  ;;  %18487 = vst [vmem:[#allocation70_spill] sm:$0xff] %v13535_v20  ;;  %18488 = vst [vmem:[#allocation19_spill] sm:$0xff] %v13537_v30  ;;  %5710 = vmatprep.subr.mxu1 %v18491_v11  ;;  %v18492_v21 = vand.u32 4294901760, %v13463_v26  ;;  %v13560_v11 = vsub.f32 %v13472_v15, %v18498_v39  ;;  %v13576_v39 = vsub.f32 %v5778_v27, %v13523_v8 }
 0x42c   :  { %5503 = vmatprep.subr.mxu0 %v18490_v48  ;;  %18494 = vst [vmem:[#allocation92_spill] sm:$0xff] %v13551_v44  ;;  %5712 = vmatpush2.msra.mxu1 %v18497_v7  ;;  %v13572_v7 = vsub.f32 %v13480_v6, %v18503_v42  ;;  %v13578_v48 = vand.u32 4294901760, %v5775_v51  ;;  %v13591_v27 = vsub.f32 %v5777_v53, %v13537_v30  ;;  %v18516_v53 = vld [vmem:[#allocation88_spill] sm:$0xff]  ;;  %v18523_v6 = vld [vmem:[#allocation105_spill] sm:$0xff] }
 0x42d   :  { %v13545_v16 = vsub.f32 %v13463_v26, %v18492_v21  ;;  %5507 = vmatpush2.msra.mxu0 %v18496_v24  ;;  %5714 = vmatprep.subr.mxu1 %v18502_v63  ;;  %18504 = vst [vmem:[#allocation96_spill] sm:$0xff] %v13576_v39  ;;  %v5774_v21 = vld [vmem:[#allocation4 + $0x278] sm:$0xff]  ;;  %v18509_v63 = vand.u32 4294901760, %v13489_v1  ;;  %v5773_v24 = vld [vmem:[#allocation4 + $0x270] sm:$0xff]  ;;  %v18517_v14 = vand.u32 4294901760, %v18516_v53  ;;  %v18524_v53 = vand.u32 4294901760, %v13521_v49 }
 0x42e   :  { %5511 = vmatprep.subr.mxu0 %v18501_v58  ;;  %18505 = vst [vmem:[#allocation99_spill] sm:$0xff] %v13578_v48  ;;  %5716 = vmatpush2.msra.mxu1 %v18508_v35  ;;  %18510 = vst [vmem:[#allocation100_spill] sm:$0xff] %v13591_v27  ;;  %v13600_v35 = vsub.f32 %v13498_v10, %v18514_v52  ;;  %v13604_v58 = vsub.f32 %v5776_v33, %v13551_v44  ;;  %v13616_v10 = vand.u32 4294901760, %v5774_v21  ;;  %v18521_v33 = vld [vmem:[#allocation91_spill] sm:$0xff]  ;;  %v5771_v52 = vld [vmem:[#allocation4 + $0x260] sm:$0xff] }
 0x42f   :  { %5515 = vmatpush2.msra.mxu0 %v18507_v31  ;;  %v13587_v42 = vsub.f32 %v13489_v1, %v18509_v63  ;;  %5718 = vmatprep.subr.mxu1 %v18513_v13  ;;  %v5772_v63 = vld [vmem:[#allocation4 + $0x268] sm:$0xff]  ;;  %v18522_v1 = vand.u32 4294901760, %v18521_v33  ;;  %v13629_v13 = vsub.f32 %v5775_v51, %v13578_v48  ;;  %v18527_v33 = vld [vmem:[#allocation106_spill] sm:$0xff]  ;;  %v18530_v51 = vld [vmem:[#allocation95_spill] sm:$0xff] }
 0x430   :  { %5519 = vmatprep.subr.mxu0 %v18512_v37  ;;  %18515 = vst [vmem:[#allocation103_spill] sm:$0xff] %v13604_v58  ;;  %5720 = vmatpush2.msra.mxu1 %v18518_v61  ;;  %v18519_v37 = vand.u32 4294901760, %v13512_v32  ;;  %18520 = vst [vmem:[#allocation50_spill] sm:$0xff] %v13616_v10  ;;  %v13625_v61 = vsub.f32 %v13521_v49, %v18524_v53  ;;  %v13641_v49 = vand.u32 4294901760, %v5773_v24  ;;  %v18531_v15 = vand.u32 4294901760, %v18530_v51  ;;  %v5769_v53 = vld [vmem:[#allocation4 + $0x250] sm:$0xff] }
 0x431   :  { %5523 = vmatpush2.msra.mxu0 %v18517_v14  ;;  %5722 = vmatprep.subr.mxu1 %v18523_v6  ;;  %18525 = vst [vmem:[#allocation104_spill] sm:$0xff] %v13629_v13  ;;  %v13653_v6 = vand.u32 4294901760, %v5772_v63  ;;  %v18535_v26 = vld [vmem:[#allocation110_spill] sm:$0xff] }
 0x432   :  { %v13613_v31 = vsub.f32 %v13512_v32, %v18519_v37  ;;  %5527 = vmatprep.subr.mxu0 %v18522_v1  ;;  %v18526_v32 = vand.u32 4294901760, %v18352_v29  ;;  %5724 = vmatpush2.msra.mxu1 %v18527_v33  ;;  %v18528_v1 = vand.u32 4294901760, %v13535_v20  ;;  %18529 = vst [vmem:[#allocation107_spill] sm:$0xff] %v13641_v49  ;;  %v5770_v37 = vld [vmem:[#allocation4 + $0x258] sm:$0xff]  ;;  %v13667_v29 = vand.u32 4294901760, %v5771_v52 }
 0x433   :  { %5726 = vmatprep.subr.mxu1 %v18355_v36  ;;  %18533 = vst [vmem:[#allocation108_spill] sm:$0xff] %v13653_v6  ;;  %v18536_v36 = vand.u32 4294901760, %v13564_v62 }
 0x434   :  { %5531 = vmatpush2.msra.mxu0 %v18526_v32  ;;  %v13638_v14 = vsub.f32 %v13535_v20, %v18528_v1  ;;  %v18532_v32 = vand.u32 4294901760, %v13549_v34  ;;  %v18534_v20 = vand.u32 4294901760, %v18356_v54  ;;  %5728 = vmatpush2.msra.mxu1 %v18535_v26  ;;  %18538 = vst [vmem:[#allocation112_spill] sm:$0xff] %v13667_v29  ;;  %v5768_v1 = vld [vmem:[#allocation4 + $0x248] sm:$0xff]  ;;  %v13693_v26 = vand.u32 4294901760, %v5769_v53 }
 0x435   :  { %5535 = vmatprep.subr.mxu0 %v18531_v15  ;;  %v13662_v51 = vsub.f32 %v13564_v62, %v18536_v36  ;;  %v18540_v54 = vld [vmem:[#allocation113_spill] sm:$0xff]  ;;  %v13679_v62 = vand.u32 4294901760, %v5770_v37  ;;  %v5766_v36 = vld [vmem:[#allocation4 + $0x238] sm:$0xff] }
 0x436   :  { %v13650_v33 = vsub.f32 %v13549_v34, %v18532_v32  ;;  %5539 = vmatpush2.msra.mxu0 %v18534_v20  ;;  %v13665_v32 = vsub.f32 %v5774_v21, %v13616_v10  ;;  %v18539_v34 = vand.u32 4294901760, %v18358_v57  ;;  %5730 = vmatprep.subr.mxu1 %v18540_v54  ;;  %v18541_v20 = vand.u32 4294901760, %v13576_v39  ;;  %v5767_v21 = vld [vmem:[#allocation4 + $0x240] sm:$0xff]  ;;  %18547 = vst [vmem:[#allocation22_spill] sm:$0xff] %v13693_v26 }
 0x437   :  { %18542 = vst [vmem:[#allocation115_spill] sm:$0xff] %v13679_v62  ;;  %5732 = vmatpush2.msra.mxu1 %v18544_v9  ;;  %v13716_v10 = vsub.f32 %v5771_v52, %v13667_v29  ;;  %v13732_v52 = vand.u32 4294901760, %v5766_v36  ;;  %v18562_v9 = vand.u32 4294901760, %v18365_v3  ;;  %v18563_v29 = vand.u32 4294901760, %v13545_v16  ;;  %v5760_v3 = vld [vmem:[#allocation4 + $0x208] sm:$0xff] }
 0x438   :  { %18537 = vst [vmem:[#allocation111_spill] sm:$0xff] %v13665_v32  ;;  %5543 = vmatprep.subr.mxu0 %v18539_v34  ;;  %v13676_v15 = vsub.f32 %v13576_v39, %v18541_v20  ;;  %v18545_v34 = vand.u32 4294901760, %v13591_v27  ;;  %v13691_v20 = vsub.f32 %v5773_v24, %v13641_v49  ;;  %v18548_v39 = vand.u32 4294901760, %v18362_v56  ;;  %5736 = vmatmul.mubr.f32.vlgmr.msra.gmra.mxu1 %v18549_v12 }
 0x439   :  { %5547 = vmatpush2.msra.mxu0 %v18543_v50  ;;  %v18550_v50 = vand.u32 4294901760, %v13604_v58  ;;  %v13707_v24 = vand.u32 4294901760, %v5768_v1  ;;  %v18553_v49 = vand.u32 4294901760, %v13508_v2  ;;  %v18554_v56 = vand.u32 4294901760, %v18364_v18  ;;  %18555 = vst [vmem:[#allocation16_spill] sm:$0xff] %v13716_v10  ;;  %18561 = vst [vmem:[#allocation26_spill] sm:$0xff] %v13732_v52 }
 0x43a   :  { %v13688_v54 = vsub.f32 %v13591_v27, %v18545_v34  ;;  %18546 = vst [vmem:[#allocation116_spill] sm:$0xff] %v13691_v20  ;;  %5551 = vmatprep.subr.mxu0 %v18548_v39  ;;  %v13705_v34 = vsub.f32 %v5772_v63, %v13653_v6  ;;  %v5765_v27 = vld [vmem:[#allocation4 + $0x230] sm:$0xff]  ;;  %v5764_v63 = vld [vmem:[#allocation4 + $0x228] sm:$0xff]  ;;  %v18558_v6 = vand.u32 4294901760, %v13531_v59  ;;  %v18559_v18 = vand.u32 4294901760, %v13629_v13  ;;  %v5763_v39 = vld [vmem:[#allocation4 + $0x220] sm:$0xff] }
 0x43b   :  { %v13702_v57 = vsub.f32 %v13604_v58, %v18550_v50  ;;  %18552 = vst [vmem:[#allocation67_spill] sm:$0xff] %v13707_v24  ;;  %6005 = vmatprep.subr.mxu1 %v18553_v49  ;;  %5555 = vmatpush2.msra.mxu0 %v18554_v56  ;;  %v13718_v50 = vand.u32 4294901760, %v5767_v21  ;;  %v18557_v58 = vld [vmem:[#allocation124_spill] sm:$0xff]  ;;  %v13730_v56 = vsub.f32 %v5770_v37, %v13679_v62  ;;  %v5762_v37 = vld [vmem:[#allocation4 + $0x218] sm:$0xff]  ;;  %v18567_v62 = vand.u32 4294901760, %v13560_v11 }
 0x43c   :  { %18551 = vst [vmem:[#allocation62_spill] sm:$0xff] %v13705_v34  ;;  %5742 = vmatprep.mubr.f32.mxu1 %v18557_v58  ;;  %6011 = vmatpush1.msra.mxu1 %v18558_v6  ;;  %v13727_v49 = vsub.f32 %v13629_v13, %v18559_v18  ;;  %v13741_v2 = vsub.f32 %v5769_v53, %v13693_v26  ;;  %v13743_v18 = vand.u32 4294901760, %v5765_v27  ;;  %v18566_v13 = vand.u32 4294901760, %v18366_v46  ;;  %v5761_v53 = vld [vmem:[#allocation4 + $0x210] sm:$0xff] }
 0x43d   :  { %18556 = vst [vmem:[#allocation15_spill] sm:$0xff] %v13718_v50  ;;  %18560 = vst [vmem:[#allocation46_spill] sm:$0xff] %v13730_v56  ;;  %5559 = vmatprep.subr.mxu0 %v18562_v9  ;;  %6017 = vmatprep.subr.mxu1 %v18563_v29  ;;  %v13752_v29 = vsub.f32 %v5768_v1, %v13707_v24  ;;  %v13754_v9 = vand.u32 4294901760, %v5764_v63  ;;  %v18570_v59 = vand.u32 4294901760, %v18367_v38  ;;  %v18571_v6 = vld [vmem:[#allocation122_spill] sm:$0xff]  ;;  %v18572_v46 = vand.u32 4294901760, %v13665_v32 }
 0x43e   :  { %18564 = vst [vmem:[#allocation29_spill] sm:$0xff] %v13741_v2  ;;  %18565 = vst [vmem:[#allocation47_spill] sm:$0xff] %v13743_v18  ;;  %5563 = vmatpush2.msra.mxu0 %v18566_v13  ;;  %6023 = vmatpush1.msra.mxu1 %v18567_v62  ;;  %v13766_v13 = vsub.f32 %v5767_v21, %v13718_v50  ;;  %v13768_v1 = vand.u32 4294901760, %v5763_v39  ;;  %v18575_v16 = vand.u32 4294901760, %v13572_v7  ;;  %v18576_v38 = vand.u32 4294901760, %v18368_v4  ;;  %v18579_v21 = vld [vmem:[#allocation128_spill] sm:$0xff] }
 0x43f   :  { %18568 = vst [vmem:[#allocation9_spill] sm:$0xff] %v13752_v29  ;;  %18569 = vst [vmem:[#allocation17_spill] sm:$0xff] %v13754_v9  ;;  %5567 = vmatprep.subr.mxu0 %v18570_v59  ;;  %5744 = vmatmul.mubr.f32.gmra.mxu1 %v18571_v6  ;;  %v13762_v11 = vsub.f32 %v13665_v32, %v18572_v46  ;;  %v13777_v46 = vsub.f32 %v5766_v36, %v13732_v52  ;;  %v13779_v62 = vand.u32 4294901760, %v5762_v37  ;;  %v5759_v36 = vld [vmem:[#allocation4 + $0x200] sm:$0xff] }
 0x440   :  { %18573 = vst [vmem:[#allocation59_spill] sm:$0xff] %v13766_v13  ;;  %18574 = vst [vmem:[#allocation34_spill] sm:$0xff] %v13768_v1  ;;  %6029 = vmatprep.subr.mxu1 %v18575_v16  ;;  %5571 = vmatpush2.msra.mxu0 %v18576_v38  ;;  %v18580_v32 = vand.u32 4294901760, %v13587_v42  ;;  %v18581_v7 = vand.u32 4294901760, %v13691_v20  ;;  %v13791_v38 = vsub.f32 %v5765_v27, %v13743_v18  ;;  %v13793_v59 = vand.u32 4294901760, %v5761_v53 }
 0x441   :  { %18577 = vst [vmem:[#allocation66_spill] sm:$0xff] %v13777_v46  ;;  %18578 = vst [vmem:[#allocation41_spill] sm:$0xff] %v13779_v62  ;;  %5750 = vmatprep.mubr.f32.mxu1 %v18579_v21  ;;  %v18584_v24 = vand.u32 4294901760, %v18369_v5  ;;  %v18585_v52 = vand.u32 4294901760, %v13600_v35  ;;  %v18586_v42 = vand.u32 4294901760, %v13705_v34  ;;  %v13806_v4 = vsub.f32 %v5764_v63, %v13754_v9  ;;  %v5822_v35 = vld [vmem:[#allocation4 + $0x3f8] sm:$0xff] }
 0x442   :  { %6035 = vmatpush1.msra.mxu1 %v18580_v32  ;;  %v13787_v16 = vsub.f32 %v13691_v20, %v18581_v7  ;;  %18582 = vst [vmem:[#allocation61_spill] sm:$0xff] %v13791_v38  ;;  %18583 = vst [vmem:[#allocation72_spill] sm:$0xff] %v13793_v59  ;;  %v13808_v27 = vand.u32 4294901760, %v5760_v3  ;;  %v18589_v20 = vand.u32 4294901760, %v18370_v41  ;;  %v18590_v5 = vand.u32 4294901760, %v13613_v31  ;;  %v18593_v7 = vld [vmem:[#allocation127_spill] sm:$0xff] }
 0x443   :  { %5575 = vmatprep.subr.mxu0 %v18584_v24  ;;  %6041 = vmatprep.subr.mxu1 %v18585_v52  ;;  %v13802_v32 = vsub.f32 %v13705_v34, %v18586_v42  ;;  %18587 = vst [vmem:[#allocation21_spill] sm:$0xff] %v13806_v4  ;;  %v18591_v24 = vand.u32 4294901760, %v13716_v10  ;;  %v13822_v63 = vsub.f32 %v5763_v39, %v13768_v1  ;;  %v18594_v41 = vand.u32 4294901760, %v13730_v56  ;;  %v5820_v42 = vld [vmem:[#allocation4 + $0x3e8] sm:$0xff] }
 0x444   :  { %18588 = vst [vmem:[#allocation13_spill] sm:$0xff] %v13808_v27  ;;  %5579 = vmatpush2.msra.mxu0 %v18589_v20  ;;  %6047 = vmatpush1.msra.mxu1 %v18590_v5  ;;  %v13833_v5 = vsub.f32 %v5762_v37, %v13779_v62  ;;  %v18597_v39 = vand.u32 4294901760, %v13625_v61  ;;  %v13848_v37 = vsub.f32 %v5761_v53, %v13793_v59  ;;  %v18600_v61 = vand.u32 4294901760, %v13752_v29  ;;  %v5821_v20 = vld [vmem:[#allocation4 + $0x3f0] sm:$0xff] }
 0x445   :  { %v13818_v52 = vsub.f32 %v13716_v10, %v18591_v24  ;;  %18592 = vst [vmem:[#allocation36_spill] sm:$0xff] %v13822_v63  ;;  %5583 = vmatmul.mubr.f32.vlgmr.msra.gmra.mxu0 %v18549_v12  ;;  %5752 = vmatmul.mubr.f32.gmra.mxu1 %v18593_v7  ;;  %v13829_v31 = vsub.f32 %v13730_v56, %v18594_v41  ;;  %v13835_v24 = vand.u32 4294901760, %v5759_v36  ;;  %v18598_v10 = vand.u32 4294901760, %v13741_v2 }
 0x446   :  { %18595 = vst [vmem:[#allocation10_spill] sm:$0xff] %v13833_v5  ;;  %5824 = vmatprep.subr.mxu0 %v13423_v60  ;;  %6053 = vmatprep.subr.mxu1 %v18597_v39  ;;  %18599 = vst [vmem:[#allocation69_spill] sm:$0xff] %v13848_v37  ;;  %v13856_v39 = vsub.f32 %v13752_v29, %v18600_v61  ;;  %v18602_v53 = vand.u32 4294901760, %v13638_v14  ;;  %v18603_v56 = vand.u32 4294901760, %v13766_v13  ;;  %v13872_v29 = vand.u32 4294901760, %v5822_v35  ;;  %v5819_v61 = vld [vmem:[#allocation4 + $0x3e0] sm:$0xff] }
 0x447   :  { %18596 = vst [vmem:[#allocation56_spill] sm:$0xff] %v13835_v24  ;;  %v13844_v41 = vsub.f32 %v13741_v2, %v18598_v10  ;;  %5589 = vmatprep.mubr.f32.mxu0 %v18557_v58  ;;  %5826 = vmatpush1.msra.mxu0 %v13431_v25  ;;  %v13860_v10 = vsub.f32 %v5760_v3, %v13808_v27  ;;  %v18605_v3 = vand.u32 4294901760, %v13650_v33  ;;  %v5816_v33 = vld [vmem:[#allocation4 + $0x3c8] sm:$0xff] }
 0x448   :  { %6059 = vmatpush1.msra.mxu1 %v18602_v53  ;;  %6385 = vmatprep.mubr.f32.mxu1 %v13106_v47  ;;  %v13869_v34 = vsub.f32 %v13766_v13, %v18603_v56  ;;  %18604 = vst [vmem:[#allocation25_spill] sm:$0xff] %v13872_v29  ;;  %v18606_v53 = vand.u32 4294901760, %v13777_v46  ;;  %v13885_v47 = vsub.f32 %v5759_v36, %v13835_v24  ;;  %v18608_v13 = vand.u32 4294901760, %v13662_v51  ;;  %v5818_v56 = vld [vmem:[#allocation4 + $0x3d8] sm:$0xff] }
 0x449   :  { %18601 = vst [vmem:[#allocation52_spill] sm:$0xff] %v13860_v10  ;;  %5828 = vmatprep.subr.mxu0 %v13436_v55  ;;  %6065 = vmatprep.subr.mxu1 %v18605_v3  ;;  %v18609_v3 = vand.u32 4294901760, %v13791_v38  ;;  %v18611_v51 = vand.u32 4294901760, %v13806_v4 }
 0x44a   :  { %v13881_v2 = vsub.f32 %v13777_v46, %v18606_v53  ;;  %18607 = vst [vmem:[#allocation24_spill] sm:$0xff] %v13885_v47  ;;  %5830 = vmatpush1.msra.mxu0 %v13444_v43  ;;  %6071 = vmatpush1.msra.mxu1 %v18608_v13  ;;  %v13897_v46 = vand.u32 4294901760, %v5821_v20  ;;  %v18613_v53 = vand.u32 4294901760, %v13676_v15  ;;  %v18617_v15 = vand.u32 4294901760, %v13688_v54 }
 0x44b   :  { %v13894_v14 = vsub.f32 %v13791_v38, %v18609_v3  ;;  %5591 = vmatmul.mubr.f32.gmra.mxu0 %v18571_v6  ;;  %5832 = vmatprep.subr.mxu0 %v13449_v40  ;;  %v13905_v13 = vsub.f32 %v13806_v4, %v18611_v51  ;;  %v13908_v3 = vand.u32 4294901760, %v5820_v42  ;;  %v5817_v38 = vld [vmem:[#allocation4 + $0x3d0] sm:$0xff]  ;;  %v18614_v40 = vand.u32 4294901760, %v13822_v63 }
 0x44c   :  { %18610 = vst [vmem:[#allocation63_spill] sm:$0xff] %v13897_v46  ;;  %6077 = vmatprep.subr.mxu1 %v18613_v53  ;;  %5597 = vmatprep.mubr.f32.mxu0 %v18579_v21  ;;  %v13920_v51 = vsub.f32 %v5822_v35, %v13872_v29  ;;  %v13922_v4 = vand.u32 4294901760, %v5819_v61  ;;  %v18618_v6 = vand.u32 4294901760, %v13833_v5  ;;  %v5815_v35 = vld [vmem:[#allocation4 + $0x3c0] sm:$0xff]  ;;  %v18620_v43 = vand.u32 4294901760, %v13702_v57 }
 0x44d   :  { %18612 = vst [vmem:[#allocation44_spill] sm:$0xff] %v13908_v3  ;;  %v13917_v36 = vsub.f32 %v13822_v63, %v18614_v40  ;;  %5834 = vmatpush1.msra.mxu0 %v13457_v0  ;;  %6083 = vmatpush1.msra.mxu1 %v18617_v15  ;;  %v13934_v63 = vand.u32 4294901760, %v5818_v56  ;;  %v18621_v15 = vand.u32 4294901760, %v13848_v37  ;;  %v5814_v40 = vld [vmem:[#allocation4 + $0x3b8] sm:$0xff]  ;;  %v18625_v57 = vand.u32 4294901760, %v13860_v10  ;;  %v18634_v0 = vld [vmem:[#allocation129_spill] sm:$0xff] }
 0x44e   :  { %18615 = vst [vmem:[#allocation8_spill] sm:$0xff] %v13920_v51  ;;  %18616 = vst [vmem:[#allocation18_spill] sm:$0xff] %v13922_v4  ;;  %v13931_v21 = vsub.f32 %v13833_v5, %v18618_v6  ;;  %5836 = vmatprep.subr.mxu0 %v13465_v17  ;;  %6089 = vmatprep.subr.mxu1 %v18620_v43  ;;  %v13946_v6 = vsub.f32 %v5821_v20, %v13897_v46  ;;  %v13948_v5 = vand.u32 4294901760, %v5817_v38 }
 0x44f   :  { %18619 = vst [vmem:[#allocation53_spill] sm:$0xff] %v13934_v63  ;;  %v13943_v53 = vsub.f32 %v13848_v37, %v18621_v15  ;;  %5838 = vmatpush1.msra.mxu0 %v13474_v19  ;;  %v18624_v17 = vand.u32 4294901760, %v13727_v49  ;;  %v13957_v54 = vsub.f32 %v13860_v10, %v18625_v57  ;;  %v13960_v15 = vsub.f32 %v5820_v42, %v13908_v3  ;;  %v5813_v37 = vld [vmem:[#allocation4 + $0x3b0] sm:$0xff]  ;;  %v5812_v57 = vld [vmem:[#allocation4 + $0x3a8] sm:$0xff] }
 0x450   :  { %18622 = vst [vmem:[#allocation38_spill] sm:$0xff] %v13946_v6  ;;  %18623 = vst [vmem:[#allocation68_spill] sm:$0xff] %v13948_v5  ;;  %v13962_v20 = vand.u32 4294901760, %v5816_v33  ;;  %5599 = vmatmul.mubr.f32.gmra.mxu0 %v18593_v7  ;;  %5840 = vmatprep.subr.mxu0 %v13482_v28  ;;  %v13969_v43 = vsub.f32 %v5819_v61, %v13922_v4  ;;  %v13971_v19 = vand.u32 4294901760, %v5815_v35  ;;  %v18630_v42 = vand.u32 4294901760, %v13762_v11  ;;  %v5809_v10 = vld [vmem:[#allocation4 + $0x390] sm:$0xff] }
 0x451   :  { %6095 = vmatpush1.msra.mxu1 %v18624_v17  ;;  %18626 = vst [vmem:[#allocation35_spill] sm:$0xff] %v13960_v15  ;;  %5842 = vmatpush1.msra.mxu0 %v13491_v22  ;;  %v18631_v7 = vand.u32 4294901760, %v13885_v47  ;;  %v13983_v49 = vsub.f32 %v5818_v56, %v13934_v63  ;;  %v13985_v61 = vand.u32 4294901760, %v5814_v40  ;;  %v5811_v17 = vld [vmem:[#allocation4 + $0x3a0] sm:$0xff]  ;;  %v18635_v11 = vand.u32 4294901760, %v13787_v16  ;;  %v5808_v16 = vld [vmem:[#allocation4 + $0x388] sm:$0xff] }
 0x452   :  { %18627 = vst [vmem:[#allocation30_spill] sm:$0xff] %v13962_v20  ;;  %18628 = vst [vmem:[#allocation14_spill] sm:$0xff] %v13969_v43  ;;  %6101 = vmatprep.subr.mxu1 %v18630_v42  ;;  %5956 = vmatprep.mubr.f32.mxu0 %v18634_v0  ;;  %v13993_v22 = vsub.f32 %v5817_v38, %v13948_v5  ;;  %v18638_v56 = vand.u32 4294901760, %v13802_v32  ;;  %v14005_v42 = vand.u32 4294901760, %v5812_v57  ;;  %v18641_v38 = vand.u32 4294901760, %v13818_v52 }
 0x453   :  { %18629 = vst [vmem:[#allocation74_spill] sm:$0xff] %v13971_v19  ;;  %v13980_v28 = vsub.f32 %v13885_v47, %v18631_v7  ;;  %18632 = vst [vmem:[#allocation60_spill] sm:$0xff] %v13983_v49  ;;  %6107 = vmatpush1.msra.mxu1 %v18635_v11  ;;  %v13995_v7 = vand.u32 4294901760, %v5813_v37  ;;  %v5810_v47 = vld [vmem:[#allocation4 + $0x398] sm:$0xff]  ;;  %5844 = vmatprep.subr.mxu0 %v13500_v23  ;;  %v14003_v11 = vsub.f32 %v5816_v33, %v13962_v20 }
 0x454   :  { %18633 = vst [vmem:[#allocation77_spill] sm:$0xff] %v13985_v61  ;;  %18636 = vst [vmem:[#allocation71_spill] sm:$0xff] %v13993_v22  ;;  %6113 = vmatprep.subr.mxu1 %v18638_v56  ;;  %5846 = vmatpush1.msra.mxu0 %v13514_v45  ;;  %v18642_v23 = vand.u32 4294901760, %v13920_v51  ;;  %v14017_v0 = vsub.f32 %v5815_v35, %v13971_v19  ;;  %v14019_v33 = vand.u32 4294901760, %v5811_v17  ;;  %v18645_v45 = vand.u32 4294901760, %v13829_v31 }
 0x455   :  { %18637 = vst [vmem:[#allocation78_spill] sm:$0xff] %v13995_v7  ;;  %18639 = vst [vmem:[#allocation20_spill] sm:$0xff] %v14003_v11  ;;  %6119 = vmatpush1.msra.mxu1 %v18641_v38  ;;  %5848 = vmatprep.subr.mxu0 %v13523_v8  ;;  %v18648_v35 = vand.u32 4294901760, %v13844_v41  ;;  %v18649_v56 = vand.u32 4294901760, %v13946_v6  ;;  %v14041_v31 = vsub.f32 %v5813_v37, %v13995_v7  ;;  %v14043_v52 = vand.u32 4294901760, %v5809_v10 }
 0x456   :  { %18640 = vst [vmem:[#allocation81_spill] sm:$0xff] %v14005_v42  ;;  %v14013_v32 = vsub.f32 %v13920_v51, %v18642_v23  ;;  %18643 = vst [vmem:[#allocation73_spill] sm:$0xff] %v14017_v0  ;;  %6125 = vmatprep.subr.mxu1 %v18645_v45  ;;  %v14027_v23 = vsub.f32 %v5814_v40, %v13985_v61  ;;  %v14029_v51 = vand.u32 4294901760, %v5810_v47  ;;  %5850 = vmatpush1.msra.mxu0 %v13537_v30  ;;  %v5807_v40 = vld [vmem:[#allocation4 + $0x380] sm:$0xff] }
 0x457   :  { %18644 = vst [vmem:[#allocation82_spill] sm:$0xff] %v14019_v33  ;;  %6131 = vmatpush1.msra.mxu1 %v18648_v35  ;;  %v14037_v8 = vsub.f32 %v13946_v6, %v18649_v56  ;;  %18650 = vst [vmem:[#allocation12_spill] sm:$0xff] %v14041_v31  ;;  %5852 = vmatprep.subr.mxu0 %v13551_v44  ;;  %v18652_v38 = vand.u32 4294901760, %v13856_v39  ;;  %v18653_v41 = vand.u32 4294901760, %v13960_v15  ;;  %v14057_v37 = vand.u32 4294901760, %v5808_v16 }
 0x458   :  { %18646 = vst [vmem:[#allocation65_spill] sm:$0xff] %v14027_v23  ;;  %18647 = vst [vmem:[#allocation85_spill] sm:$0xff] %v14029_v51  ;;  %v14055_v45 = vsub.f32 %v5812_v57, %v14005_v42  ;;  %5854 = vmatpush1.msra.mxu0 %v13578_v48  ;;  %v18656_v6 = vand.u32 4294901760, %v13869_v34  ;;  %v6196_v39 = vand.u32 4294901760, %v14013_v32  ;;  %v14070_v56 = vsub.f32 %v5811_v17, %v14019_v33  ;;  %v18659_v57 = vld [vmem:[#allocation50_spill] sm:$0xff]  ;;  %v18663_v17 = vld [vmem:[#allocation107_spill] sm:$0xff] }
 0x459   :  { %18651 = vst [vmem:[#allocation86_spill] sm:$0xff] %v14043_v52  ;;  %6137 = vmatprep.subr.mxu1 %v18652_v38  ;;  %v14051_v35 = vsub.f32 %v13960_v15, %v18653_v41  ;;  %18655 = vst [vmem:[#allocation89_spill] sm:$0xff] %v14057_v37  ;;  %v18657_v38 = vand.u32 4294901760, %v13969_v43  ;;  %5856 = vmatprep.subr.mxu0 %v18659_v57  ;;  %v18660_v15 = vand.u32 4294901760, %v13881_v2  ;;  %v18661_v34 = vand.u32 4294901760, %v13983_v49  ;;  %v5806_v41 = vld [vmem:[#allocation4 + $0x378] sm:$0xff] }
 0x45a   :  { %18654 = vst [vmem:[#allocation75_spill] sm:$0xff] %v14055_v45  ;;  %6143 = vmatpush1.msra.mxu1 %v18656_v6  ;;  %18658 = vst [vmem:[#allocation76_spill] sm:$0xff] %v14070_v56  ;;  %5858 = vmatpush1.msra.mxu0 %v18663_v17  ;;  %v18664_v57 = vand.u32 4294901760, %v13894_v14  ;;  %v6202_v2 = vand.u32 4294901760, %v14037_v8  ;;  %v18668_v48 = vand.u32 4294901760, %v13905_v13  ;;  %v5805_v32 = vld [vmem:[#allocation4 + $0x370] sm:$0xff] }
 0x45b   :  { %v14066_v44 = vsub.f32 %v13969_v43, %v18657_v38  ;;  %6149 = vmatprep.subr.mxu1 %v18660_v15  ;;  %v14078_v6 = vsub.f32 %v13983_v49, %v18661_v34  ;;  %v14082_v38 = vsub.f32 %v5810_v47, %v14029_v51  ;;  %v14084_v43 = vand.u32 4294901760, %v5807_v40  ;;  %v18667_v49 = vld [vmem:[#allocation108_spill] sm:$0xff] }
 0x45c   :  { %6155 = vmatpush1.msra.mxu1 %v18664_v57  ;;  %v18665_v15 = vand.u32 4294901760, %v13993_v22  ;;  %v14097_v47 = vsub.f32 %v5809_v10, %v14043_v52  ;;  %5860 = vmatprep.subr.mxu0 %v18667_v49  ;;  %v6208_v14 = vand.u32 4294901760, %v14051_v35  ;;  %v18669_v57 = vand.u32 4294901760, %v14003_v11  ;;  %v18671_v10 = vld [vmem:[#allocation112_spill] sm:$0xff] }
 0x45d   :  { %18662 = vst [vmem:[#allocation90_spill] sm:$0xff] %v14082_v38  ;;  %6161 = vmatprep.subr.mxu1 %v18668_v48  ;;  %5862 = vmatpush1.msra.mxu0 %v18671_v10  ;;  %v18672_v49 = vand.u32 4294901760, %v13917_v36  ;;  %v6214_v48 = vand.u32 4294901760, %v14066_v44  ;;  %v18673_v13 = vand.u32 4294901760, %v14017_v0  ;;  %v18675_v17 = vand.u32 4294901760, %v13931_v21 }
 0x45e   :  { %v14093_v34 = vsub.f32 %v13993_v22, %v18665_v15  ;;  %18666 = vst [vmem:[#allocation79_spill] sm:$0xff] %v14097_v47  ;;  %v14106_v8 = vsub.f32 %v14003_v11, %v18669_v57  ;;  %v14110_v22 = vsub.f32 %v5808_v16, %v14057_v37  ;;  %v14122_v11 = vand.u32 4294901760, %v5806_v41  ;;  %v5804_v15 = vld [vmem:[#allocation4 + $0x368] sm:$0xff]  ;;  %v18674_v16 = vld [vmem:[#allocation115_spill] sm:$0xff]  ;;  %v5803_v57 = vld [vmem:[#allocation4 + $0x360] sm:$0xff] }
 0x45f   :  { %6167 = vmatpush1.msra.mxu1 %v18672_v49  ;;  %v14119_v35 = vsub.f32 %v14017_v0, %v18673_v13  ;;  %5864 = vmatprep.subr.mxu0 %v18674_v16  ;;  %v6220_v36 = vand.u32 4294901760, %v14078_v6  ;;  %v18676_v49 = vand.u32 4294901760, %v14027_v23  ;;  %v14135_v0 = vsub.f32 %v5807_v40, %v14084_v43  ;;  %v5802_v13 = vld [vmem:[#allocation4 + $0x358] sm:$0xff] }
 0x460   :  { %18670 = vst [vmem:[#allocation93_spill] sm:$0xff] %v14110_v22  ;;  %6173 = vmatprep.subr.mxu1 %v18675_v17  ;;  %5866 = vmatpush1.msra.mxu0 %v13693_v26  ;;  %v18678_v16 = vand.u32 4294901760, %v13943_v53  ;;  %v6226_v21 = vand.u32 4294901760, %v14093_v34  ;;  %v18679_v6 = vand.u32 4294901760, %v14041_v31  ;;  %v18680_v40 = vld [vmem:[#allocation67_spill] sm:$0xff]  ;;  %v18681_v10 = vand.u32 4294901760, %v13957_v54 }
 0x461   :  { %v14131_v44 = vsub.f32 %v14027_v23, %v18676_v49  ;;  %18677 = vst [vmem:[#allocation80_spill] sm:$0xff] %v14135_v0  ;;  %v14147_v23 = vand.u32 4294901760, %v5805_v32  ;;  %5868 = vmatprep.subr.mxu0 %v18680_v40  ;;  %v6232_v53 = vand.u32 4294901760, %v14106_v8  ;;  %v5801_v49 = vld [vmem:[#allocation4 + $0x350] sm:$0xff]  ;;  %v18684_v26 = vand.u32 4294901760, %v13980_v28 }
 0x462   :  { %6179 = vmatpush1.msra.mxu1 %v18678_v16  ;;  %v14144_v17 = vsub.f32 %v14041_v31, %v18679_v6  ;;  %v18682_v16 = vand.u32 4294901760, %v14055_v45  ;;  %v14159_v31 = vand.u32 4294901760, %v5804_v15  ;;  %5870 = vmatpush1.msra.mxu0 %v13718_v50  ;;  %v6238_v54 = vand.u32 4294901760, %v14119_v35  ;;  %v5800_v6 = vld [vmem:[#allocation4 + $0x348] sm:$0xff]  ;;  %v18688_v40 = vld [vmem:[#allocation26_spill] sm:$0xff] }
 0x463   :  { %6185 = vmatprep.subr.mxu1 %v18681_v10  ;;  %v18685_v10 = vand.u32 4294901760, %v14070_v56  ;;  %5872 = vmatprep.subr.mxu0 %v18688_v40  ;;  %v6244_v50 = vand.u32 4294901760, %v14131_v44  ;;  %v18689_v28 = vand.u32 4294901760, %v14082_v38  ;;  %v18690_v40 = vand.u32 4294901760, %v14097_v47 }
 0x464   :  { %v14156_v34 = vsub.f32 %v14055_v45, %v18682_v16  ;;  %18683 = vst [vmem:[#allocation94_spill] sm:$0xff] %v14159_v31  ;;  %6191 = vmatpush1.msra.mxu1 %v18684_v26  ;;  %v14171_v16 = vsub.f32 %v5806_v41, %v14122_v11  ;;  %v14173_v45 = vand.u32 4294901760, %v5803_v57  ;;  %5874 = vmatpush1.msra.mxu0 %v13743_v18  ;;  %v6250_v41 = vand.u32 4294901760, %v14144_v17 }
 0x465   :  { %v14168_v8 = vsub.f32 %v14070_v56, %v18685_v10  ;;  %6197 = vmatprep.subr.mxu1 %v6196_v39  ;;  %v14180_v26 = vsub.f32 %v14082_v38, %v18689_v28  ;;  %v14183_v10 = vand.u32 4294901760, %v5802_v13  ;;  %v5799_v56 = vld [vmem:[#allocation4 + $0x340] sm:$0xff]  ;;  %v14190_v39 = vsub.f32 %v14097_v47, %v18690_v40  ;;  %v5798_v38 = vld [vmem:[#allocation4 + $0x338] sm:$0xff]  ;;  %5876 = vmatprep.subr.mxu0 %v13754_v9 }
 0x466   :  { %18686 = vst [vmem:[#allocation83_spill] sm:$0xff] %v14171_v16  ;;  %18687 = vst [vmem:[#allocation97_spill] sm:$0xff] %v14173_v45  ;;  %6203 = vmatpush2.msra.mxu1 %v6202_v2  ;;  %v14193_v44 = vsub.f32 %v5805_v32, %v14147_v23  ;;  %v14195_v28 = vand.u32 4294901760, %v5801_v49  ;;  %v6256_v35 = vand.u32 4294901760, %v14156_v34  ;;  %v18693_v2 = vand.u32 4294901760, %v14110_v22  ;;  %v5797_v32 = vld [vmem:[#allocation4 + $0x330] sm:$0xff]  ;;  %5878 = vmatpush1.msra.mxu0 %v13768_v1 }
 0x467   :  { %6209 = vmatprep.subr.mxu1 %v6208_v14  ;;  %v14205_v18 = vsub.f32 %v5804_v15, %v14159_v31  ;;  %v14207_v40 = vand.u32 4294901760, %v5800_v6  ;;  %v6262_v47 = vand.u32 4294901760, %v14168_v8  ;;  %v14213_v34 = vsub.f32 %v5803_v57, %v14173_v45  ;;  %5880 = vmatprep.subr.mxu0 %v13779_v62  ;;  %v5795_v57 = vld [vmem:[#allocation4 + $0x320] sm:$0xff] }
 0x468   :  { %18691 = vst [vmem:[#allocation84_spill] sm:$0xff] %v14193_v44  ;;  %18692 = vst [vmem:[#allocation98_spill] sm:$0xff] %v14195_v28  ;;  %v14202_v17 = vsub.f32 %v14110_v22, %v18693_v2  ;;  %6215 = vmatpush2.msra.mxu1 %v6214_v48  ;;  %v14215_v9 = vand.u32 4294901760, %v5799_v56  ;;  %v5796_v2 = vld [vmem:[#allocation4 + $0x328] sm:$0xff]  ;;  %v6268_v15 = vand.u32 4294901760, %v14180_v26  ;;  %v18697_v22 = vand.u32 4294901760, %v14135_v0  ;;  %5882 = vmatpush1.msra.mxu0 %v13793_v59 }
 0x469   :  { %18694 = vst [vmem:[#allocation87_spill] sm:$0xff] %v14205_v18  ;;  %18695 = vst [vmem:[#allocation101_spill] sm:$0xff] %v14207_v40  ;;  %6221 = vmatprep.subr.mxu1 %v6220_v36  ;;  %v14225_v48 = vsub.f32 %v5802_v13, %v14183_v10  ;;  %v14227_v8 = vand.u32 4294901760, %v5798_v38  ;;  %v6274_v14 = vand.u32 4294901760, %v14190_v39  ;;  %v14233_v26 = vsub.f32 %v5801_v49, %v14195_v28  ;;  %v5793_v39 = vld [vmem:[#allocation4 + $0x310] sm:$0xff] }
 0x46a   :  { %18696 = vst [vmem:[#allocation88_spill] sm:$0xff] %v14215_v9  ;;  %v14222_v1 = vsub.f32 %v14135_v0, %v18697_v22  ;;  %6227 = vmatpush2.msra.mxu1 %v6226_v21  ;;  %v14235_v62 = vand.u32 4294901760, %v5797_v32  ;;  %v5794_v22 = vld [vmem:[#allocation4 + $0x318] sm:$0xff]  ;;  %5884 = vmatprep.subr.mxu0 %v13808_v27  ;;  %v6280_v13 = vand.u32 4294901760, %v14202_v17  ;;  %v14241_v59 = vsub.f32 %v5800_v6, %v14207_v40  ;;  %v5792_v0 = vld [vmem:[#allocation4 + $0x308] sm:$0xff] }
 0x46b   :  { %18698 = vst [vmem:[#allocation102_spill] sm:$0xff] %v14227_v8  ;;  %18699 = vst [vmem:[#allocation91_spill] sm:$0xff] %v14233_v26  ;;  %6233 = vmatprep.subr.mxu1 %v6232_v53  ;;  %v14243_v21 = vand.u32 4294901760, %v5796_v2  ;;  %5886 = vmatpush1.msra.mxu0 %v13835_v24  ;;  %v18700_v49 = vand.u32 4294901760, %v14171_v16  ;;  %v14251_v53 = vsub.f32 %v5799_v56, %v14215_v9  ;;  %v14253_v17 = vand.u32 4294901760, %v5795_v57 }
 0x46c   :  { %6239 = vmatpush2.msra.mxu1 %v6238_v54  ;;  %5888 = vmatprep.subr.mxu0 %v13872_v29  ;;  %v6286_v6 = vand.u32 4294901760, %v14222_v1  ;;  %v14259_v54 = vsub.f32 %v5798_v38, %v14227_v8  ;;  %v14261_v30 = vand.u32 4294901760, %v5794_v22  ;;  %v18702_v56 = vand.u32 4294901760, %v14193_v44 }
 0x46d   :  { %v6291_v36 = vsub.f32 %v14171_v16, %v18700_v49  ;;  %6245 = vmatprep.subr.mxu1 %v6244_v50  ;;  %v5791_v49 = vld [vmem:[#allocation4 + $0x300] sm:$0xff]  ;;  %5890 = vmatpush2.msra.mxu0 %v13897_v46  ;;  %v14269_v50 = vsub.f32 %v5797_v32, %v14235_v62  ;;  %v14271_v1 = vand.u32 4294901760, %v5793_v39  ;;  %v18703_v38 = vand.u32 4294901760, %v14205_v18 }
 0x46e   :  { %18701 = vst [vmem:[#allocation105_spill] sm:$0xff] %v14259_v54  ;;  %6251 = vmatpush2.msra.mxu1 %v6250_v41  ;;  %v6297_v27 = vsub.f32 %v14193_v44, %v18702_v56  ;;  %5892 = vmatprep.subr.mxu0 %v13908_v3  ;;  %v14279_v46 = vsub.f32 %v5796_v2, %v14243_v21  ;;  %v14281_v56 = vand.u32 4294901760, %v5792_v0  ;;  %v18705_v32 = vand.u32 4294901760, %v14213_v34 }
 0x46f   :  { %6257 = vmatprep.subr.mxu1 %v6256_v35  ;;  %v6303_v24 = vsub.f32 %v14205_v18, %v18703_v38  ;;  %5894 = vmatpush2.msra.mxu0 %v13922_v4  ;;  %v14289_v44 = vsub.f32 %v5795_v57, %v14253_v17  ;;  %v14291_v38 = vand.u32 4294901760, %v5791_v49  ;;  %v6292_v2 = vand.u32 4294901760, %v6291_v36 }
 0x470   :  { %18704 = vst [vmem:[#allocation106_spill] sm:$0xff] %v14281_v56  ;;  %6263 = vmatpush2.msra.mxu1 %v6262_v47  ;;  %v6309_v16 = vsub.f32 %v14213_v34, %v18705_v32  ;;  %5896 = vmatprep.subr.mxu0 %v13934_v63  ;;  %v18706_v41 = vand.u32 4294901760, %v14225_v48  ;;  %v14299_v4 = vsub.f32 %v5794_v22, %v14261_v30  ;;  %v6298_v57 = vand.u32 4294901760, %v6297_v27 }
 0x471   :  { %6269 = vmatprep.subr.mxu1 %v6268_v15  ;;  %5898 = vmatpush2.msra.mxu0 %v13948_v5  ;;  %v18707_v32 = vand.u32 4294901760, %v14233_v26  ;;  %v14307_v36 = vsub.f32 %v5793_v39, %v14271_v1  ;;  %v18708_v22 = vand.u32 4294901760, %v14241_v59  ;;  %v14315_v27 = vsub.f32 %v5792_v0, %v14281_v56 }
 0x472   :  { %v6315_v18 = vsub.f32 %v14225_v48, %v18706_v41  ;;  %6275 = vmatpush2.msra.mxu1 %v6274_v14  ;;  %5900 = vmatprep.subr.mxu0 %v13962_v20  ;;  %v6304_v41 = vand.u32 4294901760, %v6303_v24  ;;  %v18710_v39 = vand.u32 4294901760, %v14251_v53  ;;  %v14323_v24 = vsub.f32 %v5791_v49, %v14291_v38 }
 0x473   :  { %v6321_v35 = vsub.f32 %v14233_v26, %v18707_v32  ;;  %6281 = vmatprep.subr.mxu1 %v6280_v13  ;;  %v6327_v47 = vsub.f32 %v14241_v59, %v18708_v22  ;;  %18709 = vst [vmem:[#allocation95_spill] sm:$0xff] %v14315_v27  ;;  %5902 = vmatpush2.msra.mxu0 %v13971_v19  ;;  %v6310_v32 = vand.u32 4294901760, %v6309_v16  ;;  %v18712_v0 = vand.u32 4294901760, %v14259_v54 }
 0x474   :  { %6287 = vmatpush2.msra.mxu1 %v6286_v6  ;;  %v6333_v15 = vsub.f32 %v14251_v53, %v18710_v39  ;;  %18711 = vst [vmem:[#allocation110_spill] sm:$0xff] %v14323_v24  ;;  %5904 = vmatprep.subr.mxu0 %v13985_v61  ;;  %v6316_v22 = vand.u32 4294901760, %v6315_v18  ;;  %v18713_v39 = vand.u32 4294901760, %v14269_v50  ;;  %v18718_v49 = vand.u32 4294901760, %v14315_v27 }
 0x475   :  { %6293 = vmatprep.subr.mxu1 %v6292_v2  ;;  %v6339_v14 = vsub.f32 %v14259_v54, %v18712_v0  ;;  %5906 = vmatpush2.msra.mxu0 %v13995_v7  ;;  %v6322_v16 = vand.u32 4294901760, %v6321_v35  ;;  %v6328_v18 = vand.u32 4294901760, %v6327_v47  ;;  %v18714_v2 = vand.u32 4294901760, %v14279_v46  ;;  %v4915_v54 = vpop.f32.mrf.mxu1 }
 0x476   :  { %6299 = vmatpush2.msra.mxu1 %v6298_v57  ;;  %v6345_v13 = vsub.f32 %v14269_v50, %v18713_v39  ;;  %5908 = vmatprep.subr.mxu0 %v14005_v42  ;;  %v6334_v35 = vand.u32 4294901760, %v6333_v15  ;;  %v18715_v57 = vand.u32 4294901760, %v14289_v44  ;;  %v18717_v15 = vand.u32 4294901760, %v14307_v36 }
 0x477   :  { %6305 = vmatprep.subr.mxu1 %v6304_v41  ;;  %v6351_v0 = vsub.f32 %v14279_v46, %v18714_v2  ;;  %5910 = vmatpush2.msra.mxu0 %v14019_v33  ;;  %v6340_v47 = vand.u32 4294901760, %v6339_v14  ;;  %v18716_v41 = vand.u32 4294901760, %v14299_v4  ;;  %v6375_v14 = vsub.f32 %v14315_v27, %v18718_v49 }
 0x478   :  { %6311 = vmatpush2.msra.mxu1 %v6310_v32  ;;  %v6357_v39 = vsub.f32 %v14289_v44, %v18715_v57  ;;  %5912 = vmatprep.subr.mxu0 %v14029_v51  ;;  %v6346_v6 = vand.u32 4294901760, %v6345_v13  ;;  %v6369_v32 = vsub.f32 %v14307_v36, %v18717_v15 }
 0x479   :  { %6317 = vmatprep.subr.mxu1 %v6316_v22  ;;  %v6363_v2 = vsub.f32 %v14299_v4, %v18716_v41  ;;  %5914 = vmatpush2.msra.mxu0 %v14043_v52  ;;  %v6352_v57 = vand.u32 4294901760, %v6351_v0  ;;  %v4917_v22 = vpop.f32.mrf.mxu1  ;;  %v4490_v0 = vpop.f32.mrf.mxu0  ;;  %v6376_v49 = vand.u32 4294901760, %v6375_v14 }
 0x47a   :  { %6323 = vmatpush2.msra.mxu1 %v6322_v16  ;;  %5916 = vmatprep.subr.mxu0 %v14057_v37  ;;  %v6358_v41 = vand.u32 4294901760, %v6357_v39  ;;  %v18719_v16 = vand.u32 4294901760, %v14323_v24 }
 0x47b   :  { %6329 = vmatprep.subr.mxu1 %v6328_v18  ;;  %5918 = vmatpush2.msra.mxu0 %v14084_v43  ;;  %v6364_v15 = vand.u32 4294901760, %v6363_v2  ;;  %v6370_v18 = vand.u32 4294901760, %v6369_v32  ;;  %v4923_v27 = vpop.f32.mrf.mxu1 }
 0x47c   :  { %6335 = vmatpush2.msra.mxu1 %v6334_v35  ;;  %v6381_v13 = vsub.f32 %v14323_v24, %v18719_v16  ;;  %5920 = vmatprep.subr.mxu0 %v14122_v11  ;;  %v14364_v35 = vadd.f32 %v4915_v54, %v4490_v0  ;;  %v4492_v16 = vpop.f32.mrf.mxu0  ;;  %v18736_v24 = vld [vmem:[#allocation32_spill] sm:$0xff] }
 0x47d   :  { %6341 = vmatprep.subr.mxu1 %v6340_v47  ;;  %5922 = vmatpush2.msra.mxu0 %v14147_v23  ;;  %v14368_v47 = vadd.f32 %v4917_v22, %v4492_v16 }
 0x47e   :  { %6347 = vmatpush2.msra.mxu1 %v6346_v6  ;;  %5924 = vmatprep.subr.mxu0 %v14159_v31  ;;  %v6382_v39 = vand.u32 4294901760, %v6381_v13  ;;  %v4925_v6 = vpop.f32.mrf.mxu1  ;;  %v4506_v54 = vpop.f32.mrf.mxu0 }
 0x47f   :  { %6353 = vmatprep.subr.mxu1 %v6352_v57  ;;  %5926 = vmatpush2.msra.mxu0 %v14173_v45  ;;  %v14375_v2 = vadd.f32 %v4923_v27, %v4506_v54  ;;  %v18720_v27 = vld [vmem:[#allocation51_spill] sm:$0xff]  ;;  %v18726_v54 = vld [vmem:[#allocation33_spill] sm:$0xff] }
 0x480   :  { %6359 = vmatpush2.msra.mxu1 %v6358_v41  ;;  %5928 = vmatprep.subr.mxu0 %v14183_v10  ;;  %v4508_v32 = vpop.f32.mrf.mxu0  ;;  %v4931_v57 = vpop.f32.mrf.mxu1  ;;  %v18721_v41 = vld [vmem:[#allocation122_spill] sm:$0xff] }
 0x481   :  { %6365 = vmatprep.subr.mxu1 %v6364_v15  ;;  %5930 = vmatpush2.msra.mxu0 %v14195_v28  ;;  %v14381_v14 = vadd.f32 %v4925_v6, %v4508_v32  ;;  %v18722_v15 = vld [vmem:[#allocation28_spill] sm:$0xff]  ;;  %v18725_v6 = vld [vmem:[#allocation57_spill] sm:$0xff]  ;;  %v18727_v32 = vld [vmem:[#allocation134_spill] sm:$0xff] }
 0x482   :  { %6371 = vmatpush2.msra.mxu1 %v6370_v18  ;;  %5932 = vmatprep.subr.mxu0 %v14207_v40  ;;  %v4522_v22 = vpop.f32.mrf.mxu0  ;;  %v4933_v18 = vpop.f32.mrf.mxu1 }
 0x483   :  { %6377 = vmatprep.subr.mxu1 %v6376_v49  ;;  %5934 = vmatpush2.msra.mxu0 %v14215_v9  ;;  %v14389_v13 = vadd.f32 %v4931_v57, %v4522_v22  ;;  %v18723_v49 = vld [vmem:[#allocation128_spill] sm:$0xff]  ;;  %v18728_v57 = vld [vmem:[#allocation127_spill] sm:$0xff] }
 0x484   :  { %6383 = vmatpush2.msra.mxu1 %v6382_v39  ;;  %5936 = vmatprep.subr.mxu0 %v14227_v8  ;;  %v4524_v0 = vpop.f32.mrf.mxu0  ;;  %v18724_v39 = vld [vmem:[#allocation40_spill] sm:$0xff]  ;;  %v18729_v22 = vld [vmem:[#allocation27_spill] sm:$0xff] }
 0x485   :  { %6387 = vmatmul.mubr.f32.vlgmr.msra.gmra.mxu1 %v18549_v12  ;;  %6633 = vmatprep.subr.mxu1 %v13423_v60  ;;  %v14395_v16 = vadd.f32 %v4933_v18, %v4524_v0  ;;  %v18732_v18 = vld [vmem:[#allocation37_spill] sm:$0xff]  ;;  %v18733_v0 = vld [vmem:[#allocation39_spill] sm:$0xff] }
 0x486   :  { %5938 = vmatpush2.msra.mxu0 %v14235_v62  ;;  %6393 = vmatprep.mubr.f32.mxu1 %v18557_v58  ;;  %v18734_v58 = vld [vmem:[#allocation125_spill] sm:$0xff]  ;;  %v18735_v12 = vld [vmem:[#allocation55_spill] sm:$0xff] }
 0x487   :  { %6635 = vmatpush1.msra.mxu1 %v13431_v25  ;;  %5940 = vmatprep.subr.mxu0 %v14243_v21 }
 0x488   :  { %6637 = vmatprep.subr.mxu1 %v13436_v55  ;;  %5942 = vmatpush2.msra.mxu0 %v14253_v17 }
 0x489   :  { %6639 = vmatpush1.msra.mxu1 %v18720_v27  ;;  %5944 = vmatprep.subr.mxu0 %v14261_v30 }
 0x48a   :  { %6395 = vmatmul.mubr.f32.gmra.mxu1 %v18721_v41  ;;  %6641 = vmatprep.subr.mxu1 %v18722_v15  ;;  %v18730_v41 = vld [vmem:[#allocation45_spill] sm:$0xff] }
 0x48b   :  { %5946 = vmatpush2.msra.mxu0 %v14271_v1  ;;  %6401 = vmatprep.mubr.f32.mxu1 %v18723_v49  ;;  %v18731_v49 = vld [vmem:[#allocation135_spill] sm:$0xff] }
 0x48c   :  { %6643 = vmatpush1.msra.mxu1 %v18724_v39  ;;  %5948 = vmatprep.subr.mxu0 %v14281_v56 }
 0x48d   :  { %6645 = vmatprep.subr.mxu1 %v18725_v6  ;;  %5950 = vmatpush2.msra.mxu0 %v14291_v38 }
 0x48e   :  { %6647 = vmatpush1.msra.mxu1 %v18726_v54  ;;  %5962 = vmatmul.mubr.f32.vlgmr.msra.gmra.mxu0 %v18727_v32  ;;  %v18737_v54 = vld [vmem:[#allocation43_spill] sm:$0xff] }
 0x48f   :  { %6403 = vmatmul.mubr.f32.gmra.mxu1 %v18728_v57  ;;  %6411 = vmatprep.subr.mxu0 %v18729_v22  ;;  %v18738_v32 = vld [vmem:[#allocation11_spill] sm:$0xff]  ;;  %v18739_v57 = vld [vmem:[#allocation138_spill] sm:$0xff] }
 0x490   :  { %6649 = vmatprep.subr.mxu1 %v18730_v41  ;;  %5972 = vmatprep.mubr.f32.mxu0 %v18731_v49  ;;  %v18740_v22 = vld [vmem:[#allocation58_spill] sm:$0xff]  ;;  %v18742_v49 = vld [vmem:[#allocation139_spill] sm:$0xff] }
 0x491   :  { %6414 = vmatpush1.msra.mxu0 %v18732_v18  ;;  %6651 = vmatpush1.msra.mxu1 %v18733_v0  ;;  %v18741_v41 = vld [vmem:[#allocation42_spill] sm:$0xff]  ;;  %v18744_v0 = vld [vmem:[#allocation19_spill] sm:$0xff] }
 0x492   :  { %6763 = vmatprep.mubr.f32.mxu1 %v18734_v58  ;;  %6417 = vmatprep.subr.mxu0 %v18735_v12  ;;  %v18743_v18 = vld [vmem:[#allocation54_spill] sm:$0xff]  ;;  %v18745_v58 = vld [vmem:[#allocation48_spill] sm:$0xff] }
 0x493   :  { %6653 = vmatprep.subr.mxu1 %v18736_v24  ;;  %6420 = vmatpush1.msra.mxu0 %v18737_v54  ;;  %v18746_v12 = vld [vmem:[#allocation92_spill] sm:$0xff]  ;;  %v18748_v54 = vld [vmem:[#allocation99_spill] sm:$0xff] }
 0x494   :  { %6655 = vmatpush1.msra.mxu1 %v18738_v32  ;;  %5978 = vmatmul.mubr.f32.gmra.mxu0 %v18739_v57  ;;  %v18747_v24 = vld [vmem:[#allocation64_spill] sm:$0xff]  ;;  %v18749_v32 = vld [vmem:[#allocation23_spill] sm:$0xff]  ;;  %v18750_v57 = vld [vmem:[#allocation49_spill] sm:$0xff] }
 0x495   :  { %6423 = vmatprep.subr.mxu0 %v18740_v22  ;;  %6657 = vmatprep.subr.mxu1 %v18741_v41  ;;  %v18751_v22 = vld [vmem:[#allocation50_spill] sm:$0xff] }
 0x496   :  { %5988 = vmatprep.mubr.f32.mxu0 %v18742_v49  ;;  %6426 = vmatpush1.msra.mxu0 %v18743_v18  ;;  %v18752_v41 = vld [vmem:[#allocation70_spill] sm:$0xff]  ;;  %v18753_v49 = vld [vmem:[#allocation121_spill] sm:$0xff]  ;;  %v18754_v18 = vld [vmem:[#allocation107_spill] sm:$0xff] }
 0x497   :  { %6659 = vmatpush1.msra.mxu1 %v18744_v0  ;;  %6429 = vmatprep.subr.mxu0 %v18745_v58  ;;  %v18755_v0 = vld [vmem:[#allocation31_spill] sm:$0xff]  ;;  %v18756_v58 = vld [vmem:[#allocation108_spill] sm:$0xff] }
 0x498   :  { %6661 = vmatprep.subr.mxu1 %v18746_v12  ;;  %6432 = vmatpush1.msra.mxu0 %v18747_v24  ;;  %v18757_v12 = vld [vmem:[#allocation109_spill] sm:$0xff]  ;;  %v18758_v24 = vld [vmem:[#allocation112_spill] sm:$0xff] }
 0x499   :  { %6663 = vmatpush1.msra.mxu1 %v18748_v54  ;;  %5994 = vmatmul.mubr.f32.gmra.mxu0 %v18749_v32  ;;  %v18759_v54 = vld [vmem:[#allocation96_spill] sm:$0xff]  ;;  %v18760_v32 = vld [vmem:[#allocation115_spill] sm:$0xff] }
 0x49a   :  { %6435 = vmatprep.subr.mxu0 %v18750_v57  ;;  %6665 = vmatprep.subr.mxu1 %v18751_v22  ;;  %v18761_v57 = vld [vmem:[#allocation100_spill] sm:$0xff]  ;;  %v18762_v22 = vld [vmem:[#allocation22_spill] sm:$0xff] }
 0x49b   :  { %6438 = vmatpush1.msra.mxu0 %v18752_v41  ;;  %6603 = vmatprep.mubr.f32.mxu0 %v18753_v49  ;;  %v18763_v41 = vld [vmem:[#allocation103_spill] sm:$0xff] }
 0x49c   :  { %6667 = vmatpush1.msra.mxu1 %v18754_v18  ;;  %6441 = vmatprep.subr.mxu0 %v18755_v0  ;;  %v18764_v49 = vld [vmem:[#allocation67_spill] sm:$0xff]  ;;  %v18765_v18 = vld [vmem:[#allocation104_spill] sm:$0xff] }
 0x49d   :  { %6669 = vmatprep.subr.mxu1 %v18756_v58  ;;  %6444 = vmatpush1.msra.mxu0 %v18757_v12  ;;  %v18766_v0 = vld [vmem:[#allocation15_spill] sm:$0xff]  ;;  %v18768_v12 = vld [vmem:[#allocation26_spill] sm:$0xff] }
 0x49e   :  { %6671 = vmatpush1.msra.mxu1 %v18758_v24  ;;  %6447 = vmatprep.subr.mxu0 %v18759_v54  ;;  %v18767_v58 = vld [vmem:[#allocation111_spill] sm:$0xff]  ;;  %v18769_v24 = vld [vmem:[#allocation116_spill] sm:$0xff] }
 0x49f   :  { %6673 = vmatprep.subr.mxu1 %v18760_v32  ;;  %6450 = vmatpush1.msra.mxu0 %v18761_v57  ;;  %v18770_v54 = vld [vmem:[#allocation47_spill] sm:$0xff]  ;;  %v18771_v32 = vld [vmem:[#allocation62_spill] sm:$0xff]  ;;  %v18772_v57 = vld [vmem:[#allocation17_spill] sm:$0xff] }
 0x4a0   :  { %6675 = vmatpush1.msra.mxu1 %v18762_v22  ;;  %6453 = vmatprep.subr.mxu0 %v18763_v41  ;;  %v18773_v22 = vld [vmem:[#allocation16_spill] sm:$0xff]  ;;  %v18774_v41 = vld [vmem:[#allocation34_spill] sm:$0xff] }
 0x4a1   :  { %6677 = vmatprep.subr.mxu1 %v18764_v49  ;;  %6456 = vmatpush1.msra.mxu0 %v18765_v18  ;;  %v18775_v49 = vld [vmem:[#allocation46_spill] sm:$0xff]  ;;  %v18776_v18 = vld [vmem:[#allocation41_spill] sm:$0xff] }
 0x4a2   :  { %6679 = vmatpush1.msra.mxu1 %v18766_v0  ;;  %6459 = vmatprep.subr.mxu0 %v18767_v58  ;;  %v18777_v0 = vld [vmem:[#allocation29_spill] sm:$0xff]  ;;  %v18778_v58 = vld [vmem:[#allocation72_spill] sm:$0xff] }
 0x4a3   :  { %6681 = vmatprep.subr.mxu1 %v18768_v12  ;;  %6462 = vmatpush1.msra.mxu0 %v18769_v24  ;;  %v18779_v12 = vld [vmem:[#allocation9_spill] sm:$0xff] }
 0x4a4   :  { %6683 = vmatpush1.msra.mxu1 %v18770_v54  ;;  %6465 = vmatprep.subr.mxu0 %v18771_v32  ;;  %v18780_v24 = vld [vmem:[#allocation13_spill] sm:$0xff]  ;;  %v18781_v54 = vld [vmem:[#allocation59_spill] sm:$0xff]  ;;  %v18782_v32 = vld [vmem:[#allocation56_spill] sm:$0xff] }
 0x4a5   :  { %6685 = vmatprep.subr.mxu1 %v18772_v57  ;;  %6468 = vmatpush1.msra.mxu0 %v18773_v22  ;;  %v18783_v57 = vld [vmem:[#allocation66_spill] sm:$0xff] }
 0x4a6   :  { %6687 = vmatpush1.msra.mxu1 %v18774_v41  ;;  %6471 = vmatprep.subr.mxu0 %v18775_v49  ;;  %v18784_v41 = vld [vmem:[#allocation61_spill] sm:$0xff]  ;;  %v18785_v49 = vld [vmem:[#allocation63_spill] sm:$0xff] }
 0x4a7   :  { %6689 = vmatprep.subr.mxu1 %v18776_v18  ;;  %6474 = vmatpush1.msra.mxu0 %v18777_v0  ;;  %v18786_v18 = vld [vmem:[#allocation21_spill] sm:$0xff] }
 0x4a8   :  { %6691 = vmatpush1.msra.mxu1 %v18778_v58  ;;  %6477 = vmatprep.subr.mxu0 %v18779_v12  ;;  %v18787_v58 = vld [vmem:[#allocation36_spill] sm:$0xff]  ;;  %v18788_v12 = vld [vmem:[#allocation18_spill] sm:$0xff] }
 0x4a9   :  { %6693 = vmatprep.subr.mxu1 %v18780_v24  ;;  %6480 = vmatpush1.msra.mxu0 %v18781_v54  ;;  %v18789_v24 = vld [vmem:[#allocation10_spill] sm:$0xff] }
 0x4aa   :  { %6695 = vmatpush1.msra.mxu1 %v18782_v32  ;;  %6483 = vmatprep.subr.mxu0 %v18783_v57  ;;  %v18790_v32 = vld [vmem:[#allocation69_spill] sm:$0xff] }
 0x4ab   :  { %6697 = vmatprep.subr.mxu1 %v13872_v29  ;;  %6486 = vmatpush1.msra.mxu0 %v18784_v41  ;;  %v18791_v29 = vld [vmem:[#allocation52_spill] sm:$0xff] }
 0x4ac   :  { %6699 = vmatpush2.msra.mxu1 %v18785_v49  ;;  %6489 = vmatprep.subr.mxu0 %v18786_v18  ;;  %v18792_v49 = vld [vmem:[#allocation24_spill] sm:$0xff] }
 0x4ad   :  { %6701 = vmatprep.subr.mxu1 %v13908_v3  ;;  %6492 = vmatpush1.msra.mxu0 %v18787_v58  ;;  %v18793_v3 = vld [vmem:[#allocation8_spill] sm:$0xff] }
 0x4ae   :  { %6703 = vmatpush2.msra.mxu1 %v18788_v12  ;;  %6495 = vmatprep.subr.mxu0 %v18789_v24  ;;  %v18794_v12 = vld [vmem:[#allocation38_spill] sm:$0xff] }
 0x4af   :  { %6705 = vmatprep.subr.mxu1 %v13934_v63  ;;  %6498 = vmatpush1.msra.mxu0 %v18790_v32  ;;  %v18795_v63 = vld [vmem:[#allocation35_spill] sm:$0xff] }
 0x4b0   :  { %6707 = vmatpush2.msra.mxu1 %v13948_v5  ;;  %6501 = vmatprep.subr.mxu0 %v18791_v29  ;;  %v18796_v5 = vld [vmem:[#allocation14_spill] sm:$0xff] }
 0x4b1   :  { %6709 = vmatprep.subr.mxu1 %v13962_v20  ;;  %6504 = vmatpush1.msra.mxu0 %v18792_v49  ;;  %v18797_v20 = vld [vmem:[#allocation60_spill] sm:$0xff] }
 0x4b2   :  { %6711 = vmatpush2.msra.mxu1 %v13971_v19  ;;  %6507 = vmatprep.subr.mxu0 %v18793_v3  ;;  %v18798_v19 = vld [vmem:[#allocation71_spill] sm:$0xff] }
 0x4b3   :  { %6713 = vmatprep.subr.mxu1 %v13985_v61  ;;  %6510 = vmatpush2.msra.mxu0 %v18794_v12  ;;  %v18799_v61 = vld [vmem:[#allocation20_spill] sm:$0xff] }
 0x4b4   :  { %6715 = vmatpush2.msra.mxu1 %v13995_v7  ;;  %6513 = vmatprep.subr.mxu0 %v18795_v63  ;;  %v18800_v7 = vld [vmem:[#allocation73_spill] sm:$0xff] }
 0x4b5   :  { %6717 = vmatprep.subr.mxu1 %v14005_v42  ;;  %6516 = vmatpush2.msra.mxu0 %v18796_v5  ;;  %v18801_v42 = vld [vmem:[#allocation65_spill] sm:$0xff] }
 0x4b6   :  { %6719 = vmatpush2.msra.mxu1 %v14019_v33  ;;  %6519 = vmatprep.subr.mxu0 %v18797_v20  ;;  %v18802_v33 = vld [vmem:[#allocation12_spill] sm:$0xff] }
 0x4b7   :  { %6721 = vmatprep.subr.mxu1 %v14029_v51  ;;  %6522 = vmatpush2.msra.mxu0 %v18798_v19  ;;  %v18803_v51 = vld [vmem:[#allocation75_spill] sm:$0xff] }
 0x4b8   :  { %6723 = vmatpush2.msra.mxu1 %v14043_v52  ;;  %6525 = vmatprep.subr.mxu0 %v18799_v61  ;;  %v18804_v52 = vld [vmem:[#allocation76_spill] sm:$0xff] }
 0x4b9   :  { %6725 = vmatprep.subr.mxu1 %v14057_v37  ;;  %6528 = vmatpush2.msra.mxu0 %v18800_v7  ;;  %v5295_v37 = vpop.f32.mrf.mxu1  ;;  %v18805_v7 = vld [vmem:[#allocation90_spill] sm:$0xff] }
 0x4ba   :  { %6727 = vmatpush2.msra.mxu1 %v14084_v43  ;;  %6531 = vmatprep.subr.mxu0 %v18801_v42  ;;  %v18806_v42 = vld [vmem:[#allocation79_spill] sm:$0xff] }
 0x4bb   :  { %6729 = vmatprep.subr.mxu1 %v14122_v11  ;;  %6534 = vmatpush2.msra.mxu0 %v18802_v33  ;;  %v18807_v33 = vld [vmem:[#allocation93_spill] sm:$0xff] }
 0x4bc   :  { %6731 = vmatpush2.msra.mxu1 %v14147_v23  ;;  %6537 = vmatprep.subr.mxu0 %v18803_v51  ;;  %v18808_v51 = vld [vmem:[#allocation80_spill] sm:$0xff] }
 0x4bd   :  { %6733 = vmatprep.subr.mxu1 %v14159_v31  ;;  %6540 = vmatpush2.msra.mxu0 %v18804_v52  ;;  %v5297_v52 = vpop.f32.mrf.mxu1  ;;  %v18809_v31 = vld [vmem:[#allocation83_spill] sm:$0xff] }
 0x4be   :  { %6735 = vmatpush2.msra.mxu1 %v14173_v45  ;;  %6543 = vmatprep.subr.mxu0 %v18805_v7  ;;  %v5134_v7 = vpop.f32.mrf.mxu0  ;;  %v18810_v45 = vld [vmem:[#allocation84_spill] sm:$0xff] }
 0x4bf   :  { %6737 = vmatprep.subr.mxu1 %v14183_v10  ;;  %6546 = vmatpush2.msra.mxu0 %v18806_v42  ;;  %v18811_v42 = vld [vmem:[#allocation87_spill] sm:$0xff] }
 0x4c0   :  { %6739 = vmatpush2.msra.mxu1 %v14195_v28  ;;  %6549 = vmatprep.subr.mxu0 %v18807_v33  ;;  %v5135_v28 = vadd.f32 %v5134_v7, %v14364_v35 }
 0x4c1   :  { %6741 = vmatprep.subr.mxu1 %v14207_v40  ;;  %6552 = vmatpush2.msra.mxu0 %v18808_v51  ;;  %v5136_v40 = vpop.f32.mrf.mxu0 }
 0x4c2   :  { %6743 = vmatpush2.msra.mxu1 %v14215_v9  ;;  %6555 = vmatprep.subr.mxu0 %v18809_v31  ;;  %v5307_v9 = vpop.f32.mrf.mxu1  ;;  %v5137_v31 = vadd.f32 %v5136_v40, %v14368_v47  ;;  %v18812_v40 = vld [vmem:[#allocation105_spill] sm:$0xff]  ;;  %v18813_v47 = vld [vmem:[#allocation120_spill] sm:$0xff] }
 0x4c3   :  { %6745 = vmatprep.subr.mxu1 %v14227_v8  ;;  %6558 = vmatpush2.msra.mxu0 %v18810_v45  ;;  %v14515_v8 = vadd.f32 %v5295_v37, %v5135_v28  ;;  %v5144_v35 = vpop.f32.mrf.mxu0 }
 0x4c4   :  { %6747 = vmatpush2.msra.mxu1 %v14235_v62  ;;  %6561 = vmatprep.subr.mxu0 %v18811_v42  ;;  %v14521_v7 = vadd.f32 %v5297_v52, %v5137_v31  ;;  %v5309_v37 = vpop.f32.mrf.mxu1  ;;  %v5145_v28 = vadd.f32 %v5144_v35, %v14375_v2 }
 0x4c5   :  { %6749 = vmatprep.subr.mxu1 %v14243_v21  ;;  %6564 = vmatpush2.msra.mxu0 %v14213_v34 }
 0x4c6   :  { %6751 = vmatpush2.msra.mxu1 %v14253_v17  ;;  %6567 = vmatprep.subr.mxu0 %v14225_v48  ;;  %v14533_v31 = vadd.f32 %v5307_v9, %v5145_v28  ;;  %v5319_v2 = vpop.f32.mrf.mxu1  ;;  %v18815_v9 = vld [vmem:[#allocation131_spill] sm:$0xff]  ;;  %v18818_v28 = vld [vmem:[#allocation110_spill] sm:$0xff] }
 0x4c7   :  { %6753 = vmatprep.subr.mxu1 %v14261_v30  ;;  %6570 = vmatpush2.msra.mxu0 %v14233_v26  ;;  %v5146_v26 = vpop.f32.mrf.mxu0 }
 0x4c8   :  { %6755 = vmatpush2.msra.mxu1 %v14271_v1  ;;  %6573 = vmatprep.subr.mxu0 %v14241_v59  ;;  %v5147_v52 = vadd.f32 %v5146_v26, %v14381_v14  ;;  %v18816_v14 = vld [vmem:[#allocation136_spill] sm:$0xff] }
 0x4c9   :  { %6757 = vmatprep.subr.mxu1 %v14281_v56  ;;  %6576 = vmatpush2.msra.mxu0 %v14251_v53  ;;  %v18814_v56 = vld [vmem:[#allocation130_spill] sm:$0xff]  ;;  %v5154_v35 = vpop.f32.mrf.mxu0 }
 0x4ca   :  { %6759 = vmatpush2.msra.mxu1 %v14291_v38  ;;  %6579 = vmatprep.subr.mxu0 %v18812_v40 }
 0x4cb   :  { %6767 = vmatmul.mubr.f32.vlgmr.msra.gmra.mxu1 %v18813_v47  ;;  %7079 = vmatprep.subr.mxu1 %v13423_v60  ;;  %v14539_v47 = vadd.f32 %v5309_v37, %v5147_v52  ;;  %v5155_v60 = vadd.f32 %v5154_v35, %v14389_v13  ;;  %v5156_v26 = vpop.f32.mrf.mxu0  ;;  %v18817_v37 = vld [vmem:[#allocation95_spill] sm:$0xff]  ;;  %v18820_v52 = vld [vmem:[#allocation118_spill] sm:$0xff] }
 0x4cc   :  { %6582 = vmatpush2.msra.mxu0 %v14269_v50  ;;  %6775 = vmatprep.mubr.f32.mxu1 %v18814_v56 }
 0x4cd   :  { %7081 = vmatpush1.msra.mxu1 %v13431_v25  ;;  %6585 = vmatprep.subr.mxu0 %v14279_v46  ;;  %v5157_v25 = vadd.f32 %v5156_v26, %v14395_v16  ;;  %v18821_v16 = vld [vmem:[#allocation137_spill] sm:$0xff] }
 0x4ce   :  { %7083 = vmatprep.subr.mxu1 %v13436_v55  ;;  %6588 = vmatpush2.msra.mxu0 %v14289_v44  ;;  %v14549_v55 = vadd.f32 %v5319_v2, %v5155_v60  ;;  %v18822_v2 = vld [vmem:[#allocation27_spill] sm:$0xff]  ;;  %v18824_v60 = vld [vmem:[#allocation45_spill] sm:$0xff] }
 0x4cf   :  { %7085 = vmatpush1.msra.mxu1 %v18720_v27  ;;  %6591 = vmatprep.subr.mxu0 %v14299_v4  ;;  %v5321_v27 = vpop.f32.mrf.mxu1  ;;  %v18823_v35 = vand.u32 4294901760, %v18822_v2  ;;  %v18826_v26 = vld [vmem:[#allocation37_spill] sm:$0xff]  ;;  %v18835_v2 = vld [vmem:[#allocation11_spill] sm:$0xff] }
 0x4d0   :  { %6779 = vmatmul.mubr.f32.gmra.mxu1 %v18815_v9  ;;  %7087 = vmatprep.subr.mxu1 %v18722_v15  ;;  %v14555_v13 = vadd.f32 %v5321_v27, %v5157_v25  ;;  %v18819_v15 = vld [vmem:[#allocation33_spill] sm:$0xff]  ;;  %v18829_v25 = vld [vmem:[#allocation119_spill] sm:$0xff] }
 0x4d1   :  { %6594 = vmatpush2.msra.mxu0 %v14307_v36  ;;  %6787 = vmatprep.mubr.f32.mxu1 %v18816_v14  ;;  %v18827_v14 = vand.u32 4294901760, %v18826_v26  ;;  %v18830_v27 = vld [vmem:[#allocation55_spill] sm:$0xff]  ;;  %v18840_v26 = vld [vmem:[#allocation133_spill] sm:$0xff] }
 0x4d2   :  { %7089 = vmatpush1.msra.mxu1 %v18724_v39  ;;  %6597 = vmatprep.subr.mxu0 %v18817_v37  ;;  %v18825_v39 = vld [vmem:[#allocation126_spill] sm:$0xff] }
 0x4d3   :  { %7091 = vmatprep.subr.mxu1 %v18725_v6  ;;  %6600 = vmatpush2.msra.mxu0 %v18818_v28  ;;  %v18828_v6 = vld [vmem:[#allocation39_spill] sm:$0xff] }
 0x4d4   :  { %7093 = vmatpush1.msra.mxu1 %v18819_v15  ;;  %6606 = vmatmul.mubr.f32.vlgmr.msra.gmra.mxu0 %v18820_v52  ;;  %v18831_v15 = vand.u32 4294901760, %v18830_v27  ;;  %v18832_v52 = vld [vmem:[#allocation32_spill] sm:$0xff]  ;;  %v18843_v27 = vld [vmem:[#allocation19_spill] sm:$0xff] }
 0x4d5   :  { %6791 = vmatmul.mubr.f32.gmra.mxu1 %v18821_v16  ;;  %6800 = vmatprep.subr.mxu0 %v18823_v35  ;;  %v18833_v16 = vld [vmem:[#allocation43_spill] sm:$0xff] }
 0x4d6   :  { %7095 = vmatprep.subr.mxu1 %v18824_v60  ;;  %6613 = vmatprep.mubr.f32.mxu0 %v18825_v39  ;;  %v18834_v9 = vand.u32 4294901760, %v18833_v16  ;;  %v18836_v35 = vld [vmem:[#allocation123_spill] sm:$0xff]  ;;  %v18837_v60 = vld [vmem:[#allocation58_spill] sm:$0xff]  ;;  %v18847_v16 = vld [vmem:[#allocation64_spill] sm:$0xff] }
 0x4d7   :  { %6804 = vmatpush1.msra.mxu0 %v18827_v14  ;;  %7097 = vmatpush1.msra.mxu1 %v18828_v6  ;;  %v18838_v39 = vand.u32 4294901760, %v18837_v60  ;;  %v18839_v14 = vld [vmem:[#allocation42_spill] sm:$0xff]  ;;  %v18851_v60 = vld [vmem:[#allocation49_spill] sm:$0xff] }
 0x4d8   :  { %7207 = vmatprep.mubr.f32.mxu1 %v18829_v25  ;;  %6808 = vmatprep.subr.mxu0 %v18831_v15  ;;  %v18841_v6 = vld [vmem:[#allocation54_spill] sm:$0xff] }
 0x4d9   :  { %7099 = vmatprep.subr.mxu1 %v18832_v52  ;;  %6812 = vmatpush1.msra.mxu0 %v18834_v9  ;;  %v18842_v56 = vand.u32 4294901760, %v18841_v6  ;;  %v18844_v52 = vld [vmem:[#allocation48_spill] sm:$0xff] }
 0x4da   :  { %7101 = vmatpush1.msra.mxu1 %v18835_v2  ;;  %6616 = vmatmul.mubr.f32.gmra.mxu0 %v18836_v35  ;;  %v18845_v15 = vand.u32 4294901760, %v18844_v52  ;;  %v18846_v9 = vld [vmem:[#allocation92_spill] sm:$0xff]  ;;  %v18848_v2 = vand.u32 4294901760, %v18847_v16  ;;  %v18849_v35 = vld [vmem:[#allocation99_spill] sm:$0xff] }
 0x4db   :  { %6816 = vmatprep.subr.mxu0 %v18838_v39  ;;  %7103 = vmatprep.subr.mxu1 %v18839_v14  ;;  %v18850_v39 = vld [vmem:[#allocation132_spill] sm:$0xff]  ;;  %v18852_v14 = vand.u32 4294901760, %v18851_v60  ;;  %v18857_v52 = vld [vmem:[#allocation31_spill] sm:$0xff] }
 0x4dc   :  { %6623 = vmatprep.mubr.f32.mxu0 %v18840_v26  ;;  %6820 = vmatpush1.msra.mxu0 %v18842_v56  ;;  %v18853_v26 = vld [vmem:[#allocation50_spill] sm:$0xff]  ;;  %v18863_v60 = vld [vmem:[#allocation96_spill] sm:$0xff] }
 0x4dd   :  { %7105 = vmatpush1.msra.mxu1 %v18843_v27  ;;  %6824 = vmatprep.subr.mxu0 %v18845_v15  ;;  %v18854_v56 = vld [vmem:[#allocation70_spill] sm:$0xff]  ;;  %v18856_v27 = vld [vmem:[#allocation107_spill] sm:$0xff]  ;;  %v18858_v15 = vand.u32 4294901760, %v18857_v52 }
 0x4de   :  { %7107 = vmatprep.subr.mxu1 %v18846_v9  ;;  %6828 = vmatpush1.msra.mxu0 %v18848_v2  ;;  %v18855_v6 = vand.u32 4294901760, %v18854_v56  ;;  %v18859_v9 = vld [vmem:[#allocation108_spill] sm:$0xff] }
 0x4df   :  { %7109 = vmatpush1.msra.mxu1 %v18849_v35  ;;  %6626 = vmatmul.mubr.f32.gmra.mxu0 %v18850_v39  ;;  %v18860_v35 = vld [vmem:[#allocation109_spill] sm:$0xff]  ;;  %v18862_v2 = vld [vmem:[#allocation112_spill] sm:$0xff]  ;;  %v18868_v39 = vld [vmem:[#allocation22_spill] sm:$0xff] }
 0x4e0   :  { %6832 = vmatprep.subr.mxu0 %v18852_v14  ;;  %7111 = vmatprep.subr.mxu1 %v18853_v26  ;;  %v18861_v16 = vand.u32 4294901760, %v18860_v35  ;;  %v18864_v14 = vand.u32 4294901760, %v18863_v60  ;;  %v18865_v26 = vld [vmem:[#allocation115_spill] sm:$0xff]  ;;  %v18866_v56 = vld [vmem:[#allocation100_spill] sm:$0xff] }
 0x4e1   :  { %6836 = vmatpush1.msra.mxu0 %v18855_v6  ;;  %7054 = vmatprep.mubr.f32.mxu0 %v18829_v25  ;;  %v18867_v6 = vand.u32 4294901760, %v18866_v56 }
 0x4e2   :  { %7113 = vmatpush1.msra.mxu1 %v18856_v27  ;;  %6840 = vmatprep.subr.mxu0 %v18858_v15  ;;  %v18869_v27 = vld [vmem:[#allocation103_spill] sm:$0xff] }
 0x4e3   :  { %7115 = vmatprep.subr.mxu1 %v18859_v9  ;;  %6844 = vmatpush1.msra.mxu0 %v18861_v16  ;;  %v18870_v52 = vand.u32 4294901760, %v18869_v27  ;;  %v18871_v15 = vld [vmem:[#allocation67_spill] sm:$0xff]  ;;  %v18872_v9 = vld [vmem:[#allocation104_spill] sm:$0xff] }
 0x4e4   :  { %7117 = vmatpush1.msra.mxu1 %v18862_v2  ;;  %6848 = vmatprep.subr.mxu0 %v18864_v14  ;;  %v18873_v35 = vand.u32 4294901760, %v18872_v9  ;;  %v18874_v16 = vld [vmem:[#allocation15_spill] sm:$0xff]  ;;  %v18877_v14 = vld [vmem:[#allocation26_spill] sm:$0xff] }
 0x4e5   :  { %7119 = vmatprep.subr.mxu1 %v18865_v26  ;;  %6852 = vmatpush1.msra.mxu0 %v18867_v6  ;;  %v18875_v2 = vld [vmem:[#allocation111_spill] sm:$0xff]  ;;  %v18878_v26 = vld [vmem:[#allocation116_spill] sm:$0xff]  ;;  %v18885_v9 = vld [vmem:[#allocation34_spill] sm:$0xff] }
 0x4e6   :  { %7121 = vmatpush1.msra.mxu1 %v18868_v39  ;;  %6856 = vmatprep.subr.mxu0 %v18870_v52  ;;  %v18876_v60 = vand.u32 4294901760, %v18875_v2  ;;  %v18879_v56 = vand.u32 4294901760, %v18878_v26  ;;  %v18880_v6 = vld [vmem:[#allocation47_spill] sm:$0xff]  ;;  %v18881_v39 = vld [vmem:[#allocation62_spill] sm:$0xff]  ;;  %v18883_v52 = vld [vmem:[#allocation17_spill] sm:$0xff] }
 0x4e7   :  { %7123 = vmatprep.subr.mxu1 %v18871_v15  ;;  %6860 = vmatpush1.msra.mxu0 %v18873_v35  ;;  %v18882_v27 = vand.u32 4294901760, %v18881_v39  ;;  %v18884_v15 = vand.u32 4294901760, %v18773_v22  ;;  %v18886_v35 = vld [vmem:[#allocation46_spill] sm:$0xff]  ;;  %v18888_v2 = vld [vmem:[#allocation41_spill] sm:$0xff]  ;;  %v18894_v22 = vand.u32 4294901760, %v18781_v54  ;;  %v18895_v39 = vld [vmem:[#allocation56_spill] sm:$0xff] }
 0x4e8   :  { %7125 = vmatpush1.msra.mxu1 %v18874_v16  ;;  %6864 = vmatprep.subr.mxu0 %v18876_v60  ;;  %v18887_v16 = vand.u32 4294901760, %v18886_v35  ;;  %v18889_v60 = vand.u32 4294901760, %v18777_v0  ;;  %v18891_v26 = vld [vmem:[#allocation9_spill] sm:$0xff]  ;;  %v18898_v0 = vand.u32 4294901760, %v18784_v41  ;;  %v7262_v35 = vld [vmem:[#allocation4 + $0x4f0] sm:$0xff]  ;;  %v18905_v41 = vand.u32 4294901760, %v18789_v24 }
 0x4e9   :  { %7127 = vmatprep.subr.mxu1 %v18877_v14  ;;  %6868 = vmatpush1.msra.mxu0 %v18879_v56  ;;  %v18890_v14 = vld [vmem:[#allocation72_spill] sm:$0xff]  ;;  %v18892_v56 = vand.u32 4294901760, %v18891_v26 }
 0x4ea   :  { %7129 = vmatpush1.msra.mxu1 %v18880_v6  ;;  %6872 = vmatprep.subr.mxu0 %v18882_v27  ;;  %v18893_v6 = vld [vmem:[#allocation13_spill] sm:$0xff]  ;;  %v7263_v27 = vld [vmem:[#allocation4 + $0x4f8] sm:$0xff]  ;;  %v7260_v26 = vld [vmem:[#allocation4 + $0x4e0] sm:$0xff] }
 0x4eb   :  { %7131 = vmatprep.subr.mxu1 %v18883_v52  ;;  %6876 = vmatpush1.msra.mxu0 %v18884_v15  ;;  %v18896_v52 = vand.u32 4294901760, %v18783_v57  ;;  %v18897_v15 = vld [vmem:[#allocation25_spill] sm:$0xff]  ;;  %v14648_v54 = vand.u32 4294901760, %v7263_v27  ;;  %v18904_v57 = vld [vmem:[#allocation18_spill] sm:$0xff] }
 0x4ec   :  { %7133 = vmatpush1.msra.mxu1 %v18885_v9  ;;  %6880 = vmatprep.subr.mxu0 %v18887_v16  ;;  %v18899_v9 = vld [vmem:[#allocation63_spill] sm:$0xff]  ;;  %v18900_v16 = vand.u32 4294901760, %v18786_v18 }
 0x4ed   :  { %7135 = vmatprep.subr.mxu1 %v18888_v2  ;;  %6884 = vmatpush1.msra.mxu0 %v18889_v60  ;;  %v18901_v2 = vld [vmem:[#allocation44_spill] sm:$0xff]  ;;  %18902 = vst [vmem:[#allocation113_spill] sm:$0xff] %v14648_v54  ;;  %v7261_v60 = vld [vmem:[#allocation4 + $0x4e8] sm:$0xff]  ;;  %v7259_v18 = vld [vmem:[#allocation4 + $0x4d8] sm:$0xff]  ;;  %v14667_v24 = vsub.f32 %v7263_v27, %v14648_v54 }
 0x4ee   :  { %7137 = vmatpush1.msra.mxu1 %v18890_v14  ;;  %6888 = vmatprep.subr.mxu0 %v18892_v56  ;;  %v18903_v14 = vand.u32 4294901760, %v18787_v58  ;;  %v18906_v56 = vld [vmem:[#allocation53_spill] sm:$0xff] }
 0x4ef   :  { %7139 = vmatprep.subr.mxu1 %v18893_v6  ;;  %6892 = vmatpush1.msra.mxu0 %v18894_v22  ;;  %v14656_v6 = vand.u32 4294901760, %v7262_v35  ;;  %v7258_v22 = vld [vmem:[#allocation4 + $0x4d0] sm:$0xff]  ;;  %v7257_v58 = vld [vmem:[#allocation4 + $0x4c8] sm:$0xff]  ;;  %18913 = vst [vmem:[#allocation28_spill] sm:$0xff] %v14667_v24 }
 0x4f0   :  { %7141 = vmatpush1.msra.mxu1 %v18895_v39  ;;  %6896 = vmatprep.subr.mxu0 %v18896_v52  ;;  %v18908_v39 = vand.u32 4294901760, %v18790_v32  ;;  %v18909_v52 = vld [vmem:[#allocation68_spill] sm:$0xff]  ;;  %v18916_v32 = vld [vmem:[#allocation74_spill] sm:$0xff] }
 0x4f1   :  { %7143 = vmatprep.subr.mxu1 %v18897_v15  ;;  %6900 = vmatpush1.msra.mxu0 %v18898_v0  ;;  %18907 = vst [vmem:[#allocation114_spill] sm:$0xff] %v14656_v6  ;;  %v14661_v15 = vand.u32 4294901760, %v7261_v60  ;;  %v18911_v0 = vand.u32 4294901760, %v18791_v29  ;;  %v18919_v29 = vand.u32 4294901760, %v18793_v3  ;;  %v14682_v27 = vsub.f32 %v7262_v35, %v14656_v6  ;;  %v18935_v35 = vld [vmem:[#allocation85_spill] sm:$0xff] }
 0x4f2   :  { %7145 = vmatpush2.msra.mxu1 %v18899_v9  ;;  %6904 = vmatprep.subr.mxu0 %v18900_v16  ;;  %v18912_v9 = vld [vmem:[#allocation30_spill] sm:$0xff]  ;;  %v14669_v16 = vand.u32 4294901760, %v7260_v26  ;;  %v18927_v3 = vand.u32 4294901760, %v18795_v63 }
 0x4f3   :  { %7147 = vmatprep.subr.mxu1 %v18901_v2  ;;  %6908 = vmatpush1.msra.mxu0 %v18903_v14  ;;  %18910 = vst [vmem:[#allocation51_spill] sm:$0xff] %v14661_v15  ;;  %v7256_v2 = vld [vmem:[#allocation4 + $0x4c0] sm:$0xff]  ;;  %v18915_v14 = vand.u32 4294901760, %v18792_v49  ;;  %18921 = vst [vmem:[#allocation29_spill] sm:$0xff] %v14682_v27  ;;  %v18924_v49 = vld [vmem:[#allocation78_spill] sm:$0xff] }
 0x4f4   :  { %7149 = vmatpush2.msra.mxu1 %v18904_v57  ;;  %6912 = vmatprep.subr.mxu0 %v18905_v41  ;;  %18914 = vst [vmem:[#allocation40_spill] sm:$0xff] %v14669_v16  ;;  %v14674_v57 = vand.u32 4294901760, %v7259_v18  ;;  %v14676_v41 = vand.u32 4294901760, %v7258_v22 }
 0x4f5   :  { %7151 = vmatprep.subr.mxu1 %v18906_v56  ;;  %6916 = vmatpush1.msra.mxu0 %v18908_v39  ;;  %v18920_v56 = vld [vmem:[#allocation77_spill] sm:$0xff]  ;;  %v14684_v39 = vand.u32 4294901760, %v7257_v58 }
 0x4f6   :  { %7153 = vmatpush2.msra.mxu1 %v18909_v52  ;;  %6920 = vmatprep.subr.mxu0 %v18911_v0  ;;  %18917 = vst [vmem:[#allocation57_spill] sm:$0xff] %v14674_v57  ;;  %18918 = vst [vmem:[#allocation16_spill] sm:$0xff] %v14676_v41  ;;  %v18923_v52 = vand.u32 4294901760, %v18794_v12  ;;  %v14690_v0 = vsub.f32 %v7261_v60, %v14661_v15  ;;  %v7254_v12 = vld [vmem:[#allocation4 + $0x4b0] sm:$0xff]  ;;  %v14708_v63 = vsub.f32 %v7258_v22, %v14676_v41  ;;  %v18955_v41 = vld [vmem:[#allocation12_spill] sm:$0xff] }
 0x4f7   :  { %7155 = vmatprep.subr.mxu1 %v18912_v9  ;;  %6924 = vmatpush1.msra.mxu0 %v18915_v14  ;;  %18922 = vst [vmem:[#allocation59_spill] sm:$0xff] %v14684_v39  ;;  %v14692_v9 = vand.u32 4294901760, %v7256_v2  ;;  %v7255_v14 = vld [vmem:[#allocation4 + $0x4b8] sm:$0xff]  ;;  %v18931_v60 = vld [vmem:[#allocation82_spill] sm:$0xff] }
 0x4f8   :  { %7157 = vmatpush2.msra.mxu1 %v18916_v32  ;;  %6928 = vmatprep.subr.mxu0 %v18919_v29  ;;  %18925 = vst [vmem:[#allocation66_spill] sm:$0xff] %v14690_v0  ;;  %v18928_v32 = vld [vmem:[#allocation81_spill] sm:$0xff]  ;;  %v14699_v29 = vsub.f32 %v7260_v26, %v14669_v16  ;;  %18933 = vst [vmem:[#allocation10_spill] sm:$0xff] %v14708_v63  ;;  %v14715_v16 = vsub.f32 %v7257_v58, %v14684_v39  ;;  %v7250_v26 = vld [vmem:[#allocation4 + $0x490] sm:$0xff]  ;;  %v18943_v58 = vand.u32 4294901760, %v18799_v61 }
 0x4f9   :  { %7159 = vmatprep.subr.mxu1 %v18920_v56  ;;  %6932 = vmatpush2.msra.mxu0 %v18923_v52  ;;  %18926 = vst [vmem:[#allocation61_spill] sm:$0xff] %v14692_v9  ;;  %v7253_v56 = vld [vmem:[#allocation4 + $0x4a8] sm:$0xff]  ;;  %v18930_v52 = vand.u32 4294901760, %v18796_v5  ;;  %v14717_v5 = vand.u32 4294901760, %v7255_v14  ;;  %v7248_v61 = vld [vmem:[#allocation4 + $0x480] sm:$0xff] }
 0x4fa   :  { %7161 = vmatpush2.msra.mxu1 %v18924_v49  ;;  %6936 = vmatprep.subr.mxu0 %v18927_v3  ;;  %18929 = vst [vmem:[#allocation21_spill] sm:$0xff] %v14699_v29  ;;  %v14705_v49 = vsub.f32 %v7259_v18, %v14674_v57  ;;  %v7252_v3 = vld [vmem:[#allocation4 + $0x4a0] sm:$0xff]  ;;  %18936 = vst [vmem:[#allocation69_spill] sm:$0xff] %v14715_v16  ;;  %v18938_v18 = vand.u32 4294901760, %v18798_v19  ;;  %v18944_v39 = vld [vmem:[#allocation89_spill] sm:$0xff]  ;;  %v18945_v19 = vand.u32 4294901760, %v14667_v24 }
 0x4fb   :  { %7163 = vmatprep.subr.mxu1 %v18928_v32  ;;  %6940 = vmatpush2.msra.mxu0 %v18930_v52  ;;  %v18934_v32 = vand.u32 4294901760, %v18797_v20  ;;  %18937 = vst [vmem:[#allocation52_spill] sm:$0xff] %v14717_v5  ;;  %v7251_v52 = vld [vmem:[#allocation4 + $0x498] sm:$0xff]  ;;  %v14724_v20 = vsub.f32 %v7256_v2, %v14692_v9  ;;  %v14739_v22 = vand.u32 4294901760, %v7252_v3  ;;  %v18947_v2 = vld [vmem:[#allocation73_spill] sm:$0xff] }
 0x4fc   :  { %7165 = vmatpush2.msra.mxu1 %v18931_v60  ;;  %18932 = vst [vmem:[#allocation36_spill] sm:$0xff] %v14705_v49  ;;  %v18939_v60 = vld [vmem:[#allocation86_spill] sm:$0xff]  ;;  %v18948_v9 = vand.u32 4294901760, %v18947_v2  ;;  %v18950_v57 = vld [vmem:[#allocation65_spill] sm:$0xff]  ;;  %v14760_v2 = vand.u32 4294901760, %v7250_v26 }
 0x4fd   :  { %6944 = vmatprep.subr.mxu0 %v18934_v32  ;;  %7167 = vmatprep.subr.mxu1 %v18935_v35  ;;  %18940 = vst [vmem:[#allocation24_spill] sm:$0xff] %v14724_v20  ;;  %v14726_v32 = vand.u32 4294901760, %v7254_v12  ;;  %v14728_v35 = vand.u32 4294901760, %v7253_v56  ;;  %18946 = vst [vmem:[#allocation35_spill] sm:$0xff] %v14739_v22  ;;  %v18951_v15 = vand.u32 4294901760, %v18950_v57  ;;  %v14787_v57 = vsub.f32 %v7252_v3, %v14739_v22 }
 0x4fe   :  { %6948 = vmatpush2.msra.mxu0 %v18938_v18  ;;  %7169 = vmatpush2.msra.mxu1 %v18939_v60  ;;  %v14736_v18 = vsub.f32 %v14667_v24, %v18945_v19  ;;  %v18952_v19 = vand.u32 4294901760, %v14682_v27  ;;  %18954 = vst [vmem:[#allocation71_spill] sm:$0xff] %v14760_v2  ;;  %v18956_v24 = vand.u32 4294901760, %v18955_v41  ;;  %v18962_v41 = vld [vmem:[#allocation94_spill] sm:$0xff] }
 0x4ff   :  { %18941 = vst [vmem:[#allocation8_spill] sm:$0xff] %v14726_v32  ;;  %18942 = vst [vmem:[#allocation38_spill] sm:$0xff] %v14728_v35  ;;  %6952 = vmatprep.subr.mxu0 %v18943_v58  ;;  %7171 = vmatprep.subr.mxu1 %v18944_v39  ;;  %v14746_v58 = vand.u32 4294901760, %v7251_v52  ;;  %v7249_v39 = vld [vmem:[#allocation4 + $0x488] sm:$0xff] }
 0x500   :  { %6956 = vmatpush2.msra.mxu0 %v18948_v9  ;;  %7173 = vmatpush2.msra.mxu1 %v14084_v43  ;;  %v14754_v60 = vsub.f32 %v14682_v27, %v18952_v19  ;;  %v14758_v43 = vsub.f32 %v7255_v14, %v14717_v5  ;;  %v14772_v19 = vsub.f32 %v7254_v12, %v14726_v32  ;;  %v18960_v9 = vld [vmem:[#allocation75_spill] sm:$0xff]  ;;  %v14789_v12 = vand.u32 4294901760, %v7249_v39  ;;  %v18979_v32 = vld [vmem:[#allocation98_spill] sm:$0xff] }
 0x501   :  { %18949 = vst [vmem:[#allocation14_spill] sm:$0xff] %v14746_v58  ;;  %6960 = vmatprep.subr.mxu0 %v18951_v15  ;;  %7175 = vmatprep.subr.mxu1 %v14122_v11  ;;  %v18957_v11 = vand.u32 4294901760, %v14690_v0  ;;  %v14775_v14 = vsub.f32 %v7253_v56, %v14728_v35  ;;  %v18961_v27 = vand.u32 4294901760, %v18960_v9  ;;  %18964 = vst [vmem:[#allocation80_spill] sm:$0xff] %v14787_v57  ;;  %v18968_v35 = vld [vmem:[#allocation97_spill] sm:$0xff]  ;;  %v18969_v9 = vand.u32 4294901760, %v14705_v49 }
 0x502   :  { %18953 = vst [vmem:[#allocation60_spill] sm:$0xff] %v14758_v43  ;;  %6964 = vmatpush2.msra.mxu0 %v18956_v24  ;;  %7177 = vmatpush2.msra.mxu1 %v14147_v23  ;;  %18958 = vst [vmem:[#allocation20_spill] sm:$0xff] %v14772_v19  ;;  %v18963_v24 = vand.u32 4294901760, %v14699_v29  ;;  %v18970_v23 = vand.u32 4294901760, %v14708_v63  ;;  %v14805_v3 = vsub.f32 %v7251_v52, %v14746_v58 }
 0x503   :  { %v14768_v15 = vsub.f32 %v14690_v0, %v18957_v11  ;;  %18959 = vst [vmem:[#allocation93_spill] sm:$0xff] %v14775_v14  ;;  %6968 = vmatprep.subr.mxu0 %v18961_v27  ;;  %7179 = vmatprep.subr.mxu1 %v18962_v41  ;;  %18965 = vst [vmem:[#allocation84_spill] sm:$0xff] %v14789_v12  ;;  %v18966_v0 = vld [vmem:[#allocation76_spill] sm:$0xff]  ;;  %v5737_v27 = vpop.f32.mrf.mxu1  ;;  %v14797_v41 = vsub.f32 %v14705_v49, %v18969_v9  ;;  %v18975_v9 = vand.u32 4294901760, %v14715_v16 }
 0x504   :  { %v14784_v11 = vsub.f32 %v14699_v29, %v18963_v24  ;;  %v18967_v56 = vand.u32 4294901760, %v18966_v0  ;;  %7181 = vmatpush2.msra.mxu1 %v18968_v35  ;;  %v14802_v24 = vsub.f32 %v14708_v63, %v18970_v23  ;;  %18971 = vst [vmem:[#allocation87_spill] sm:$0xff] %v14805_v3  ;;  %v14807_v29 = vand.u32 4294901760, %v7248_v61  ;;  %v7247_v0 = vld [vmem:[#allocation4 + $0x478] sm:$0xff]  ;;  %v7246_v23 = vld [vmem:[#allocation4 + $0x470] sm:$0xff] }
 0x505   :  { %7183 = vmatprep.subr.mxu1 %v14183_v10  ;;  %v14816_v49 = vsub.f32 %v14715_v16, %v18975_v9  ;;  %v14820_v52 = vsub.f32 %v7250_v26, %v14760_v2  ;;  %v18977_v63 = vld [vmem:[#allocation79_spill] sm:$0xff]  ;;  %v18980_v10 = vand.u32 4294901760, %v14724_v20  ;;  %v18981_v26 = vand.u32 4294901760, %v18807_v33  ;;  %v18982_v16 = vld [vmem:[#allocation101_spill] sm:$0xff]  ;;  %v18986_v9 = vld [vmem:[#allocation88_spill] sm:$0xff]  ;;  %v5739_v35 = vpop.f32.mrf.mxu1 }
 0x506   :  { %6972 = vmatpush2.msra.mxu0 %v18967_v56  ;;  %18972 = vst [vmem:[#allocation105_spill] sm:$0xff] %v14807_v29  ;;  %v18973_v56 = vld [vmem:[#allocation90_spill] sm:$0xff]  ;;  %v18978_v58 = vand.u32 4294901760, %v18977_v63  ;;  %7185 = vmatpush2.msra.mxu1 %v18979_v32  ;;  %v14850_v63 = vsub.f32 %v7248_v61, %v14807_v29  ;;  %v7245_v32 = vld [vmem:[#allocation4 + $0x468] sm:$0xff]  ;;  %v18993_v61 = vand.u32 4294901760, %v18810_v45  ;;  %v18996_v45 = vand.u32 4294901760, %v18811_v42 }
 0x507   :  { %v18974_v22 = vand.u32 4294901760, %v18973_v56  ;;  %18976 = vst [vmem:[#allocation95_spill] sm:$0xff] %v14820_v52  ;;  %v14829_v56 = vsub.f32 %v14724_v20, %v18980_v10  ;;  %7187 = vmatprep.subr.mxu1 %v18982_v16  ;;  %v18985_v10 = vand.u32 4294901760, %v18808_v51  ;;  %v14862_v16 = vand.u32 4294901760, %v7246_v23  ;;  %v5745_v42 = vpop.f32.mrf.mxu1 }
 0x508   :  { %7189 = vmatpush2.msra.mxu1 %v18986_v9  ;;  %18987 = vst [vmem:[#allocation27_spill] sm:$0xff] %v14850_v63  ;;  %v18991_v9 = vand.u32 4294901760, %v14758_v43 }
 0x509   :  { %6976 = vmatprep.subr.mxu0 %v18974_v22  ;;  %v14841_v22 = vand.u32 4294901760, %v7247_v0  ;;  %18992 = vst [vmem:[#allocation45_spill] sm:$0xff] %v14862_v16 }
 0x50a   :  { %6980 = vmatpush2.msra.mxu0 %v18978_v58  ;;  %v14839_v58 = vsub.f32 %v7249_v39, %v14789_v12  ;;  %v18988_v39 = vld [vmem:[#allocation83_spill] sm:$0xff]  ;;  %v18990_v12 = vld [vmem:[#allocation102_spill] sm:$0xff]  ;;  %v14859_v33 = vsub.f32 %v14758_v43, %v18991_v9  ;;  %v18995_v9 = vand.u32 4294901760, %v14775_v14  ;;  %v7244_v43 = vld [vmem:[#allocation4 + $0x460] sm:$0xff] }
 0x50b   :  { %6984 = vmatprep.subr.mxu0 %v18981_v26  ;;  %18984 = vst [vmem:[#allocation33_spill] sm:$0xff] %v14841_v22  ;;  %v18989_v20 = vand.u32 4294901760, %v18988_v39  ;;  %7191 = vmatprep.subr.mxu1 %v18990_v12  ;;  %v18994_v39 = vand.u32 4294901760, %v14772_v19 }
 0x50c   :  { %18983 = vst [vmem:[#allocation110_spill] sm:$0xff] %v14839_v58  ;;  %6988 = vmatpush2.msra.mxu0 %v18985_v10  ;;  %v5584_v10 = vpop.f32.mrf.mxu0  ;;  %7193 = vmatpush2.msra.mxu1 %v14235_v62  ;;  %v14877_v26 = vsub.f32 %v14775_v14, %v18995_v9  ;;  %v7243_v9 = vld [vmem:[#allocation4 + $0x458] sm:$0xff]  ;;  %v19000_v14 = vand.u32 4294901760, %v14213_v34 }
 0x50d   :  { %6992 = vmatprep.subr.mxu0 %v18989_v20  ;;  %v5585_v12 = vadd.f32 %v5584_v10, %v14515_v8  ;;  %v14872_v51 = vsub.f32 %v14772_v19, %v18994_v39  ;;  %7195 = vmatprep.subr.mxu1 %v14243_v21  ;;  %v14889_v39 = vsub.f32 %v7247_v0, %v14841_v22  ;;  %v14891_v20 = vand.u32 4294901760, %v7245_v32  ;;  %v19012_v0 = vld [vmem:[#allocation106_spill] sm:$0xff] }
 0x50e   :  { %6996 = vmatpush2.msra.mxu0 %v18993_v61  ;;  %v5586_v62 = vpop.f32.mrf.mxu0  ;;  %v18997_v61 = vand.u32 4294901760, %v14787_v57  ;;  %7197 = vmatpush2.msra.mxu1 %v14253_v17  ;;  %v19004_v17 = vand.u32 4294901760, %v14820_v52  ;;  %v14926_v34 = vand.u32 4294901760, %v7243_v9 }
 0x50f   :  { %7000 = vmatprep.subr.mxu0 %v18996_v45  ;;  %18998 = vst [vmem:[#allocation37_spill] sm:$0xff] %v14889_v39  ;;  %18999 = vst [vmem:[#allocation39_spill] sm:$0xff] %v14891_v20  ;;  %v14896_v21 = vadd.f32 %v5737_v27, %v5585_v12  ;;  %v5587_v45 = vadd.f32 %v5586_v62, %v14521_v7  ;;  %7199 = vmatprep.subr.mxu1 %v14261_v30  ;;  %v14917_v27 = vand.u32 4294901760, %v7244_v43  ;;  %v7242_v12 = vld [vmem:[#allocation4 + $0x450] sm:$0xff]  ;;  %v19007_v62 = vld [vmem:[#allocation91_spill] sm:$0xff] }
 0x510   :  { %v14885_v8 = vsub.f32 %v14787_v57, %v18997_v61  ;;  %7004 = vmatpush2.msra.mxu0 %v19000_v14  ;;  %v19002_v61 = vand.u32 4294901760, %v14805_v3  ;;  %v19003_v57 = vand.u32 4294901760, %v14225_v48  ;;  %v14912_v14 = vsub.f32 %v14820_v52, %v19004_v17  ;;  %7201 = vmatpush2.msra.mxu1 %v14271_v1  ;;  %19010 = vst [vmem:[#allocation58_spill] sm:$0xff] %v14926_v34  ;;  %v7241_v17 = vld [vmem:[#allocation4 + $0x448] sm:$0xff]  ;;  %v19027_v52 = vld [vmem:[#allocation124_spill] sm:$0xff] }
 0x511   :  { %19001 = vst [vmem:[#allocation55_spill] sm:$0xff] %v14896_v21  ;;  %v14915_v7 = vsub.f32 %v7246_v23, %v14862_v16  ;;  %19006 = vst [vmem:[#allocation43_spill] sm:$0xff] %v14917_v27  ;;  %v14923_v48 = vadd.f32 %v5739_v35, %v5587_v45  ;;  %v19011_v23 = vand.u32 4294901760, %v14241_v59  ;;  %7203 = vmatprep.subr.mxu1 %v19012_v0  ;;  %v19015_v30 = vand.u32 4294901760, %v14251_v53  ;;  %v5747_v59 = vpop.f32.mrf.mxu1  ;;  %v19019_v53 = vld [vmem:[#allocation117_spill] sm:$0xff] }
 0x512   :  { %v14902_v10 = vsub.f32 %v14805_v3, %v19002_v61  ;;  %7008 = vmatprep.subr.mxu0 %v19003_v57  ;;  %v19008_v61 = vand.u32 4294901760, %v19007_v62  ;;  %v5592_v62 = vpop.f32.mrf.mxu0  ;;  %v14939_v45 = vsub.f32 %v7245_v32, %v14891_v20  ;;  %v7240_v57 = vld [vmem:[#allocation4 + $0x440] sm:$0xff]  ;;  %7205 = vmatpush2.msra.mxu1 %v14291_v38  ;;  %v19016_v21 = vand.u32 4294901760, %v14850_v63  ;;  %v7239_v32 = vld [vmem:[#allocation4 + $0x438] sm:$0xff] }
 0x513   :  { %19005 = vst [vmem:[#allocation32_spill] sm:$0xff] %v14915_v7  ;;  %19009 = vst [vmem:[#allocation11_spill] sm:$0xff] %v14923_v48  ;;  %v5593_v0 = vadd.f32 %v5592_v62, %v14533_v31  ;;  %v14951_v35 = vand.u32 4294901760, %v7242_v12  ;;  %v19018_v48 = vand.u32 4294901760, %v18812_v40  ;;  %7209 = vmatmul.mubr.f32.vlgmr.msra.gmra.mxu1 %v19019_v53  ;;  %v14959_v62 = vsub.f32 %v7244_v43, %v14917_v27  ;;  %v7237_v43 = vld [vmem:[#allocation4 + $0x428] sm:$0xff] }
 0x514   :  { %7012 = vmatpush2.msra.mxu0 %v19008_v61  ;;  %v19013_v61 = vand.u32 4294901760, %v14839_v58  ;;  %19014 = vst [vmem:[#allocation42_spill] sm:$0xff] %v14939_v45  ;;  %v14971_v38 = vsub.f32 %v7243_v9, %v14926_v34  ;;  %v14973_v31 = vand.u32 4294901760, %v7240_v57  ;;  %7215 = vmatprep.mubr.f32.mxu1 %v19027_v52  ;;  %v19028_v3 = vand.u32 4294901760, %v14754_v60  ;;  %v7236_v9 = vld [vmem:[#allocation4 + $0x420] sm:$0xff]  ;;  %v5753_v60 = vpop.f32.mrf.mxu1 }
 0x515   :  { %7016 = vmatprep.subr.mxu0 %v19011_v23  ;;  %19017 = vst [vmem:[#allocation54_spill] sm:$0xff] %v14951_v35  ;;  %19020 = vst [vmem:[#allocation19_spill] sm:$0xff] %v14959_v62  ;;  %v14961_v23 = vand.u32 4294901760, %v7241_v17  ;;  %v14967_v40 = vadd.f32 %v5745_v42, %v5593_v0  ;;  %v19031_v42 = vand.u32 4294901760, %v14279_v46  ;;  %v19032_v0 = vand.u32 4294901760, %v14768_v15 }
 0x516   :  { %v14935_v1 = vsub.f32 %v14839_v58, %v19013_v61  ;;  %7020 = vmatpush2.msra.mxu0 %v19015_v30  ;;  %v14949_v61 = vsub.f32 %v14850_v63, %v19016_v21  ;;  %v5594_v30 = vpop.f32.mrf.mxu0  ;;  %v7238_v21 = vld [vmem:[#allocation4 + $0x430] sm:$0xff]  ;;  %v19022_v63 = vand.u32 4294901760, %v14736_v18  ;;  %v19023_v58 = vand.u32 4294901760, %v14269_v50  ;;  %19025 = vst [vmem:[#allocation64_spill] sm:$0xff] %v14971_v38  ;;  %19026 = vst [vmem:[#allocation99_spill] sm:$0xff] %v14973_v31  ;;  %v5755_v19 = vpop.f32.mrf.mxu1 }
 0x517   :  { %7024 = vmatprep.subr.mxu0 %v19018_v48  ;;  %19021 = vst [vmem:[#allocation48_spill] sm:$0xff] %v14961_v23  ;;  %19024 = vst [vmem:[#allocation92_spill] sm:$0xff] %v14967_v40  ;;  %v5595_v48 = vadd.f32 %v5594_v30, %v14539_v47  ;;  %v19029_v50 = vand.u32 4294901760, %v14889_v39  ;;  %v14997_v40 = vand.u32 4294901760, %v7238_v21  ;;  %v7235_v47 = vld [vmem:[#allocation4 + $0x418] sm:$0xff]  ;;  %v19037_v46 = vand.u32 4294901760, %v14784_v11 }
 0x518   :  { %7478 = vmatprep.subr.mxu1 %v19022_v63  ;;  %7028 = vmatpush2.msra.mxu0 %v19023_v58  ;;  %v14985_v58 = vand.u32 4294901760, %v7239_v32  ;;  %v5600_v18 = vpop.f32.mrf.mxu0  ;;  %v19041_v30 = vld [vmem:[#allocation122_spill] sm:$0xff] }
 0x519   :  { %7484 = vmatpush1.msra.mxu1 %v19028_v3  ;;  %v14982_v63 = vsub.f32 %v14889_v39, %v19029_v50  ;;  %7032 = vmatprep.subr.mxu0 %v19031_v42  ;;  %v14991_v3 = vadd.f32 %v5747_v59, %v5595_v48  ;;  %v14995_v50 = vsub.f32 %v7242_v12, %v14951_v35  ;;  %v19036_v39 = vand.u32 4294901760, %v14289_v44  ;;  %v7234_v12 = vld [vmem:[#allocation4 + $0x410] sm:$0xff] }
 0x51a   :  { %19030 = vst [vmem:[#allocation49_spill] sm:$0xff] %v14985_v58  ;;  %7490 = vmatprep.subr.mxu1 %v19032_v0  ;;  %19035 = vst [vmem:[#allocation107_spill] sm:$0xff] %v14997_v40  ;;  %v5601_v15 = vadd.f32 %v5600_v18, %v14549_v55  ;;  %v15006_v48 = vsub.f32 %v7241_v17, %v14961_v23  ;;  %v15008_v42 = vand.u32 4294901760, %v7237_v43  ;;  %v19040_v0 = vand.u32 4294901760, %v14299_v4 }
 0x51b   :  { %19033 = vst [vmem:[#allocation50_spill] sm:$0xff] %v14991_v3  ;;  %19034 = vst [vmem:[#allocation70_spill] sm:$0xff] %v14995_v50  ;;  %7036 = vmatpush2.msra.mxu0 %v19036_v39  ;;  %7496 = vmatpush1.msra.mxu1 %v19037_v46  ;;  %v19042_v44 = vand.u32 4294901760, %v14915_v7  ;;  %v5602_v39 = vpop.f32.mrf.mxu0  ;;  %v15020_v18 = vsub.f32 %v7240_v57, %v14973_v31  ;;  %v15022_v17 = vand.u32 4294901760, %v7236_v9  ;;  %v7233_v46 = vld [vmem:[#allocation4 + $0x408] sm:$0xff]  ;;  %v19045_v59 = vand.u32 4294901760, %v14797_v41 }
 0x51c   :  { %19038 = vst [vmem:[#allocation31_spill] sm:$0xff] %v15006_v48  ;;  %19039 = vst [vmem:[#allocation108_spill] sm:$0xff] %v15008_v42  ;;  %7040 = vmatprep.subr.mxu0 %v19040_v0  ;;  %7217 = vmatmul.mubr.f32.gmra.mxu1 %v19041_v30  ;;  %v19046_v4 = vand.u32 4294901760, %v14307_v36  ;;  %v15028_v0 = vadd.f32 %v5753_v60, %v5601_v15  ;;  %v15032_v3 = vsub.f32 %v7239_v32, %v14985_v58  ;;  %v19050_v57 = vld [vmem:[#allocation128_spill] sm:$0xff] }
 0x51d   :  { %v15016_v11 = vsub.f32 %v14915_v7, %v19042_v44  ;;  %19043 = vst [vmem:[#allocation109_spill] sm:$0xff] %v15020_v18  ;;  %19044 = vst [vmem:[#allocation112_spill] sm:$0xff] %v15022_v17  ;;  %7502 = vmatprep.subr.mxu1 %v19045_v59  ;;  %v5603_v44 = vadd.f32 %v5602_v39, %v14555_v13  ;;  %v15034_v55 = vand.u32 4294901760, %v7235_v47  ;;  %7223 = vmatprep.mubr.f32.mxu1 %v19050_v57  ;;  %v7232_v15 = vld [vmem:[#allocation4 + $0x400] sm:$0xff] }
 0x51e   :  { %7044 = vmatpush2.msra.mxu0 %v19046_v4  ;;  %19047 = vst [vmem:[#allocation96_spill] sm:$0xff] %v15028_v0  ;;  %19048 = vst [vmem:[#allocation115_spill] sm:$0xff] %v15032_v3  ;;  %v19051_v7 = vand.u32 4294901760, %v14802_v24  ;;  %v19052_v41 = vand.u32 4294901760, %v14939_v45  ;;  %v15046_v13 = vsub.f32 %v7238_v21, %v14997_v40  ;;  %v15048_v32 = vand.u32 4294901760, %v7234_v12 }
 0x51f   :  { %19049 = vst [vmem:[#allocation100_spill] sm:$0xff] %v15034_v55  ;;  %v19055_v59 = vand.u32 4294901760, %v18817_v37  ;;  %v19056_v24 = vand.u32 4294901760, %v14816_v49  ;;  %v15058_v4 = vsub.f32 %v7237_v43, %v15008_v42  ;;  %v19060_v21 = vand.u32 4294901760, %v18818_v28  ;;  %v7293_v37 = vld [vmem:[#allocation4 + $0x5e8] sm:$0xff] }
 0x520   :  { %7508 = vmatpush1.msra.mxu1 %v19051_v7  ;;  %v15042_v36 = vsub.f32 %v14939_v45, %v19052_v41  ;;  %19053 = vst [vmem:[#allocation22_spill] sm:$0xff] %v15046_v13  ;;  %19054 = vst [vmem:[#allocation103_spill] sm:$0xff] %v15048_v32  ;;  %v15054_v7 = vadd.f32 %v5755_v19, %v5603_v44  ;;  %v15060_v41 = vand.u32 4294901760, %v7233_v46  ;;  %v19061_v60 = vand.u32 4294901760, %v14829_v56 }
 0x521   :  { %7048 = vmatprep.subr.mxu0 %v19055_v59  ;;  %7514 = vmatprep.subr.mxu1 %v19056_v24  ;;  %19058 = vst [vmem:[#allocation104_spill] sm:$0xff] %v15058_v4  ;;  %v19062_v49 = vand.u32 4294901760, %v14959_v62  ;;  %v15074_v43 = vsub.f32 %v7236_v9, %v15022_v17  ;;  %v19064_v59 = vld [vmem:[#allocation127_spill] sm:$0xff]  ;;  %v19065_v28 = vand.u32 4294901760, %v14971_v38  ;;  %v15085_v24 = vsub.f32 %v7235_v47, %v15034_v55 }
 0x522   :  { %19057 = vst [vmem:[#allocation67_spill] sm:$0xff] %v15054_v7  ;;  %19059 = vst [vmem:[#allocation15_spill] sm:$0xff] %v15060_v41  ;;  %7052 = vmatpush2.msra.mxu0 %v19060_v21  ;;  %7520 = vmatpush1.msra.mxu1 %v19061_v60  ;;  %v15087_v21 = vand.u32 4294901760, %v7232_v15  ;;  %v19068_v9 = vand.u32 4294901760, %v14859_v33  ;;  %v19069_v44 = vand.u32 4294901760, %v14995_v50  ;;  %v15100_v47 = vsub.f32 %v7234_v12, %v15048_v32  ;;  %v7294_v60 = vld [vmem:[#allocation4 + $0x5f0] sm:$0xff] }
 0x523   :  { %v15070_v19 = vsub.f32 %v14959_v62, %v19062_v49  ;;  %19063 = vst [vmem:[#allocation111_spill] sm:$0xff] %v15074_v43  ;;  %7056 = vmatmul.mubr.f32.vlgmr.msra.gmra.mxu0 %v19019_v53  ;;  %7225 = vmatmul.mubr.f32.gmra.mxu1 %v19064_v59  ;;  %v15081_v56 = vsub.f32 %v14971_v38, %v19065_v28  ;;  %19066 = vst [vmem:[#allocation26_spill] sm:$0xff] %v15085_v24  ;;  %v7295_v49 = vld [vmem:[#allocation4 + $0x5f8] sm:$0xff]  ;;  %v19071_v33 = vand.u32 4294901760, %v15006_v48 }
 0x524   :  { %19067 = vst [vmem:[#allocation116_spill] sm:$0xff] %v15087_v21  ;;  %7297 = vmatprep.subr.mxu0 %v14648_v54  ;;  %7526 = vmatprep.subr.mxu1 %v19068_v9  ;;  %v15096_v28 = vsub.f32 %v14995_v50, %v19069_v44  ;;  %19070 = vst [vmem:[#allocation47_spill] sm:$0xff] %v15100_v47  ;;  %v15112_v44 = vsub.f32 %v7233_v46, %v15060_v41  ;;  %v19073_v12 = vand.u32 4294901760, %v14872_v51  ;;  %v19076_v46 = vld [vmem:[#allocation51_spill] sm:$0xff] }
 0x525   :  { %7062 = vmatprep.mubr.f32.mxu0 %v19027_v52  ;;  %7299 = vmatpush1.msra.mxu0 %v14656_v6  ;;  %v15108_v9 = vsub.f32 %v15006_v48, %v19071_v33  ;;  %v19074_v39 = vand.u32 4294901760, %v15020_v18  ;;  %v15124_v48 = vand.u32 4294901760, %v7295_v49  ;;  %v19077_v50 = vand.u32 4294901760, %v14877_v26  ;;  %v7292_v33 = vld [vmem:[#allocation4 + $0x5e0] sm:$0xff]  ;;  %v7289_v26 = vld [vmem:[#allocation4 + $0x5c8] sm:$0xff]  ;;  %v7282_v6 = vld [vmem:[#allocation4 + $0x590] sm:$0xff] }
 0x526   :  { %19072 = vst [vmem:[#allocation62_spill] sm:$0xff] %v15112_v44  ;;  %7532 = vmatpush1.msra.mxu1 %v19073_v12  ;;  %7858 = vmatprep.mubr.f32.mxu1 %v18829_v25  ;;  %v19078_v12 = vand.u32 4294901760, %v15032_v3  ;;  %v15137_v25 = vsub.f32 %v7232_v15, %v15087_v21  ;;  %v19081_v38 = vand.u32 4294901760, %v14885_v8  ;;  %v19084_v15 = vld [vmem:[#allocation57_spill] sm:$0xff]  ;;  %v19085_v8 = vand.u32 4294901760, %v15058_v4 }
 0x527   :  { %v15121_v0 = vsub.f32 %v15020_v18, %v19074_v39  ;;  %19075 = vst [vmem:[#allocation17_spill] sm:$0xff] %v15124_v48  ;;  %7301 = vmatprep.subr.mxu0 %v19076_v46  ;;  %7538 = vmatprep.subr.mxu1 %v19077_v50  ;;  %v19080_v18 = vld [vmem:[#allocation40_spill] sm:$0xff]  ;;  %v19082_v50 = vand.u32 4294901760, %v15046_v13  ;;  %v7291_v39 = vld [vmem:[#allocation4 + $0x5d8] sm:$0xff]  ;;  %v19093_v45 = vand.u32 4294901760, %v15085_v24  ;;  %v19096_v46 = vand.u32 4294901760, %v14935_v1 }
 0x528   :  { %v15133_v7 = vsub.f32 %v15032_v3, %v19078_v12  ;;  %19079 = vst [vmem:[#allocation34_spill] sm:$0xff] %v15137_v25  ;;  %7303 = vmatpush1.msra.mxu0 %v19080_v18  ;;  %7544 = vmatpush1.msra.mxu1 %v19081_v38  ;;  %v15149_v3 = vand.u32 4294901760, %v7294_v60  ;;  %v15157_v38 = vsub.f32 %v15058_v4, %v19085_v8  ;;  %v19087_v12 = vand.u32 4294901760, %v14902_v10  ;;  %v19095_v18 = vld [vmem:[#allocation59_spill] sm:$0xff]  ;;  %v19112_v52 = vld [vmem:[#allocation129_spill] sm:$0xff] }
 0x529   :  { %v15146_v51 = vsub.f32 %v15046_v13, %v19082_v50  ;;  %7064 = vmatmul.mubr.f32.gmra.mxu0 %v19041_v30  ;;  %7305 = vmatprep.subr.mxu0 %v19084_v15  ;;  %v15160_v50 = vand.u32 4294901760, %v7293_v37  ;;  %v7290_v13 = vld [vmem:[#allocation4 + $0x5d0] sm:$0xff]  ;;  %v19088_v15 = vand.u32 4294901760, %v15074_v43  ;;  %v15172_v8 = vsub.f32 %v7295_v49, %v15124_v48  ;;  %v19091_v30 = vld [vmem:[#allocation16_spill] sm:$0xff] }
 0x52a   :  { %19083 = vst [vmem:[#allocation46_spill] sm:$0xff] %v15149_v3  ;;  %7550 = vmatprep.subr.mxu1 %v19087_v12  ;;  %7070 = vmatprep.mubr.f32.mxu0 %v19050_v57  ;;  %v15174_v4 = vand.u32 4294901760, %v7292_v33  ;;  %v19092_v10 = vand.u32 4294901760, %v14912_v14  ;;  %v15183_v57 = vsub.f32 %v15085_v24, %v19093_v45  ;;  %v7288_v49 = vld [vmem:[#allocation4 + $0x5c0] sm:$0xff]  ;;  %v15198_v45 = vsub.f32 %v7294_v60, %v15149_v3 }
 0x52b   :  { %19086 = vst [vmem:[#allocation41_spill] sm:$0xff] %v15160_v50  ;;  %v15169_v62 = vsub.f32 %v15074_v43, %v19088_v15  ;;  %19089 = vst [vmem:[#allocation72_spill] sm:$0xff] %v15172_v8  ;;  %7307 = vmatpush1.msra.mxu0 %v19091_v30  ;;  %v15186_v43 = vand.u32 4294901760, %v7291_v39  ;;  %v15200_v24 = vand.u32 4294901760, %v7290_v13  ;;  %v7287_v15 = vld [vmem:[#allocation4 + $0x5b8] sm:$0xff]  ;;  %v19100_v30 = vld [vmem:[#allocation61_spill] sm:$0xff] }
 0x52c   :  { %19090 = vst [vmem:[#allocation9_spill] sm:$0xff] %v15174_v4  ;;  %7556 = vmatpush1.msra.mxu1 %v19092_v10  ;;  %7309 = vmatprep.subr.mxu0 %v19095_v18  ;;  %v19097_v10 = vand.u32 4294901760, %v15100_v47  ;;  %19098 = vst [vmem:[#allocation56_spill] sm:$0xff] %v15198_v45  ;;  %v19101_v18 = vand.u32 4294901760, %v14949_v61  ;;  %v15214_v60 = vand.u32 4294901760, %v7289_v26  ;;  %v15221_v1 = vsub.f32 %v7292_v33, %v15174_v4 }
 0x52d   :  { %19094 = vst [vmem:[#allocation13_spill] sm:$0xff] %v15186_v43  ;;  %7562 = vmatprep.subr.mxu1 %v19096_v46  ;;  %19099 = vst [vmem:[#allocation25_spill] sm:$0xff] %v15200_v24  ;;  %7311 = vmatpush1.msra.mxu0 %v19100_v30  ;;  %v19102_v46 = vand.u32 4294901760, %v15112_v44  ;;  %v15223_v30 = vand.u32 4294901760, %v7288_v49  ;;  %v15235_v61 = vsub.f32 %v7291_v39, %v15186_v43  ;;  %v15237_v33 = vand.u32 4294901760, %v7287_v15  ;;  %v19116_v39 = vld [vmem:[#allocation38_spill] sm:$0xff] }
 0x52e   :  { %v15195_v12 = vsub.f32 %v15100_v47, %v19097_v10  ;;  %7568 = vmatpush1.msra.mxu1 %v19101_v18  ;;  %v15212_v10 = vsub.f32 %v7293_v37, %v15160_v50  ;;  %19104 = vst [vmem:[#allocation44_spill] sm:$0xff] %v15214_v60  ;;  %v7286_v47 = vld [vmem:[#allocation4 + $0x5b0] sm:$0xff]  ;;  %7072 = vmatmul.mubr.f32.gmra.mxu0 %v19064_v59  ;;  %19105 = vst [vmem:[#allocation18_spill] sm:$0xff] %v15221_v1  ;;  %v19107_v37 = vand.u32 4294901760, %v14982_v63  ;;  %v7284_v18 = vld [vmem:[#allocation4 + $0x5a0] sm:$0xff] }
 0x52f   :  { %v15209_v14 = vsub.f32 %v15112_v44, %v19102_v46  ;;  %7313 = vmatprep.subr.mxu0 %v14717_v5  ;;  %19106 = vst [vmem:[#allocation53_spill] sm:$0xff] %v15223_v30  ;;  %v7285_v46 = vld [vmem:[#allocation4 + $0x5a8] sm:$0xff]  ;;  %v19108_v44 = vld [vmem:[#allocation8_spill] sm:$0xff]  ;;  %v19109_v59 = vand.u32 4294901760, %v15137_v25  ;;  %19110 = vst [vmem:[#allocation68_spill] sm:$0xff] %v15235_v61  ;;  %7429 = vmatprep.mubr.f32.mxu0 %v19112_v52  ;;  %v19113_v63 = vand.u32 4294901760, %v15016_v11 }
 0x530   :  { %19103 = vst [vmem:[#allocation63_spill] sm:$0xff] %v15212_v10  ;;  %7574 = vmatprep.subr.mxu1 %v19107_v37  ;;  %7315 = vmatpush1.msra.mxu0 %v19108_v44  ;;  %19111 = vst [vmem:[#allocation30_spill] sm:$0xff] %v15237_v33  ;;  %v15245_v44 = vsub.f32 %v7290_v13, %v15200_v24  ;;  %v19117_v54 = vand.u32 4294901760, %v15042_v36  ;;  %v15257_v37 = vand.u32 4294901760, %v7285_v46  ;;  %v19120_v13 = vld [vmem:[#allocation35_spill] sm:$0xff]  ;;  %v19121_v53 = vand.u32 4294901760, %v15070_v19 }
 0x531   :  { %v15232_v5 = vsub.f32 %v15137_v25, %v19109_v59  ;;  %7580 = vmatpush1.msra.mxu1 %v19113_v63  ;;  %v15247_v59 = vand.u32 4294901760, %v7286_v47  ;;  %v7283_v25 = vld [vmem:[#allocation4 + $0x598] sm:$0xff]  ;;  %7317 = vmatprep.subr.mxu0 %v19116_v39  ;;  %v15255_v63 = vsub.f32 %v7289_v26, %v15214_v60  ;;  %v19122_v39 = vand.u32 4294901760, %v15172_v8  ;;  %v7281_v11 = vld [vmem:[#allocation4 + $0x588] sm:$0xff]  ;;  %v19125_v60 = vld [vmem:[#allocation14_spill] sm:$0xff] }
 0x532   :  { %19114 = vst [vmem:[#allocation74_spill] sm:$0xff] %v15245_v44  ;;  %7586 = vmatprep.subr.mxu1 %v19117_v54  ;;  %19119 = vst [vmem:[#allocation81_spill] sm:$0xff] %v15257_v37  ;;  %7319 = vmatpush1.msra.mxu0 %v19120_v13  ;;  %v15269_v52 = vsub.f32 %v7288_v49, %v15223_v30  ;;  %v15271_v26 = vand.u32 4294901760, %v7284_v18  ;;  %v19126_v13 = vand.u32 4294901760, %v15081_v56  ;;  %v7280_v54 = vld [vmem:[#allocation4 + $0x580] sm:$0xff]  ;;  %v19129_v49 = vand.u32 4294901760, %v15096_v28 }
 0x533   :  { %19115 = vst [vmem:[#allocation77_spill] sm:$0xff] %v15247_v59  ;;  %19118 = vst [vmem:[#allocation78_spill] sm:$0xff] %v15255_v63  ;;  %7592 = vmatpush1.msra.mxu1 %v19121_v53  ;;  %v15265_v36 = vsub.f32 %v15172_v8, %v19122_v39  ;;  %7321 = vmatprep.subr.mxu0 %v19125_v60  ;;  %v15279_v39 = vsub.f32 %v7287_v15, %v15237_v33  ;;  %v15281_v8 = vand.u32 4294901760, %v7283_v25  ;;  %v19132_v19 = vld [vmem:[#allocation84_spill] sm:$0xff] }
 0x534   :  { %19123 = vst [vmem:[#allocation82_spill] sm:$0xff] %v15269_v52  ;;  %19124 = vst [vmem:[#allocation85_spill] sm:$0xff] %v15271_v26  ;;  %7598 = vmatprep.subr.mxu1 %v19126_v13  ;;  %7323 = vmatpush1.msra.mxu0 %v14760_v2  ;;  %v19130_v60 = vand.u32 4294901760, %v15198_v45  ;;  %v15293_v53 = vsub.f32 %v7286_v47, %v15247_v59  ;;  %v15295_v15 = vand.u32 4294901760, %v7282_v6  ;;  %v19133_v33 = vand.u32 4294901760, %v15108_v9 }
 0x535   :  { %19127 = vst [vmem:[#allocation86_spill] sm:$0xff] %v15279_v39  ;;  %19128 = vst [vmem:[#allocation89_spill] sm:$0xff] %v15281_v8  ;;  %7604 = vmatpush1.msra.mxu1 %v19129_v49  ;;  %7325 = vmatprep.subr.mxu0 %v19132_v19  ;;  %v19134_v28 = vand.u32 4294901760, %v15212_v10  ;;  %v15309_v13 = vand.u32 4294901760, %v7281_v11  ;;  %v19136_v47 = vand.u32 4294901760, %v15121_v0  ;;  %v19137_v9 = vand.u32 4294901760, %v15221_v1 }
 0x536   :  { %v15289_v56 = vsub.f32 %v15198_v45, %v19130_v60  ;;  %19131 = vst [vmem:[#allocation73_spill] sm:$0xff] %v15293_v53  ;;  %7610 = vmatprep.subr.mxu1 %v19133_v33  ;;  %v15307_v45 = vsub.f32 %v7285_v46, %v15257_v37  ;;  %7327 = vmatpush1.msra.mxu0 %v14807_v29  ;;  %v15323_v60 = vand.u32 4294901760, %v7280_v54  ;;  %v19140_v46 = vand.u32 4294901760, %v15133_v7 }
 0x537   :  { %v15303_v49 = vsub.f32 %v15212_v10, %v19134_v28  ;;  %7616 = vmatpush1.msra.mxu1 %v19136_v47  ;;  %v15317_v33 = vsub.f32 %v15221_v1, %v19137_v9  ;;  %v15321_v10 = vsub.f32 %v7284_v18, %v15271_v26  ;;  %7329 = vmatprep.subr.mxu0 %v14841_v22  ;;  %v7669_v0 = vand.u32 4294901760, %v15265_v36  ;;  %v7279_v9 = vld [vmem:[#allocation4 + $0x578] sm:$0xff] }
 0x538   :  { %19135 = vst [vmem:[#allocation65_spill] sm:$0xff] %v15307_v45  ;;  %19139 = vst [vmem:[#allocation75_spill] sm:$0xff] %v15323_v60  ;;  %7622 = vmatprep.subr.mxu1 %v19140_v46  ;;  %v19141_v47 = vand.u32 4294901760, %v15235_v61  ;;  %v15336_v28 = vsub.f32 %v7283_v25, %v15281_v8  ;;  %7331 = vmatpush1.msra.mxu0 %v14862_v16  ;;  %v19143_v18 = vand.u32 4294901760, %v15146_v51  ;;  %v7675_v7 = vand.u32 4294901760, %v15289_v56 }
 0x539   :  { %19138 = vst [vmem:[#allocation12_spill] sm:$0xff] %v15321_v10  ;;  %v19144_v46 = vand.u32 4294901760, %v15245_v44  ;;  %7333 = vmatprep.subr.mxu0 %v14891_v20  ;;  %v19146_v25 = vand.u32 4294901760, %v15157_v38  ;;  %v7681_v51 = vand.u32 4294901760, %v15303_v49  ;;  %v19147_v56 = vand.u32 4294901760, %v15255_v63 }
 0x53a   :  { %v15332_v29 = vsub.f32 %v15235_v61, %v19141_v47  ;;  %19142 = vst [vmem:[#allocation94_spill] sm:$0xff] %v15336_v28  ;;  %7628 = vmatpush1.msra.mxu1 %v19143_v18  ;;  %v15349_v61 = vsub.f32 %v7282_v6, %v15295_v15  ;;  %v15362_v47 = vsub.f32 %v7281_v11, %v15309_v13  ;;  %v7278_v6 = vld [vmem:[#allocation4 + $0x570] sm:$0xff]  ;;  %v7687_v38 = vand.u32 4294901760, %v15317_v33  ;;  %v7277_v11 = vld [vmem:[#allocation4 + $0x568] sm:$0xff] }
 0x53b   :  { %v15345_v36 = vsub.f32 %v15245_v44, %v19144_v46  ;;  %7634 = vmatprep.subr.mxu1 %v19146_v25  ;;  %v15358_v18 = vsub.f32 %v15255_v63, %v19147_v56  ;;  %7335 = vmatpush1.msra.mxu0 %v14917_v27  ;;  %v19149_v44 = vand.u32 4294901760, %v15169_v62  ;;  %v19150_v49 = vand.u32 4294901760, %v15269_v52  ;;  %v7276_v56 = vld [vmem:[#allocation4 + $0x560] sm:$0xff] }
 0x53c   :  { %19145 = vst [vmem:[#allocation76_spill] sm:$0xff] %v15349_v61  ;;  %19148 = vst [vmem:[#allocation97_spill] sm:$0xff] %v15362_v47  ;;  %v15375_v46 = vsub.f32 %v7280_v54, %v15323_v60  ;;  %7337 = vmatprep.subr.mxu0 %v14926_v34  ;;  %v19152_v63 = vand.u32 4294901760, %v15183_v57  ;;  %v7693_v62 = vand.u32 4294901760, %v15332_v29  ;;  %v19155_v54 = vand.u32 4294901760, %v15195_v12 }
 0x53d   :  { %7640 = vmatpush1.msra.mxu1 %v19149_v44  ;;  %v15371_v25 = vsub.f32 %v15269_v52, %v19150_v49  ;;  %v19153_v44 = vand.u32 4294901760, %v15279_v39  ;;  %v15387_v52 = vand.u32 4294901760, %v7279_v9  ;;  %7339 = vmatpush1.msra.mxu0 %v14951_v35  ;;  %v7699_v57 = vand.u32 4294901760, %v15345_v36  ;;  %v7275_v49 = vld [vmem:[#allocation4 + $0x558] sm:$0xff] }
 0x53e   :  { %19151 = vst [vmem:[#allocation90_spill] sm:$0xff] %v15375_v46  ;;  %7646 = vmatprep.subr.mxu1 %v19152_v63  ;;  %v19156_v63 = vand.u32 4294901760, %v15293_v53  ;;  %7341 = vmatprep.subr.mxu0 %v14961_v23  ;;  %v19158_v1 = vand.u32 4294901760, %v15209_v14  ;;  %v7705_v12 = vand.u32 4294901760, %v15358_v18  ;;  %v19161_v35 = vand.u32 4294901760, %v15232_v5 }
 0x53f   :  { %v15384_v33 = vsub.f32 %v15279_v39, %v19153_v44  ;;  %19154 = vst [vmem:[#allocation79_spill] sm:$0xff] %v15387_v52  ;;  %7652 = vmatpush1.msra.mxu1 %v19155_v54  ;;  %v15399_v39 = vand.u32 4294901760, %v7278_v6  ;;  %v19159_v54 = vand.u32 4294901760, %v15307_v45  ;;  %v7274_v44 = vld [vmem:[#allocation4 + $0x550] sm:$0xff]  ;;  %7343 = vmatpush1.msra.mxu0 %v14973_v31  ;;  %v7711_v14 = vand.u32 4294901760, %v15371_v25 }
 0x540   :  { %v15396_v29 = vsub.f32 %v15293_v53, %v19156_v63  ;;  %7658 = vmatprep.subr.mxu1 %v19158_v1  ;;  %v15411_v53 = vand.u32 4294901760, %v7277_v11  ;;  %v19162_v1 = vand.u32 4294901760, %v15321_v10  ;;  %v7273_v63 = vld [vmem:[#allocation4 + $0x548] sm:$0xff]  ;;  %7345 = vmatprep.subr.mxu0 %v14985_v58  ;;  %v19164_v5 = vand.u32 4294901760, %v15336_v28 }
 0x541   :  { %19157 = vst [vmem:[#allocation98_spill] sm:$0xff] %v15399_v39  ;;  %v15408_v36 = vsub.f32 %v15307_v45, %v19159_v54  ;;  %7664 = vmatpush1.msra.mxu1 %v19161_v35  ;;  %v15423_v45 = vand.u32 4294901760, %v7276_v56  ;;  %v7717_v31 = vand.u32 4294901760, %v15384_v33  ;;  %v15433_v25 = vsub.f32 %v7279_v9, %v15387_v52  ;;  %7347 = vmatpush1.msra.mxu0 %v14997_v40  ;;  %v7271_v9 = vld [vmem:[#allocation4 + $0x538] sm:$0xff] }
 0x542   :  { %19160 = vst [vmem:[#allocation101_spill] sm:$0xff] %v15411_v53  ;;  %v15420_v18 = vsub.f32 %v15321_v10, %v19162_v1  ;;  %7670 = vmatprep.subr.mxu1 %v7669_v0  ;;  %v15430_v35 = vsub.f32 %v15336_v28, %v19164_v5  ;;  %v15435_v1 = vand.u32 4294901760, %v7275_v49  ;;  %v7272_v10 = vld [vmem:[#allocation4 + $0x540] sm:$0xff]  ;;  %v7723_v54 = vand.u32 4294901760, %v15396_v29  ;;  %7349 = vmatprep.subr.mxu0 %v15008_v42 }
 0x543   :  { %19163 = vst [vmem:[#allocation88_spill] sm:$0xff] %v15423_v45  ;;  %19165 = vst [vmem:[#allocation83_spill] sm:$0xff] %v15433_v25  ;;  %7676 = vmatpush2.msra.mxu1 %v7675_v7  ;;  %v19167_v0 = vand.u32 4294901760, %v15349_v61  ;;  %v15445_v58 = vsub.f32 %v7278_v6, %v15399_v39  ;;  %v15447_v5 = vand.u32 4294901760, %v7274_v44  ;;  %v7729_v28 = vand.u32 4294901760, %v15408_v36  ;;  %v7270_v6 = vld [vmem:[#allocation4 + $0x530] sm:$0xff]  ;;  %7351 = vmatpush1.msra.mxu0 %v15022_v17 }
 0x544   :  { %19166 = vst [vmem:[#allocation102_spill] sm:$0xff] %v15435_v1  ;;  %7682 = vmatprep.subr.mxu1 %v7681_v51  ;;  %v19169_v7 = vand.u32 4294901760, %v15362_v47  ;;  %v15457_v40 = vsub.f32 %v7277_v11, %v15411_v53  ;;  %v19172_v51 = vand.u32 4294901760, %v15375_v46  ;;  %v15469_v42 = vsub.f32 %v7276_v56, %v15423_v45  ;;  %v7269_v11 = vld [vmem:[#allocation4 + $0x528] sm:$0xff]  ;;  %7353 = vmatprep.subr.mxu0 %v15034_v55 }
 0x545   :  { %v15442_v33 = vsub.f32 %v15349_v61, %v19167_v0  ;;  %19168 = vst [vmem:[#allocation91_spill] sm:$0xff] %v15445_v58  ;;  %v15459_v0 = vand.u32 4294901760, %v7273_v63  ;;  %7688 = vmatpush2.msra.mxu1 %v7687_v38  ;;  %v7735_v61 = vand.u32 4294901760, %v15420_v18  ;;  %v15477_v18 = vsub.f32 %v7275_v49, %v15435_v1  ;;  %7355 = vmatpush1.msra.mxu0 %v15048_v32 }
 0x546   :  { %v15454_v29 = vsub.f32 %v15362_v47, %v19169_v7  ;;  %19170 = vst [vmem:[#allocation106_spill] sm:$0xff] %v15457_v40  ;;  %v15466_v36 = vsub.f32 %v15375_v46, %v19172_v51  ;;  %19173 = vst [vmem:[#allocation140_spill] sm:$0xff] %v15469_v42  ;;  %v15471_v7 = vand.u32 4294901760, %v7272_v10  ;;  %7694 = vmatprep.subr.mxu1 %v7693_v62  ;;  %v7741_v47 = vand.u32 4294901760, %v15430_v35  ;;  %v7268_v51 = vld [vmem:[#allocation4 + $0x520] sm:$0xff]  ;;  %v7267_v35 = vld [vmem:[#allocation4 + $0x518] sm:$0xff] }
 0x547   :  { %19171 = vst [vmem:[#allocation129_spill] sm:$0xff] %v15459_v0  ;;  %v15479_v17 = vand.u32 4294901760, %v7271_v9  ;;  %7700 = vmatpush2.msra.mxu1 %v7699_v57  ;;  %v7747_v56 = vand.u32 4294901760, %v15442_v33  ;;  %v15485_v55 = vsub.f32 %v7274_v44, %v15447_v5  ;;  %v15487_v62 = vand.u32 4294901760, %v7270_v6  ;;  %7357 = vmatprep.subr.mxu0 %v15060_v41  ;;  %v7266_v33 = vld [vmem:[#allocation4 + $0x510] sm:$0xff]  ;;  %v7264_v46 = vld [vmem:[#allocation4 + $0x500] sm:$0xff] }
 0x548   :  { %7706 = vmatprep.subr.mxu1 %v7705_v12  ;;  %v7753_v49 = vand.u32 4294901760, %v15454_v29  ;;  %v15493_v32 = vsub.f32 %v7273_v63, %v15459_v0  ;;  %v15495_v57 = vand.u32 4294901760, %v7269_v11  ;;  %7359 = vmatpush1.msra.mxu0 %v15087_v21  ;;  %v7759_v44 = vand.u32 4294901760, %v15466_v36  ;;  %v7265_v29 = vld [vmem:[#allocation4 + $0x508] sm:$0xff] }
 0x549   :  { %19174 = vst [vmem:[#allocation141_spill] sm:$0xff] %v15485_v55  ;;  %7712 = vmatpush2.msra.mxu1 %v7711_v14  ;;  %v15501_v41 = vsub.f32 %v7272_v10, %v15471_v7  ;;  %v15503_v12 = vand.u32 4294901760, %v7268_v51  ;;  %7361 = vmatprep.subr.mxu0 %v15124_v48  ;;  %v19175_v63 = vand.u32 4294901760, %v15433_v25  ;;  %v15511_v14 = vsub.f32 %v7271_v9, %v15479_v17 }
 0x54a   :  { %7718 = vmatprep.subr.mxu1 %v7717_v31  ;;  %v15513_v36 = vand.u32 4294901760, %v7267_v35  ;;  %7363 = vmatpush2.msra.mxu0 %v15149_v3  ;;  %v19176_v10 = vand.u32 4294901760, %v15445_v58  ;;  %v15521_v23 = vsub.f32 %v7270_v6, %v15487_v62  ;;  %v19177_v9 = vand.u32 4294901760, %v15457_v40 }
 0x54b   :  { %v7764_v38 = vsub.f32 %v15433_v25, %v19175_v63  ;;  %7724 = vmatpush2.msra.mxu1 %v7723_v54  ;;  %v15523_v63 = vand.u32 4294901760, %v7266_v33  ;;  %7365 = vmatprep.subr.mxu0 %v15160_v50  ;;  %v15531_v25 = vsub.f32 %v7269_v11, %v15495_v57  ;;  %v19179_v6 = vand.u32 4294901760, %v15469_v42 }
 0x54c   :  { %v7770_v48 = vsub.f32 %v15445_v58, %v19176_v10  ;;  %7730 = vmatprep.subr.mxu1 %v7729_v28  ;;  %v7776_v21 = vsub.f32 %v15457_v40, %v19177_v9  ;;  %v15533_v10 = vand.u32 4294901760, %v7265_v29  ;;  %7367 = vmatpush2.msra.mxu0 %v15174_v4  ;;  %v15541_v58 = vsub.f32 %v7268_v51, %v15503_v12 }
 0x54d   :  { %19178 = vst [vmem:[#allocation142_spill] sm:$0xff] %v15531_v25  ;;  %7736 = vmatpush2.msra.mxu1 %v7735_v61  ;;  %v7782_v31 = vsub.f32 %v15469_v42, %v19179_v6  ;;  %v15543_v9 = vand.u32 4294901760, %v7264_v46  ;;  %7369 = vmatprep.subr.mxu0 %v15186_v43  ;;  %v7765_v11 = vand.u32 4294901760, %v7764_v38  ;;  %v19180_v54 = vand.u32 4294901760, %v15477_v18  ;;  %v19183_v42 = vld [vmem:[#allocation44_spill] sm:$0xff] }
 0x54e   :  { %7742 = vmatprep.subr.mxu1 %v7741_v47  ;;  %v15551_v4 = vsub.f32 %v7267_v35, %v15513_v36  ;;  %7371 = vmatpush2.msra.mxu0 %v15200_v24  ;;  %v7771_v51 = vand.u32 4294901760, %v7770_v48  ;;  %v19181_v6 = vand.u32 4294901760, %v15485_v55  ;;  %v15559_v38 = vsub.f32 %v7266_v33, %v15523_v63 }
 0x54f   :  { %v7788_v40 = vsub.f32 %v15477_v18, %v19180_v54  ;;  %7748 = vmatpush2.msra.mxu1 %v7747_v56  ;;  %7373 = vmatprep.subr.mxu0 %v19183_v42  ;;  %v7777_v54 = vand.u32 4294901760, %v7776_v21  ;;  %v19184_v35 = vand.u32 4294901760, %v15493_v32  ;;  %v15567_v48 = vsub.f32 %v7265_v29, %v15533_v10 }
 0x550   :  { %v7794_v28 = vsub.f32 %v15485_v55, %v19181_v6  ;;  %19182 = vst [vmem:[#allocation143_spill] sm:$0xff] %v15559_v38  ;;  %7754 = vmatprep.subr.mxu1 %v7753_v49  ;;  %7375 = vmatpush2.msra.mxu0 %v15223_v30  ;;  %v7783_v6 = vand.u32 4294901760, %v7782_v31  ;;  %v19185_v33 = vand.u32 4294901760, %v15501_v41  ;;  %v15575_v21 = vsub.f32 %v7264_v46, %v15543_v9  ;;  %v19187_v55 = vld [vmem:[#allocation30_spill] sm:$0xff] }
 0x551   :  { %v7800_v61 = vsub.f32 %v15493_v32, %v19184_v35  ;;  %7760 = vmatpush2.msra.mxu1 %v7759_v44  ;;  %7377 = vmatprep.subr.mxu0 %v19187_v55  ;;  %v7789_v35 = vand.u32 4294901760, %v7788_v40  ;;  %v19188_v29 = vand.u32 4294901760, %v15511_v14 }
 0x552   :  { %v7806_v47 = vsub.f32 %v15501_v41, %v19185_v33  ;;  %19186 = vst [vmem:[#allocation144_spill] sm:$0xff] %v15575_v21  ;;  %7766 = vmatprep.subr.mxu1 %v7765_v11  ;;  %7379 = vmatpush2.msra.mxu0 %v15247_v59  ;;  %v7795_v31 = vand.u32 4294901760, %v7794_v28  ;;  %v19189_v33 = vand.u32 4294901760, %v15521_v23  ;;  %v19190_v11 = vand.u32 4294901760, %v15531_v25 }
 0x553   :  { %v7812_v56 = vsub.f32 %v15511_v14, %v19188_v29  ;;  %7772 = vmatpush2.msra.mxu1 %v7771_v51  ;;  %7381 = vmatprep.subr.mxu0 %v15257_v37  ;;  %v7801_v40 = vand.u32 4294901760, %v7800_v61  ;;  %v19191_v51 = vand.u32 4294901760, %v15541_v58  ;;  %v17433_v46 = vand.u32 4294901760, %v15575_v21 }
 0x554   :  { %v7818_v49 = vsub.f32 %v15521_v23, %v19189_v33  ;;  %7778 = vmatprep.subr.mxu1 %v7777_v54  ;;  %v7824_v29 = vsub.f32 %v15531_v25, %v19190_v11  ;;  %7383 = vmatpush2.msra.mxu0 %v15271_v26  ;;  %v7807_v28 = vand.u32 4294901760, %v7806_v47  ;;  %v19192_v54 = vand.u32 4294901760, %v15551_v4  ;;  %v6388_v25 = vpop.f32.mrf.mxu1 }
 0x555   :  { %7784 = vmatpush2.msra.mxu1 %v7783_v6  ;;  %v7830_v33 = vsub.f32 %v15541_v58, %v19191_v51  ;;  %7385 = vmatprep.subr.mxu0 %v15281_v8  ;;  %v7813_v61 = vand.u32 4294901760, %v7812_v56  ;;  %v19193_v47 = vand.u32 4294901760, %v15559_v38 }
 0x556   :  { %7790 = vmatprep.subr.mxu1 %v7789_v35  ;;  %v7836_v11 = vsub.f32 %v15551_v4, %v19192_v54  ;;  %7387 = vmatpush2.msra.mxu0 %v15295_v15  ;;  %v7819_v6 = vand.u32 4294901760, %v7818_v49  ;;  %v7825_v51 = vand.u32 4294901760, %v7824_v29  ;;  %v19194_v35 = vand.u32 4294901760, %v15567_v48 }
 0x557   :  { %7796 = vmatpush2.msra.mxu1 %v7795_v31  ;;  %v7842_v44 = vsub.f32 %v15559_v38, %v19193_v47  ;;  %7389 = vmatprep.subr.mxu0 %v15309_v13  ;;  %v7831_v54 = vand.u32 4294901760, %v7830_v33  ;;  %v7854_v49 = vsub.f32 %v15575_v21, %v17433_v46  ;;  %v6390_v47 = vpop.f32.mrf.mxu1  ;;  %v5963_v38 = vpop.f32.mrf.mxu0  ;;  %v19219_v21 = vld [vmem:[#allocation38_spill] sm:$0xff] }
 0x558   :  { %7802 = vmatprep.subr.mxu1 %v7801_v40  ;;  %v7848_v56 = vsub.f32 %v15567_v48, %v19194_v35  ;;  %7391 = vmatpush2.msra.mxu0 %v15323_v60  ;;  %v7837_v31 = vand.u32 4294901760, %v7836_v11  ;;  %v15615_v29 = vadd.f32 %v6388_v25, %v5963_v38 }
 0x559   :  { %7808 = vmatpush2.msra.mxu1 %v7807_v28  ;;  %7393 = vmatprep.subr.mxu0 %v15387_v52  ;;  %v7843_v40 = vand.u32 4294901760, %v7842_v44  ;;  %v5965_v33 = vpop.f32.mrf.mxu0  ;;  %v7855_v35 = vand.u32 4294901760, %v7854_v49  ;;  %v19197_v44 = vld [vmem:[#allocation117_spill] sm:$0xff]  ;;  %v19201_v49 = vld [vmem:[#allocation114_spill] sm:$0xff] }
 0x55a   :  { %7814 = vmatprep.subr.mxu1 %v7813_v61  ;;  %7395 = vmatpush2.msra.mxu0 %v15399_v39  ;;  %v7849_v28 = vand.u32 4294901760, %v7848_v56  ;;  %v15619_v46 = vadd.f32 %v6390_v47, %v5965_v33  ;;  %v6396_v61 = vpop.f32.mrf.mxu1  ;;  %v19203_v47 = vld [vmem:[#allocation40_spill] sm:$0xff] }
 0x55b   :  { %7820 = vmatpush2.msra.mxu1 %v7819_v6  ;;  %7397 = vmatprep.subr.mxu0 %v15411_v53  ;;  %v5979_v25 = vpop.f32.mrf.mxu0  ;;  %v19206_v33 = vld [vmem:[#allocation128_spill] sm:$0xff] }
 0x55c   :  { %7826 = vmatprep.subr.mxu1 %v7825_v51  ;;  %7399 = vmatpush2.msra.mxu0 %v15423_v45  ;;  %19195 = vst [vmem:[#allocation145_spill] sm:$0xff] %v15619_v46  ;;  %v15625_v38 = vadd.f32 %v6396_v61, %v5979_v25  ;;  %v6398_v11 = vpop.f32.mrf.mxu1  ;;  %v19198_v51 = vld [vmem:[#allocation113_spill] sm:$0xff]  ;;  %v19208_v61 = vld [vmem:[#allocation59_spill] sm:$0xff] }
 0x55d   :  { %7832 = vmatpush2.msra.mxu1 %v7831_v54  ;;  %7401 = vmatprep.subr.mxu0 %v15435_v1  ;;  %v5981_v6 = vpop.f32.mrf.mxu0  ;;  %v19200_v54 = vld [vmem:[#allocation124_spill] sm:$0xff]  ;;  %v19209_v25 = vld [vmem:[#allocation61_spill] sm:$0xff]  ;;  %v19214_v46 = vld [vmem:[#allocation135_spill] sm:$0xff] }
 0x55e   :  { %7838 = vmatprep.subr.mxu1 %v7837_v31  ;;  %7403 = vmatpush2.msra.mxu0 %v15447_v5  ;;  %19196 = vst [vmem:[#allocation146_spill] sm:$0xff] %v15625_v38  ;;  %v15631_v56 = vadd.f32 %v6398_v11, %v5981_v6  ;;  %v19202_v31 = vld [vmem:[#allocation51_spill] sm:$0xff]  ;;  %v19210_v11 = vld [vmem:[#allocation134_spill] sm:$0xff]  ;;  %v19212_v38 = vld [vmem:[#allocation28_spill] sm:$0xff] }
 0x55f   :  { %7844 = vmatpush2.msra.mxu1 %v7843_v40  ;;  %7405 = vmatprep.subr.mxu0 %v15459_v0  ;;  %v19204_v40 = vld [vmem:[#allocation122_spill] sm:$0xff]  ;;  %v19211_v6 = vld [vmem:[#allocation127_spill] sm:$0xff] }
 0x560   :  { %7850 = vmatprep.subr.mxu1 %v7849_v28  ;;  %7407 = vmatpush2.msra.mxu0 %v15471_v7  ;;  %19199 = vst [vmem:[#allocation113_spill] sm:$0xff] %v15631_v56  ;;  %v19205_v28 = vld [vmem:[#allocation57_spill] sm:$0xff]  ;;  %v19213_v56 = vld [vmem:[#allocation52_spill] sm:$0xff] }
 0x561   :  { %7856 = vmatpush2.msra.mxu1 %v7855_v35  ;;  %7409 = vmatprep.subr.mxu0 %v15479_v17  ;;  %v19207_v35 = vld [vmem:[#allocation16_spill] sm:$0xff] }
 0x562   :  { %7860 = vmatmul.mubr.f32.vlgmr.msra.gmra.mxu1 %v19197_v44  ;;  %8106 = vmatprep.subr.mxu1 %v19198_v51  ;;  %v19218_v44 = vld [vmem:[#allocation66_spill] sm:$0xff] }
 0x563   :  { %7411 = vmatpush2.msra.mxu0 %v15487_v62  ;;  %7866 = vmatprep.mubr.f32.mxu1 %v19200_v54  ;;  %v19217_v54 = vld [vmem:[#allocation125_spill] sm:$0xff] }
 0x564   :  { %8108 = vmatpush1.msra.mxu1 %v19201_v49  ;;  %7413 = vmatprep.subr.mxu0 %v15495_v57 }
 0x565   :  { %8110 = vmatprep.subr.mxu1 %v19202_v31  ;;  %7415 = vmatpush2.msra.mxu0 %v15503_v12 }
 0x566   :  { %8112 = vmatpush1.msra.mxu1 %v19203_v47  ;;  %7417 = vmatprep.subr.mxu0 %v15513_v36 }
 0x567   :  { %7868 = vmatmul.mubr.f32.gmra.mxu1 %v19204_v40  ;;  %8114 = vmatprep.subr.mxu1 %v19205_v28  ;;  %v19216_v40 = vld [vmem:[#allocation8_spill] sm:$0xff] }
 0x568   :  { %7419 = vmatpush2.msra.mxu0 %v15523_v63  ;;  %7874 = vmatprep.mubr.f32.mxu1 %v19206_v33  ;;  %v19215_v33 = vld [vmem:[#allocation29_spill] sm:$0xff] }
 0x569   :  { %8116 = vmatpush1.msra.mxu1 %v19207_v35  ;;  %7421 = vmatprep.subr.mxu0 %v15533_v10 }
 0x56a   :  { %8118 = vmatprep.subr.mxu1 %v19208_v61  ;;  %7423 = vmatpush2.msra.mxu0 %v15543_v9 }
 0x56b   :  { %8120 = vmatpush1.msra.mxu1 %v19209_v25  ;;  %7435 = vmatmul.mubr.f32.vlgmr.msra.gmra.mxu0 %v19210_v11  ;;  %v19220_v25 = vld [vmem:[#allocation21_spill] sm:$0xff]  ;;  %v19221_v11 = vld [vmem:[#allocation35_spill] sm:$0xff] }
 0x56c   :  { %7876 = vmatmul.mubr.f32.gmra.mxu1 %v19211_v6  ;;  %7884 = vmatprep.subr.mxu0 %v19212_v38  ;;  %v19222_v6 = vld [vmem:[#allocation138_spill] sm:$0xff]  ;;  %v19223_v38 = vld [vmem:[#allocation36_spill] sm:$0xff] }
 0x56d   :  { %8122 = vmatprep.subr.mxu1 %v19213_v56  ;;  %7445 = vmatprep.mubr.f32.mxu0 %v19214_v46  ;;  %v19224_v56 = vld [vmem:[#allocation14_spill] sm:$0xff]  ;;  %v19225_v46 = vld [vmem:[#allocation139_spill] sm:$0xff] }
 0x56e   :  { %7887 = vmatpush1.msra.mxu0 %v19215_v33  ;;  %8124 = vmatpush1.msra.mxu1 %v19216_v40  ;;  %v19226_v33 = vld [vmem:[#allocation10_spill] sm:$0xff] }
 0x56f   :  { %8236 = vmatprep.mubr.f32.mxu1 %v19217_v54  ;;  %7890 = vmatprep.subr.mxu0 %v19218_v44  ;;  %v19227_v54 = vld [vmem:[#allocation69_spill] sm:$0xff] }
 0x570   :  { %8126 = vmatprep.subr.mxu1 %v19219_v21  ;;  %7893 = vmatpush1.msra.mxu0 %v19220_v25  ;;  %v19228_v21 = vld [vmem:[#allocation24_spill] sm:$0xff]  ;;  %v19229_v25 = vld [vmem:[#allocation105_spill] sm:$0xff] }
 0x571   :  { %8128 = vmatpush1.msra.mxu1 %v19221_v11  ;;  %7451 = vmatmul.mubr.f32.gmra.mxu0 %v19222_v6  ;;  %v19230_v11 = vld [vmem:[#allocation23_spill] sm:$0xff]  ;;  %v19231_v6 = vld [vmem:[#allocation60_spill] sm:$0xff] }
 0x572   :  { %7896 = vmatprep.subr.mxu0 %v19223_v38  ;;  %8130 = vmatprep.subr.mxu1 %v19224_v56  ;;  %v19232_v56 = vld [vmem:[#allocation20_spill] sm:$0xff] }
 0x573   :  { %7461 = vmatprep.mubr.f32.mxu0 %v19225_v46  ;;  %7899 = vmatpush1.msra.mxu0 %v19226_v33  ;;  %v19233_v46 = vld [vmem:[#allocation121_spill] sm:$0xff] }
 0x574   :  { %8132 = vmatpush1.msra.mxu1 %v14760_v2  ;;  %7902 = vmatprep.subr.mxu0 %v19227_v54  ;;  %v19234_v2 = vld [vmem:[#allocation93_spill] sm:$0xff] }
 0x575   :  { %8134 = vmatprep.subr.mxu1 %v19132_v19  ;;  %7905 = vmatpush1.msra.mxu0 %v19228_v21  ;;  %v19235_v19 = vld [vmem:[#allocation80_spill] sm:$0xff] }
 0x576   :  { %8136 = vmatpush1.msra.mxu1 %v19229_v25  ;;  %7467 = vmatmul.mubr.f32.gmra.mxu0 %v19230_v11  ;;  %v19236_v25 = vld [vmem:[#allocation87_spill] sm:$0xff] }
 0x577   :  { %7908 = vmatprep.subr.mxu0 %v19231_v6  ;;  %8138 = vmatprep.subr.mxu1 %v14841_v22  ;;  %v19237_v11 = vld [vmem:[#allocation95_spill] sm:$0xff]  ;;  %v19238_v22 = vld [vmem:[#allocation54_spill] sm:$0xff] }
 0x578   :  { %7911 = vmatpush1.msra.mxu0 %v19232_v56  ;;  %8076 = vmatprep.mubr.f32.mxu0 %v19233_v46  ;;  %v19239_v56 = vld [vmem:[#allocation110_spill] sm:$0xff]  ;;  %v19240_v46 = vld [vmem:[#allocation48_spill] sm:$0xff] }
 0x579   :  { %8140 = vmatpush1.msra.mxu1 %v14862_v16  ;;  %7914 = vmatprep.subr.mxu0 %v19234_v2  ;;  %v19241_v16 = vld [vmem:[#allocation27_spill] sm:$0xff] }
 0x57a   :  { %8142 = vmatprep.subr.mxu1 %v14891_v20  ;;  %7917 = vmatpush1.msra.mxu0 %v19235_v19  ;;  %v19242_v2 = vld [vmem:[#allocation99_spill] sm:$0xff]  ;;  %v19243_v20 = vld [vmem:[#allocation37_spill] sm:$0xff] }
 0x57b   :  { %8144 = vmatpush1.msra.mxu1 %v14917_v27  ;;  %7920 = vmatprep.subr.mxu0 %v19236_v25  ;;  %v19244_v19 = vld [vmem:[#allocation49_spill] sm:$0xff]  ;;  %v19245_v27 = vld [vmem:[#allocation32_spill] sm:$0xff]  ;;  %v19246_v25 = vld [vmem:[#allocation107_spill] sm:$0xff] }
 0x57c   :  { %8146 = vmatprep.subr.mxu1 %v14926_v34  ;;  %7923 = vmatpush1.msra.mxu0 %v19237_v11  ;;  %v19247_v34 = vld [vmem:[#allocation42_spill] sm:$0xff]  ;;  %v19248_v11 = vld [vmem:[#allocation108_spill] sm:$0xff] }
 0x57d   :  { %8148 = vmatpush1.msra.mxu1 %v19238_v22  ;;  %7926 = vmatprep.subr.mxu0 %v19239_v56  ;;  %v19249_v22 = vld [vmem:[#allocation19_spill] sm:$0xff]  ;;  %v19250_v56 = vld [vmem:[#allocation112_spill] sm:$0xff] }
 0x57e   :  { %8150 = vmatprep.subr.mxu1 %v19240_v46  ;;  %7929 = vmatpush1.msra.mxu0 %v19241_v16  ;;  %v19251_v46 = vld [vmem:[#allocation64_spill] sm:$0xff] }
 0x57f   :  { %8152 = vmatpush1.msra.mxu1 %v19242_v2  ;;  %7932 = vmatprep.subr.mxu0 %v19243_v20  ;;  %v19252_v16 = vld [vmem:[#allocation100_spill] sm:$0xff]  ;;  %v19253_v2 = vld [vmem:[#allocation70_spill] sm:$0xff]  ;;  %v19254_v20 = vld [vmem:[#allocation103_spill] sm:$0xff] }
 0x580   :  { %8154 = vmatprep.subr.mxu1 %v19244_v19  ;;  %7935 = vmatpush1.msra.mxu0 %v19245_v27  ;;  %v19255_v19 = vld [vmem:[#allocation31_spill] sm:$0xff] }
 0x581   :  { %8156 = vmatpush1.msra.mxu1 %v19246_v25  ;;  %7938 = vmatprep.subr.mxu0 %v19247_v34  ;;  %v19256_v27 = vld [vmem:[#allocation15_spill] sm:$0xff]  ;;  %v19257_v25 = vld [vmem:[#allocation109_spill] sm:$0xff]  ;;  %v19258_v34 = vld [vmem:[#allocation116_spill] sm:$0xff] }
 0x582   :  { %8158 = vmatprep.subr.mxu1 %v19248_v11  ;;  %7941 = vmatpush1.msra.mxu0 %v19249_v22  ;;  %v19259_v11 = vld [vmem:[#allocation115_spill] sm:$0xff]  ;;  %v19260_v22 = vld [vmem:[#allocation17_spill] sm:$0xff] }
 0x583   :  { %8160 = vmatpush1.msra.mxu1 %v19250_v56  ;;  %7944 = vmatprep.subr.mxu0 %v19251_v46  ;;  %v19261_v56 = vld [vmem:[#allocation22_spill] sm:$0xff] }
 0x584   :  { %8162 = vmatprep.subr.mxu1 %v19252_v16  ;;  %7947 = vmatpush1.msra.mxu0 %v19253_v2  ;;  %v19262_v16 = vld [vmem:[#allocation104_spill] sm:$0xff] }
 0x585   :  { %8164 = vmatpush1.msra.mxu1 %v19254_v20  ;;  %7950 = vmatprep.subr.mxu0 %v19255_v19  ;;  %v19263_v20 = vld [vmem:[#allocation111_spill] sm:$0xff]  ;;  %v19264_v19 = vld [vmem:[#allocation9_spill] sm:$0xff] }
 0x586   :  { %8166 = vmatprep.subr.mxu1 %v19256_v27  ;;  %7953 = vmatpush1.msra.mxu0 %v19257_v25  ;;  %v19265_v27 = vld [vmem:[#allocation26_spill] sm:$0xff] }
 0x587   :  { %8168 = vmatpush1.msra.mxu1 %v19258_v34  ;;  %7956 = vmatprep.subr.mxu0 %v19259_v11  ;;  %v19266_v34 = vld [vmem:[#allocation47_spill] sm:$0xff] }
 0x588   :  { %8170 = vmatprep.subr.mxu1 %v19260_v22  ;;  %7959 = vmatpush1.msra.mxu0 %v19261_v56  ;;  %v19267_v22 = vld [vmem:[#allocation62_spill] sm:$0xff] }
 0x589   :  { %8172 = vmatpush2.msra.mxu1 %v15149_v3  ;;  %7962 = vmatprep.subr.mxu0 %v19262_v16  ;;  %v19268_v3 = vld [vmem:[#allocation34_spill] sm:$0xff] }
 0x58a   :  { %8174 = vmatprep.subr.mxu1 %v15160_v50  ;;  %7965 = vmatpush1.msra.mxu0 %v19263_v20  ;;  %v19269_v50 = vld [vmem:[#allocation72_spill] sm:$0xff] }
 0x58b   :  { %8176 = vmatpush2.msra.mxu1 %v19264_v19  ;;  %7968 = vmatprep.subr.mxu0 %v19265_v27  ;;  %v19270_v19 = vld [vmem:[#allocation56_spill] sm:$0xff] }
 0x58c   :  { %8178 = vmatprep.subr.mxu1 %v15186_v43  ;;  %7971 = vmatpush1.msra.mxu0 %v19266_v34  ;;  %v19271_v43 = vld [vmem:[#allocation63_spill] sm:$0xff] }
 0x58d   :  { %8180 = vmatpush2.msra.mxu1 %v15200_v24  ;;  %7974 = vmatprep.subr.mxu0 %v19267_v22  ;;  %v19272_v24 = vld [vmem:[#allocation18_spill] sm:$0xff] }
 0x58e   :  { %8182 = vmatprep.subr.mxu1 %v19183_v42  ;;  %7977 = vmatpush1.msra.mxu0 %v19268_v3  ;;  %v19273_v42 = vld [vmem:[#allocation68_spill] sm:$0xff] }
 0x58f   :  { %8184 = vmatpush2.msra.mxu1 %v15223_v30  ;;  %7980 = vmatprep.subr.mxu0 %v19269_v50  ;;  %v19274_v30 = vld [vmem:[#allocation74_spill] sm:$0xff] }
 0x590   :  { %8186 = vmatprep.subr.mxu1 %v19187_v55  ;;  %7983 = vmatpush2.msra.mxu0 %v19270_v19  ;;  %v19275_v55 = vld [vmem:[#allocation78_spill] sm:$0xff] }
 0x591   :  { %8188 = vmatpush2.msra.mxu1 %v15247_v59  ;;  %7986 = vmatprep.subr.mxu0 %v19271_v43  ;;  %v19276_v59 = vld [vmem:[#allocation82_spill] sm:$0xff] }
 0x592   :  { %8190 = vmatprep.subr.mxu1 %v15257_v37  ;;  %7989 = vmatpush2.msra.mxu0 %v19272_v24  ;;  %v19277_v37 = vld [vmem:[#allocation86_spill] sm:$0xff] }
 0x593   :  { %8192 = vmatpush2.msra.mxu1 %v15271_v26  ;;  %7992 = vmatprep.subr.mxu0 %v19273_v42  ;;  %v19278_v26 = vld [vmem:[#allocation73_spill] sm:$0xff] }
 0x594   :  { %8194 = vmatprep.subr.mxu1 %v15281_v8  ;;  %7995 = vmatpush2.msra.mxu0 %v19274_v30  ;;  %v15741_v8 = vpop.f32.mrf.mxu0  ;;  %v19280_v30 = vld [vmem:[#allocation65_spill] sm:$0xff] }
 0x595   :  { %8196 = vmatpush2.msra.mxu1 %v15295_v15  ;;  %7998 = vmatprep.subr.mxu0 %v19275_v55  ;;  %19279 = vst [vmem:[#allocation114_spill] sm:$0xff] %v15741_v8  ;;  %v19281_v55 = vld [vmem:[#allocation12_spill] sm:$0xff]  ;;  %v19286_v8 = vld [vmem:[#allocation97_spill] sm:$0xff] }
 0x596   :  { %8198 = vmatprep.subr.mxu1 %v15309_v13  ;;  %8001 = vmatpush2.msra.mxu0 %v19276_v59  ;;  %v15747_v59 = vpop.f32.mrf.mxu1 }
 0x597   :  { %8200 = vmatpush2.msra.mxu1 %v15323_v60  ;;  %8004 = vmatprep.subr.mxu0 %v19277_v37  ;;  %19282 = vst [vmem:[#allocation51_spill] sm:$0xff] %v15747_v59  ;;  %v19283_v60 = vld [vmem:[#allocation94_spill] sm:$0xff]  ;;  %v19289_v59 = vld [vmem:[#allocation83_spill] sm:$0xff] }
 0x598   :  { %8202 = vmatprep.subr.mxu1 %v15387_v52  ;;  %8007 = vmatpush2.msra.mxu0 %v19278_v26  ;;  %v19284_v52 = vld [vmem:[#allocation76_spill] sm:$0xff] }
 0x599   :  { %8204 = vmatpush2.msra.mxu1 %v15399_v39  ;;  %8010 = vmatprep.subr.mxu0 %v19280_v30  ;;  %v15753_v39 = vpop.f32.mrf.mxu0 }
 0x59a   :  { %8206 = vmatprep.subr.mxu1 %v15411_v53  ;;  %8013 = vmatpush2.msra.mxu0 %v19281_v55  ;;  %19285 = vst [vmem:[#allocation40_spill] sm:$0xff] %v15753_v39  ;;  %v19287_v53 = vld [vmem:[#allocation90_spill] sm:$0xff] }
 0x59b   :  { %8208 = vmatpush2.msra.mxu1 %v15423_v45  ;;  %8016 = vmatprep.subr.mxu0 %v19283_v60  ;;  %v15759_v45 = vpop.f32.mrf.mxu1 }
 0x59c   :  { %8210 = vmatprep.subr.mxu1 %v15435_v1  ;;  %8019 = vmatpush2.msra.mxu0 %v19284_v52  ;;  %19288 = vst [vmem:[#allocation57_spill] sm:$0xff] %v15759_v45  ;;  %v6607_v1 = vpop.f32.mrf.mxu0  ;;  %v19290_v52 = vld [vmem:[#allocation91_spill] sm:$0xff] }
 0x59d   :  { %8212 = vmatpush2.msra.mxu1 %v15447_v5  ;;  %8022 = vmatprep.subr.mxu0 %v19286_v8  ;;  %v6608_v39 = vadd.f32 %v6607_v1, %v15615_v29  ;;  %v19291_v8 = vld [vmem:[#allocation106_spill] sm:$0xff]  ;;  %v19298_v29 = vld [vmem:[#allocation131_spill] sm:$0xff] }
 0x59e   :  { %8214 = vmatprep.subr.mxu1 %v15459_v0  ;;  %8025 = vmatpush2.msra.mxu0 %v19287_v53  ;;  %v6768_v53 = vpop.f32.mrf.mxu1  ;;  %v19292_v0 = vld [vmem:[#allocation140_spill] sm:$0xff]  ;;  %v19297_v1 = vld [vmem:[#allocation142_spill] sm:$0xff] }
 0x59f   :  { %8216 = vmatpush2.msra.mxu1 %v15471_v7  ;;  %8028 = vmatprep.subr.mxu0 %v19289_v59  ;;  %v15770_v45 = vadd.f32 %v6768_v53, %v6608_v39  ;;  %v19295_v53 = vld [vmem:[#allocation120_spill] sm:$0xff]  ;;  %v19296_v39 = vld [vmem:[#allocation130_spill] sm:$0xff] }
 0x5a0   :  { %8218 = vmatprep.subr.mxu1 %v15479_v17  ;;  %8031 = vmatpush2.msra.mxu0 %v19290_v52  ;;  %v19294_v52 = vld [vmem:[#allocation141_spill] sm:$0xff] }
 0x5a1   :  { %8220 = vmatpush2.msra.mxu1 %v15487_v62  ;;  %8034 = vmatprep.subr.mxu0 %v19291_v8  ;;  %19293 = vst [vmem:[#allocation16_spill] sm:$0xff] %v15770_v45  ;;  %v19307_v45 = vld [vmem:[#allocation52_spill] sm:$0xff] }
 0x5a2   :  { %8222 = vmatprep.subr.mxu1 %v15495_v57  ;;  %8037 = vmatpush2.msra.mxu0 %v19292_v0 }
 0x5a3   :  { %8224 = vmatpush2.msra.mxu1 %v15503_v12  ;;  %8040 = vmatprep.subr.mxu0 %v15477_v18 }
 0x5a4   :  { %8226 = vmatprep.subr.mxu1 %v15513_v36  ;;  %8043 = vmatpush2.msra.mxu0 %v19294_v52 }
 0x5a5   :  { %8228 = vmatpush2.msra.mxu1 %v15523_v63  ;;  %8046 = vmatprep.subr.mxu0 %v15493_v32 }
 0x5a6   :  { %8230 = vmatprep.subr.mxu1 %v15533_v10  ;;  %8049 = vmatpush2.msra.mxu0 %v15501_v41 }
 0x5a7   :  { %8232 = vmatpush2.msra.mxu1 %v15543_v9  ;;  %8052 = vmatprep.subr.mxu0 %v15511_v14 }
 0x5a8   :  { %8240 = vmatmul.mubr.f32.vlgmr.msra.gmra.mxu1 %v19295_v53  ;;  %8552 = vmatprep.subr.mxu1 %v19198_v51  ;;  %v19299_v51 = vld [vmem:[#allocation143_spill] sm:$0xff]  ;;  %v19300_v53 = vld [vmem:[#allocation136_spill] sm:$0xff] }
 0x5a9   :  { %8055 = vmatpush2.msra.mxu0 %v15521_v23  ;;  %8248 = vmatprep.mubr.f32.mxu1 %v19296_v39  ;;  %v19304_v39 = vld [vmem:[#allocation137_spill] sm:$0xff] }
 0x5aa   :  { %8554 = vmatpush1.msra.mxu1 %v19201_v49  ;;  %8058 = vmatprep.subr.mxu0 %v19297_v1  ;;  %v19301_v49 = vld [vmem:[#allocation144_spill] sm:$0xff] }
 0x5ab   :  { %8556 = vmatprep.subr.mxu1 %v19202_v31  ;;  %8061 = vmatpush2.msra.mxu0 %v15541_v58  ;;  %v19302_v31 = vld [vmem:[#allocation61_spill] sm:$0xff] }
 0x5ac   :  { %8558 = vmatpush1.msra.mxu1 %v19203_v47  ;;  %8064 = vmatprep.subr.mxu0 %v15551_v4  ;;  %v19303_v47 = vld [vmem:[#allocation118_spill] sm:$0xff] }
 0x5ad   :  { %8252 = vmatmul.mubr.f32.gmra.mxu1 %v19298_v29  ;;  %8560 = vmatprep.subr.mxu1 %v19205_v28  ;;  %v19305_v29 = vld [vmem:[#allocation28_spill] sm:$0xff] }
 0x5ae   :  { %8067 = vmatpush2.msra.mxu0 %v19299_v51  ;;  %8260 = vmatprep.mubr.f32.mxu1 %v19300_v53  ;;  %v19306_v28 = vand.u32 4294901760, %v19305_v29  ;;  %v19308_v53 = vld [vmem:[#allocation126_spill] sm:$0xff]  ;;  %v19316_v29 = vld [vmem:[#allocation35_spill] sm:$0xff] }
 0x5af   :  { %8562 = vmatpush1.msra.mxu1 %v19207_v35  ;;  %8070 = vmatprep.subr.mxu0 %v15567_v48  ;;  %v19309_v35 = vld [vmem:[#allocation29_spill] sm:$0xff] }
 0x5b0   :  { %8564 = vmatprep.subr.mxu1 %v19208_v61  ;;  %8073 = vmatpush2.msra.mxu0 %v19301_v49  ;;  %v19310_v51 = vand.u32 4294901760, %v19309_v35  ;;  %v19311_v61 = vld [vmem:[#allocation119_spill] sm:$0xff]  ;;  %v19323_v35 = vand.u32 4294901760, %v19227_v54  ;;  %v19332_v54 = vld [vmem:[#allocation45_spill] sm:$0xff] }
 0x5b1   :  { %8566 = vmatpush1.msra.mxu1 %v19302_v31  ;;  %8079 = vmatmul.mubr.f32.vlgmr.msra.gmra.mxu0 %v19303_v47  ;;  %v19312_v31 = vand.u32 4294901760, %v19218_v44  ;;  %v19313_v47 = vld [vmem:[#allocation38_spill] sm:$0xff]  ;;  %v19322_v44 = vld [vmem:[#allocation71_spill] sm:$0xff] }
 0x5b2   :  { %8264 = vmatmul.mubr.f32.gmra.mxu1 %v19304_v39  ;;  %8273 = vmatprep.subr.mxu0 %v19306_v28  ;;  %v19314_v39 = vld [vmem:[#allocation21_spill] sm:$0xff]  ;;  %v19318_v28 = vand.u32 4294901760, %v19223_v38  ;;  %v19327_v38 = vld [vmem:[#allocation132_spill] sm:$0xff] }
 0x5b3   :  { %8568 = vmatprep.subr.mxu1 %v19307_v45  ;;  %8086 = vmatprep.mubr.f32.mxu0 %v19308_v53  ;;  %v19315_v49 = vand.u32 4294901760, %v19314_v39  ;;  %v19317_v45 = vld [vmem:[#allocation123_spill] sm:$0xff]  ;;  %v19321_v53 = vand.u32 4294901760, %v19226_v33  ;;  %v19328_v39 = vand.u32 4294901760, %v19231_v6  ;;  %v19330_v33 = vld [vmem:[#allocation20_spill] sm:$0xff] }
 0x5b4   :  { %8277 = vmatpush1.msra.mxu0 %v19310_v51  ;;  %8570 = vmatpush1.msra.mxu1 %v19216_v40  ;;  %v19319_v51 = vld [vmem:[#allocation14_spill] sm:$0xff]  ;;  %v19320_v40 = vld [vmem:[#allocation133_spill] sm:$0xff]  ;;  %v19339_v6 = vld [vmem:[#allocation87_spill] sm:$0xff] }
 0x5b5   :  { %8680 = vmatprep.mubr.f32.mxu1 %v19311_v61  ;;  %8281 = vmatprep.subr.mxu0 %v19312_v31  ;;  %v19325_v31 = vand.u32 4294901760, %v19228_v21  ;;  %v19335_v21 = vld [vmem:[#allocation39_spill] sm:$0xff] }
 0x5b6   :  { %8572 = vmatprep.subr.mxu1 %v19313_v47  ;;  %8285 = vmatpush1.msra.mxu0 %v19315_v49  ;;  %v19324_v49 = vld [vmem:[#allocation84_spill] sm:$0xff]  ;;  %v19326_v47 = vld [vmem:[#allocation105_spill] sm:$0xff] }
 0x5b7   :  { %8574 = vmatpush1.msra.mxu1 %v19316_v29  ;;  %8089 = vmatmul.mubr.f32.gmra.mxu0 %v19317_v45  ;;  %v19329_v29 = vld [vmem:[#allocation33_spill] sm:$0xff]  ;;  %v19331_v45 = vand.u32 4294901760, %v19330_v33  ;;  %v19348_v33 = vld [vmem:[#allocation27_spill] sm:$0xff] }
 0x5b8   :  { %8289 = vmatprep.subr.mxu0 %v19318_v28  ;;  %8576 = vmatprep.subr.mxu1 %v19319_v51  ;;  %v19333_v28 = vld [vmem:[#allocation93_spill] sm:$0xff] }
 0x5b9   :  { %8096 = vmatprep.mubr.f32.mxu0 %v19320_v40  ;;  %8293 = vmatpush1.msra.mxu0 %v19321_v53  ;;  %v19334_v51 = vand.u32 4294901760, %v19333_v28  ;;  %v19336_v40 = vld [vmem:[#allocation80_spill] sm:$0xff]  ;;  %v19351_v28 = vld [vmem:[#allocation37_spill] sm:$0xff] }
 0x5ba   :  { %8578 = vmatpush1.msra.mxu1 %v19322_v44  ;;  %8297 = vmatprep.subr.mxu0 %v19323_v35  ;;  %v19337_v53 = vand.u32 4294901760, %v19336_v40  ;;  %v19338_v44 = vld [vmem:[#allocation43_spill] sm:$0xff]  ;;  %v19340_v35 = vand.u32 4294901760, %v19339_v6  ;;  %v19354_v40 = vld [vmem:[#allocation32_spill] sm:$0xff]  ;;  %v19357_v6 = vld [vmem:[#allocation42_spill] sm:$0xff] }
 0x5bb   :  { %8580 = vmatprep.subr.mxu1 %v19324_v49  ;;  %8301 = vmatpush1.msra.mxu0 %v19325_v31  ;;  %v19341_v49 = vld [vmem:[#allocation58_spill] sm:$0xff]  ;;  %v19342_v31 = vld [vmem:[#allocation95_spill] sm:$0xff] }
 0x5bc   :  { %8582 = vmatpush1.msra.mxu1 %v19326_v47  ;;  %8099 = vmatmul.mubr.f32.gmra.mxu0 %v19327_v38  ;;  %v19343_v47 = vand.u32 4294901760, %v19342_v31  ;;  %v19345_v38 = vld [vmem:[#allocation110_spill] sm:$0xff]  ;;  %v19360_v31 = vld [vmem:[#allocation19_spill] sm:$0xff] }
 0x5bd   :  { %8305 = vmatprep.subr.mxu0 %v19328_v39  ;;  %8584 = vmatprep.subr.mxu1 %v19329_v29  ;;  %v19346_v39 = vand.u32 4294901760, %v19345_v38  ;;  %v19347_v29 = vld [vmem:[#allocation48_spill] sm:$0xff]  ;;  %v19363_v38 = vand.u32 4294901760, %v19251_v46  ;;  %v19372_v46 = vand.u32 4294901760, %v19259_v11  ;;  %v19380_v11 = vand.u32 4294901760, %v19265_v27 }
 0x5be   :  { %8309 = vmatpush1.msra.mxu0 %v19331_v45  ;;  %8527 = vmatprep.mubr.f32.mxu0 %v19311_v61  ;;  %v19344_v61 = vld [vmem:[#allocation54_spill] sm:$0xff]  ;;  %v19349_v45 = vand.u32 4294901760, %v19348_v33  ;;  %v19366_v33 = vld [vmem:[#allocation103_spill] sm:$0xff]  ;;  %v19388_v27 = vand.u32 4294901760, %v19269_v50  ;;  %v19396_v50 = vand.u32 4294901760, %v19273_v42  ;;  %v19405_v42 = vand.u32 4294901760, %v19277_v37 }
 0x5bf   :  { %8586 = vmatpush1.msra.mxu1 %v19332_v54  ;;  %8313 = vmatprep.subr.mxu0 %v19334_v51  ;;  %v19350_v54 = vld [vmem:[#allocation99_spill] sm:$0xff]  ;;  %v19352_v51 = vand.u32 4294901760, %v19351_v28  ;;  %v19413_v37 = vand.u32 4294901760, %v19283_v60  ;;  %v19422_v60 = vand.u32 4294901760, %v19289_v59  ;;  %v19427_v59 = vand.u32 4294901760, %v15477_v18  ;;  %v19432_v18 = vld [vmem:[#allocation117_spill] sm:$0xff] }
 0x5c0   :  { %8588 = vmatprep.subr.mxu1 %v19335_v21  ;;  %8317 = vmatpush1.msra.mxu0 %v19337_v53  ;;  %v19353_v21 = vld [vmem:[#allocation49_spill] sm:$0xff]  ;;  %v19355_v53 = vand.u32 4294901760, %v19354_v40  ;;  %v19369_v28 = vld [vmem:[#allocation15_spill] sm:$0xff] }
 0x5c1   :  { %8590 = vmatpush1.msra.mxu1 %v19338_v44  ;;  %8321 = vmatprep.subr.mxu0 %v19340_v35  ;;  %v19356_v44 = vld [vmem:[#allocation107_spill] sm:$0xff]  ;;  %v19358_v35 = vand.u32 4294901760, %v19357_v6  ;;  %v19373_v40 = vld [vmem:[#allocation17_spill] sm:$0xff] }
 0x5c2   :  { %8592 = vmatprep.subr.mxu1 %v19341_v49  ;;  %8325 = vmatpush1.msra.mxu0 %v19343_v47  ;;  %v19359_v49 = vld [vmem:[#allocation108_spill] sm:$0xff]  ;;  %v19361_v47 = vand.u32 4294901760, %v19360_v31  ;;  %v19377_v6 = vld [vmem:[#allocation41_spill] sm:$0xff] }
 0x5c3   :  { %8594 = vmatpush1.msra.mxu1 %v19344_v61  ;;  %8329 = vmatprep.subr.mxu0 %v19346_v39  ;;  %v19362_v61 = vld [vmem:[#allocation112_spill] sm:$0xff]  ;;  %v19383_v31 = vld [vmem:[#allocation25_spill] sm:$0xff] }
 0x5c4   :  { %8596 = vmatprep.subr.mxu1 %v19347_v29  ;;  %8333 = vmatpush1.msra.mxu0 %v19349_v45  ;;  %v19364_v39 = vld [vmem:[#allocation100_spill] sm:$0xff]  ;;  %v19365_v29 = vand.u32 4294901760, %v19253_v2  ;;  %v19367_v45 = vld [vmem:[#allocation31_spill] sm:$0xff]  ;;  %v19374_v2 = vand.u32 4294901760, %v19261_v56  ;;  %v19382_v56 = vand.u32 4294901760, %v19266_v34  ;;  %v19390_v34 = vand.u32 4294901760, %v19270_v19 }
 0x5c5   :  { %8598 = vmatpush1.msra.mxu1 %v19350_v54  ;;  %8337 = vmatprep.subr.mxu0 %v19352_v51  ;;  %v19368_v54 = vand.u32 4294901760, %v19367_v45  ;;  %v19370_v51 = vand.u32 4294901760, %v19257_v25  ;;  %v19378_v25 = vand.u32 4294901760, %v19263_v20  ;;  %v19386_v20 = vand.u32 4294901760, %v19268_v3  ;;  %v19397_v45 = vld [vmem:[#allocation89_spill] sm:$0xff] }
 0x5c6   :  { %8600 = vmatprep.subr.mxu1 %v19353_v21  ;;  %8341 = vmatpush1.msra.mxu0 %v19355_v53  ;;  %v19371_v21 = vld [vmem:[#allocation116_spill] sm:$0xff]  ;;  %v19375_v53 = vld [vmem:[#allocation46_spill] sm:$0xff]  ;;  %v19394_v3 = vand.u32 4294901760, %v19272_v24 }
 0x5c7   :  { %8602 = vmatpush1.msra.mxu1 %v19356_v44  ;;  %8345 = vmatprep.subr.mxu0 %v19358_v35  ;;  %v19376_v44 = vand.u32 4294901760, %v19262_v16  ;;  %v19379_v35 = vld [vmem:[#allocation9_spill] sm:$0xff]  ;;  %v19384_v16 = vand.u32 4294901760, %v19267_v22  ;;  %v19392_v22 = vand.u32 4294901760, %v19271_v43 }
 0x5c8   :  { %8604 = vmatprep.subr.mxu1 %v19359_v49  ;;  %8349 = vmatpush1.msra.mxu0 %v19361_v47  ;;  %v19381_v49 = vld [vmem:[#allocation13_spill] sm:$0xff]  ;;  %v19385_v47 = vld [vmem:[#allocation44_spill] sm:$0xff] }
 0x5c9   :  { %8606 = vmatpush1.msra.mxu1 %v19362_v61  ;;  %8353 = vmatprep.subr.mxu0 %v19363_v38  ;;  %v19387_v61 = vld [vmem:[#allocation53_spill] sm:$0xff]  ;;  %v19389_v38 = vld [vmem:[#allocation30_spill] sm:$0xff] }
 0x5ca   :  { %8608 = vmatprep.subr.mxu1 %v19364_v39  ;;  %8357 = vmatpush1.msra.mxu0 %v19365_v29  ;;  %v19391_v39 = vld [vmem:[#allocation77_spill] sm:$0xff] }
 0x5cb   :  { %8610 = vmatpush1.msra.mxu1 %v19366_v33  ;;  %8361 = vmatprep.subr.mxu0 %v19368_v54  ;;  %v19393_v29 = vld [vmem:[#allocation81_spill] sm:$0xff]  ;;  %v19398_v54 = vld [vmem:[#allocation74_spill] sm:$0xff] }
 0x5cc   :  { %8612 = vmatprep.subr.mxu1 %v19369_v28  ;;  %8365 = vmatpush1.msra.mxu0 %v19370_v51  ;;  %v19395_v33 = vld [vmem:[#allocation85_spill] sm:$0xff]  ;;  %v19399_v19 = vand.u32 4294901760, %v19398_v54  ;;  %v19400_v28 = vld [vmem:[#allocation78_spill] sm:$0xff] }
 0x5cd   :  { %8614 = vmatpush1.msra.mxu1 %v19371_v21  ;;  %8369 = vmatprep.subr.mxu0 %v19372_v46  ;;  %v19401_v43 = vand.u32 4294901760, %v19400_v28  ;;  %v19402_v51 = vld [vmem:[#allocation82_spill] sm:$0xff]  ;;  %v19404_v21 = vld [vmem:[#allocation75_spill] sm:$0xff] }
 0x5ce   :  { %8616 = vmatprep.subr.mxu1 %v19373_v40  ;;  %8373 = vmatpush1.msra.mxu0 %v19374_v2  ;;  %v19403_v24 = vand.u32 4294901760, %v19402_v51  ;;  %v19406_v46 = vld [vmem:[#allocation79_spill] sm:$0xff]  ;;  %v19407_v40 = vand.u32 4294901760, %v19278_v26  ;;  %v19408_v2 = vld [vmem:[#allocation98_spill] sm:$0xff] }
 0x5cf   :  { %8618 = vmatpush2.msra.mxu1 %v19375_v53  ;;  %8377 = vmatprep.subr.mxu0 %v19376_v44  ;;  %v19410_v53 = vld [vmem:[#allocation101_spill] sm:$0xff]  ;;  %v19412_v44 = vld [vmem:[#allocation88_spill] sm:$0xff] }
 0x5d0   :  { %8620 = vmatprep.subr.mxu1 %v19377_v6  ;;  %8381 = vmatpush1.msra.mxu0 %v19378_v25  ;;  %v19414_v6 = vld [vmem:[#allocation102_spill] sm:$0xff]  ;;  %v19415_v25 = vld [vmem:[#allocation76_spill] sm:$0xff] }
 0x5d1   :  { %8622 = vmatpush2.msra.mxu1 %v19379_v35  ;;  %8385 = vmatprep.subr.mxu0 %v19380_v11  ;;  %v19416_v26 = vand.u32 4294901760, %v19415_v25  ;;  %v19417_v35 = vld [vmem:[#allocation97_spill] sm:$0xff] }
 0x5d2   :  { %8624 = vmatprep.subr.mxu1 %v19381_v49  ;;  %8389 = vmatpush1.msra.mxu0 %v19382_v56  ;;  %v19419_v11 = vld [vmem:[#allocation129_spill] sm:$0xff]  ;;  %v19420_v49 = vld [vmem:[#allocation90_spill] sm:$0xff]  ;;  %v19423_v56 = vld [vmem:[#allocation91_spill] sm:$0xff] }
 0x5d3   :  { %8626 = vmatpush2.msra.mxu1 %v19383_v31  ;;  %8393 = vmatprep.subr.mxu0 %v19384_v16  ;;  %v19424_v31 = vand.u32 4294901760, %v19423_v56  ;;  %v19426_v16 = vand.u32 4294901760, %v19292_v0  ;;  %v19430_v0 = vand.u32 4294901760, %v15501_v41  ;;  %v19437_v41 = vand.u32 4294901760, %v15551_v4 }
 0x5d4   :  { %8628 = vmatprep.subr.mxu1 %v19385_v47  ;;  %8397 = vmatpush1.msra.mxu0 %v19386_v20  ;;  %v19446_v4 = vmov 0.0   ;;  %v6609_v20 = vpop.f32.mrf.mxu0 }
 0x5d5   :  { %8630 = vmatpush2.msra.mxu1 %v19387_v61  ;;  %8401 = vmatprep.subr.mxu0 %v19388_v27 }
 0x5d6   :  { %8632 = vmatprep.subr.mxu1 %v19389_v38  ;;  %8405 = vmatpush2.msra.mxu0 %v19390_v34  ;;  %v16012_v27 = vpop.f32.mrf.mxu0 }
 0x5d7   :  { %8634 = vmatpush2.msra.mxu1 %v19391_v39  ;;  %8409 = vmatprep.subr.mxu0 %v19392_v22 }
 0x5d8   :  { %8636 = vmatprep.subr.mxu1 %v19393_v29  ;;  %8413 = vmatpush2.msra.mxu0 %v19394_v3  ;;  %v6619_v34 = vpop.f32.mrf.mxu0 }
 0x5d9   :  { %8638 = vmatpush2.msra.mxu1 %v19395_v33  ;;  %8417 = vmatprep.subr.mxu0 %v19396_v50 }
 0x5da   :  { %8640 = vmatprep.subr.mxu1 %v19397_v45  ;;  %8421 = vmatpush2.msra.mxu0 %v19399_v19  ;;  %v6627_v22 = vpop.f32.mrf.mxu0 }
 0x5db   :  { %8642 = vmatpush2.msra.mxu1 %v15295_v15  ;;  %8425 = vmatprep.subr.mxu0 %v19401_v43  ;;  %v19409_v15 = vand.u32 4294901760, %v19280_v30  ;;  %v19418_v30 = vand.u32 4294901760, %v19417_v35 }
 0x5dc   :  { %8644 = vmatprep.subr.mxu1 %v15309_v13  ;;  %8429 = vmatpush2.msra.mxu0 %v19403_v24  ;;  %v19411_v13 = vand.u32 4294901760, %v19281_v55  ;;  %v19421_v55 = vand.u32 4294901760, %v19420_v49  ;;  %v6629_v3 = vpop.f32.mrf.mxu0 }
 0x5dd   :  { %8646 = vmatpush2.msra.mxu1 %v19404_v21  ;;  %8433 = vmatprep.subr.mxu0 %v19405_v42 }
 0x5de   :  { %8648 = vmatprep.subr.mxu1 %v19406_v46  ;;  %8437 = vmatpush2.msra.mxu0 %v19407_v40 }
 0x5df   :  { %8650 = vmatpush2.msra.mxu1 %v19408_v2  ;;  %8441 = vmatprep.subr.mxu0 %v19409_v15 }
 0x5e0   :  { %8652 = vmatprep.subr.mxu1 %v19410_v53  ;;  %8445 = vmatpush2.msra.mxu0 %v19411_v13 }
 0x5e1   :  { %8654 = vmatpush2.msra.mxu1 %v19412_v44  ;;  %8449 = vmatprep.subr.mxu0 %v19413_v37 }
 0x5e2   :  { %8656 = vmatprep.subr.mxu1 %v19414_v6  ;;  %8453 = vmatpush2.msra.mxu0 %v19416_v26 }
 0x5e3   :  { %8658 = vmatpush2.msra.mxu1 %v15447_v5  ;;  %8457 = vmatprep.subr.mxu0 %v19418_v30  ;;  %v19425_v5 = vand.u32 4294901760, %v19291_v8  ;;  %v19429_v8 = vand.u32 4294901760, %v15493_v32  ;;  %v19435_v32 = vand.u32 4294901760, %v19297_v1  ;;  %v16022_v50 = vpop.f32.mrf.mxu0 }
 0x5e4   :  { %8660 = vmatprep.subr.mxu1 %v19419_v11  ;;  %8461 = vmatpush2.msra.mxu0 %v19421_v55 }
 0x5e5   :  { %8662 = vmatpush2.msra.mxu1 %v15471_v7  ;;  %8465 = vmatprep.subr.mxu0 %v19422_v60  ;;  %v19431_v7 = vand.u32 4294901760, %v15511_v14  ;;  %v19439_v14 = vld [vmem:[#allocation143_spill] sm:$0xff]  ;;  %v16026_v54 = vpop.f32.mrf.mxu0 }
 0x5e6   :  { %8664 = vmatprep.subr.mxu1 %v15479_v17  ;;  %8469 = vmatpush2.msra.mxu0 %v19424_v31  ;;  %v19428_v17 = vand.u32 4294901760, %v19294_v52  ;;  %v19433_v52 = vand.u32 4294901760, %v15521_v23  ;;  %v19442_v23 = vand.u32 4294901760, %v15567_v48  ;;  %v16004_v48 = vpop.f32.mrf.mxu1 }
 0x5e7   :  { %8666 = vmatpush2.msra.mxu1 %v15487_v62  ;;  %8473 = vmatprep.subr.mxu0 %v19425_v5  ;;  %v19434_v62 = vld [vmem:[#allocation124_spill] sm:$0xff] }
 0x5e8   :  { %8668 = vmatprep.subr.mxu1 %v15495_v57  ;;  %8477 = vmatpush2.msra.mxu0 %v19426_v16  ;;  %v19436_v57 = vand.u32 4294901760, %v15541_v58  ;;  %v19445_v58 = vld [vmem:[#allocation127_spill] sm:$0xff]  ;;  %v16006_v1 = vpop.f32.mrf.mxu1 }
 0x5e9   :  { %8670 = vmatpush2.msra.mxu1 %v15503_v12  ;;  %8481 = vmatprep.subr.mxu0 %v19427_v59  ;;  %v19438_v12 = vld [vmem:[#allocation122_spill] sm:$0xff]  ;;  %v16030_v28 = vpop.f32.mrf.mxu0 }
 0x5ea   :  { %8672 = vmatprep.subr.mxu1 %v15513_v36  ;;  %8485 = vmatpush2.msra.mxu0 %v19428_v17  ;;  %v19440_v36 = vand.u32 4294901760, %v19439_v14  ;;  %v16008_v47 = vpop.f32.mrf.mxu1 }
 0x5eb   :  { %8674 = vmatpush2.msra.mxu1 %v15523_v63  ;;  %8489 = vmatprep.subr.mxu0 %v19429_v8  ;;  %v19441_v63 = vld [vmem:[#allocation128_spill] sm:$0xff]  ;;  %v16034_v51 = vpop.f32.mrf.mxu0 }
 0x5ec   :  { %8676 = vmatprep.subr.mxu1 %v15533_v10  ;;  %8493 = vmatpush2.msra.mxu0 %v19430_v0  ;;  %v19443_v10 = vld [vmem:[#allocation144_spill] sm:$0xff]  ;;  %v16010_v61 = vpop.f32.mrf.mxu1 }
 0x5ed   :  { %8678 = vmatpush2.msra.mxu1 %v15543_v9  ;;  %8497 = vmatprep.subr.mxu0 %v19431_v7  ;;  %v19444_v9 = vand.u32 4294901760, %v19443_v10  ;;  %v19451_v0 = vld [vmem:[#allocation92_spill] sm:$0xff] }
 0x5ee   :  { %8682 = vmatmul.mubr.f32.vlgmr.msra.gmra.mxu1 %v19432_v18  ;;  %8501 = vmatpush2.msra.mxu0 %v19433_v52  ;;  %v16014_v38 = vpop.f32.mrf.mxu1  ;;  %v16036_v21 = vpop.f32.mrf.mxu0  ;;  %v16045_v7 = vand.u32 4294901760, %v19451_v0 }
 0x5ef   :  { %8688 = vmatprep.mubr.f32.mxu1 %v19434_v62  ;;  %8505 = vmatprep.subr.mxu0 %v19435_v32 }
 0x5f0   :  { %8509 = vmatpush2.msra.mxu0 %v19436_v57  ;;  %v16016_v39 = vpop.f32.mrf.mxu1  ;;  %v16038_v46 = vpop.f32.mrf.mxu0  ;;  %v19453_v57 = vld [vmem:[#allocation40_spill] sm:$0xff] }
 0x5f1   :  { %8513 = vmatprep.subr.mxu0 %v19437_v41  ;;  %19447 = vst [vmem:[#allocation59_spill] sm:$0xff] %v16016_v39  ;;  %v19454_v41 = vld [vmem:[#allocation57_spill] sm:$0xff] }
 0x5f2   :  { %8690 = vmatmul.mubr.f32.gmra.mxu1 %v19438_v12  ;;  %8517 = vmatpush2.msra.mxu0 %v19440_v36  ;;  %v16018_v29 = vpop.f32.mrf.mxu1 }
 0x5f3   :  { %8696 = vmatprep.mubr.f32.mxu1 %v19441_v63  ;;  %8521 = vmatprep.subr.mxu0 %v19442_v23  ;;  %v19456_v23 = vld [vmem:[#allocation51_spill] sm:$0xff] }
 0x5f4   :  { %8525 = vmatpush2.msra.mxu0 %v19444_v9  ;;  %v16020_v33 = vpop.f32.mrf.mxu1  ;;  %v19457_v9 = vld [vmem:[#allocation145_spill] sm:$0xff] }
 0x5f5   :  { %8529 = vmatmul.mubr.f32.vlgmr.msra.gmra.mxu0 %v19432_v18  ;;  %19448 = vst [vmem:[#allocation134_spill] sm:$0xff] %v16020_v33 }
 0x5f6   :  { %8698 = vmatmul.mubr.f32.gmra.mxu1 %v19445_v58  ;;  %8535 = vmatprep.mubr.f32.mxu0 %v19434_v62  ;;  %v16024_v45 = vpop.f32.mrf.mxu1  ;;  %v19452_v62 = vld [vmem:[#allocation96_spill] sm:$0xff] }
 0x5f7   :  { %9005 = vmatprep.mubr.f32.mxu1 %v19446_v4  ;;  %19449 = vst [vmem:[#allocation135_spill] sm:$0xff] %v16024_v45  ;;  %v16048_v32 = vand.u32 4294901760, %v19452_v62  ;;  %v19459_v45 = vld [vmem:[#allocation11_spill] sm:$0xff] }
 0x5f8   :  { %v16028_v19 = vpop.f32.mrf.mxu1 }
 0x5f9   :  { %8537 = vmatmul.mubr.f32.gmra.mxu0 %v19438_v12  ;;  %19450 = vst [vmem:[#allocation8_spill] sm:$0xff] %v16028_v19  ;;  %v6407_v12 = vadd.f32 %v19454_v41, %v19453_v57  ;;  %v16059_v19 = vand.u32 4294901760, %v19459_v45 }
 0x5fa   :  { %8543 = vmatprep.mubr.f32.mxu0 %v19441_v63  ;;  %v16032_v43 = vpop.f32.mrf.mxu1  ;;  %v19455_v63 = vld [vmem:[#allocation114_spill] sm:$0xff] }
 0x5fb   :  { %v6405_v10 = vadd.f32 %v19456_v23, %v19455_v63 }
 0x5fd   :  { %8545 = vmatmul.mubr.f32.gmra.mxu0 %v19445_v58  ;;  %v6610_v58 = vadd.f32 %v6609_v20, %v19457_v9 }
 0x5fe   :  { %8817 = vmatprep.mubr.f32.mxu0 %v19446_v4 }
 0x622   :  { %v7861_v24 = vpop.f32.mrf.mxu1 }
 0x624   :  { %v7863_v42 = vpop.f32.mrf.mxu1 }
 0x627   :  { %v7869_v40 = vpop.f32.mrf.mxu1 }
 0x629   :  { %v7871_v15 = vpop.f32.mrf.mxu1 }
 0x62b   :  { %v7436_v2 = vpop.f32.mrf.mxu0 }
 0x62c   :  { %v7877_v13 = vpop.f32.mrf.mxu1  ;;  %v7862_v18 = vadd.f32 %v7861_v24, %v7436_v2  ;;  %v6630_v24 = vadd.f32 %v6629_v3, %v6407_v12  ;;  %v16071_v3 = vsub.f32 %v19452_v62, %v16048_v32 }
 0x62d   :  { %v7438_v53 = vpop.f32.mrf.mxu0 }
 0x62e   :  { %v7879_v37 = vpop.f32.mrf.mxu1  ;;  %v7864_v8 = vadd.f32 %v7863_v42, %v7438_v53  ;;  %v19458_v53 = vld [vmem:[#allocation55_spill] sm:$0xff] }
 0x62f   :  { %v16056_v39 = vand.u32 4294901760, %v19458_v53 }
 0x631   :  { %v7452_v44 = vpop.f32.mrf.mxu0 }
 0x632   :  { %v7870_v14 = vadd.f32 %v7869_v40, %v7452_v44  ;;  %v16063_v40 = vsub.f32 %v19451_v0, %v16045_v7  ;;  %v19460_v44 = vld [vmem:[#allocation113_spill] sm:$0xff]  ;;  %v6771_v0 = vadd.f32 %v16004_v48, %v6610_v58 }
 0x633   :  { %v7454_v6 = vpop.f32.mrf.mxu0 }
 0x634   :  { %v7872_v2 = vadd.f32 %v7871_v15, %v7454_v6 }
 0x636   :  { %v7468_v26 = vpop.f32.mrf.mxu0 }
 0x637   :  { %v7878_v12 = vadd.f32 %v7877_v13, %v7468_v26 }
 0x638   :  { %v7470_v30 = vpop.f32.mrf.mxu0 }
 0x639   :  { %v7880_v63 = vadd.f32 %v7879_v37, %v7470_v30 }
 0x668   :  { %v8241_v25 = vpop.f32.mrf.mxu1 }
 0x66a   :  { %v8243_v35 = vpop.f32.mrf.mxu1 }
 0x66d   :  { %v8253_v11 = vpop.f32.mrf.mxu1 }
 0x66f   :  { %v8255_v55 = vpop.f32.mrf.mxu1 }
 0x671   :  { %v8080_v49 = vpop.f32.mrf.mxu0 }
 0x672   :  { %v16040_v56 = vpop.f32.mrf.mxu1  ;;  %v8081_v4 = vadd.f32 %v8080_v49, %v7862_v18  ;;  %v19461_v49 = vld [vmem:[#allocation50_spill] sm:$0xff] }
 0x673   :  { %v8082_v60 = vpop.f32.mrf.mxu0  ;;  %v16067_v18 = vand.u32 4294901760, %v19461_v49 }
 0x674   :  { %v16042_v5 = vpop.f32.mrf.mxu1  ;;  %v8083_v36 = vadd.f32 %v8082_v60, %v7864_v8  ;;  %v6620_v60 = vadd.f32 %v6619_v34, %v19460_v44  ;;  %v6628_v8 = vadd.f32 %v6627_v22, %v6405_v10  ;;  %v6795_v22 = vadd.f32 %v16014_v38, %v6630_v24 }
 0x675   :  { %v7060_v38 = vadd.f32 %v16026_v54, %v6771_v0 }
 0x676   :  { %v8244_v6 = vadd.f32 %v8243_v35, %v8083_v36  ;;  %v6783_v9 = vadd.f32 %v16008_v47, %v6620_v60  ;;  %v6793_v62 = vadd.f32 %v16010_v61, %v6628_v8 }
 0x677   :  { %v8090_v31 = vpop.f32.mrf.mxu0 }
 0x678   :  { %v8091_v33 = vadd.f32 %v8090_v31, %v7870_v14  ;;  %v19462_v31 = vld [vmem:[#allocation146_spill] sm:$0xff]  ;;  %v8242_v14 = vadd.f32 %v8241_v25, %v8081_v4  ;;  %v19463_v4 = vld [vmem:[#allocation67_spill] sm:$0xff]  ;;  %v7074_v47 = vadd.f32 %v16036_v21, %v6793_v62  ;;  %v7068_v61 = vadd.f32 %v16034_v51, %v6783_v9  ;;  %v8704_v51 = vld [vmem:[%s16450_s5] sm:$0xff] }
 0x679   :  { %v8092_v16 = vpop.f32.mrf.mxu0  ;;  %v6618_v41 = vadd.f32 %v16012_v27, %v19462_v31  ;;  %v7076_v27 = vadd.f32 %v16038_v46, %v6795_v22  ;;  %v16081_v25 = vand.u32 4294901760, %v19463_v4 }
 0x67a   :  { %v8093_v15 = vadd.f32 %v8092_v16, %v7872_v2  ;;  %v8254_v10 = vadd.f32 %v8253_v11, %v8091_v33 }
 0x67b   :  { %v6781_v33 = vadd.f32 %v16006_v1, %v6618_v41  ;;  %v7229_v1 = vadd.f32 %v16032_v43, %v7076_v27 }
 0x67c   :  { %v8100_v17 = vpop.f32.mrf.mxu0  ;;  %v8256_v13 = vadd.f32 %v8255_v55, %v8093_v15 }
 0x67d   :  { %v8101_v44 = vadd.f32 %v8100_v17, %v7878_v12  ;;  %v19464_v17 = vld [vmem:[#allocation16_spill] sm:$0xff]  ;;  %v7066_v55 = vadd.f32 %v16030_v28, %v6781_v33 }
 0x67e   :  { %v8102_v42 = vpop.f32.mrf.mxu0  ;;  %v7058_v46 = vadd.f32 %v16022_v50, %v19464_v17  ;;  %v19465_v50 = vld [vmem:[#allocation8_spill] sm:$0xff] }
 0x67f   :  { %v8103_v2 = vadd.f32 %v8102_v42, %v7880_v63  ;;  %v8266_v24 = vadd.f32 %v16040_v56, %v8101_v44  ;;  %v7227_v8 = vadd.f32 %v19465_v50, %v7074_v47  ;;  %v19466_v56 = vld [vmem:[#allocation135_spill] sm:$0xff] }
 0x681   :  { %v8268_v21 = vadd.f32 %v16042_v5, %v8103_v2  ;;  %v16119_v9 = vand.u32 4294901760, %v7227_v8 }
 0x6ae   :  { %v8683_v59 = vpop.f32.mrf.mxu1 }
 0x6b0   :  { %v8685_v52 = vpop.f32.mrf.mxu1 }
 0x6b2   :  { %v8691_v57 = vpop.f32.mrf.mxu1 }
 0x6b4   :  { %v8693_v16 = vpop.f32.mrf.mxu1 }
 0x6b5   :  { %v8530_v20 = vpop.f32.mrf.mxu0 }
 0x6b6   :  { %v8531_v35 = vadd.f32 %v8530_v20, %v8242_v14  ;;  %v8699_v42 = vpop.f32.mrf.mxu1  ;;  %v7221_v20 = vadd.f32 %v19466_v56, %v7068_v61  ;;  %v16111_v14 = vsub.f32 %v19463_v4, %v16081_v25 }
 0x6b7   :  { %v8532_v34 = vpop.f32.mrf.mxu0 }
 0x6b8   :  { %v8533_v23 = vadd.f32 %v8532_v34, %v8244_v6  ;;  %v8684_v58 = vadd.f32 %v8683_v59, %v8531_v35  ;;  %v19467_v6 = vld [vmem:[#allocation134_spill] sm:$0xff]  ;;  %v8701_v0 = vpop.f32.mrf.mxu1  ;;  %v16113_v34 = vand.u32 4294901760, %v7229_v1  ;;  %v16129_v35 = vand.u32 4294901760, %v7221_v20 }
 0x6b9   :  { %v8538_v36 = vpop.f32.mrf.mxu0  ;;  %v7219_v31 = vadd.f32 %v19467_v6, %v7066_v55 }
 0x6ba   :  { %v8539_v48 = vadd.f32 %v8538_v36, %v8254_v10  ;;  %v8686_v26 = vadd.f32 %v8685_v52, %v8533_v23  ;;  %v7213_v52 = vadd.f32 %v16018_v29, %v7060_v38  ;;  %v16106_v41 = vand.u32 4294901760, %v8684_v58  ;;  %v19468_v23 = vld [vmem:[#allocation59_spill] sm:$0xff] }
 0x6bb   :  { %v8540_v37 = vpop.f32.mrf.mxu0  ;;  %v8727_v29 = vsel %vm8725_vm7, %v8704_v51, 0  ;;  %v7211_v10 = vadd.f32 %v19468_v23, %v7058_v46  ;;  %v16149_v33 = vsub.f32 %v7229_v1, %v16113_v34  ;;  %v16166_v46 = vsub.f32 %v7221_v20, %v16129_v35 }
 0x6bc   :  { %v8692_v30 = vadd.f32 %v8691_v57, %v8539_v48  ;;  %v8541_v11 = vadd.f32 %v8540_v37, %v8256_v13  ;;  %v16101_v15 = vand.u32 4294901760, %v8686_v26  ;;  %v16136_v2 = vand.u32 4294901760, %v8727_v29 }
 0x6bd   :  { %v8546_v54 = vpop.f32.mrf.mxu0  ;;  %v16138_v48 = vand.u32 4294901760, %v7213_v52  ;;  %v16140_v13 = vand.u32 4294901760, %v7219_v31  ;;  %v16143_v4 = vsub.f32 %v8684_v58, %v16106_v41 }
 0x6be   :  { %v8694_v60 = vadd.f32 %v8693_v16, %v8541_v11  ;;  %v16098_v28 = vand.u32 4294901760, %v8692_v30  ;;  %v8547_v59 = vadd.f32 %v8546_v54, %v8266_v24  ;;  %v8705_v16 = vld [vmem:[%s16450_s5 + $0x8] sm:$0xff]  ;;  %v16132_v36 = vsub.f32 %v8686_v26, %v16101_v15  ;;  %v8706_v24 = vld [vmem:[%s16450_s5 + $0x10] sm:$0xff] }
 0x6bf   :  { %v8548_v57 = vpop.f32.mrf.mxu0  ;;  %v8730_v61 = vsel %vm8725_vm7, %v8705_v16, 0  ;;  %v16157_v26 = vand.u32 4294901760, %v7211_v10  ;;  %v16178_v54 = vsub.f32 %v7219_v31, %v16140_v13  ;;  %v17462_v1 = vand.u32 4294901760, %v16143_v4 }
 0x6c0   :  { %v16103_v43 = vand.u32 4294901760, %v8694_v60  ;;  %v8549_v5 = vadd.f32 %v8548_v57, %v8268_v21  ;;  %v8700_v12 = vadd.f32 %v8699_v42, %v8547_v59  ;;  %v16122_v62 = vsub.f32 %v8692_v30, %v16098_v28 }
 0x6c1   :  { %v16160_v30 = vsub.f32 %v7227_v8, %v16119_v9  ;;  %v17464_v58 = vand.u32 4294901760, %v16132_v36  ;;  %v16172_v42 = vsub.f32 %v8727_v29, %v16136_v2  ;;  %v16185_v21 = vand.u32 4294901760, %v8730_v61 }
 0x6c2   :  { %v16116_v22 = vsub.f32 %v8694_v60, %v16103_v43  ;;  %v8702_v63 = vadd.f32 %v8701_v0, %v8549_v5  ;;  %v16124_v44 = vand.u32 4294901760, %v8700_v12  ;;  %v8885_v11 = vand.u32 4294901760, %v16122_v62 }
 0x6c3   :  { %v16188_v51 = vsub.f32 %v7213_v52, %v16138_v48  ;;  %v17463_v59 = vand.u32 4294901760, %v16149_v33  ;;  %v16199_v57 = vsub.f32 %v7211_v10, %v16157_v26  ;;  %v17467_v56 = vand.u32 4294901760, %v16160_v30 }
 0x6c4   :  { %v16134_v27 = vand.u32 4294901760, %v8702_v63  ;;  %v16146_v38 = vsub.f32 %v8700_v12, %v16124_v44  ;;  %v8879_v37 = vand.u32 4294901760, %v16116_v22  ;;  %v8886_v52 = vsub.f32 %v16122_v62, %v8885_v11 }
 0x6c5   :  { %v8733_v20 = vsel %vm8725_vm7, %v8706_v24, 0  ;;  %v8892_v6 = vsub.f32 %v16132_v36, %v17464_v58  ;;  %v17465_v31 = vand.u32 4294901760, %v16166_v46  ;;  %v17466_v0 = vand.u32 4294901760, %v16172_v42 }
 0x6c6   :  { %v16152_v47 = vsub.f32 %v8702_v63, %v16134_v27  ;;  %8750 = vmatprep.subr.mxu0 %v16134_v27  ;;  %v8873_v17 = vand.u32 4294901760, %v16146_v38  ;;  %v8880_v8 = vsub.f32 %v16116_v22, %v8879_v37  ;;  %v17468_v12 = vand.u32 4294901760, %v16178_v54 }
 0x6c7   :  { %8752 = vmatpush1.msra.mxu0 %v16124_v44  ;;  %v8898_v63 = vsub.f32 %v16143_v4, %v17462_v1  ;;  %v16219_v23 = vsub.f32 %v8730_v61, %v16185_v21  ;;  %v8904_v16 = vsub.f32 %v16149_v33, %v17463_v59  ;;  %v17469_v24 = vand.u32 4294901760, %v16188_v51 }
 0x6c8   :  { %8754 = vmatprep.subr.mxu0 %v16103_v43  ;;  %v8867_v55 = vand.u32 4294901760, %v16152_v47  ;;  %v8874_v60 = vsub.f32 %v16146_v38, %v8873_v17  ;;  %v8881_v10 = vand.u32 4294901760, %v8880_v8  ;;  %v17470_v1 = vand.u32 4294901760, %v16199_v57 }
 0x6c9   :  { %8756 = vmatpush1.msra.mxu0 %v16098_v28  ;;  %v8887_v61 = vand.u32 4294901760, %v8886_v52  ;;  %v8910_v8 = vsub.f32 %v16160_v30, %v17467_v56  ;;  %v8916_v59 = vsub.f32 %v16166_v46, %v17465_v31  ;;  %v17471_v58 = vand.u32 4294901760, %v16111_v14 }
 0x6ca   :  { %8758 = vmatprep.subr.mxu0 %v16101_v15  ;;  %v8868_v50 = vsub.f32 %v16152_v47, %v8867_v55  ;;  %v8875_v29 = vand.u32 4294901760, %v8874_v60  ;;  %v16230_v60 = vsub.f32 %v19461_v49, %v16067_v18  ;;  %v8821_v49 = vsub.f32 %v16172_v42, %v17466_v0 }
 0x6cb   :  { %8760 = vmatpush1.msra.mxu0 %v16106_v41  ;;  %v16247_v52 = vsub.f32 %v19459_v45, %v16059_v19  ;;  %v17472_v31 = vand.u32 4294901760, %v16071_v3  ;;  %v8905_v0 = vand.u32 4294901760, %v8904_v16  ;;  %v8928_v45 = vsub.f32 %v16188_v51, %v17469_v24 }
 0x6cc   :  { %8762 = vmatprep.subr.mxu0 %v16113_v34  ;;  %v8869_v5 = vand.u32 4294901760, %v8868_v50  ;;  %v16226_v50 = vand.u32 4294901760, %v8733_v20  ;;  %v8951_v16 = vand.u32 4294901760, %v16230_v60  ;;  %v8822_v24 = vand.u32 4294901760, %v8821_v49 }
 0x6cd   :  { %8764 = vmatpush1.msra.mxu0 %v16119_v9 }
 0x6ce   :  { %8766 = vmatprep.subr.mxu0 %v16129_v35  ;;  %8870 = vmatprep.subr.mxu1 %v8869_v5  ;;  %v8893_v5 = vand.u32 4294901760, %v8892_v6  ;;  %v8922_v6 = vsub.f32 %v16178_v54, %v17468_v12  ;;  %v16260_v56 = vsub.f32 %v8733_v20, %v16226_v50  ;;  %v8957_v12 = vand.u32 4294901760, %v16063_v40 }
 0x6cf   :  { %8768 = vmatpush1.msra.mxu0 %v16140_v13  ;;  %8876 = vmatpush1.msra.mxu1 %v8875_v29  ;;  %v8899_v29 = vand.u32 4294901760, %v8898_v63  ;;  %v16264_v63 = vsub.f32 %v19458_v53, %v16056_v39  ;;  %v8917_v20 = vand.u32 4294901760, %v8916_v59  ;;  %v8940_v53 = vsub.f32 %v16111_v14, %v17471_v58 }
 0x6d0   :  { %8770 = vmatprep.subr.mxu0 %v16138_v48  ;;  %8882 = vmatprep.subr.mxu1 %v8881_v10  ;;  %v8831_v10 = vand.u32 4294901760, %v16219_v23  ;;  %v8946_v59 = vsub.f32 %v16071_v3, %v17472_v31  ;;  %v17473_v49 = vand.u32 4294901760, %v16260_v56 }
 0x6d1   :  { %8772 = vmatpush1.msra.mxu0 %v16157_v26  ;;  %8888 = vmatpush1.msra.mxu1 %v8887_v61  ;;  %v8911_v61 = vand.u32 4294901760, %v8910_v8  ;;  %v8923_v8 = vand.u32 4294901760, %v8922_v6  ;;  %v8969_v58 = vand.u32 4294901760, %v16264_v63 }
 0x6d2   :  { %8774 = vmatprep.subr.mxu0 %v16081_v25  ;;  %8894 = vmatprep.subr.mxu1 %v8893_v5  ;;  %v8934_v5 = vsub.f32 %v16199_v57, %v17470_v1  ;;  %v8963_v1 = vand.u32 4294901760, %v16247_v52 }
 0x6d3   :  { %8776 = vmatpush1.msra.mxu0 %v16048_v32  ;;  %8900 = vmatpush1.msra.mxu1 %v8899_v29  ;;  %v8832_v29 = vsub.f32 %v16219_v23, %v8831_v10 }
 0x6d4   :  { %8778 = vmatprep.subr.mxu0 %v16067_v18  ;;  %8906 = vmatprep.subr.mxu1 %v8905_v0  ;;  %v8929_v0 = vand.u32 4294901760, %v8928_v45  ;;  %v8935_v6 = vand.u32 4294901760, %v8934_v5  ;;  %v8958_v45 = vsub.f32 %v16063_v40, %v8957_v12  ;;  %v8947_v5 = vand.u32 4294901760, %v8946_v59 }
 0x6d5   :  { %8780 = vmatpush1.msra.mxu0 %v16045_v7  ;;  %8912 = vmatpush1.msra.mxu1 %v8911_v61  ;;  %v8952_v61 = vsub.f32 %v16230_v60, %v8951_v16  ;;  %v8833_v31 = vand.u32 4294901760, %v8832_v29  ;;  %v8970_v29 = vsub.f32 %v16264_v63, %v8969_v58 }
 0x6d6   :  { %8782 = vmatprep.subr.mxu0 %v16059_v19  ;;  %8918 = vmatprep.subr.mxu1 %v8917_v20  ;;  %v8941_v20 = vand.u32 4294901760, %v8940_v53  ;;  %v19469_v53 = vmov 0.0  }
 0x6d7   :  { %8784 = vmatpush1.msra.mxu0 %v16056_v39  ;;  %8924 = vmatpush1.msra.mxu1 %v8923_v8  ;;  %v8964_v8 = vsub.f32 %v16247_v52, %v8963_v1 }
 0x6d8   :  { %8823 = vmatmul.mubr.f32.vlgmr.msra.gmra.mxu0 %v8822_v24  ;;  %8930 = vmatprep.subr.mxu1 %v8929_v0  ;;  %v8843_v24 = vsub.f32 %v16260_v56, %v17473_v49  ;;  %v8953_v0 = vand.u32 4294901760, %v8952_v61  ;;  %v8971_v49 = vand.u32 4294901760, %v8970_v29 }
 0x6d9   :  { %9043 = vmatprep.subr.mxu0 %v16152_v47  ;;  %8936 = vmatpush1.msra.mxu1 %v8935_v6  ;;  %v8959_v6 = vand.u32 4294901760, %v8958_v45  ;;  %v8965_v59 = vand.u32 4294901760, %v8964_v8  ;;  %v19470_v47 = vand.u32 4294901760, %v16132_v36 }
 0x6da   :  { %9046 = vmatpush1.msra.mxu0 %v16146_v38  ;;  %8942 = vmatprep.subr.mxu1 %v8941_v20  ;;  %v8844_v20 = vand.u32 4294901760, %v8843_v24  ;;  %v19471_v38 = vand.u32 4294901760, %v16143_v4 }
 0x6db   :  { %9049 = vmatprep.subr.mxu0 %v16116_v22  ;;  %8828 = vmatprep.mubr.f32.mxu0 %v19469_v53  ;;  %v19472_v22 = vand.u32 4294901760, %v16149_v33 }
 0x6dc   :  { %8948 = vmatpush1.msra.mxu1 %v8947_v5  ;;  %9052 = vmatpush1.msra.mxu0 %v16122_v62  ;;  %v19473_v62 = vand.u32 4294901760, %v16160_v30 }
 0x6dd   :  { %8834 = vmatmul.mubr.f32.gmra.mxu0 %v8833_v31  ;;  %8954 = vmatprep.subr.mxu1 %v8953_v0 }
 0x6de   :  { %9055 = vmatprep.subr.mxu0 %v16132_v36  ;;  %8960 = vmatpush1.msra.mxu1 %v8959_v6  ;;  %v19474_v36 = vand.u32 4294901760, %v16172_v42 }
 0x6df   :  { %9058 = vmatpush1.msra.mxu0 %v16143_v4  ;;  %8966 = vmatprep.subr.mxu1 %v8965_v59  ;;  %v19475_v4 = vand.u32 4294901760, %v16166_v46 }
 0x6e0   :  { %9061 = vmatprep.subr.mxu0 %v16149_v33  ;;  %8839 = vmatprep.mubr.f32.mxu0 %v19469_v53  ;;  %v19476_v33 = vand.u32 4294901760, %v16178_v54 }
 0x6e1   :  { %8972 = vmatpush1.msra.mxu1 %v8971_v49  ;;  %9064 = vmatpush1.msra.mxu0 %v16160_v30  ;;  %v19478_v30 = vand.u32 4294901760, %v16199_v57 }
 0x6e2   :  { %8845 = vmatmul.mubr.f32.gmra.mxu0 %v8844_v20  ;;  %9007 = vmatmul.mubr.f32.vlgmr.msra.gmra.mxu1 %v16136_v2 }
 0x6e3   :  { %9067 = vmatprep.subr.mxu0 %v16166_v46  ;;  %9167 = vmatprep.subr.mxu1 %v16134_v27  ;;  %v8713_v46 = vpop.permute.xlu1 %8712 }
 0x6e4   :  { %9070 = vmatpush1.msra.mxu0 %v16178_v54  ;;  %9169 = vmatpush1.msra.mxu1 %v16124_v44 }
 0x6e5   :  { %9073 = vmatprep.subr.mxu0 %v16188_v51  ;;  %9171 = vmatprep.subr.mxu1 %v16103_v43 }
 0x6e6   :  { %9012 = vmatprep.mubr.f32.mxu1 %v19469_v53  ;;  %9076 = vmatpush1.msra.mxu0 %v16199_v57 }
 0x6e7   :  { %9173 = vmatpush1.msra.mxu1 %v16098_v28  ;;  %9079 = vmatprep.subr.mxu0 %v16111_v14 }
 0x6e8   :  { %9014 = vmatmul.mubr.f32.gmra.mxu1 %v16185_v21  ;;  %9175 = vmatprep.subr.mxu1 %v16101_v15 }
 0x6e9   :  { %9082 = vmatpush1.msra.mxu0 %v16071_v3  ;;  %9177 = vmatpush1.msra.mxu1 %v16106_v41 }
 0x6ea   :  { %9085 = vmatprep.subr.mxu0 %v16230_v60  ;;  %9179 = vmatprep.subr.mxu1 %v16113_v34 }
 0x6eb   :  { %9019 = vmatprep.mubr.f32.mxu1 %v19469_v53  ;;  %9088 = vmatpush1.msra.mxu0 %v16063_v40 }
 0x6ec   :  { %9181 = vmatpush1.msra.mxu1 %v16119_v9  ;;  %9091 = vmatprep.subr.mxu0 %v16247_v52 }
 0x6ed   :  { %9021 = vmatmul.mubr.f32.gmra.mxu1 %v16226_v50  ;;  %9183 = vmatprep.subr.mxu1 %v16129_v35 }
 0x6ee   :  { %9094 = vmatpush1.msra.mxu0 %v16264_v63  ;;  %9127 = vmatprep.mubr.f32.mxu0 %v19469_v53 }
 0x6ef   :  { %9185 = vmatpush1.msra.mxu1 %v16140_v13  ;;  %9130 = vmatmul.mubr.f32.vlgmr.msra.gmra.mxu0 %v16172_v42 }
 0x6f0   :  { %9187 = vmatprep.subr.mxu1 %v16138_v48  ;;  %9279 = vmatprep.subr.mxu0 %v8867_v55 }
 0x6f1   :  { %9189 = vmatpush1.msra.mxu1 %v16157_v26  ;;  %9283 = vmatpush1.msra.mxu0 %v8873_v17 }
 0x6f2   :  { %9191 = vmatprep.subr.mxu1 %v16081_v25  ;;  %9287 = vmatprep.subr.mxu0 %v8879_v37  ;;  %v19477_v37 = vand.u32 4294901760, %v16188_v51  ;;  %v8718_v51 = vpop.permute.xlu0 %8717 }
 0x6f3   :  { %9135 = vmatprep.mubr.f32.mxu0 %v19469_v53  ;;  %9193 = vmatpush1.msra.mxu1 %v16048_v32 }
 0x6f4   :  { %9291 = vmatpush1.msra.mxu0 %v8885_v11  ;;  %9195 = vmatprep.subr.mxu1 %v16067_v18  ;;  %v19479_v11 = vand.u32 4294901760, %v16111_v14 }
 0x6f5   :  { %9138 = vmatmul.mubr.f32.gmra.mxu0 %v16219_v23  ;;  %9295 = vmatprep.subr.mxu0 %v19470_v47 }
 0x6f6   :  { %9197 = vmatpush1.msra.mxu1 %v16045_v7  ;;  %9299 = vmatpush1.msra.mxu0 %v19471_v38 }
 0x6f7   :  { %9199 = vmatprep.subr.mxu1 %v16059_v19  ;;  %9303 = vmatprep.subr.mxu0 %v19472_v22 }
 0x6f8   :  { %9143 = vmatprep.mubr.f32.mxu0 %v19469_v53  ;;  %9201 = vmatpush1.msra.mxu1 %v16056_v39 }
 0x6f9   :  { %9234 = vmatprep.mubr.f32.mxu1 %v19469_v53  ;;  %9307 = vmatpush1.msra.mxu0 %v19473_v62 }
 0x6fa   :  { %9146 = vmatmul.mubr.f32.gmra.mxu0 %v16260_v56  ;;  %9238 = vmatmul.mubr.f32.vlgmr.msra.gmra.mxu1 %v19474_v36 }
 0x6fb   :  { %9311 = vmatprep.subr.mxu0 %v19475_v4  ;;  %9417 = vmatprep.subr.mxu1 %v16134_v27 }
 0x6fc   :  { %9315 = vmatpush1.msra.mxu0 %v19476_v33  ;;  %9419 = vmatpush1.msra.mxu1 %v16124_v44  ;;  %v19480_v44 = vand.u32 4294901760, %v16071_v3  ;;  %v19481_v3 = vand.u32 4294901760, %v16260_v56 }
 0x6fd   :  { %9319 = vmatprep.subr.mxu0 %v19477_v37  ;;  %9421 = vmatprep.subr.mxu1 %v16103_v43 }
 0x6fe   :  { %9243 = vmatprep.mubr.f32.mxu1 %v19469_v53  ;;  %9323 = vmatpush1.msra.mxu0 %v19478_v30 }
 0x6ff   :  { %9423 = vmatpush1.msra.mxu1 %v16098_v28  ;;  %9327 = vmatprep.subr.mxu0 %v19479_v11 }
 0x700   :  { %9247 = vmatmul.mubr.f32.gmra.mxu1 %v8831_v10  ;;  %9425 = vmatprep.subr.mxu1 %v16101_v15 }
 0x701   :  { %9331 = vmatpush1.msra.mxu0 %v19480_v44  ;;  %9427 = vmatpush1.msra.mxu1 %v16106_v41 }
 0x702   :  { %9335 = vmatprep.subr.mxu0 %v8951_v16  ;;  %9429 = vmatprep.subr.mxu1 %v16113_v34 }
 0x703   :  { %9252 = vmatprep.mubr.f32.mxu1 %v19469_v53  ;;  %9339 = vmatpush1.msra.mxu0 %v8957_v12 }
 0x704   :  { %9431 = vmatpush1.msra.mxu1 %v16119_v9  ;;  %9343 = vmatprep.subr.mxu0 %v8963_v1 }
 0x705   :  { %9256 = vmatmul.mubr.f32.gmra.mxu1 %v19481_v3  ;;  %9433 = vmatprep.subr.mxu1 %v16129_v35 }
 0x706   :  { %9347 = vmatpush1.msra.mxu0 %v8969_v58  ;;  %9380 = vmatprep.mubr.f32.mxu0 %v19469_v53 }
 0x707   :  { %9435 = vmatpush1.msra.mxu1 %v16140_v13  ;;  %9382 = vmatmul.mubr.f32.vlgmr.msra.gmra.mxu0 %v16136_v2 }
 0x708   :  { %9437 = vmatprep.subr.mxu1 %v16138_v48  ;;  %9387 = vmatprep.mubr.f32.mxu0 %v19469_v53 }
 0x709   :  { %9439 = vmatpush1.msra.mxu1 %v16157_v26  ;;  %9484 = vmatprep.mubr.f32.mxu1 %v19469_v53 }
 0x70a   :  { %9441 = vmatprep.subr.mxu1 %v16081_v25 }
 0x70b   :  { %9443 = vmatpush1.msra.mxu1 %v16048_v32  ;;  %9389 = vmatmul.mubr.f32.gmra.mxu0 %v16185_v21 }
 0x70c   :  { %9445 = vmatprep.subr.mxu1 %v16067_v18  ;;  %9394 = vmatprep.mubr.f32.mxu0 %v19469_v53 }
 0x70d   :  { %9447 = vmatpush1.msra.mxu1 %v16045_v7 }
 0x70e   :  { %9449 = vmatprep.subr.mxu1 %v16059_v19 }
 0x70f   :  { %9451 = vmatpush1.msra.mxu1 %v16056_v39  ;;  %9396 = vmatmul.mubr.f32.gmra.mxu0 %v16226_v50 }
 0x710   :  { %9486 = vmatmul.mubr.f32.vlgmr.msra.gmra.mxu1 %v16136_v2 }
 0x711   :  { %9491 = vmatprep.mubr.f32.mxu1 %v19469_v53 }
 0x714   :  { %9493 = vmatmul.mubr.f32.gmra.mxu1 %v16185_v21 }
 0x715   :  { %9498 = vmatprep.mubr.f32.mxu1 %v19469_v53 }
 0x718   :  { %9500 = vmatmul.mubr.f32.gmra.mxu1 %v16226_v50  ;;  %v8723_v50 = vpop.permute.xlu1 %8722 }
 0x798   :  { %v8824_v32 = vpop.f32.mrf.mxu0 }
 0x799   :  { %v8825_v58 = vadd.f32 %v8824_v32, %v8713_v46 }
 0x79a   :  { %v8826_v40 = vpop.f32.mrf.mxu0 }
 0x79b   :  { %v8827_v54 = vadd.f32 %v8826_v40, %v8713_v46 }
 0x79d   :  { %v8835_v18 = vpop.f32.mrf.mxu0 }
 0x79e   :  { %v8836_v56 = vadd.f32 %v8835_v18, %v8718_v51 }
 0x79f   :  { %v8837_v25 = vpop.f32.mrf.mxu0 }
 0x7a0   :  { %v8838_v60 = vadd.f32 %v8837_v25, %v8718_v51 }
 0x7a2   :  { %v9008_v7 = vpop.f32.mrf.mxu1  ;;  %v8846_v28 = vpop.f32.mrf.mxu0 }
 0x7a3   :  { %v9009_v1 = vadd.f32 %v9008_v7, %v8825_v58  ;;  %v8847_v16 = vadd.f32 %v8846_v28, %v8723_v50 }
 0x7a4   :  { %v9010_v19 = vpop.f32.mrf.mxu1  ;;  %v8848_v15 = vpop.f32.mrf.mxu0 }
 0x7a5   :  { %v9011_v31 = vadd.f32 %v9010_v19, %v8827_v54  ;;  %v8849_v53 = vadd.f32 %v8848_v15, %v8723_v50 }
 0x7a8   :  { %v9015_v39 = vpop.f32.mrf.mxu1 }
 0x7a9   :  { %v9016_v52 = vadd.f32 %v9015_v39, %v8836_v56 }
 0x7aa   :  { %v9017_v43 = vpop.f32.mrf.mxu1 }
 0x7ab   :  { %v9018_v45 = vadd.f32 %v9017_v43, %v8838_v60 }
 0x7ad   :  { %v9022_v14 = vpop.f32.mrf.mxu1 }
 0x7ae   :  { %v9023_v0 = vadd.f32 %v9022_v14, %v8847_v16 }
 0x7af   :  { %v9131_v41 = vpop.f32.mrf.mxu0  ;;  %v9024_v9 = vpop.f32.mrf.mxu1 }
 0x7b0   :  { %v9132_v12 = vadd.f32 %v9131_v41, %v9009_v1  ;;  %v9025_v38 = vadd.f32 %v9024_v9, %v8849_v53 }
 0x7b1   :  { %v9133_v34 = vpop.f32.mrf.mxu0 }
 0x7b2   :  { %v9134_v10 = vadd.f32 %v9133_v34, %v9011_v31 }
 0x7b5   :  { %v9139_v35 = vpop.f32.mrf.mxu0 }
 0x7b6   :  { %v9140_v8 = vadd.f32 %v9139_v35, %v9016_v52 }
 0x7b7   :  { %v9141_v2 = vpop.f32.mrf.mxu0 }
 0x7b8   :  { %v9142_v6 = vadd.f32 %v9141_v2, %v9018_v45 }
 0x7ba   :  { %v9239_v27 = vpop.f32.mrf.mxu1  ;;  %v9147_v13 = vpop.f32.mrf.mxu0 }
 0x7bb   :  { %v9240_v63 = vadd.f32 %v9239_v27, %v9132_v12  ;;  %v9148_v36 = vadd.f32 %v9147_v13, %v9023_v0 }
 0x7bc   :  { %v9241_v48 = vpop.f32.mrf.mxu1  ;;  %v9149_v17 = vpop.f32.mrf.mxu0 }
 0x7bd   :  { %v9242_v5 = vadd.f32 %v9241_v48, %v9134_v10  ;;  %v9150_v11 = vadd.f32 %v9149_v17, %v9025_v38 }
 0x7c0   :  { %v9248_v26 = vpop.f32.mrf.mxu1 }
 0x7c1   :  { %v9249_v59 = vadd.f32 %v9248_v26, %v9140_v8 }
 0x7c2   :  { %v9250_v55 = vpop.f32.mrf.mxu1 }
 0x7c3   :  { %v9251_v4 = vadd.f32 %v9250_v55, %v9142_v6 }
 0x7c5   :  { %v9257_v57 = vpop.f32.mrf.mxu1 }
 0x7c6   :  { %v9258_v44 = vadd.f32 %v9257_v57, %v9148_v36 }
 0x7c7   :  { %v9383_v42 = vpop.f32.mrf.mxu0  ;;  %v9259_v49 = vpop.f32.mrf.mxu1 }
 0x7c8   :  { %v9384_v24 = vadd.f32 %v9383_v42, %v9240_v63  ;;  %v9260_v7 = vadd.f32 %v9259_v49, %v9150_v11 }
 0x7c9   :  { %v9385_v21 = vpop.f32.mrf.mxu0 }
 0x7ca   :  { %v9386_v20 = vadd.f32 %v9385_v21, %v9242_v5 }
 0x7cb   :  { %v9390_v23 = vpop.f32.mrf.mxu0 }
 0x7cc   :  { %v9391_v33 = vadd.f32 %v9390_v23, %v9249_v59 }
 0x7cd   :  { %v9392_v61 = vpop.f32.mrf.mxu0 }
 0x7ce   :  { %v9393_v3 = vadd.f32 %v9392_v61, %v9251_v4 }
 0x7cf   :  { %v9397_v22 = vpop.f32.mrf.mxu0 }
 0x7d0   :  { %v9487_v29 = vpop.f32.mrf.mxu1  ;;  %v9398_v25 = vadd.f32 %v9397_v22, %v9258_v44 }
 0x7d1   :  { %v9488_v47 = vadd.f32 %v9487_v29, %v9384_v24  ;;  %v9399_v40 = vpop.f32.mrf.mxu0 }
 0x7d2   :  { %v9489_v62 = vpop.f32.mrf.mxu1  ;;  %v9400_v39 = vadd.f32 %v9399_v40, %v9260_v7 }
 0x7d3   :  { %9506 = vst [vmem:[%s16452_s7] sm:$0xff] %v9488_v47  ;;  %v9490_v37 = vadd.f32 %v9489_v62, %v9386_v20 }
 0x7d4   :  { %v9494_v30 = vpop.f32.mrf.mxu1 }
 0x7d5   :  { %9507 = vst [vmem:[%s16452_s7 + $0x8] sm:$0xff] %v9490_v37  ;;  %v9495_v32 = vadd.f32 %v9494_v30, %v9391_v33 }
 0x7d6   :  { %v9496_v18 = vpop.f32.mrf.mxu1 }
 0x7d7   :  { %9508 = vst [vmem:[%s16452_s7 + $0x10] sm:$0xff] %v9495_v32  ;;  %v9497_v19 = vadd.f32 %v9496_v18, %v9393_v3 }
 0x7d8   :  { %v9501_v28 = vpop.f32.mrf.mxu1 }
 0x7d9   :  { %9509 = vst [vmem:[%s16452_s7 + $0x18] sm:$0xff] %v9497_v19  ;;  %v9502_v15 = vadd.f32 %v9501_v28, %v9398_v25 }
 0x7da   :  { %v9503_v43 = vpop.f32.mrf.mxu1 }
 0x7db   :  { %9510 = vst [vmem:[%s16452_s7 + $0x20] sm:$0xff] %v9502_v15  ;;  %v9504_v41 = vadd.f32 %v9503_v43, %v9400_v39 }
 0x7dd   :  { %9511 = vst [vmem:[%s16452_s7 + $0x28] sm:$0xff] %v9504_v41 }
 0x7de   :  { %9516 = vsyncpa [#allocation3], 1 }
 0x7df   :  { %9517 = vsyncpa [#allocation5], 1 }

</bundles_post_ra>
